<compile_context>
chip_gen: v7x
topology: tpu7x:2x2x1
jax: 0.10.0
libtpu: 0.0.40
codegen_flags: <defaults>
</compile_context>

<pallas_src>
import jax
import jax.numpy as jnp
from jax import lax
from jax.experimental import pallas as pl
from jax.experimental.pallas import tpu as pltpu

C = 3    # in/out channels
K = 3    # 3x3 kernel, stride 1, padding 1
CH = 8   # sublane chunk size (f32 sublanes per vreg)


def _build_kernel(H, W, Wp, slab, pfin, TN):
    """Returns a Pallas kernel closed over the static geometry."""
    n_chunks = TN // CH

    def kernel(x_ref, mask_ref, w1_ref, b1_ref, w2_ref, b2_ref, out_ref, h1p_ref):
        # x_ref   : (C, TN, pfin) f32 VMEM — per-channel zero-padded planes,
        #           row-major flattened with padded width Wp (+ tail zeros).
        # mask_ref: (CH, slab)    f32 VMEM — 1.0 on real columns (< W), 0.0 on
        #           the Wp-W junk columns of each flattened row.
        # w*_ref  : (K*K*C*C,)    f32 SMEM — HWIO weights, flattened row-major.
        # b*_ref  : (C,)          f32 SMEM
        # out_ref : (C, TN, slab) f32 VMEM — flattened (H, Wp) outputs.
        # h1p_ref : (C, CH, pfin) f32 VMEM scratch — re-padded conv1
        #           activations for the current 8-row chunk.
        mask = mask_ref[...]                                    # (CH, slab)

        # Zero the scratch every grid step: the padding lanes are never
        # written inside the chunk loop, so they must start at 0.  Done
        # unconditionally (not program_id==0 gated) so it stays correct when
        # the parallel grid axis is split across TensorCores.
        h1p_ref[...] = jnp.zeros_like(h1p_ref)

        def conv3x3(load_win, w_ref, b_ref):
            # load_win(ci, s) -> (CH, slab) window at flattened lane offset s.
            # A 3x3 tap (dy, dx) is a constant lane offset s = dy*Wp + dx in
            # the flattened padded layout.  Two partial accumulators per
            # output channel; the first is seeded with the bias.
            acc_a = [jnp.full((CH, slab), b_ref[co], jnp.float32) for co in range(C)]
            acc_b = [jnp.zeros((CH, slab), jnp.float32) for co in range(C)]
            tap = 0
            for dy in range(K):
                for dx in range(K):
                    s = dy * Wp + dx
                    for ci in range(C):
                        win = load_win(ci, s)
                        for co in range(C):
                            w = w_ref[((dy * K + dx) * C + ci) * C + co]
                            if tap % 2 == 0:
                                acc_a[co] = acc_a[co] + w * win
                            else:
                                acc_b[co] = acc_b[co] + w * win
                        tap += 1
            return [acc_a[co] + acc_b[co] for co in range(C)]

        def chunk_body(blk):
            row0 = pl.multiple_of(blk * CH, CH)

            # ---- conv1 + bias + relu; junk columns zeroed so they act as the
            #      horizontal zero padding for conv2.  Stored into the scratch
            #      at lane offset Wp+1 == the (1,1) shift of the padded plane.
            h1 = conv3x3(
                lambda ci, s: x_ref[ci, pl.ds(row0, CH), pl.ds(s, slab)],
                w1_ref, b1_ref)
            for ci in range(C):
                h1p_ref[ci, :, pl.ds(Wp + 1, slab)] = jnp.maximum(h1[ci], 0.0) * mask

            # ---- conv2 + bias + relu + residual ----
            h2 = conv3x3(
                lambda ci, s: h1p_ref[ci, :, pl.ds(s, slab)],
                w2_ref, b2_ref)
            for co in range(C):
                res = x_ref[co, pl.ds(row0, CH), pl.ds(Wp + 1, slab)]
                out_ref[co, pl.ds(row0, CH), :] = jnp.maximum(h2[co], 0.0) + res

        if n_chunks == 1:
            chunk_body(0)
        else:
            def body(blk, carry):
                chunk_body(blk)
                return carry
            lax.fori_loop(0, n_chunks, body, 0, unroll=True)

    return kernel


def simple_residual_block(x_nchw, w1, b1, w2, b2, *, tn=32):
    """x_nchw: (N, 3, H, W) f32; w*: (3, 3, 3, 3) HWIO; b*: (3,). Returns NCHW."""
    N, cin, H, W = x_nchw.shape
    assert cin == C

    # Padded width: >= W+2 (1-pixel conv padding each side) and a multiple of
    # 8 so the flattened row slab H*Wp is 128-lane aligned when H % 16 == 0
    # (16x16 -> slab = 384 -> fully unmasked lane-dense stores).
    Wp = -(-(W + 2) // 8) * 8
    Hp = H + 2
    slab = H * Wp
    pfin = Hp * Wp + 2          # covers the largest shift (2*Wp + 2) + slab

    # Batch packing + grid tiling: pad N to a multiple of 8 (full sublanes),
    # then to a multiple of the per-step tile TN.  TN*(pfin+slab)*C*4 bytes,
    # double-buffered, stays far under the scoped VMEM limit on v5e/v6e/v7x
    # for these image sizes; shrink tn for very large H, W.
    Np = -(-N // CH) * CH
    TN = min(tn, Np)
    TN = -(-TN // CH) * CH
    Np = -(-Np // TN) * TN
    grid = (Np // TN,)

    x = x_nchw.astype(jnp.float32)
    x = jnp.transpose(x, (1, 0, 2, 3))                              # (C, N, H, W)
    x = jnp.pad(x, ((0, 0), (0, Np - N), (1, 1), (1, Wp - W - 1)))  # (C, Np, Hp, Wp)
    x = x.reshape(C, Np, Hp * Wp)
    x = jnp.pad(x, ((0, 0), (0, 0), (0, pfin - Hp * Wp)))           # (C, Np, pfin)

    # Column-validity mask for the flattened (H, Wp) rows (one vreg-dense
    # (8, slab) plane so no in-kernel sublane broadcast is needed).
    col = jnp.arange(slab, dtype=jnp.int32) % Wp
    mask = jnp.broadcast_to((col < W).astype(jnp.float32)[None, :], (CH, slab))

    w1f = w1.astype(jnp.float32).reshape(-1)        # (81,) HWIO row-major
    b1f = b1.astype(jnp.float32)
    w2f = w2.astype(jnp.float32).reshape(-1)
    b2f = b2.astype(jnp.float32)

    kernel = _build_kernel(H, W, Wp, slab, pfin, TN)

    out_flat = pl.pallas_call(
        kernel,
        out_shape=jax.ShapeDtypeStruct((C, Np, slab), jnp.float32),
        grid_spec=pltpu.PrefetchScalarGridSpec(
            num_scalar_prefetch=0,
            grid=grid,
            in_specs=[
                pl.BlockSpec((C, TN, pfin), lambda i: (0, i, 0)),           # x
                pl.BlockSpec((CH, slab), lambda i: (0, 0)),                 # mask
                pl.BlockSpec(memory_space=pltpu.MemorySpace.SMEM),          # w1
                pl.BlockSpec(memory_space=pltpu.MemorySpace.SMEM),          # b1
                pl.BlockSpec(memory_space=pltpu.MemorySpace.SMEM),          # w2
                pl.BlockSpec(memory_space=pltpu.MemorySpace.SMEM),          # b2
            ],
            out_specs=pl.BlockSpec((C, TN, slab), lambda i: (0, i, 0)),
            scratch_shapes=[pltpu.VMEM((C, CH, pfin), jnp.float32)],
        ),
        compiler_params=pltpu.CompilerParams(
            dimension_semantics=("parallel",),      # both TCs on v7x
        ),
    )(x, mask, w1f, b1f, w2f, b2f)

    out = out_flat.reshape(C, Np, H, Wp)[:, :N, :, :W]   # strip batch/col padding
    return jnp.transpose(out, (1, 0, 2, 3))              # NCHW to match PyTorch


def reference_block(x_nchw, w1, b1, w2, b2):
    """Pure-JAX reference (NHWC conv), for sanity checking."""
    x = jnp.transpose(x_nchw, (0, 2, 3, 1))
    dn = lax.conv_dimension_numbers(x.shape, w1.shape, ('NHWC', 'HWIO', 'NHWC'))
    h = lax.conv_general_dilated(x, w1, (1, 1), 'SAME', dimension_numbers=dn) + b1
    h = jnp.maximum(h, 0.0)
    h = lax.conv_general_dilated(h, w2, (1, 1), 'SAME', dimension_numbers=dn) + b2
    h = jnp.maximum(h, 0.0) + x
    return jnp.transpose(h, (0, 3, 1, 2))


if __name__ == "__main__":
    key = jax.random.PRNGKey(0)
    k_x, k_w1, k_b1, k_w2, k_b2 = jax.random.split(key, 5)

    N, H, W = 2, 16, 16
    x = jax.random.normal(k_x, (N, C, H, W), dtype=jnp.float32)

    # Deterministic synthetic parameters (HWIO layout), roughly PyTorch-scale.
    fan_in = C * K * K
    bound = 1.0 / (fan_in ** 0.5)
    w1 = jax.random.uniform(k_w1, (K, K, C, C), minval=-bound, maxval=bound)
    b1 = jax.random.uniform(k_b1, (C,), minval=-bound, maxval=bound)
    w2 = jax.random.uniform(k_w2, (K, K, C, C), minval=-bound, maxval=bound)
    b2 = jax.random.uniform(k_b2, (C,), minval=-bound, maxval=bound)

    out = simple_residual_block(x, w1, b1, w2, b2)
    out = jax.block_until_ready(out)

    ref = jax.block_until_ready(reference_block(x, w1, b1, w2, b2))
    assert out.shape == (N, C, H, W)
    assert jnp.allclose(out, ref, atol=1e-4, rtol=1e-4), "mismatch vs JAX reference"

    print("KERNEL_OK")
</pallas_src>

<mosaic_0001>
module attributes {stable_mosaic.version = 11 : i64} {
  func.func @kernel(%arg0: i32, %arg1: memref<3x8x434xf32, #tpu.memory_space<vmem>>, %arg2: memref<8x384xf32, #tpu.memory_space<vmem>>, %arg3: memref<81xf32, #tpu.memory_space<smem>>, %arg4: memref<3xf32, #tpu.memory_space<smem>>, %arg5: memref<81xf32, #tpu.memory_space<smem>>, %arg6: memref<3xf32, #tpu.memory_space<smem>>, %arg7: memref<3x8x384xf32, #tpu.memory_space<vmem>>, %arg8: memref<3x8x434xf32, #tpu.memory_space<vmem>>) attributes {dimension_semantics = [#tpu.dimension_semantics<parallel>], iteration_bounds = array<i64: 1>, scalar_prefetch = 0 : i64, scratch_operands = 1 : i64, tpu.core_type = #tpu.core_type<tc>, window_params = [{transform_indices = @transform_0, window_bounds = array<i64: 3, 8, 434>}, {pipeline_mode = #tpu.pipeline_mode<synchronous>, transform_indices = @transform_1, window_bounds = array<i64: 8, 384>}, {transform_indices = @transform_2, window_bounds = array<i64: 81>}, {transform_indices = @transform_3, window_bounds = array<i64: 3>}, {transform_indices = @transform_4, window_bounds = array<i64: 81>}, {transform_indices = @transform_5, window_bounds = array<i64: 3>}, {transform_indices = @transform_6, window_bounds = array<i64: 3, 8, 384>}]} {
    %c0 = arith.constant 0 : index
    %c0_0 = arith.constant 0 : index
    %0 = vector.load %arg2[%c0, %c0_0] : memref<8x384xf32, #tpu.memory_space<vmem>>, vector<8x384xf32>
    %cst = arith.constant 0.000000e+00 : f32
    %1 = vector.broadcast %cst : f32 to vector<3x8x434xf32>
    %c0_1 = arith.constant 0 : index
    %c0_2 = arith.constant 0 : index
    %c0_3 = arith.constant 0 : index
    %2 = vector.load %arg8[%c0_1, %c0_2, %c0_3] : memref<3x8x434xf32, #tpu.memory_space<vmem>>, vector<3x8x434xf32>
    tpu.vector_store %arg8[%c0_1, %c0_2, %c0_3], %1 {strides = array<i32>} : memref<3x8x434xf32, #tpu.memory_space<vmem>>, vector<3x8x434xf32>,
    %c0_i32 = arith.constant 0 : i32
    %3 = tpu.assume_multiple %c0_i32, 8 : i32
    %c0_4 = arith.constant 0 : index
    %4 = memref.load %arg4[%c0_4] : memref<3xf32, #tpu.memory_space<smem>>
    %5 = vector.broadcast %4 : f32 to vector<8x384xf32>
    %c1 = arith.constant 1 : index
    %6 = memref.load %arg4[%c1] : memref<3xf32, #tpu.memory_space<smem>>
    %7 = vector.broadcast %6 : f32 to vector<8x384xf32>
    %c2 = arith.constant 2 : index
    %8 = memref.load %arg4[%c2] : memref<3xf32, #tpu.memory_space<smem>>
    %9 = vector.broadcast %8 : f32 to vector<8x384xf32>
    %cst_5 = arith.constant 0.000000e+00 : f32
    %10 = vector.broadcast %cst_5 : f32 to vector<8x384xf32>
    %cst_6 = arith.constant 0.000000e+00 : f32
    %11 = vector.broadcast %cst_6 : f32 to vector<8x384xf32>
    %cst_7 = arith.constant 0.000000e+00 : f32
    %12 = vector.broadcast %cst_7 : f32 to vector<8x384xf32>
    %c0_8 = arith.constant 0 : index
    %13 = arith.index_cast %3 : i32 to index
    %c0_9 = arith.constant 0 : index
    %14 = vector.load %arg1[%c0_8, %13, %c0_9] : memref<3x8x434xf32, #tpu.memory_space<vmem>>, vector<1x8x384xf32>
    %15 = vector.shape_cast %14 : vector<1x8x384xf32> to vector<8x384xf32>
    %c0_10 = arith.constant 0 : index
    %16 = memref.load %arg3[%c0_10] : memref<81xf32, #tpu.memory_space<smem>>
    %17 = vector.broadcast %16 : f32 to vector<8x384xf32>
    %18 = arith.mulf %17, %15 : vector<8x384xf32>
    %19 = arith.addf %5, %18 : vector<8x384xf32>
    %c1_11 = arith.constant 1 : index
    %20 = memref.load %arg3[%c1_11] : memref<81xf32, #tpu.memory_space<smem>>
    %21 = vector.broadcast %20 : f32 to vector<8x384xf32>
    %22 = arith.mulf %21, %15 : vector<8x384xf32>
    %23 = arith.addf %7, %22 : vector<8x384xf32>
    %c2_12 = arith.constant 2 : index
    %24 = memref.load %arg3[%c2_12] : memref<81xf32, #tpu.memory_space<smem>>
    %25 = vector.broadcast %24 : f32 to vector<8x384xf32>
    %26 = arith.mulf %25, %15 : vector<8x384xf32>
    %27 = arith.addf %9, %26 : vector<8x384xf32>
    %c1_13 = arith.constant 1 : index
    %28 = arith.index_cast %3 : i32 to index
    %c0_14 = arith.constant 0 : index
    %29 = vector.load %arg1[%c1_13, %28, %c0_14] : memref<3x8x434xf32, #tpu.memory_space<vmem>>, vector<1x8x384xf32>
    %30 = vector.shape_cast %29 : vector<1x8x384xf32> to vector<8x384xf32>
    %c3 = arith.constant 3 : index
    %31 = memref.load %arg3[%c3] : memref<81xf32, #tpu.memory_space<smem>>
    %32 = vector.broadcast %31 : f32 to vector<8x384xf32>
    %33 = arith.mulf %32, %30 : vector<8x384xf32>
    %34 = arith.addf %10, %33 : vector<8x384xf32>
    %c4 = arith.constant 4 : index
    %35 = memref.load %arg3[%c4] : memref<81xf32, #tpu.memory_space<smem>>
    %36 = vector.broadcast %35 : f32 to vector<8x384xf32>
    %37 = arith.mulf %36, %30 : vector<8x384xf32>
    %38 = arith.addf %11, %37 : vector<8x384xf32>
    %c5 = arith.constant 5 : index
    %39 = memref.load %arg3[%c5] : memref<81xf32, #tpu.memory_space<smem>>
    %40 = vector.broadcast %39 : f32 to vector<8x384xf32>
    %41 = arith.mulf %40, %30 : vector<8x384xf32>
    %42 = arith.addf %12, %41 : vector<8x384xf32>
    %c2_15 = arith.constant 2 : index
    %43 = arith.index_cast %3 : i32 to index
    %c0_16 = arith.constant 0 : index
    %44 = vector.load %arg1[%c2_15, %43, %c0_16] : memref<3x8x434xf32, #tpu.memory_space<vmem>>, vector<1x8x384xf32>
    %45 = vector.shape_cast %44 : vector<1x8x384xf32> to vector<8x384xf32>
    %c6 = arith.constant 6 : index
    %46 = memref.load %arg3[%c6] : memref<81xf32, #tpu.memory_space<smem>>
    %47 = vector.broadcast %46 : f32 to vector<8x384xf32>
    %48 = arith.mulf %47, %45 : vector<8x384xf32>
    %49 = arith.addf %19, %48 : vector<8x384xf32>
    %c7 = arith.constant 7 : index
    %50 = memref.load %arg3[%c7] : memref<81xf32, #tpu.memory_space<smem>>
    %51 = vector.broadcast %50 : f32 to vector<8x384xf32>
    %52 = arith.mulf %51, %45 : vector<8x384xf32>
    %53 = arith.addf %23, %52 : vector<8x384xf32>
    %c8 = arith.constant 8 : index
    %54 = memref.load %arg3[%c8] : memref<81xf32, #tpu.memory_space<smem>>
    %55 = vector.broadcast %54 : f32 to vector<8x384xf32>
    %56 = arith.mulf %55, %45 : vector<8x384xf32>
    %57 = arith.addf %27, %56 : vector<8x384xf32>
    %c0_17 = arith.constant 0 : index
    %58 = arith.index_cast %3 : i32 to index
    %c1_18 = arith.constant 1 : index
    %59 = vector.load %arg1[%c0_17, %58, %c1_18] : memref<3x8x434xf32, #tpu.memory_space<vmem>>, vector<1x8x384xf32>
    %60 = vector.shape_cast %59 : vector<1x8x384xf32> to vector<8x384xf32>
    %c9 = arith.constant 9 : index
    %61 = memref.load %arg3[%c9] : memref<81xf32, #tpu.memory_space<smem>>
    %62 = vector.broadcast %61 : f32 to vector<8x384xf32>
    %63 = arith.mulf %62, %60 : vector<8x384xf32>
    %64 = arith.addf %34, %63 : vector<8x384xf32>
    %c10 = arith.constant 10 : index
    %65 = memref.load %arg3[%c10] : memref<81xf32, #tpu.memory_space<smem>>
    %66 = vector.broadcast %65 : f32 to vector<8x384xf32>
    %67 = arith.mulf %66, %60 : vector<8x384xf32>
    %68 = arith.addf %38, %67 : vector<8x384xf32>
    %c11 = arith.constant 11 : index
    %69 = memref.load %arg3[%c11] : memref<81xf32, #tpu.memory_space<smem>>
    %70 = vector.broadcast %69 : f32 to vector<8x384xf32>
    %71 = arith.mulf %70, %60 : vector<8x384xf32>
    %72 = arith.addf %42, %71 : vector<8x384xf32>
    %c1_19 = arith.constant 1 : index
    %73 = arith.index_cast %3 : i32 to index
    %c1_20 = arith.constant 1 : index
    %74 = vector.load %arg1[%c1_19, %73, %c1_20] : memref<3x8x434xf32, #tpu.memory_space<vmem>>, vector<1x8x384xf32>
    %75 = vector.shape_cast %74 : vector<1x8x384xf32> to vector<8x384xf32>
    %c12 = arith.constant 12 : index
    %76 = memref.load %arg3[%c12] : memref<81xf32, #tpu.memory_space<smem>>
    %77 = vector.broadcast %76 : f32 to vector<8x384xf32>
    %78 = arith.mulf %77, %75 : vector<8x384xf32>
    %79 = arith.addf %49, %78 : vector<8x384xf32>
    %c13 = arith.constant 13 : index
    %80 = memref.load %arg3[%c13] : memref<81xf32, #tpu.memory_space<smem>>
    %81 = vector.broadcast %80 : f32 to vector<8x384xf32>
    %82 = arith.mulf %81, %75 : vector<8x384xf32>
    %83 = arith.addf %53, %82 : vector<8x384xf32>
    %c14 = arith.constant 14 : index
    %84 = memref.load %arg3[%c14] : memref<81xf32, #tpu.memory_space<smem>>
    %85 = vector.broadcast %84 : f32 to vector<8x384xf32>
    %86 = arith.mulf %85, %75 : vector<8x384xf32>
    %87 = arith.addf %57, %86 : vector<8x384xf32>
    %c2_21 = arith.constant 2 : index
    %88 = arith.index_cast %3 : i32 to index
    %c1_22 = arith.constant 1 : index
    %89 = vector.load %arg1[%c2_21, %88, %c1_22] : memref<3x8x434xf32, #tpu.memory_space<vmem>>, vector<1x8x384xf32>
    %90 = vector.shape_cast %89 : vector<1x8x384xf32> to vector<8x384xf32>
    %c15 = arith.constant 15 : index
    %91 = memref.load %arg3[%c15] : memref<81xf32, #tpu.memory_space<smem>>
    %92 = vector.broadcast %91 : f32 to vector<8x384xf32>
    %93 = arith.mulf %92, %90 : vector<8x384xf32>
    %94 = arith.addf %64, %93 : vector<8x384xf32>
    %c16 = arith.constant 16 : index
    %95 = memref.load %arg3[%c16] : memref<81xf32, #tpu.memory_space<smem>>
    %96 = vector.broadcast %95 : f32 to vector<8x384xf32>
    %97 = arith.mulf %96, %90 : vector<8x384xf32>
    %98 = arith.addf %68, %97 : vector<8x384xf32>
    %c17 = arith.constant 17 : index
    %99 = memref.load %arg3[%c17] : memref<81xf32, #tpu.memory_space<smem>>
    %100 = vector.broadcast %99 : f32 to vector<8x384xf32>
    %101 = arith.mulf %100, %90 : vector<8x384xf32>
    %102 = arith.addf %72, %101 : vector<8x384xf32>
    %c0_23 = arith.constant 0 : index
    %103 = arith.index_cast %3 : i32 to index
    %c2_24 = arith.constant 2 : index
    %104 = vector.load %arg1[%c0_23, %103, %c2_24] : memref<3x8x434xf32, #tpu.memory_space<vmem>>, vector<1x8x384xf32>
    %105 = vector.shape_cast %104 : vector<1x8x384xf32> to vector<8x384xf32>
    %c18 = arith.constant 18 : index
    %106 = memref.load %arg3[%c18] : memref<81xf32, #tpu.memory_space<smem>>
    %107 = vector.broadcast %106 : f32 to vector<8x384xf32>
    %108 = arith.mulf %107, %105 : vector<8x384xf32>
    %109 = arith.addf %79, %108 : vector<8x384xf32>
    %c19 = arith.constant 19 : index
    %110 = memref.load %arg3[%c19] : memref<81xf32, #tpu.memory_space<smem>>
    %111 = vector.broadcast %110 : f32 to vector<8x384xf32>
    %112 = arith.mulf %111, %105 : vector<8x384xf32>
    %113 = arith.addf %83, %112 : vector<8x384xf32>
    %c20 = arith.constant 20 : index
    %114 = memref.load %arg3[%c20] : memref<81xf32, #tpu.memory_space<smem>>
    %115 = vector.broadcast %114 : f32 to vector<8x384xf32>
    %116 = arith.mulf %115, %105 : vector<8x384xf32>
    %117 = arith.addf %87, %116 : vector<8x384xf32>
    %c1_25 = arith.constant 1 : index
    %118 = arith.index_cast %3 : i32 to index
    %c2_26 = arith.constant 2 : index
    %119 = vector.load %arg1[%c1_25, %118, %c2_26] : memref<3x8x434xf32, #tpu.memory_space<vmem>>, vector<1x8x384xf32>
    %120 = vector.shape_cast %119 : vector<1x8x384xf32> to vector<8x384xf32>
    %c21 = arith.constant 21 : index
    %121 = memref.load %arg3[%c21] : memref<81xf32, #tpu.memory_space<smem>>
    %122 = vector.broadcast %121 : f32 to vector<8x384xf32>
    %123 = arith.mulf %122, %120 : vector<8x384xf32>
    %124 = arith.addf %94, %123 : vector<8x384xf32>
    %c22 = arith.constant 22 : index
    %125 = memref.load %arg3[%c22] : memref<81xf32, #tpu.memory_space<smem>>
    %126 = vector.broadcast %125 : f32 to vector<8x384xf32>
    %127 = arith.mulf %126, %120 : vector<8x384xf32>
    %128 = arith.addf %98, %127 : vector<8x384xf32>
    %c23 = arith.constant 23 : index
    %129 = memref.load %arg3[%c23] : memref<81xf32, #tpu.memory_space<smem>>
    %130 = vector.broadcast %129 : f32 to vector<8x384xf32>
    %131 = arith.mulf %130, %120 : vector<8x384xf32>
    %132 = arith.addf %102, %131 : vector<8x384xf32>
    %c2_27 = arith.constant 2 : index
    %133 = arith.index_cast %3 : i32 to index
    %c2_28 = arith.constant 2 : index
    %134 = vector.load %arg1[%c2_27, %133, %c2_28] : memref<3x8x434xf32, #tpu.memory_space<vmem>>, vector<1x8x384xf32>
    %135 = vector.shape_cast %134 : vector<1x8x384xf32> to vector<8x384xf32>
    %c24 = arith.constant 24 : index
    %136 = memref.load %arg3[%c24] : memref<81xf32, #tpu.memory_space<smem>>
    %137 = vector.broadcast %136 : f32 to vector<8x384xf32>
    %138 = arith.mulf %137, %135 : vector<8x384xf32>
    %139 = arith.addf %109, %138 : vector<8x384xf32>
    %c25 = arith.constant 25 : index
    %140 = memref.load %arg3[%c25] : memref<81xf32, #tpu.memory_space<smem>>
    %141 = vector.broadcast %140 : f32 to vector<8x384xf32>
    %142 = arith.mulf %141, %135 : vector<8x384xf32>
    %143 = arith.addf %113, %142 : vector<8x384xf32>
    %c26 = arith.constant 26 : index
    %144 = memref.load %arg3[%c26] : memref<81xf32, #tpu.memory_space<smem>>
    %145 = vector.broadcast %144 : f32 to vector<8x384xf32>
    %146 = arith.mulf %145, %135 : vector<8x384xf32>
    %147 = arith.addf %117, %146 : vector<8x384xf32>
    %c0_29 = arith.constant 0 : index
    %148 = arith.index_cast %3 : i32 to index
    %c24_30 = arith.constant 24 : index
    %149 = vector.load %arg1[%c0_29, %148, %c24_30] : memref<3x8x434xf32, #tpu.memory_space<vmem>>, vector<1x8x384xf32>
    %150 = vector.shape_cast %149 : vector<1x8x384xf32> to vector<8x384xf32>
    %c27 = arith.constant 27 : index
    %151 = memref.load %arg3[%c27] : memref<81xf32, #tpu.memory_space<smem>>
    %152 = vector.broadcast %151 : f32 to vector<8x384xf32>
    %153 = arith.mulf %152, %150 : vector<8x384xf32>
    %154 = arith.addf %124, %153 : vector<8x384xf32>
    %c28 = arith.constant 28 : index
    %155 = memref.load %arg3[%c28] : memref<81xf32, #tpu.memory_space<smem>>
    %156 = vector.broadcast %155 : f32 to vector<8x384xf32>
    %157 = arith.mulf %156, %150 : vector<8x384xf32>
    %158 = arith.addf %128, %157 : vector<8x384xf32>
    %c29 = arith.constant 29 : index
    %159 = memref.load %arg3[%c29] : memref<81xf32, #tpu.memory_space<smem>>
    %160 = vector.broadcast %159 : f32 to vector<8x384xf32>
    %161 = arith.mulf %160, %150 : vector<8x384xf32>
    %162 = arith.addf %132, %161 : vector<8x384xf32>
    %c1_31 = arith.constant 1 : index
    %163 = arith.index_cast %3 : i32 to index
    %c24_32 = arith.constant 24 : index
    %164 = vector.load %arg1[%c1_31, %163, %c24_32] : memref<3x8x434xf32, #tpu.memory_space<vmem>>, vector<1x8x384xf32>
    %165 = vector.shape_cast %164 : vector<1x8x384xf32> to vector<8x384xf32>
    %c30 = arith.constant 30 : index
    %166 = memref.load %arg3[%c30] : memref<81xf32, #tpu.memory_space<smem>>
    %167 = vector.broadcast %166 : f32 to vector<8x384xf32>
    %168 = arith.mulf %167, %165 : vector<8x384xf32>
    %169 = arith.addf %139, %168 : vector<8x384xf32>
    %c31 = arith.constant 31 : index
    %170 = memref.load %arg3[%c31] : memref<81xf32, #tpu.memory_space<smem>>
    %171 = vector.broadcast %170 : f32 to vector<8x384xf32>
    %172 = arith.mulf %171, %165 : vector<8x384xf32>
    %173 = arith.addf %143, %172 : vector<8x384xf32>
    %c32 = arith.constant 32 : index
    %174 = memref.load %arg3[%c32] : memref<81xf32, #tpu.memory_space<smem>>
    %175 = vector.broadcast %174 : f32 to vector<8x384xf32>
    %176 = arith.mulf %175, %165 : vector<8x384xf32>
    %177 = arith.addf %147, %176 : vector<8x384xf32>
    %c2_33 = arith.constant 2 : index
    %178 = arith.index_cast %3 : i32 to index
    %c24_34 = arith.constant 24 : index
    %179 = vector.load %arg1[%c2_33, %178, %c24_34] : memref<3x8x434xf32, #tpu.memory_space<vmem>>, vector<1x8x384xf32>
    %180 = vector.shape_cast %179 : vector<1x8x384xf32> to vector<8x384xf32>
    %c33 = arith.constant 33 : index
    %181 = memref.load %arg3[%c33] : memref<81xf32, #tpu.memory_space<smem>>
    %182 = vector.broadcast %181 : f32 to vector<8x384xf32>
    %183 = arith.mulf %182, %180 : vector<8x384xf32>
    %184 = arith.addf %154, %183 : vector<8x384xf32>
    %c34 = arith.constant 34 : index
    %185 = memref.load %arg3[%c34] : memref<81xf32, #tpu.memory_space<smem>>
    %186 = vector.broadcast %185 : f32 to vector<8x384xf32>
    %187 = arith.mulf %186, %180 : vector<8x384xf32>
    %188 = arith.addf %158, %187 : vector<8x384xf32>
    %c35 = arith.constant 35 : index
    %189 = memref.load %arg3[%c35] : memref<81xf32, #tpu.memory_space<smem>>
    %190 = vector.broadcast %189 : f32 to vector<8x384xf32>
    %191 = arith.mulf %190, %180 : vector<8x384xf32>
    %192 = arith.addf %162, %191 : vector<8x384xf32>
    %c0_35 = arith.constant 0 : index
    %193 = arith.index_cast %3 : i32 to index
    %c25_36 = arith.constant 25 : index
    %194 = vector.load %arg1[%c0_35, %193, %c25_36] : memref<3x8x434xf32, #tpu.memory_space<vmem>>, vector<1x8x384xf32>
    %195 = vector.shape_cast %194 : vector<1x8x384xf32> to vector<8x384xf32>
    %c36 = arith.constant 36 : index
    %196 = memref.load %arg3[%c36] : memref<81xf32, #tpu.memory_space<smem>>
    %197 = vector.broadcast %196 : f32 to vector<8x384xf32>
    %198 = arith.mulf %197, %195 : vector<8x384xf32>
    %199 = arith.addf %169, %198 : vector<8x384xf32>
    %c37 = arith.constant 37 : index
    %200 = memref.load %arg3[%c37] : memref<81xf32, #tpu.memory_space<smem>>
    %201 = vector.broadcast %200 : f32 to vector<8x384xf32>
    %202 = arith.mulf %201, %195 : vector<8x384xf32>
    %203 = arith.addf %173, %202 : vector<8x384xf32>
    %c38 = arith.constant 38 : index
    %204 = memref.load %arg3[%c38] : memref<81xf32, #tpu.memory_space<smem>>
    %205 = vector.broadcast %204 : f32 to vector<8x384xf32>
    %206 = arith.mulf %205, %195 : vector<8x384xf32>
    %207 = arith.addf %177, %206 : vector<8x384xf32>
    %c1_37 = arith.constant 1 : index
    %208 = arith.index_cast %3 : i32 to index
    %c25_38 = arith.constant 25 : index
    %209 = vector.load %arg1[%c1_37, %208, %c25_38] : memref<3x8x434xf32, #tpu.memory_space<vmem>>, vector<1x8x384xf32>
    %210 = vector.shape_cast %209 : vector<1x8x384xf32> to vector<8x384xf32>
    %c39 = arith.constant 39 : index
    %211 = memref.load %arg3[%c39] : memref<81xf32, #tpu.memory_space<smem>>
    %212 = vector.broadcast %211 : f32 to vector<8x384xf32>
    %213 = arith.mulf %212, %210 : vector<8x384xf32>
    %214 = arith.addf %184, %213 : vector<8x384xf32>
    %c40 = arith.constant 40 : index
    %215 = memref.load %arg3[%c40] : memref<81xf32, #tpu.memory_space<smem>>
    %216 = vector.broadcast %215 : f32 to vector<8x384xf32>
    %217 = arith.mulf %216, %210 : vector<8x384xf32>
    %218 = arith.addf %188, %217 : vector<8x384xf32>
    %c41 = arith.constant 41 : index
    %219 = memref.load %arg3[%c41] : memref<81xf32, #tpu.memory_space<smem>>
    %220 = vector.broadcast %219 : f32 to vector<8x384xf32>
    %221 = arith.mulf %220, %210 : vector<8x384xf32>
    %222 = arith.addf %192, %221 : vector<8x384xf32>
    %c2_39 = arith.constant 2 : index
    %223 = arith.index_cast %3 : i32 to index
    %c25_40 = arith.constant 25 : index
    %224 = vector.load %arg1[%c2_39, %223, %c25_40] : memref<3x8x434xf32, #tpu.memory_space<vmem>>, vector<1x8x384xf32>
    %225 = vector.shape_cast %224 : vector<1x8x384xf32> to vector<8x384xf32>
    %c42 = arith.constant 42 : index
    %226 = memref.load %arg3[%c42] : memref<81xf32, #tpu.memory_space<smem>>
    %227 = vector.broadcast %226 : f32 to vector<8x384xf32>
    %228 = arith.mulf %227, %225 : vector<8x384xf32>
    %229 = arith.addf %199, %228 : vector<8x384xf32>
    %c43 = arith.constant 43 : index
    %230 = memref.load %arg3[%c43] : memref<81xf32, #tpu.memory_space<smem>>
    %231 = vector.broadcast %230 : f32 to vector<8x384xf32>
    %232 = arith.mulf %231, %225 : vector<8x384xf32>
    %233 = arith.addf %203, %232 : vector<8x384xf32>
    %c44 = arith.constant 44 : index
    %234 = memref.load %arg3[%c44] : memref<81xf32, #tpu.memory_space<smem>>
    %235 = vector.broadcast %234 : f32 to vector<8x384xf32>
    %236 = arith.mulf %235, %225 : vector<8x384xf32>
    %237 = arith.addf %207, %236 : vector<8x384xf32>
    %c0_41 = arith.constant 0 : index
    %238 = arith.index_cast %3 : i32 to index
    %c26_42 = arith.constant 26 : index
    %239 = vector.load %arg1[%c0_41, %238, %c26_42] : memref<3x8x434xf32, #tpu.memory_space<vmem>>, vector<1x8x384xf32>
    %240 = vector.shape_cast %239 : vector<1x8x384xf32> to vector<8x384xf32>
    %c45 = arith.constant 45 : index
    %241 = memref.load %arg3[%c45] : memref<81xf32, #tpu.memory_space<smem>>
    %242 = vector.broadcast %241 : f32 to vector<8x384xf32>
    %243 = arith.mulf %242, %240 : vector<8x384xf32>
    %244 = arith.addf %214, %243 : vector<8x384xf32>
    %c46 = arith.constant 46 : index
    %245 = memref.load %arg3[%c46] : memref<81xf32, #tpu.memory_space<smem>>
    %246 = vector.broadcast %245 : f32 to vector<8x384xf32>
    %247 = arith.mulf %246, %240 : vector<8x384xf32>
    %248 = arith.addf %218, %247 : vector<8x384xf32>
    %c47 = arith.constant 47 : index
    %249 = memref.load %arg3[%c47] : memref<81xf32, #tpu.memory_space<smem>>
    %250 = vector.broadcast %249 : f32 to vector<8x384xf32>
    %251 = arith.mulf %250, %240 : vector<8x384xf32>
    %252 = arith.addf %222, %251 : vector<8x384xf32>
    %c1_43 = arith.constant 1 : index
    %253 = arith.index_cast %3 : i32 to index
    %c26_44 = arith.constant 26 : index
    %254 = vector.load %arg1[%c1_43, %253, %c26_44] : memref<3x8x434xf32, #tpu.memory_space<vmem>>, vector<1x8x384xf32>
    %255 = vector.shape_cast %254 : vector<1x8x384xf32> to vector<8x384xf32>
    %c48 = arith.constant 48 : index
    %256 = memref.load %arg3[%c48] : memref<81xf32, #tpu.memory_space<smem>>
    %257 = vector.broadcast %256 : f32 to vector<8x384xf32>
    %258 = arith.mulf %257, %255 : vector<8x384xf32>
    %259 = arith.addf %229, %258 : vector<8x384xf32>
    %c49 = arith.constant 49 : index
    %260 = memref.load %arg3[%c49] : memref<81xf32, #tpu.memory_space<smem>>
    %261 = vector.broadcast %260 : f32 to vector<8x384xf32>
    %262 = arith.mulf %261, %255 : vector<8x384xf32>
    %263 = arith.addf %233, %262 : vector<8x384xf32>
    %c50 = arith.constant 50 : index
    %264 = memref.load %arg3[%c50] : memref<81xf32, #tpu.memory_space<smem>>
    %265 = vector.broadcast %264 : f32 to vector<8x384xf32>
    %266 = arith.mulf %265, %255 : vector<8x384xf32>
    %267 = arith.addf %237, %266 : vector<8x384xf32>
    %c2_45 = arith.constant 2 : index
    %268 = arith.index_cast %3 : i32 to index
    %c26_46 = arith.constant 26 : index
    %269 = vector.load %arg1[%c2_45, %268, %c26_46] : memref<3x8x434xf32, #tpu.memory_space<vmem>>, vector<1x8x384xf32>
    %270 = vector.shape_cast %269 : vector<1x8x384xf32> to vector<8x384xf32>
    %c51 = arith.constant 51 : index
    %271 = memref.load %arg3[%c51] : memref<81xf32, #tpu.memory_space<smem>>
    %272 = vector.broadcast %271 : f32 to vector<8x384xf32>
    %273 = arith.mulf %272, %270 : vector<8x384xf32>
    %274 = arith.addf %244, %273 : vector<8x384xf32>
    %c52 = arith.constant 52 : index
    %275 = memref.load %arg3[%c52] : memref<81xf32, #tpu.memory_space<smem>>
    %276 = vector.broadcast %275 : f32 to vector<8x384xf32>
    %277 = arith.mulf %276, %270 : vector<8x384xf32>
    %278 = arith.addf %248, %277 : vector<8x384xf32>
    %c53 = arith.constant 53 : index
    %279 = memref.load %arg3[%c53] : memref<81xf32, #tpu.memory_space<smem>>
    %280 = vector.broadcast %279 : f32 to vector<8x384xf32>
    %281 = arith.mulf %280, %270 : vector<8x384xf32>
    %282 = arith.addf %252, %281 : vector<8x384xf32>
    %c0_47 = arith.constant 0 : index
    %283 = arith.index_cast %3 : i32 to index
    %c48_48 = arith.constant 48 : index
    %284 = vector.load %arg1[%c0_47, %283, %c48_48] : memref<3x8x434xf32, #tpu.memory_space<vmem>>, vector<1x8x384xf32>
    %285 = vector.shape_cast %284 : vector<1x8x384xf32> to vector<8x384xf32>
    %c54 = arith.constant 54 : index
    %286 = memref.load %arg3[%c54] : memref<81xf32, #tpu.memory_space<smem>>
    %287 = vector.broadcast %286 : f32 to vector<8x384xf32>
    %288 = arith.mulf %287, %285 : vector<8x384xf32>
    %289 = arith.addf %259, %288 : vector<8x384xf32>
    %c55 = arith.constant 55 : index
    %290 = memref.load %arg3[%c55] : memref<81xf32, #tpu.memory_space<smem>>
    %291 = vector.broadcast %290 : f32 to vector<8x384xf32>
    %292 = arith.mulf %291, %285 : vector<8x384xf32>
    %293 = arith.addf %263, %292 : vector<8x384xf32>
    %c56 = arith.constant 56 : index
    %294 = memref.load %arg3[%c56] : memref<81xf32, #tpu.memory_space<smem>>
    %295 = vector.broadcast %294 : f32 to vector<8x384xf32>
    %296 = arith.mulf %295, %285 : vector<8x384xf32>
    %297 = arith.addf %267, %296 : vector<8x384xf32>
    %c1_49 = arith.constant 1 : index
    %298 = arith.index_cast %3 : i32 to index
    %c48_50 = arith.constant 48 : index
    %299 = vector.load %arg1[%c1_49, %298, %c48_50] : memref<3x8x434xf32, #tpu.memory_space<vmem>>, vector<1x8x384xf32>
    %300 = vector.shape_cast %299 : vector<1x8x384xf32> to vector<8x384xf32>
    %c57 = arith.constant 57 : index
    %301 = memref.load %arg3[%c57] : memref<81xf32, #tpu.memory_space<smem>>
    %302 = vector.broadcast %301 : f32 to vector<8x384xf32>
    %303 = arith.mulf %302, %300 : vector<8x384xf32>
    %304 = arith.addf %274, %303 : vector<8x384xf32>
    %c58 = arith.constant 58 : index
    %305 = memref.load %arg3[%c58] : memref<81xf32, #tpu.memory_space<smem>>
    %306 = vector.broadcast %305 : f32 to vector<8x384xf32>
    %307 = arith.mulf %306, %300 : vector<8x384xf32>
    %308 = arith.addf %278, %307 : vector<8x384xf32>
    %c59 = arith.constant 59 : index
    %309 = memref.load %arg3[%c59] : memref<81xf32, #tpu.memory_space<smem>>
    %310 = vector.broadcast %309 : f32 to vector<8x384xf32>
    %311 = arith.mulf %310, %300 : vector<8x384xf32>
    %312 = arith.addf %282, %311 : vector<8x384xf32>
    %c2_51 = arith.constant 2 : index
    %313 = arith.index_cast %3 : i32 to index
    %c48_52 = arith.constant 48 : index
    %314 = vector.load %arg1[%c2_51, %313, %c48_52] : memref<3x8x434xf32, #tpu.memory_space<vmem>>, vector<1x8x384xf32>
    %315 = vector.shape_cast %314 : vector<1x8x384xf32> to vector<8x384xf32>
    %c60 = arith.constant 60 : index
    %316 = memref.load %arg3[%c60] : memref<81xf32, #tpu.memory_space<smem>>
    %317 = vector.broadcast %316 : f32 to vector<8x384xf32>
    %318 = arith.mulf %317, %315 : vector<8x384xf32>
    %319 = arith.addf %289, %318 : vector<8x384xf32>
    %c61 = arith.constant 61 : index
    %320 = memref.load %arg3[%c61] : memref<81xf32, #tpu.memory_space<smem>>
    %321 = vector.broadcast %320 : f32 to vector<8x384xf32>
    %322 = arith.mulf %321, %315 : vector<8x384xf32>
    %323 = arith.addf %293, %322 : vector<8x384xf32>
    %c62 = arith.constant 62 : index
    %324 = memref.load %arg3[%c62] : memref<81xf32, #tpu.memory_space<smem>>
    %325 = vector.broadcast %324 : f32 to vector<8x384xf32>
    %326 = arith.mulf %325, %315 : vector<8x384xf32>
    %327 = arith.addf %297, %326 : vector<8x384xf32>
    %c0_53 = arith.constant 0 : index
    %328 = arith.index_cast %3 : i32 to index
    %c49_54 = arith.constant 49 : index
    %329 = vector.load %arg1[%c0_53, %328, %c49_54] : memref<3x8x434xf32, #tpu.memory_space<vmem>>, vector<1x8x384xf32>
    %330 = vector.shape_cast %329 : vector<1x8x384xf32> to vector<8x384xf32>
    %c63 = arith.constant 63 : index
    %331 = memref.load %arg3[%c63] : memref<81xf32, #tpu.memory_space<smem>>
    %332 = vector.broadcast %331 : f32 to vector<8x384xf32>
    %333 = arith.mulf %332, %330 : vector<8x384xf32>
    %334 = arith.addf %304, %333 : vector<8x384xf32>
    %c64 = arith.constant 64 : index
    %335 = memref.load %arg3[%c64] : memref<81xf32, #tpu.memory_space<smem>>
    %336 = vector.broadcast %335 : f32 to vector<8x384xf32>
    %337 = arith.mulf %336, %330 : vector<8x384xf32>
    %338 = arith.addf %308, %337 : vector<8x384xf32>
    %c65 = arith.constant 65 : index
    %339 = memref.load %arg3[%c65] : memref<81xf32, #tpu.memory_space<smem>>
    %340 = vector.broadcast %339 : f32 to vector<8x384xf32>
    %341 = arith.mulf %340, %330 : vector<8x384xf32>
    %342 = arith.addf %312, %341 : vector<8x384xf32>
    %c1_55 = arith.constant 1 : index
    %343 = arith.index_cast %3 : i32 to index
    %c49_56 = arith.constant 49 : index
    %344 = vector.load %arg1[%c1_55, %343, %c49_56] : memref<3x8x434xf32, #tpu.memory_space<vmem>>, vector<1x8x384xf32>
    %345 = vector.shape_cast %344 : vector<1x8x384xf32> to vector<8x384xf32>
    %c66 = arith.constant 66 : index
    %346 = memref.load %arg3[%c66] : memref<81xf32, #tpu.memory_space<smem>>
    %347 = vector.broadcast %346 : f32 to vector<8x384xf32>
    %348 = arith.mulf %347, %345 : vector<8x384xf32>
    %349 = arith.addf %319, %348 : vector<8x384xf32>
    %c67 = arith.constant 67 : index
    %350 = memref.load %arg3[%c67] : memref<81xf32, #tpu.memory_space<smem>>
    %351 = vector.broadcast %350 : f32 to vector<8x384xf32>
    %352 = arith.mulf %351, %345 : vector<8x384xf32>
    %353 = arith.addf %323, %352 : vector<8x384xf32>
    %c68 = arith.constant 68 : index
    %354 = memref.load %arg3[%c68] : memref<81xf32, #tpu.memory_space<smem>>
    %355 = vector.broadcast %354 : f32 to vector<8x384xf32>
    %356 = arith.mulf %355, %345 : vector<8x384xf32>
    %357 = arith.addf %327, %356 : vector<8x384xf32>
    %c2_57 = arith.constant 2 : index
    %358 = arith.index_cast %3 : i32 to index
    %c49_58 = arith.constant 49 : index
    %359 = vector.load %arg1[%c2_57, %358, %c49_58] : memref<3x8x434xf32, #tpu.memory_space<vmem>>, vector<1x8x384xf32>
    %360 = vector.shape_cast %359 : vector<1x8x384xf32> to vector<8x384xf32>
    %c69 = arith.constant 69 : index
    %361 = memref.load %arg3[%c69] : memref<81xf32, #tpu.memory_space<smem>>
    %362 = vector.broadcast %361 : f32 to vector<8x384xf32>
    %363 = arith.mulf %362, %360 : vector<8x384xf32>
    %364 = arith.addf %334, %363 : vector<8x384xf32>
    %c70 = arith.constant 70 : index
    %365 = memref.load %arg3[%c70] : memref<81xf32, #tpu.memory_space<smem>>
    %366 = vector.broadcast %365 : f32 to vector<8x384xf32>
    %367 = arith.mulf %366, %360 : vector<8x384xf32>
    %368 = arith.addf %338, %367 : vector<8x384xf32>
    %c71 = arith.constant 71 : index
    %369 = memref.load %arg3[%c71] : memref<81xf32, #tpu.memory_space<smem>>
    %370 = vector.broadcast %369 : f32 to vector<8x384xf32>
    %371 = arith.mulf %370, %360 : vector<8x384xf32>
    %372 = arith.addf %342, %371 : vector<8x384xf32>
    %c0_59 = arith.constant 0 : index
    %373 = arith.index_cast %3 : i32 to index
    %c50_60 = arith.constant 50 : index
    %374 = vector.load %arg1[%c0_59, %373, %c50_60] : memref<3x8x434xf32, #tpu.memory_space<vmem>>, vector<1x8x384xf32>
    %375 = vector.shape_cast %374 : vector<1x8x384xf32> to vector<8x384xf32>
    %c72 = arith.constant 72 : index
    %376 = memref.load %arg3[%c72] : memref<81xf32, #tpu.memory_space<smem>>
    %377 = vector.broadcast %376 : f32 to vector<8x384xf32>
    %378 = arith.mulf %377, %375 : vector<8x384xf32>
    %379 = arith.addf %349, %378 : vector<8x384xf32>
    %c73 = arith.constant 73 : index
    %380 = memref.load %arg3[%c73] : memref<81xf32, #tpu.memory_space<smem>>
    %381 = vector.broadcast %380 : f32 to vector<8x384xf32>
    %382 = arith.mulf %381, %375 : vector<8x384xf32>
    %383 = arith.addf %353, %382 : vector<8x384xf32>
    %c74 = arith.constant 74 : index
    %384 = memref.load %arg3[%c74] : memref<81xf32, #tpu.memory_space<smem>>
    %385 = vector.broadcast %384 : f32 to vector<8x384xf32>
    %386 = arith.mulf %385, %375 : vector<8x384xf32>
    %387 = arith.addf %357, %386 : vector<8x384xf32>
    %c1_61 = arith.constant 1 : index
    %388 = arith.index_cast %3 : i32 to index
    %c50_62 = arith.constant 50 : index
    %389 = vector.load %arg1[%c1_61, %388, %c50_62] : memref<3x8x434xf32, #tpu.memory_space<vmem>>, vector<1x8x384xf32>
    %390 = vector.shape_cast %389 : vector<1x8x384xf32> to vector<8x384xf32>
    %c75 = arith.constant 75 : index
    %391 = memref.load %arg3[%c75] : memref<81xf32, #tpu.memory_space<smem>>
    %392 = vector.broadcast %391 : f32 to vector<8x384xf32>
    %393 = arith.mulf %392, %390 : vector<8x384xf32>
    %394 = arith.addf %364, %393 : vector<8x384xf32>
    %c76 = arith.constant 76 : index
    %395 = memref.load %arg3[%c76] : memref<81xf32, #tpu.memory_space<smem>>
    %396 = vector.broadcast %395 : f32 to vector<8x384xf32>
    %397 = arith.mulf %396, %390 : vector<8x384xf32>
    %398 = arith.addf %368, %397 : vector<8x384xf32>
    %c77 = arith.constant 77 : index
    %399 = memref.load %arg3[%c77] : memref<81xf32, #tpu.memory_space<smem>>
    %400 = vector.broadcast %399 : f32 to vector<8x384xf32>
    %401 = arith.mulf %400, %390 : vector<8x384xf32>
    %402 = arith.addf %372, %401 : vector<8x384xf32>
    %c2_63 = arith.constant 2 : index
    %403 = arith.index_cast %3 : i32 to index
    %c50_64 = arith.constant 50 : index
    %404 = vector.load %arg1[%c2_63, %403, %c50_64] : memref<3x8x434xf32, #tpu.memory_space<vmem>>, vector<1x8x384xf32>
    %405 = vector.shape_cast %404 : vector<1x8x384xf32> to vector<8x384xf32>
    %c78 = arith.constant 78 : index
    %406 = memref.load %arg3[%c78] : memref<81xf32, #tpu.memory_space<smem>>
    %407 = vector.broadcast %406 : f32 to vector<8x384xf32>
    %408 = arith.mulf %407, %405 : vector<8x384xf32>
    %409 = arith.addf %379, %408 : vector<8x384xf32>
    %c79 = arith.constant 79 : index
    %410 = memref.load %arg3[%c79] : memref<81xf32, #tpu.memory_space<smem>>
    %411 = vector.broadcast %410 : f32 to vector<8x384xf32>
    %412 = arith.mulf %411, %405 : vector<8x384xf32>
    %413 = arith.addf %383, %412 : vector<8x384xf32>
    %c80 = arith.constant 80 : index
    %414 = memref.load %arg3[%c80] : memref<81xf32, #tpu.memory_space<smem>>
    %415 = vector.broadcast %414 : f32 to vector<8x384xf32>
    %416 = arith.mulf %415, %405 : vector<8x384xf32>
    %417 = arith.addf %387, %416 : vector<8x384xf32>
    %418 = arith.addf %409, %394 : vector<8x384xf32>
    %419 = arith.addf %413, %398 : vector<8x384xf32>
    %420 = arith.addf %417, %402 : vector<8x384xf32>
    %cst_65 = arith.constant 0.000000e+00 : f32
    %421 = vector.broadcast %cst_65 : f32 to vector<8x384xf32>
    %422 = arith.maximumf %418, %421 : vector<8x384xf32>
    %423 = arith.mulf %422, %0 : vector<8x384xf32>
    %c0_66 = arith.constant 0 : index
    %c0_67 = arith.constant 0 : index
    %c25_68 = arith.constant 25 : index
    %424 = vector.load %arg8[%c0_66, %c0_67, %c25_68] : memref<3x8x434xf32, #tpu.memory_space<vmem>>, vector<1x8x384xf32>
    %425 = vector.shape_cast %424 : vector<1x8x384xf32> to vector<8x384xf32>
    %426 = vector.shape_cast %423 : vector<8x384xf32> to vector<1x8x384xf32>
    tpu.vector_store %arg8[%c0_66, %c0_67, %c25_68], %426 {strides = array<i32>} : memref<3x8x434xf32, #tpu.memory_space<vmem>>, vector<1x8x384xf32>,
    %cst_69 = arith.constant 0.000000e+00 : f32
    %427 = vector.broadcast %cst_69 : f32 to vector<8x384xf32>
    %428 = arith.maximumf %419, %427 : vector<8x384xf32>
    %429 = arith.mulf %428, %0 : vector<8x384xf32>
    %c1_70 = arith.constant 1 : index
    %c0_71 = arith.constant 0 : index
    %c25_72 = arith.constant 25 : index
    %430 = vector.load %arg8[%c1_70, %c0_71, %c25_72] : memref<3x8x434xf32, #tpu.memory_space<vmem>>, vector<1x8x384xf32>
    %431 = vector.shape_cast %430 : vector<1x8x384xf32> to vector<8x384xf32>
    %432 = vector.shape_cast %429 : vector<8x384xf32> to vector<1x8x384xf32>
    tpu.vector_store %arg8[%c1_70, %c0_71, %c25_72], %432 {strides = array<i32>} : memref<3x8x434xf32, #tpu.memory_space<vmem>>, vector<1x8x384xf32>,
    %cst_73 = arith.constant 0.000000e+00 : f32
    %433 = vector.broadcast %cst_73 : f32 to vector<8x384xf32>
    %434 = arith.maximumf %420, %433 : vector<8x384xf32>
    %435 = arith.mulf %434, %0 : vector<8x384xf32>
    %c2_74 = arith.constant 2 : index
    %c0_75 = arith.constant 0 : index
    %c25_76 = arith.constant 25 : index
    %436 = vector.load %arg8[%c2_74, %c0_75, %c25_76] : memref<3x8x434xf32, #tpu.memory_space<vmem>>, vector<1x8x384xf32>
    %437 = vector.shape_cast %436 : vector<1x8x384xf32> to vector<8x384xf32>
    %438 = vector.shape_cast %435 : vector<8x384xf32> to vector<1x8x384xf32>
    tpu.vector_store %arg8[%c2_74, %c0_75, %c25_76], %438 {strides = array<i32>} : memref<3x8x434xf32, #tpu.memory_space<vmem>>, vector<1x8x384xf32>,
    %c0_77 = arith.constant 0 : index
    %439 = memref.load %arg6[%c0_77] : memref<3xf32, #tpu.memory_space<smem>>
    %440 = vector.broadcast %439 : f32 to vector<8x384xf32>
    %c1_78 = arith.constant 1 : index
    %441 = memref.load %arg6[%c1_78] : memref<3xf32, #tpu.memory_space<smem>>
    %442 = vector.broadcast %441 : f32 to vector<8x384xf32>
    %c2_79 = arith.constant 2 : index
    %443 = memref.load %arg6[%c2_79] : memref<3xf32, #tpu.memory_space<smem>>
    %444 = vector.broadcast %443 : f32 to vector<8x384xf32>
    %cst_80 = arith.constant 0.000000e+00 : f32
    %445 = vector.broadcast %cst_80 : f32 to vector<8x384xf32>
    %cst_81 = arith.constant 0.000000e+00 : f32
    %446 = vector.broadcast %cst_81 : f32 to vector<8x384xf32>
    %cst_82 = arith.constant 0.000000e+00 : f32
    %447 = vector.broadcast %cst_82 : f32 to vector<8x384xf32>
    %c0_83 = arith.constant 0 : index
    %c0_84 = arith.constant 0 : index
    %c0_85 = arith.constant 0 : index
    %448 = vector.load %arg8[%c0_83, %c0_84, %c0_85] : memref<3x8x434xf32, #tpu.memory_space<vmem>>, vector<1x8x384xf32>
    %449 = vector.shape_cast %448 : vector<1x8x384xf32> to vector<8x384xf32>
    %c0_86 = arith.constant 0 : index
    %450 = memref.load %arg5[%c0_86] : memref<81xf32, #tpu.memory_space<smem>>
    %451 = vector.broadcast %450 : f32 to vector<8x384xf32>
    %452 = arith.mulf %451, %449 : vector<8x384xf32>
    %453 = arith.addf %440, %452 : vector<8x384xf32>
    %c1_87 = arith.constant 1 : index
    %454 = memref.load %arg5[%c1_87] : memref<81xf32, #tpu.memory_space<smem>>
    %455 = vector.broadcast %454 : f32 to vector<8x384xf32>
    %456 = arith.mulf %455, %449 : vector<8x384xf32>
    %457 = arith.addf %442, %456 : vector<8x384xf32>
    %c2_88 = arith.constant 2 : index
    %458 = memref.load %arg5[%c2_88] : memref<81xf32, #tpu.memory_space<smem>>
    %459 = vector.broadcast %458 : f32 to vector<8x384xf32>
    %460 = arith.mulf %459, %449 : vector<8x384xf32>
    %461 = arith.addf %444, %460 : vector<8x384xf32>
    %c1_89 = arith.constant 1 : index
    %c0_90 = arith.constant 0 : index
    %c0_91 = arith.constant 0 : index
    %462 = vector.load %arg8[%c1_89, %c0_90, %c0_91] : memref<3x8x434xf32, #tpu.memory_space<vmem>>, vector<1x8x384xf32>
    %463 = vector.shape_cast %462 : vector<1x8x384xf32> to vector<8x384xf32>
    %c3_92 = arith.constant 3 : index
    %464 = memref.load %arg5[%c3_92] : memref<81xf32, #tpu.memory_space<smem>>
    %465 = vector.broadcast %464 : f32 to vector<8x384xf32>
    %466 = arith.mulf %465, %463 : vector<8x384xf32>
    %467 = arith.addf %445, %466 : vector<8x384xf32>
    %c4_93 = arith.constant 4 : index
    %468 = memref.load %arg5[%c4_93] : memref<81xf32, #tpu.memory_space<smem>>
    %469 = vector.broadcast %468 : f32 to vector<8x384xf32>
    %470 = arith.mulf %469, %463 : vector<8x384xf32>
    %471 = arith.addf %446, %470 : vector<8x384xf32>
    %c5_94 = arith.constant 5 : index
    %472 = memref.load %arg5[%c5_94] : memref<81xf32, #tpu.memory_space<smem>>
    %473 = vector.broadcast %472 : f32 to vector<8x384xf32>
    %474 = arith.mulf %473, %463 : vector<8x384xf32>
    %475 = arith.addf %447, %474 : vector<8x384xf32>
    %c2_95 = arith.constant 2 : index
    %c0_96 = arith.constant 0 : index
    %c0_97 = arith.constant 0 : index
    %476 = vector.load %arg8[%c2_95, %c0_96, %c0_97] : memref<3x8x434xf32, #tpu.memory_space<vmem>>, vector<1x8x384xf32>
    %477 = vector.shape_cast %476 : vector<1x8x384xf32> to vector<8x384xf32>
    %c6_98 = arith.constant 6 : index
    %478 = memref.load %arg5[%c6_98] : memref<81xf32, #tpu.memory_space<smem>>
    %479 = vector.broadcast %478 : f32 to vector<8x384xf32>
    %480 = arith.mulf %479, %477 : vector<8x384xf32>
    %481 = arith.addf %453, %480 : vector<8x384xf32>
    %c7_99 = arith.constant 7 : index
    %482 = memref.load %arg5[%c7_99] : memref<81xf32, #tpu.memory_space<smem>>
    %483 = vector.broadcast %482 : f32 to vector<8x384xf32>
    %484 = arith.mulf %483, %477 : vector<8x384xf32>
    %485 = arith.addf %457, %484 : vector<8x384xf32>
    %c8_100 = arith.constant 8 : index
    %486 = memref.load %arg5[%c8_100] : memref<81xf32, #tpu.memory_space<smem>>
    %487 = vector.broadcast %486 : f32 to vector<8x384xf32>
    %488 = arith.mulf %487, %477 : vector<8x384xf32>
    %489 = arith.addf %461, %488 : vector<8x384xf32>
    %c0_101 = arith.constant 0 : index
    %c0_102 = arith.constant 0 : index
    %c1_103 = arith.constant 1 : index
    %490 = vector.load %arg8[%c0_101, %c0_102, %c1_103] : memref<3x8x434xf32, #tpu.memory_space<vmem>>, vector<1x8x384xf32>
    %491 = vector.shape_cast %490 : vector<1x8x384xf32> to vector<8x384xf32>
    %c9_104 = arith.constant 9 : index
    %492 = memref.load %arg5[%c9_104] : memref<81xf32, #tpu.memory_space<smem>>
    %493 = vector.broadcast %492 : f32 to vector<8x384xf32>
    %494 = arith.mulf %493, %491 : vector<8x384xf32>
    %495 = arith.addf %467, %494 : vector<8x384xf32>
    %c10_105 = arith.constant 10 : index
    %496 = memref.load %arg5[%c10_105] : memref<81xf32, #tpu.memory_space<smem>>
    %497 = vector.broadcast %496 : f32 to vector<8x384xf32>
    %498 = arith.mulf %497, %491 : vector<8x384xf32>
    %499 = arith.addf %471, %498 : vector<8x384xf32>
    %c11_106 = arith.constant 11 : index
    %500 = memref.load %arg5[%c11_106] : memref<81xf32, #tpu.memory_space<smem>>
    %501 = vector.broadcast %500 : f32 to vector<8x384xf32>
    %502 = arith.mulf %501, %491 : vector<8x384xf32>
    %503 = arith.addf %475, %502 : vector<8x384xf32>
    %c1_107 = arith.constant 1 : index
    %c0_108 = arith.constant 0 : index
    %c1_109 = arith.constant 1 : index
    %504 = vector.load %arg8[%c1_107, %c0_108, %c1_109] : memref<3x8x434xf32, #tpu.memory_space<vmem>>, vector<1x8x384xf32>
    %505 = vector.shape_cast %504 : vector<1x8x384xf32> to vector<8x384xf32>
    %c12_110 = arith.constant 12 : index
    %506 = memref.load %arg5[%c12_110] : memref<81xf32, #tpu.memory_space<smem>>
    %507 = vector.broadcast %506 : f32 to vector<8x384xf32>
    %508 = arith.mulf %507, %505 : vector<8x384xf32>
    %509 = arith.addf %481, %508 : vector<8x384xf32>
    %c13_111 = arith.constant 13 : index
    %510 = memref.load %arg5[%c13_111] : memref<81xf32, #tpu.memory_space<smem>>
    %511 = vector.broadcast %510 : f32 to vector<8x384xf32>
    %512 = arith.mulf %511, %505 : vector<8x384xf32>
    %513 = arith.addf %485, %512 : vector<8x384xf32>
    %c14_112 = arith.constant 14 : index
    %514 = memref.load %arg5[%c14_112] : memref<81xf32, #tpu.memory_space<smem>>
    %515 = vector.broadcast %514 : f32 to vector<8x384xf32>
    %516 = arith.mulf %515, %505 : vector<8x384xf32>
    %517 = arith.addf %489, %516 : vector<8x384xf32>
    %c2_113 = arith.constant 2 : index
    %c0_114 = arith.constant 0 : index
    %c1_115 = arith.constant 1 : index
    %518 = vector.load %arg8[%c2_113, %c0_114, %c1_115] : memref<3x8x434xf32, #tpu.memory_space<vmem>>, vector<1x8x384xf32>
    %519 = vector.shape_cast %518 : vector<1x8x384xf32> to vector<8x384xf32>
    %c15_116 = arith.constant 15 : index
    %520 = memref.load %arg5[%c15_116] : memref<81xf32, #tpu.memory_space<smem>>
    %521 = vector.broadcast %520 : f32 to vector<8x384xf32>
    %522 = arith.mulf %521, %519 : vector<8x384xf32>
    %523 = arith.addf %495, %522 : vector<8x384xf32>
    %c16_117 = arith.constant 16 : index
    %524 = memref.load %arg5[%c16_117] : memref<81xf32, #tpu.memory_space<smem>>
    %525 = vector.broadcast %524 : f32 to vector<8x384xf32>
    %526 = arith.mulf %525, %519 : vector<8x384xf32>
    %527 = arith.addf %499, %526 : vector<8x384xf32>
    %c17_118 = arith.constant 17 : index
    %528 = memref.load %arg5[%c17_118] : memref<81xf32, #tpu.memory_space<smem>>
    %529 = vector.broadcast %528 : f32 to vector<8x384xf32>
    %530 = arith.mulf %529, %519 : vector<8x384xf32>
    %531 = arith.addf %503, %530 : vector<8x384xf32>
    %c0_119 = arith.constant 0 : index
    %c0_120 = arith.constant 0 : index
    %c2_121 = arith.constant 2 : index
    %532 = vector.load %arg8[%c0_119, %c0_120, %c2_121] : memref<3x8x434xf32, #tpu.memory_space<vmem>>, vector<1x8x384xf32>
    %533 = vector.shape_cast %532 : vector<1x8x384xf32> to vector<8x384xf32>
    %c18_122 = arith.constant 18 : index
    %534 = memref.load %arg5[%c18_122] : memref<81xf32, #tpu.memory_space<smem>>
    %535 = vector.broadcast %534 : f32 to vector<8x384xf32>
    %536 = arith.mulf %535, %533 : vector<8x384xf32>
    %537 = arith.addf %509, %536 : vector<8x384xf32>
    %c19_123 = arith.constant 19 : index
    %538 = memref.load %arg5[%c19_123] : memref<81xf32, #tpu.memory_space<smem>>
    %539 = vector.broadcast %538 : f32 to vector<8x384xf32>
    %540 = arith.mulf %539, %533 : vector<8x384xf32>
    %541 = arith.addf %513, %540 : vector<8x384xf32>
    %c20_124 = arith.constant 20 : index
    %542 = memref.load %arg5[%c20_124] : memref<81xf32, #tpu.memory_space<smem>>
    %543 = vector.broadcast %542 : f32 to vector<8x384xf32>
    %544 = arith.mulf %543, %533 : vector<8x384xf32>
    %545 = arith.addf %517, %544 : vector<8x384xf32>
    %c1_125 = arith.constant 1 : index
    %c0_126 = arith.constant 0 : index
    %c2_127 = arith.constant 2 : index
    %546 = vector.load %arg8[%c1_125, %c0_126, %c2_127] : memref<3x8x434xf32, #tpu.memory_space<vmem>>, vector<1x8x384xf32>
    %547 = vector.shape_cast %546 : vector<1x8x384xf32> to vector<8x384xf32>
    %c21_128 = arith.constant 21 : index
    %548 = memref.load %arg5[%c21_128] : memref<81xf32, #tpu.memory_space<smem>>
    %549 = vector.broadcast %548 : f32 to vector<8x384xf32>
    %550 = arith.mulf %549, %547 : vector<8x384xf32>
    %551 = arith.addf %523, %550 : vector<8x384xf32>
    %c22_129 = arith.constant 22 : index
    %552 = memref.load %arg5[%c22_129] : memref<81xf32, #tpu.memory_space<smem>>
    %553 = vector.broadcast %552 : f32 to vector<8x384xf32>
    %554 = arith.mulf %553, %547 : vector<8x384xf32>
    %555 = arith.addf %527, %554 : vector<8x384xf32>
    %c23_130 = arith.constant 23 : index
    %556 = memref.load %arg5[%c23_130] : memref<81xf32, #tpu.memory_space<smem>>
    %557 = vector.broadcast %556 : f32 to vector<8x384xf32>
    %558 = arith.mulf %557, %547 : vector<8x384xf32>
    %559 = arith.addf %531, %558 : vector<8x384xf32>
    %c2_131 = arith.constant 2 : index
    %c0_132 = arith.constant 0 : index
    %c2_133 = arith.constant 2 : index
    %560 = vector.load %arg8[%c2_131, %c0_132, %c2_133] : memref<3x8x434xf32, #tpu.memory_space<vmem>>, vector<1x8x384xf32>
    %561 = vector.shape_cast %560 : vector<1x8x384xf32> to vector<8x384xf32>
    %c24_134 = arith.constant 24 : index
    %562 = memref.load %arg5[%c24_134] : memref<81xf32, #tpu.memory_space<smem>>
    %563 = vector.broadcast %562 : f32 to vector<8x384xf32>
    %564 = arith.mulf %563, %561 : vector<8x384xf32>
    %565 = arith.addf %537, %564 : vector<8x384xf32>
    %c25_135 = arith.constant 25 : index
    %566 = memref.load %arg5[%c25_135] : memref<81xf32, #tpu.memory_space<smem>>
    %567 = vector.broadcast %566 : f32 to vector<8x384xf32>
    %568 = arith.mulf %567, %561 : vector<8x384xf32>
    %569 = arith.addf %541, %568 : vector<8x384xf32>
    %c26_136 = arith.constant 26 : index
    %570 = memref.load %arg5[%c26_136] : memref<81xf32, #tpu.memory_space<smem>>
    %571 = vector.broadcast %570 : f32 to vector<8x384xf32>
    %572 = arith.mulf %571, %561 : vector<8x384xf32>
    %573 = arith.addf %545, %572 : vector<8x384xf32>
    %c0_137 = arith.constant 0 : index
    %c0_138 = arith.constant 0 : index
    %c24_139 = arith.constant 24 : index
    %574 = vector.load %arg8[%c0_137, %c0_138, %c24_139] : memref<3x8x434xf32, #tpu.memory_space<vmem>>, vector<1x8x384xf32>
    %575 = vector.shape_cast %574 : vector<1x8x384xf32> to vector<8x384xf32>
    %c27_140 = arith.constant 27 : index
    %576 = memref.load %arg5[%c27_140] : memref<81xf32, #tpu.memory_space<smem>>
    %577 = vector.broadcast %576 : f32 to vector<8x384xf32>
    %578 = arith.mulf %577, %575 : vector<8x384xf32>
    %579 = arith.addf %551, %578 : vector<8x384xf32>
    %c28_141 = arith.constant 28 : index
    %580 = memref.load %arg5[%c28_141] : memref<81xf32, #tpu.memory_space<smem>>
    %581 = vector.broadcast %580 : f32 to vector<8x384xf32>
    %582 = arith.mulf %581, %575 : vector<8x384xf32>
    %583 = arith.addf %555, %582 : vector<8x384xf32>
    %c29_142 = arith.constant 29 : index
    %584 = memref.load %arg5[%c29_142] : memref<81xf32, #tpu.memory_space<smem>>
    %585 = vector.broadcast %584 : f32 to vector<8x384xf32>
    %586 = arith.mulf %585, %575 : vector<8x384xf32>
    %587 = arith.addf %559, %586 : vector<8x384xf32>
    %c1_143 = arith.constant 1 : index
    %c0_144 = arith.constant 0 : index
    %c24_145 = arith.constant 24 : index
    %588 = vector.load %arg8[%c1_143, %c0_144, %c24_145] : memref<3x8x434xf32, #tpu.memory_space<vmem>>, vector<1x8x384xf32>
    %589 = vector.shape_cast %588 : vector<1x8x384xf32> to vector<8x384xf32>
    %c30_146 = arith.constant 30 : index
    %590 = memref.load %arg5[%c30_146] : memref<81xf32, #tpu.memory_space<smem>>
    %591 = vector.broadcast %590 : f32 to vector<8x384xf32>
    %592 = arith.mulf %591, %589 : vector<8x384xf32>
    %593 = arith.addf %565, %592 : vector<8x384xf32>
    %c31_147 = arith.constant 31 : index
    %594 = memref.load %arg5[%c31_147] : memref<81xf32, #tpu.memory_space<smem>>
    %595 = vector.broadcast %594 : f32 to vector<8x384xf32>
    %596 = arith.mulf %595, %589 : vector<8x384xf32>
    %597 = arith.addf %569, %596 : vector<8x384xf32>
    %c32_148 = arith.constant 32 : index
    %598 = memref.load %arg5[%c32_148] : memref<81xf32, #tpu.memory_space<smem>>
    %599 = vector.broadcast %598 : f32 to vector<8x384xf32>
    %600 = arith.mulf %599, %589 : vector<8x384xf32>
    %601 = arith.addf %573, %600 : vector<8x384xf32>
    %c2_149 = arith.constant 2 : index
    %c0_150 = arith.constant 0 : index
    %c24_151 = arith.constant 24 : index
    %602 = vector.load %arg8[%c2_149, %c0_150, %c24_151] : memref<3x8x434xf32, #tpu.memory_space<vmem>>, vector<1x8x384xf32>
    %603 = vector.shape_cast %602 : vector<1x8x384xf32> to vector<8x384xf32>
    %c33_152 = arith.constant 33 : index
    %604 = memref.load %arg5[%c33_152] : memref<81xf32, #tpu.memory_space<smem>>
    %605 = vector.broadcast %604 : f32 to vector<8x384xf32>
    %606 = arith.mulf %605, %603 : vector<8x384xf32>
    %607 = arith.addf %579, %606 : vector<8x384xf32>
    %c34_153 = arith.constant 34 : index
    %608 = memref.load %arg5[%c34_153] : memref<81xf32, #tpu.memory_space<smem>>
    %609 = vector.broadcast %608 : f32 to vector<8x384xf32>
    %610 = arith.mulf %609, %603 : vector<8x384xf32>
    %611 = arith.addf %583, %610 : vector<8x384xf32>
    %c35_154 = arith.constant 35 : index
    %612 = memref.load %arg5[%c35_154] : memref<81xf32, #tpu.memory_space<smem>>
    %613 = vector.broadcast %612 : f32 to vector<8x384xf32>
    %614 = arith.mulf %613, %603 : vector<8x384xf32>
    %615 = arith.addf %587, %614 : vector<8x384xf32>
    %c0_155 = arith.constant 0 : index
    %c0_156 = arith.constant 0 : index
    %c25_157 = arith.constant 25 : index
    %616 = vector.load %arg8[%c0_155, %c0_156, %c25_157] : memref<3x8x434xf32, #tpu.memory_space<vmem>>, vector<1x8x384xf32>
    %617 = vector.shape_cast %616 : vector<1x8x384xf32> to vector<8x384xf32>
    %c36_158 = arith.constant 36 : index
    %618 = memref.load %arg5[%c36_158] : memref<81xf32, #tpu.memory_space<smem>>
    %619 = vector.broadcast %618 : f32 to vector<8x384xf32>
    %620 = arith.mulf %619, %617 : vector<8x384xf32>
    %621 = arith.addf %593, %620 : vector<8x384xf32>
    %c37_159 = arith.constant 37 : index
    %622 = memref.load %arg5[%c37_159] : memref<81xf32, #tpu.memory_space<smem>>
    %623 = vector.broadcast %622 : f32 to vector<8x384xf32>
    %624 = arith.mulf %623, %617 : vector<8x384xf32>
    %625 = arith.addf %597, %624 : vector<8x384xf32>
    %c38_160 = arith.constant 38 : index
    %626 = memref.load %arg5[%c38_160] : memref<81xf32, #tpu.memory_space<smem>>
    %627 = vector.broadcast %626 : f32 to vector<8x384xf32>
    %628 = arith.mulf %627, %617 : vector<8x384xf32>
    %629 = arith.addf %601, %628 : vector<8x384xf32>
    %c1_161 = arith.constant 1 : index
    %c0_162 = arith.constant 0 : index
    %c25_163 = arith.constant 25 : index
    %630 = vector.load %arg8[%c1_161, %c0_162, %c25_163] : memref<3x8x434xf32, #tpu.memory_space<vmem>>, vector<1x8x384xf32>
    %631 = vector.shape_cast %630 : vector<1x8x384xf32> to vector<8x384xf32>
    %c39_164 = arith.constant 39 : index
    %632 = memref.load %arg5[%c39_164] : memref<81xf32, #tpu.memory_space<smem>>
    %633 = vector.broadcast %632 : f32 to vector<8x384xf32>
    %634 = arith.mulf %633, %631 : vector<8x384xf32>
    %635 = arith.addf %607, %634 : vector<8x384xf32>
    %c40_165 = arith.constant 40 : index
    %636 = memref.load %arg5[%c40_165] : memref<81xf32, #tpu.memory_space<smem>>
    %637 = vector.broadcast %636 : f32 to vector<8x384xf32>
    %638 = arith.mulf %637, %631 : vector<8x384xf32>
    %639 = arith.addf %611, %638 : vector<8x384xf32>
    %c41_166 = arith.constant 41 : index
    %640 = memref.load %arg5[%c41_166] : memref<81xf32, #tpu.memory_space<smem>>
    %641 = vector.broadcast %640 : f32 to vector<8x384xf32>
    %642 = arith.mulf %641, %631 : vector<8x384xf32>
    %643 = arith.addf %615, %642 : vector<8x384xf32>
    %c2_167 = arith.constant 2 : index
    %c0_168 = arith.constant 0 : index
    %c25_169 = arith.constant 25 : index
    %644 = vector.load %arg8[%c2_167, %c0_168, %c25_169] : memref<3x8x434xf32, #tpu.memory_space<vmem>>, vector<1x8x384xf32>
    %645 = vector.shape_cast %644 : vector<1x8x384xf32> to vector<8x384xf32>
    %c42_170 = arith.constant 42 : index
    %646 = memref.load %arg5[%c42_170] : memref<81xf32, #tpu.memory_space<smem>>
    %647 = vector.broadcast %646 : f32 to vector<8x384xf32>
    %648 = arith.mulf %647, %645 : vector<8x384xf32>
    %649 = arith.addf %621, %648 : vector<8x384xf32>
    %c43_171 = arith.constant 43 : index
    %650 = memref.load %arg5[%c43_171] : memref<81xf32, #tpu.memory_space<smem>>
    %651 = vector.broadcast %650 : f32 to vector<8x384xf32>
    %652 = arith.mulf %651, %645 : vector<8x384xf32>
    %653 = arith.addf %625, %652 : vector<8x384xf32>
    %c44_172 = arith.constant 44 : index
    %654 = memref.load %arg5[%c44_172] : memref<81xf32, #tpu.memory_space<smem>>
    %655 = vector.broadcast %654 : f32 to vector<8x384xf32>
    %656 = arith.mulf %655, %645 : vector<8x384xf32>
    %657 = arith.addf %629, %656 : vector<8x384xf32>
    %c0_173 = arith.constant 0 : index
    %c0_174 = arith.constant 0 : index
    %c26_175 = arith.constant 26 : index
    %658 = vector.load %arg8[%c0_173, %c0_174, %c26_175] : memref<3x8x434xf32, #tpu.memory_space<vmem>>, vector<1x8x384xf32>
    %659 = vector.shape_cast %658 : vector<1x8x384xf32> to vector<8x384xf32>
    %c45_176 = arith.constant 45 : index
    %660 = memref.load %arg5[%c45_176] : memref<81xf32, #tpu.memory_space<smem>>
    %661 = vector.broadcast %660 : f32 to vector<8x384xf32>
    %662 = arith.mulf %661, %659 : vector<8x384xf32>
    %663 = arith.addf %635, %662 : vector<8x384xf32>
    %c46_177 = arith.constant 46 : index
    %664 = memref.load %arg5[%c46_177] : memref<81xf32, #tpu.memory_space<smem>>
    %665 = vector.broadcast %664 : f32 to vector<8x384xf32>
    %666 = arith.mulf %665, %659 : vector<8x384xf32>
    %667 = arith.addf %639, %666 : vector<8x384xf32>
    %c47_178 = arith.constant 47 : index
    %668 = memref.load %arg5[%c47_178] : memref<81xf32, #tpu.memory_space<smem>>
    %669 = vector.broadcast %668 : f32 to vector<8x384xf32>
    %670 = arith.mulf %669, %659 : vector<8x384xf32>
    %671 = arith.addf %643, %670 : vector<8x384xf32>
    %c1_179 = arith.constant 1 : index
    %c0_180 = arith.constant 0 : index
    %c26_181 = arith.constant 26 : index
    %672 = vector.load %arg8[%c1_179, %c0_180, %c26_181] : memref<3x8x434xf32, #tpu.memory_space<vmem>>, vector<1x8x384xf32>
    %673 = vector.shape_cast %672 : vector<1x8x384xf32> to vector<8x384xf32>
    %c48_182 = arith.constant 48 : index
    %674 = memref.load %arg5[%c48_182] : memref<81xf32, #tpu.memory_space<smem>>
    %675 = vector.broadcast %674 : f32 to vector<8x384xf32>
    %676 = arith.mulf %675, %673 : vector<8x384xf32>
    %677 = arith.addf %649, %676 : vector<8x384xf32>
    %c49_183 = arith.constant 49 : index
    %678 = memref.load %arg5[%c49_183] : memref<81xf32, #tpu.memory_space<smem>>
    %679 = vector.broadcast %678 : f32 to vector<8x384xf32>
    %680 = arith.mulf %679, %673 : vector<8x384xf32>
    %681 = arith.addf %653, %680 : vector<8x384xf32>
    %c50_184 = arith.constant 50 : index
    %682 = memref.load %arg5[%c50_184] : memref<81xf32, #tpu.memory_space<smem>>
    %683 = vector.broadcast %682 : f32 to vector<8x384xf32>
    %684 = arith.mulf %683, %673 : vector<8x384xf32>
    %685 = arith.addf %657, %684 : vector<8x384xf32>
    %c2_185 = arith.constant 2 : index
    %c0_186 = arith.constant 0 : index
    %c26_187 = arith.constant 26 : index
    %686 = vector.load %arg8[%c2_185, %c0_186, %c26_187] : memref<3x8x434xf32, #tpu.memory_space<vmem>>, vector<1x8x384xf32>
    %687 = vector.shape_cast %686 : vector<1x8x384xf32> to vector<8x384xf32>
    %c51_188 = arith.constant 51 : index
    %688 = memref.load %arg5[%c51_188] : memref<81xf32, #tpu.memory_space<smem>>
    %689 = vector.broadcast %688 : f32 to vector<8x384xf32>
    %690 = arith.mulf %689, %687 : vector<8x384xf32>
    %691 = arith.addf %663, %690 : vector<8x384xf32>
    %c52_189 = arith.constant 52 : index
    %692 = memref.load %arg5[%c52_189] : memref<81xf32, #tpu.memory_space<smem>>
    %693 = vector.broadcast %692 : f32 to vector<8x384xf32>
    %694 = arith.mulf %693, %687 : vector<8x384xf32>
    %695 = arith.addf %667, %694 : vector<8x384xf32>
    %c53_190 = arith.constant 53 : index
    %696 = memref.load %arg5[%c53_190] : memref<81xf32, #tpu.memory_space<smem>>
    %697 = vector.broadcast %696 : f32 to vector<8x384xf32>
    %698 = arith.mulf %697, %687 : vector<8x384xf32>
    %699 = arith.addf %671, %698 : vector<8x384xf32>
    %c0_191 = arith.constant 0 : index
    %c0_192 = arith.constant 0 : index
    %c48_193 = arith.constant 48 : index
    %700 = vector.load %arg8[%c0_191, %c0_192, %c48_193] : memref<3x8x434xf32, #tpu.memory_space<vmem>>, vector<1x8x384xf32>
    %701 = vector.shape_cast %700 : vector<1x8x384xf32> to vector<8x384xf32>
    %c54_194 = arith.constant 54 : index
    %702 = memref.load %arg5[%c54_194] : memref<81xf32, #tpu.memory_space<smem>>
    %703 = vector.broadcast %702 : f32 to vector<8x384xf32>
    %704 = arith.mulf %703, %701 : vector<8x384xf32>
    %705 = arith.addf %677, %704 : vector<8x384xf32>
    %c55_195 = arith.constant 55 : index
    %706 = memref.load %arg5[%c55_195] : memref<81xf32, #tpu.memory_space<smem>>
    %707 = vector.broadcast %706 : f32 to vector<8x384xf32>
    %708 = arith.mulf %707, %701 : vector<8x384xf32>
    %709 = arith.addf %681, %708 : vector<8x384xf32>
    %c56_196 = arith.constant 56 : index
    %710 = memref.load %arg5[%c56_196] : memref<81xf32, #tpu.memory_space<smem>>
    %711 = vector.broadcast %710 : f32 to vector<8x384xf32>
    %712 = arith.mulf %711, %701 : vector<8x384xf32>
    %713 = arith.addf %685, %712 : vector<8x384xf32>
    %c1_197 = arith.constant 1 : index
    %c0_198 = arith.constant 0 : index
    %c48_199 = arith.constant 48 : index
    %714 = vector.load %arg8[%c1_197, %c0_198, %c48_199] : memref<3x8x434xf32, #tpu.memory_space<vmem>>, vector<1x8x384xf32>
    %715 = vector.shape_cast %714 : vector<1x8x384xf32> to vector<8x384xf32>
    %c57_200 = arith.constant 57 : index
    %716 = memref.load %arg5[%c57_200] : memref<81xf32, #tpu.memory_space<smem>>
    %717 = vector.broadcast %716 : f32 to vector<8x384xf32>
    %718 = arith.mulf %717, %715 : vector<8x384xf32>
    %719 = arith.addf %691, %718 : vector<8x384xf32>
    %c58_201 = arith.constant 58 : index
    %720 = memref.load %arg5[%c58_201] : memref<81xf32, #tpu.memory_space<smem>>
    %721 = vector.broadcast %720 : f32 to vector<8x384xf32>
    %722 = arith.mulf %721, %715 : vector<8x384xf32>
    %723 = arith.addf %695, %722 : vector<8x384xf32>
    %c59_202 = arith.constant 59 : index
    %724 = memref.load %arg5[%c59_202] : memref<81xf32, #tpu.memory_space<smem>>
    %725 = vector.broadcast %724 : f32 to vector<8x384xf32>
    %726 = arith.mulf %725, %715 : vector<8x384xf32>
    %727 = arith.addf %699, %726 : vector<8x384xf32>
    %c2_203 = arith.constant 2 : index
    %c0_204 = arith.constant 0 : index
    %c48_205 = arith.constant 48 : index
    %728 = vector.load %arg8[%c2_203, %c0_204, %c48_205] : memref<3x8x434xf32, #tpu.memory_space<vmem>>, vector<1x8x384xf32>
    %729 = vector.shape_cast %728 : vector<1x8x384xf32> to vector<8x384xf32>
    %c60_206 = arith.constant 60 : index
    %730 = memref.load %arg5[%c60_206] : memref<81xf32, #tpu.memory_space<smem>>
    %731 = vector.broadcast %730 : f32 to vector<8x384xf32>
    %732 = arith.mulf %731, %729 : vector<8x384xf32>
    %733 = arith.addf %705, %732 : vector<8x384xf32>
    %c61_207 = arith.constant 61 : index
    %734 = memref.load %arg5[%c61_207] : memref<81xf32, #tpu.memory_space<smem>>
    %735 = vector.broadcast %734 : f32 to vector<8x384xf32>
    %736 = arith.mulf %735, %729 : vector<8x384xf32>
    %737 = arith.addf %709, %736 : vector<8x384xf32>
    %c62_208 = arith.constant 62 : index
    %738 = memref.load %arg5[%c62_208] : memref<81xf32, #tpu.memory_space<smem>>
    %739 = vector.broadcast %738 : f32 to vector<8x384xf32>
    %740 = arith.mulf %739, %729 : vector<8x384xf32>
    %741 = arith.addf %713, %740 : vector<8x384xf32>
    %c0_209 = arith.constant 0 : index
    %c0_210 = arith.constant 0 : index
    %c49_211 = arith.constant 49 : index
    %742 = vector.load %arg8[%c0_209, %c0_210, %c49_211] : memref<3x8x434xf32, #tpu.memory_space<vmem>>, vector<1x8x384xf32>
    %743 = vector.shape_cast %742 : vector<1x8x384xf32> to vector<8x384xf32>
    %c63_212 = arith.constant 63 : index
    %744 = memref.load %arg5[%c63_212] : memref<81xf32, #tpu.memory_space<smem>>
    %745 = vector.broadcast %744 : f32 to vector<8x384xf32>
    %746 = arith.mulf %745, %743 : vector<8x384xf32>
    %747 = arith.addf %719, %746 : vector<8x384xf32>
    %c64_213 = arith.constant 64 : index
    %748 = memref.load %arg5[%c64_213] : memref<81xf32, #tpu.memory_space<smem>>
    %749 = vector.broadcast %748 : f32 to vector<8x384xf32>
    %750 = arith.mulf %749, %743 : vector<8x384xf32>
    %751 = arith.addf %723, %750 : vector<8x384xf32>
    %c65_214 = arith.constant 65 : index
    %752 = memref.load %arg5[%c65_214] : memref<81xf32, #tpu.memory_space<smem>>
    %753 = vector.broadcast %752 : f32 to vector<8x384xf32>
    %754 = arith.mulf %753, %743 : vector<8x384xf32>
    %755 = arith.addf %727, %754 : vector<8x384xf32>
    %c1_215 = arith.constant 1 : index
    %c0_216 = arith.constant 0 : index
    %c49_217 = arith.constant 49 : index
    %756 = vector.load %arg8[%c1_215, %c0_216, %c49_217] : memref<3x8x434xf32, #tpu.memory_space<vmem>>, vector<1x8x384xf32>
    %757 = vector.shape_cast %756 : vector<1x8x384xf32> to vector<8x384xf32>
    %c66_218 = arith.constant 66 : index
    %758 = memref.load %arg5[%c66_218] : memref<81xf32, #tpu.memory_space<smem>>
    %759 = vector.broadcast %758 : f32 to vector<8x384xf32>
    %760 = arith.mulf %759, %757 : vector<8x384xf32>
    %761 = arith.addf %733, %760 : vector<8x384xf32>
    %c67_219 = arith.constant 67 : index
    %762 = memref.load %arg5[%c67_219] : memref<81xf32, #tpu.memory_space<smem>>
    %763 = vector.broadcast %762 : f32 to vector<8x384xf32>
    %764 = arith.mulf %763, %757 : vector<8x384xf32>
    %765 = arith.addf %737, %764 : vector<8x384xf32>
    %c68_220 = arith.constant 68 : index
    %766 = memref.load %arg5[%c68_220] : memref<81xf32, #tpu.memory_space<smem>>
    %767 = vector.broadcast %766 : f32 to vector<8x384xf32>
    %768 = arith.mulf %767, %757 : vector<8x384xf32>
    %769 = arith.addf %741, %768 : vector<8x384xf32>
    %c2_221 = arith.constant 2 : index
    %c0_222 = arith.constant 0 : index
    %c49_223 = arith.constant 49 : index
    %770 = vector.load %arg8[%c2_221, %c0_222, %c49_223] : memref<3x8x434xf32, #tpu.memory_space<vmem>>, vector<1x8x384xf32>
    %771 = vector.shape_cast %770 : vector<1x8x384xf32> to vector<8x384xf32>
    %c69_224 = arith.constant 69 : index
    %772 = memref.load %arg5[%c69_224] : memref<81xf32, #tpu.memory_space<smem>>
    %773 = vector.broadcast %772 : f32 to vector<8x384xf32>
    %774 = arith.mulf %773, %771 : vector<8x384xf32>
    %775 = arith.addf %747, %774 : vector<8x384xf32>
    %c70_225 = arith.constant 70 : index
    %776 = memref.load %arg5[%c70_225] : memref<81xf32, #tpu.memory_space<smem>>
    %777 = vector.broadcast %776 : f32 to vector<8x384xf32>
    %778 = arith.mulf %777, %771 : vector<8x384xf32>
    %779 = arith.addf %751, %778 : vector<8x384xf32>
    %c71_226 = arith.constant 71 : index
    %780 = memref.load %arg5[%c71_226] : memref<81xf32, #tpu.memory_space<smem>>
    %781 = vector.broadcast %780 : f32 to vector<8x384xf32>
    %782 = arith.mulf %781, %771 : vector<8x384xf32>
    %783 = arith.addf %755, %782 : vector<8x384xf32>
    %c0_227 = arith.constant 0 : index
    %c0_228 = arith.constant 0 : index
    %c50_229 = arith.constant 50 : index
    %784 = vector.load %arg8[%c0_227, %c0_228, %c50_229] : memref<3x8x434xf32, #tpu.memory_space<vmem>>, vector<1x8x384xf32>
    %785 = vector.shape_cast %784 : vector<1x8x384xf32> to vector<8x384xf32>
    %c72_230 = arith.constant 72 : index
    %786 = memref.load %arg5[%c72_230] : memref<81xf32, #tpu.memory_space<smem>>
    %787 = vector.broadcast %786 : f32 to vector<8x384xf32>
    %788 = arith.mulf %787, %785 : vector<8x384xf32>
    %789 = arith.addf %761, %788 : vector<8x384xf32>
    %c73_231 = arith.constant 73 : index
    %790 = memref.load %arg5[%c73_231] : memref<81xf32, #tpu.memory_space<smem>>
    %791 = vector.broadcast %790 : f32 to vector<8x384xf32>
    %792 = arith.mulf %791, %785 : vector<8x384xf32>
    %793 = arith.addf %765, %792 : vector<8x384xf32>
    %c74_232 = arith.constant 74 : index
    %794 = memref.load %arg5[%c74_232] : memref<81xf32, #tpu.memory_space<smem>>
    %795 = vector.broadcast %794 : f32 to vector<8x384xf32>
    %796 = arith.mulf %795, %785 : vector<8x384xf32>
    %797 = arith.addf %769, %796 : vector<8x384xf32>
    %c1_233 = arith.constant 1 : index
    %c0_234 = arith.constant 0 : index
    %c50_235 = arith.constant 50 : index
    %798 = vector.load %arg8[%c1_233, %c0_234, %c50_235] : memref<3x8x434xf32, #tpu.memory_space<vmem>>, vector<1x8x384xf32>
    %799 = vector.shape_cast %798 : vector<1x8x384xf32> to vector<8x384xf32>
    %c75_236 = arith.constant 75 : index
    %800 = memref.load %arg5[%c75_236] : memref<81xf32, #tpu.memory_space<smem>>
    %801 = vector.broadcast %800 : f32 to vector<8x384xf32>
    %802 = arith.mulf %801, %799 : vector<8x384xf32>
    %803 = arith.addf %775, %802 : vector<8x384xf32>
    %c76_237 = arith.constant 76 : index
    %804 = memref.load %arg5[%c76_237] : memref<81xf32, #tpu.memory_space<smem>>
    %805 = vector.broadcast %804 : f32 to vector<8x384xf32>
    %806 = arith.mulf %805, %799 : vector<8x384xf32>
    %807 = arith.addf %779, %806 : vector<8x384xf32>
    %c77_238 = arith.constant 77 : index
    %808 = memref.load %arg5[%c77_238] : memref<81xf32, #tpu.memory_space<smem>>
    %809 = vector.broadcast %808 : f32 to vector<8x384xf32>
    %810 = arith.mulf %809, %799 : vector<8x384xf32>
    %811 = arith.addf %783, %810 : vector<8x384xf32>
    %c2_239 = arith.constant 2 : index
    %c0_240 = arith.constant 0 : index
    %c50_241 = arith.constant 50 : index
    %812 = vector.load %arg8[%c2_239, %c0_240, %c50_241] : memref<3x8x434xf32, #tpu.memory_space<vmem>>, vector<1x8x384xf32>
    %813 = vector.shape_cast %812 : vector<1x8x384xf32> to vector<8x384xf32>
    %c78_242 = arith.constant 78 : index
    %814 = memref.load %arg5[%c78_242] : memref<81xf32, #tpu.memory_space<smem>>
    %815 = vector.broadcast %814 : f32 to vector<8x384xf32>
    %816 = arith.mulf %815, %813 : vector<8x384xf32>
    %817 = arith.addf %789, %816 : vector<8x384xf32>
    %c79_243 = arith.constant 79 : index
    %818 = memref.load %arg5[%c79_243] : memref<81xf32, #tpu.memory_space<smem>>
    %819 = vector.broadcast %818 : f32 to vector<8x384xf32>
    %820 = arith.mulf %819, %813 : vector<8x384xf32>
    %821 = arith.addf %793, %820 : vector<8x384xf32>
    %c80_244 = arith.constant 80 : index
    %822 = memref.load %arg5[%c80_244] : memref<81xf32, #tpu.memory_space<smem>>
    %823 = vector.broadcast %822 : f32 to vector<8x384xf32>
    %824 = arith.mulf %823, %813 : vector<8x384xf32>
    %825 = arith.addf %797, %824 : vector<8x384xf32>
    %826 = arith.addf %817, %803 : vector<8x384xf32>
    %827 = arith.addf %821, %807 : vector<8x384xf32>
    %828 = arith.addf %825, %811 : vector<8x384xf32>
    %c0_245 = arith.constant 0 : index
    %829 = arith.index_cast %3 : i32 to index
    %c25_246 = arith.constant 25 : index
    %830 = vector.load %arg1[%c0_245, %829, %c25_246] : memref<3x8x434xf32, #tpu.memory_space<vmem>>, vector<1x8x384xf32>
    %831 = vector.shape_cast %830 : vector<1x8x384xf32> to vector<8x384xf32>
    %cst_247 = arith.constant 0.000000e+00 : f32
    %832 = vector.broadcast %cst_247 : f32 to vector<8x384xf32>
    %833 = arith.maximumf %826, %832 : vector<8x384xf32>
    %834 = arith.addf %833, %831 : vector<8x384xf32>
    %c0_248 = arith.constant 0 : index
    %835 = arith.index_cast %3 : i32 to index
    %c0_249 = arith.constant 0 : index
    %836 = vector.load %arg7[%c0_248, %835, %c0_249] : memref<3x8x384xf32, #tpu.memory_space<vmem>>, vector<1x8x384xf32>
    %837 = vector.shape_cast %836 : vector<1x8x384xf32> to vector<8x384xf32>
    %838 = vector.shape_cast %834 : vector<8x384xf32> to vector<1x8x384xf32>
    tpu.vector_store %arg7[%c0_248, %835, %c0_249], %838 {strides = array<i32>} : memref<3x8x384xf32, #tpu.memory_space<vmem>>, vector<1x8x384xf32>,
    %c1_250 = arith.constant 1 : index
    %839 = arith.index_cast %3 : i32 to index
    %c25_251 = arith.constant 25 : index
    %840 = vector.load %arg1[%c1_250, %839, %c25_251] : memref<3x8x434xf32, #tpu.memory_space<vmem>>, vector<1x8x384xf32>
    %841 = vector.shape_cast %840 : vector<1x8x384xf32> to vector<8x384xf32>
    %cst_252 = arith.constant 0.000000e+00 : f32
    %842 = vector.broadcast %cst_252 : f32 to vector<8x384xf32>
    %843 = arith.maximumf %827, %842 : vector<8x384xf32>
    %844 = arith.addf %843, %841 : vector<8x384xf32>
    %c1_253 = arith.constant 1 : index
    %845 = arith.index_cast %3 : i32 to index
    %c0_254 = arith.constant 0 : index
    %846 = vector.load %arg7[%c1_253, %845, %c0_254] : memref<3x8x384xf32, #tpu.memory_space<vmem>>, vector<1x8x384xf32>
    %847 = vector.shape_cast %846 : vector<1x8x384xf32> to vector<8x384xf32>
    %848 = vector.shape_cast %844 : vector<8x384xf32> to vector<1x8x384xf32>
    tpu.vector_store %arg7[%c1_253, %845, %c0_254], %848 {strides = array<i32>} : memref<3x8x384xf32, #tpu.memory_space<vmem>>, vector<1x8x384xf32>,
    %c2_255 = arith.constant 2 : index
    %849 = arith.index_cast %3 : i32 to index
    %c25_256 = arith.constant 25 : index
    %850 = vector.load %arg1[%c2_255, %849, %c25_256] : memref<3x8x434xf32, #tpu.memory_space<vmem>>, vector<1x8x384xf32>
    %851 = vector.shape_cast %850 : vector<1x8x384xf32> to vector<8x384xf32>
    %cst_257 = arith.constant 0.000000e+00 : f32
    %852 = vector.broadcast %cst_257 : f32 to vector<8x384xf32>
    %853 = arith.maximumf %828, %852 : vector<8x384xf32>
    %854 = arith.addf %853, %851 : vector<8x384xf32>
    %c2_258 = arith.constant 2 : index
    %855 = arith.index_cast %3 : i32 to index
    %c0_259 = arith.constant 0 : index
    %856 = vector.load %arg7[%c2_258, %855, %c0_259] : memref<3x8x384xf32, #tpu.memory_space<vmem>>, vector<1x8x384xf32>
    %857 = vector.shape_cast %856 : vector<1x8x384xf32> to vector<8x384xf32>
    %858 = vector.shape_cast %854 : vector<8x384xf32> to vector<1x8x384xf32>
    tpu.vector_store %arg7[%c2_258, %855, %c0_259], %858 {strides = array<i32>} : memref<3x8x384xf32, #tpu.memory_space<vmem>>, vector<1x8x384xf32>,
    return
  }
  func.func @transform_0(%arg0: i32) -> (i32, i32, i32) {
    %c0_i32 = arith.constant 0 : i32
    %c0_i32_0 = arith.constant 0 : i32
    %c0_i32_1 = arith.constant 0 : i32
    return %c0_i32, %arg0, %c0_i32_0 : i32, i32, i32
  }
  func.func @transform_1(%arg0: i32) -> (i32, i32) {
    %c0_i32 = arith.constant 0 : i32
    %c0_i32_0 = arith.constant 0 : i32
    %c0_i32_1 = arith.constant 0 : i32
    return %c0_i32, %c0_i32_0 : i32, i32
  }
  func.func @transform_2(%arg0: i32) -> i32 {
    %c0_i32 = arith.constant 0 : i32
    %c0_i32_0 = arith.constant 0 : i32
    return %c0_i32 : i32
  }
  func.func @transform_3(%arg0: i32) -> i32 {
    %c0_i32 = arith.constant 0 : i32
    %c0_i32_0 = arith.constant 0 : i32
    return %c0_i32 : i32
  }
  func.func @transform_4(%arg0: i32) -> i32 {
    %c0_i32 = arith.constant 0 : i32
    %c0_i32_0 = arith.constant 0 : i32
    return %c0_i32 : i32
  }
  func.func @transform_5(%arg0: i32) -> i32 {
    %c0_i32 = arith.constant 0 : i32
    %c0_i32_0 = arith.constant 0 : i32
    return %c0_i32 : i32
  }
  func.func @transform_6(%arg0: i32) -> (i32, i32, i32) {
    %c0_i32 = arith.constant 0 : i32
    %c0_i32_0 = arith.constant 0 : i32
    %c0_i32_1 = arith.constant 0 : i32
    return %c0_i32, %arg0, %c0_i32_0 : i32, i32, i32
  }
}

</mosaic_0001>

<bundles_post_ra>
// kernel: tpu_custom_call.1
= control target key start
LH: loop header
LB: loop body
LE: loop exit
PB: predicated region body
PF: predicated region fallthrough
CT: control target
= control target key end

     0   :  { %11 = vsyncpa [#allocation4], 0  ;;  %s8862_s0 = inlined_call_operand.hbm [shape: f32[3,8,434], index: 0, kind: input, shape index: {}]   ;;  %s8863_s1 = inlined_call_operand.hbm [shape: f32[8,384], index: 1, kind: input, shape index: {}]   ;;  %s8864_s2 = inlined_call_operand.vmem [shape: f32[81], index: 2, kind: input, shape index: {}]   ;;  %s8865_s3 = inlined_call_operand.vmem [shape: f32[3], index: 3, kind: input, shape index: {}]   ;;  %s8866_s4 = inlined_call_operand.vmem [shape: f32[81], index: 4, kind: input, shape index: {}]   ;;  %s8867_s5 = inlined_call_operand.vmem [shape: f32[3], index: 5, kind: input, shape index: {}]   ;;  %s8868_s6 = inlined_call_operand.hbm [shape: f32[3,8,384], index: 6, kind: output, shape index: {}]  }
   0x1   :  { %12 = vsyncpa [#allocation8], 0 }
   0x2   :  { %13 = vsyncpa [#allocation6], 0 }
   0x3   :  { %14 = vsyncpa [#allocation11], 0 }
   0x4   :  { %15 = vsyncpa [#allocation14], 0  ;;  %s55_s23 = sshll.u32 %s8865_s3, 4  ;;  %s56_s23 = int_to_ptr.vmem [resolvable:$true] %s55_s23 }
   0x5   :  { %16 = vsyncpa [#allocation5], 0  ;;  %s4650_s24 = scalar_lea.vmem %s56_s23, 16  ;;  %p4655_p1 = scmp.lt.s32.totalorder %s56_s23, %s56_s23 }
   0x6   :  { %p4651_p0 = scmp.ne.s32.totalorder %s56_s23, %s4650_s24  ;;  %p4656_p2 = scmp.lt.s32.totalorder %s4650_s24, %s4650_s24 }
   0x8   :  { %p4657_p3 = por %p4656_p2, %p4655_p1 }
   0xa   :  { %p4658_p4 = pnand %p4657_p3, %p4651_p0 }
   0xc   :  { %4661 = shalt.err (!%p4658_p4)
}
   0xd   :  { %s4776_s25 = smov [#allocation10]   ;;  %s4777_s26 = smov [#allocation3]  }
   0xe   :  { %58 = dma.vmem_to_smem %s56_s23, 16, %s4776_s25, [#allocation11]  }
   0xf   :  { %s22_s27 = sshll.u32 %s4777_s26, 4  ;;  %s4662_s30 = scalar_lea.hbm %s8862_s0, 1536  ;;  %s23_s27 = int_to_ptr.vmem [resolvable:$true] %s22_s27 }
  0x10   :  { %p4663_p5 = scmp.ne.s32.totalorder %s8862_s0, %s4662_s30  ;;  %p4666_p6 = scmp.lt.u32.totalorder %s4662_s30, %s8862_s0 }
  0x12   :  { %p4668_p7 = pnand %p4666_p6, %p4663_p5 }
  0x14   :  { %4671 = shalt.err (!%p4668_p7)
}
  0x15   :  { %s4672_s10 = scalar_lea.vmem %s23_s27, 1536  ;;  %p4677_p9 = scmp.lt.s32.totalorder %s23_s27, %s23_s27 }
  0x16   :  { %p4673_p8 = scmp.ne.s32.totalorder %s23_s27, %s4672_s10  ;;  %p4678_p10 = scmp.lt.s32.totalorder %s4672_s10, %s4672_s10 }
  0x18   :  { %p4679_p11 = por %p4678_p10, %p4677_p9 }
  0x1a   :  { %p4680_p12 = pnand %p4679_p11, %p4673_p8 }
  0x1c   :  { %4683 = shalt.err (!%p4680_p12)
}
  0x1d   :  { %s4778_s11 = smov 512   ;;  %s4779_s12 = smov 32  }
  0x1e   :  { %28 = dma.hbm_to_vmem [thread:$0]  %s8862_s0, 1536, %s23_s27, [#allocation4], %s4778_s11, %s4778_s11, %s4779_s12  }
  0x1f   :  { %s45_s17 = sshll.u32 %s8864_s2, 4  ;;  %s4780_s18 = smov [#allocation7]   ;;  %s46_s17 = int_to_ptr.vmem [resolvable:$true] %s45_s17 }
  0x20   :  { %s35_s19 = sshll.u32 %s4780_s18, 4  ;;  %s4684_s22 = scalar_lea.hbm %s8863_s1, 384  ;;  %s36_s19 = int_to_ptr.vmem [resolvable:$true] %s35_s19 }
  0x21   :  { %p4685_p13 = scmp.ne.s32.totalorder %s8863_s1, %s4684_s22  ;;  %p4688_p0 = scmp.lt.u32.totalorder %s4684_s22, %s8863_s1 }
  0x23   :  { %p4690_p1 = pnand %p4688_p0, %p4685_p13 }
  0x25   :  { %4693 = shalt.err (!%p4690_p1)
}
  0x26   :  { %s4694_s0 = scalar_lea.vmem %s36_s19, 384  ;;  %p4699_p3 = scmp.lt.s32.totalorder %s36_s19, %s36_s19 }
  0x27   :  { %p4695_p2 = scmp.ne.s32.totalorder %s36_s19, %s4694_s0  ;;  %p4700_p4 = scmp.lt.s32.totalorder %s4694_s0, %s4694_s0 }
  0x29   :  { %p4701_p5 = por %p4700_p4, %p4699_p3 }
  0x2b   :  { %p4702_p6 = pnand %p4701_p5, %p4695_p2 }
  0x2d   :  { %4705 = shalt.err (!%p4702_p6)
}
  0x2e   :  { %38 = dma.hbm_to_vmem [thread:$0]  %s8863_s1, 384, %s36_s19, [#allocation8]  }
  0x2f   :  { %s4706_s28 = scalar_lea.vmem %s46_s17, 16  ;;  %p4711_p8 = scmp.lt.s32.totalorder %s46_s17, %s46_s17 }
  0x30   :  { %p4707_p7 = scmp.ne.s32.totalorder %s46_s17, %s4706_s28  ;;  %p4712_p9 = scmp.lt.s32.totalorder %s4706_s28, %s4706_s28 }
  0x32   :  { %p4713_p10 = por %p4712_p9, %p4711_p8 }
  0x34   :  { %p4714_p11 = pnand %p4713_p10, %p4707_p7 }
  0x36   :  { %4717 = shalt.err (!%p4714_p11)
}
  0x37   :  { %s4781_s29 = smov [#allocation9]   ;;  %s65_s3 = sshll.u32 %s8866_s4, 4  ;;  %s66_s3 = int_to_ptr.vmem [resolvable:$true] %s65_s3 }
  0x38   :  { %48 = dma.vmem_to_smem %s46_s17, 16, %s4781_s29, [#allocation6]  }
  0x39   :  { %s75_s10 = sshll.u32 %s8867_s5, 4  ;;  %s4718_s11 = scalar_lea.vmem %s66_s3, 16  ;;  %s76_s10 = int_to_ptr.vmem [resolvable:$true] %s75_s10 }
  0x3a   :  { %p4719_p12 = scmp.ne.s32.totalorder %s66_s3, %s4718_s11  ;;  %p4723_p13 = scmp.lt.s32.totalorder %s66_s3, %s66_s3 }
  0x3b   :  { %p4724_p0 = scmp.lt.s32.totalorder %s4718_s11, %s4718_s11 }
  0x3d   :  { %p4725_p1 = por %p4724_p0, %p4723_p13 }
  0x3f   :  { %p4726_p2 = pnand %p4725_p1, %p4719_p12 }
  0x41   :  { %4729 = shalt.err (!%p4726_p2)
}
  0x42   :  { %s4782_s1 = smov [#allocation12]   ;;  %s4730_s12 = scalar_lea.vmem %s76_s10, 16 }
  0x43   :  { %68 = dma.vmem_to_smem %s66_s3, 16, %s4782_s1, [#allocation11]  }
  0x44   :  { %p4731_p3 = scmp.ne.s32.totalorder %s76_s10, %s4730_s12  ;;  %p4735_p4 = scmp.lt.s32.totalorder %s76_s10, %s76_s10 }
  0x45   :  { %p4736_p5 = scmp.lt.s32.totalorder %s4730_s12, %s4730_s12 }
  0x47   :  { %p4737_p6 = por %p4736_p5, %p4735_p4 }
  0x49   :  { %p4738_p7 = pnand %p4737_p6, %p4731_p3 }
  0x4b   :  { %4741 = shalt.err (!%p4738_p7)
}
  0x4c   :  { %s4783_s4 = smov [#allocation13]  }
  0x4d   :  { %78 = dma.vmem_to_smem %s76_s10, 16, %s4783_s4, [#allocation14]  }
  0x4e   :  { %4764 = dma.done.wait [#allocation4], 1536  }
  0x4f   :  { %4765 = vsyncadd [#allocation4], 4294965760 }
  0x50   :  { %4766 = dma.done.wait [#allocation8], 384  }
  0x51   :  { %4767 = vsyncadd [#allocation8], 4294966912 }
  0x52   :  { %4768 = dma.done.wait [#allocation6], 16  }
  0x53   :  { %4769 = vsyncadd [#allocation6], 4294967280 }
  0x54   :  { %4770 = dma.done.wait [#allocation11], 32  }
  0x55   :  { %4771 = vsyncadd [#allocation11], 4294967264 }
  0x56   :  { %4772 = dma.done.wait [#allocation14], 16  }
  0x57   :  { %4773 = vsyncadd [#allocation14], 4294967280 }
  0x58   :  { %97 = sfence }
  0x59   :  { %s4451_s5 = sld [smem:[#allocation9 + $0x9]]  ;;  %s4452_s13 = sld [smem:[#allocation9 + $0xa]]  ;;  %v4868_v0 = vld [vmem:[#allocation3 + $0x10] sm:$0xff]  ;;  %v4870_v1 = vld [vmem:[#allocation3] sm:$0xff]  ;;  %v4872_v3 = vld [vmem:[#allocation3 + $0x18] sm:$0xff]  ;;  %vm232_vm0 = vcmask 1039360  }
  0x5a   :  { %v4874_v4 = vld [vmem:[#allocation3 + $0x8] sm:$0xff]  ;;  %s4784_s14 = smov 127   ;;  %s4453_s15 = sld [smem:[#allocation9 + $0xb]]  ;;  %v4900_v21 = vld [vmem:[#allocation3 + $0x20] sm:$0xff]  ;;  %v4906_v24 = vld [vmem:[#allocation3 + $0x38] sm:$0xff]  ;;  %vm484_vm1 = vcmask 1031168  }
  0x5b   :  { %s4454_s16 = sld [smem:[#allocation9 + $0xc]]  ;;  %v4898_v19 = vld [vmem:[#allocation3 + $0x28] sm:$0xff]  ;;  %s4455_s17 = sld [smem:[#allocation9 + $0xd]]  ;;  %v4908_v25 = vld [vmem:[#allocation3 + $0x30] sm:$0xff]  ;;  %v4932_v40 = vld [vmem:[#allocation3 + $0x40] sm:$0xff]  ;;  %vm728_vm2 = vcmask 850944  }
  0x5c   :  { %s4456_s18 = sld [smem:[#allocation9 + $0xe]]  ;;  %s4457_s19 = sld [smem:[#allocation9 + $0xf]]  ;;  %v4930_v38 = vld [vmem:[#allocation3 + $0x48] sm:$0xff]  ;;  %v4938_v43 = vld [vmem:[#allocation3 + $0x58] sm:$0xff]  ;;  %v4940_v44 = vld [vmem:[#allocation3 + $0x50] sm:$0xff]  ;;  %vm972_vm3 = vcmask 842752  }
  0x5d   :  { %s4458_s20 = sld [smem:[#allocation9 + $0x10]]  ;;  %s4459_s21 = sld [smem:[#allocation9 + $0x11]]  ;;  %vm1216_vm4 = vcmask 834560   ;;  %vm1460_vm5 = vcmask 654336   ;;  %vm1704_vm6 = vcmask 646144   ;;  %vm1948_vm7 = vcmask 637952  }
  0x5e   :  { %s4460_s22 = sld [smem:[#allocation9 + $0x12]]  ;;  %s4461_s23 = sld [smem:[#allocation9 + $0x13]]  ;;  %vm104_vm8 = vcmask 408576   ;;  %vm2205_vm9 = vcmask 1047752   ;;  %vm2198_vm10 = vcmask 203776  }
  0x5f   :  { %v215_v2 = vstv %s4451_s5  ;;  %v243_v9 = vstv %s4452_s13  ;;  %s4785_s24 = smov 126   ;;  %s4462_s25 = sld [smem:[#allocation9 + $0x14]] }
  0x60   :  { %v218_v5 = vmul.f32 %v215_v2, %v4868_v0  ;;  %v216_v6 = vmul.f32 %v215_v2, %v4870_v1  ;;  %v219_v7 = vmul.f32 %v215_v2, %v4872_v3  ;;  %v217_v8 = vmul.f32 %v215_v2, %v4874_v4  ;;  %s4463_s26 = sld [smem:[#allocation9 + $0x15]]  ;;  %s4464_s0 = sld [smem:[#allocation9 + $0x16]] }
  0x61   :  { %v245_v10 = vmul.f32 %v243_v9, %v4874_v4  ;;  %v244_v11 = vmul.f32 %v243_v9, %v4870_v1  ;;  %v247_v12 = vmul.f32 %v243_v9, %v4872_v3  ;;  %v246_v13 = vmul.f32 %v243_v9, %v4868_v0  ;;  %s4465_s2 = sld [smem:[#allocation9 + $0x17]]  ;;  %s4466_s27 = sld [smem:[#allocation9 + $0x18]] }
  0x62   :  { %228 = vrot.lane.b32.xlu1 %v218_v5, %s4784_s14  ;;  %224 = vrot.lane.b32.xlu0 %v216_v6, %s4784_s14  ;;  %v270_v14 = vstv %s4453_s15  ;;  %v301_v20 = vstv %s4454_s16  ;;  %s4467_s28 = sld [smem:[#allocation9 + $0x19]]  ;;  %s4468_s29 = sld [smem:[#allocation9 + $0x1a]] }
  0x63   :  { %v272_v15 = vmul.f32 %v270_v14, %v4874_v4  ;;  %v271_v16 = vmul.f32 %v270_v14, %v4870_v1  ;;  %v274_v17 = vmul.f32 %v270_v14, %v4872_v3  ;;  %v273_v18 = vmul.f32 %v270_v14, %v4868_v0  ;;  %s4469_s30 = sld [smem:[#allocation9 + $0x1b]]  ;;  %s4470_s7 = sld [smem:[#allocation9 + $0x1c]] }
  0x64   :  { %v303_v22 = vmul.f32 %v301_v20, %v4898_v19  ;;  %v302_v23 = vmul.f32 %v301_v20, %v4900_v21  ;;  %v305_v26 = vmul.f32 %v301_v20, %v4906_v24  ;;  %v304_v27 = vmul.f32 %v301_v20, %v4908_v25  ;;  %s4786_s3 = smov 104   ;;  %s4471_s8 = sld [smem:[#allocation9 + $0x1d]] }
  0x65   :  { %v328_v28 = vstv %s4455_s17  ;;  %v355_v33 = vstv %s4456_s18  ;;  %v386_v39 = vstv %s4457_s19  ;;  %v413_v47 = vstv %s4458_s20  ;;  %s4472_s9 = sld [smem:[#allocation9 + $0x1e]]  ;;  %s4473_s10 = sld [smem:[#allocation9 + $0x1f]] }
  0x66   :  { %230 = vrot.lane.b32.xlu1 %v219_v7, %s4784_s14  ;;  %226 = vrot.lane.b32.xlu0 %v217_v8, %s4784_s14  ;;  %v330_v29 = vmul.f32 %v328_v28, %v4898_v19  ;;  %v329_v30 = vmul.f32 %v328_v28, %v4900_v21  ;;  %v332_v31 = vmul.f32 %v328_v28, %v4906_v24  ;;  %v440_v52 = vstv %s4459_s21  ;;  %s4474_s11 = sld [smem:[#allocation9 + $0x20]]  ;;  %s4475_s1 = sld [smem:[#allocation9 + $0x21]] }
  0x67   :  { %v331_v32 = vmul.f32 %v328_v28, %v4908_v25  ;;  %v357_v34 = vmul.f32 %v355_v33, %v4898_v19  ;;  %v356_v35 = vmul.f32 %v355_v33, %v4900_v21  ;;  %v359_v36 = vmul.f32 %v355_v33, %v4906_v24  ;;  %s4476_s12 = sld [smem:[#allocation9 + $0x22]]  ;;  %s4477_s4 = sld [smem:[#allocation9 + $0x23]] }
  0x68   :  { %v358_v37 = vmul.f32 %v355_v33, %v4908_v25  ;;  %v388_v41 = vmul.f32 %v386_v39, %v4930_v38  ;;  %v387_v42 = vmul.f32 %v386_v39, %v4932_v40  ;;  %v390_v45 = vmul.f32 %v386_v39, %v4938_v43  ;;  %s4478_s5 = sld [smem:[#allocation9 + $0x24]]  ;;  %s4479_s13 = sld [smem:[#allocation9 + $0x25]] }
  0x69   :  { %v389_v46 = vmul.f32 %v386_v39, %v4940_v44  ;;  %v415_v48 = vmul.f32 %v413_v47, %v4930_v38  ;;  %v414_v49 = vmul.f32 %v413_v47, %v4932_v40  ;;  %v417_v50 = vmul.f32 %v413_v47, %v4938_v43  ;;  %s4787_s15 = smov 103   ;;  %s4480_s16 = sld [smem:[#allocation9 + $0x26]] }
  0x6a   :  { %254 = vrot.lane.b32.xlu1 %v245_v10, %s4784_s14  ;;  %252 = vrot.lane.b32.xlu0 %v244_v11, %s4784_s14  ;;  %v416_v51 = vmul.f32 %v413_v47, %v4940_v44  ;;  %v442_v53 = vmul.f32 %v440_v52, %v4930_v38  ;;  %v441_v54 = vmul.f32 %v440_v52, %v4932_v40  ;;  %v467_v57 = vstv %s4460_s22  ;;  %s4481_s17 = sld [smem:[#allocation9 + $0x27]]  ;;  %s4482_s18 = sld [smem:[#allocation9 + $0x28]] }
  0x6b   :  { %v444_v55 = vmul.f32 %v440_v52, %v4938_v43  ;;  %v443_v56 = vmul.f32 %v440_v52, %v4940_v44  ;;  %v469_v58 = vmul.f32 %v467_v57, %v4874_v4  ;;  %v468_v59 = vmul.f32 %v467_v57, %v4870_v1  ;;  %s4483_s19 = sld [smem:[#allocation9 + $0x29]]  ;;  %s4484_s20 = sld [smem:[#allocation9 + $0x2a]] }
  0x6c   :  { %v471_v60 = vmul.f32 %v467_v57, %v4872_v3  ;;  %v470_v61 = vmul.f32 %v467_v57, %v4868_v0  ;;  %v495_v62 = vstv %s4461_s23  ;;  %v522_v7 = vstv %s4462_s25  ;;  %s4485_s21 = sld [smem:[#allocation9 + $0x2b]]  ;;  %s4486_s22 = sld [smem:[#allocation9 + $0x2c]] }
  0x6d   :  { %v497_v63 = vmul.f32 %v495_v62, %v4874_v4  ;;  %v496_v2 = vmul.f32 %v495_v62, %v4870_v1  ;;  %v499_v5 = vmul.f32 %v495_v62, %v4872_v3  ;;  %v498_v6 = vmul.f32 %v495_v62, %v4868_v0  ;;  %s4487_s23 = sld [smem:[#allocation9 + $0x2d]]  ;;  %s4488_s25 = sld [smem:[#allocation9 + $0x2e]] }
  0x6e   :  { %258 = vrot.lane.b32.xlu1 %v247_v12, %s4784_s14  ;;  %256 = vrot.lane.b32.xlu0 %v246_v13, %s4784_s14  ;;  %v524_v8 = vmul.f32 %v522_v7, %v4874_v4  ;;  %v523_v9 = vmul.f32 %v522_v7, %v4870_v1  ;;  %v526_v10 = vmul.f32 %v522_v7, %v4872_v3  ;;  %v549_v12 = vstv %s4463_s26  ;;  %s4788_s26 = smov 102  }
  0x6f   :  { %v525_v11 = vmul.f32 %v522_v7, %v4868_v0  ;;  %v551_v13 = vmul.f32 %v549_v12, %v4898_v19  ;;  %v550_v14 = vmul.f32 %v549_v12, %v4900_v21  ;;  %v711_v62 = vstv %s4469_s30  ;;  %s4494_s30 = sld [smem:[#allocation9 + $0x34]] }
  0x72   :  { %281 = vrot.lane.b32.xlu1 %v272_v15, %s4784_s14  ;;  %279 = vrot.lane.b32.xlu0 %v271_v16, %s4784_s14  ;;  %v553_v15 = vmul.f32 %v549_v12, %v4906_v24  ;;  %v552_v16 = vmul.f32 %v549_v12, %v4908_v25 }
  0x76   :  { %285 = vrot.lane.b32.xlu1 %v274_v17, %s4784_s14  ;;  %283 = vrot.lane.b32.xlu0 %v273_v18, %s4784_s14  ;;  %v576_v17 = vstv %s4464_s0  ;;  %s4489_s0 = sld [smem:[#allocation9 + $0x2f]] }
  0x77   :  { %v578_v18 = vmul.f32 %v576_v17, %v4898_v19  ;;  %v577_v20 = vmul.f32 %v576_v17, %v4900_v21 }
  0x7a   :  { %312 = vrot.lane.b32.xlu1 %v303_v22, %s4784_s14  ;;  %310 = vrot.lane.b32.xlu0 %v302_v23, %s4784_s14  ;;  %v580_v22 = vmul.f32 %v576_v17, %v4906_v24  ;;  %v579_v23 = vmul.f32 %v576_v17, %v4908_v25 }
  0x7e   :  { %316 = vrot.lane.b32.xlu1 %v305_v26, %s4784_s14  ;;  %314 = vrot.lane.b32.xlu0 %v304_v27, %s4784_s14  ;;  %v603_v26 = vstv %s4465_s2  ;;  %s4490_s2 = sld [smem:[#allocation9 + $0x30]] }
  0x7f   :  { %v605_v27 = vmul.f32 %v603_v26, %v4898_v19  ;;  %v604_v28 = vmul.f32 %v603_v26, %v4900_v21 }
  0x82   :  { %339 = vrot.lane.b32.xlu1 %v330_v29, %s4784_s14  ;;  %337 = vrot.lane.b32.xlu0 %v329_v30, %s4784_s14  ;;  %v607_v29 = vmul.f32 %v603_v26, %v4906_v24  ;;  %v606_v30 = vmul.f32 %v603_v26, %v4908_v25 }
  0x86   :  { %343 = vrot.lane.b32.xlu1 %v332_v31, %s4784_s14  ;;  %341 = vrot.lane.b32.xlu0 %v331_v32, %s4784_s14  ;;  %v630_v31 = vstv %s4466_s27  ;;  %s4491_s27 = sld [smem:[#allocation9 + $0x31]] }
  0x87   :  { %v634_v39 = vmul.f32 %v630_v31, %v4938_v43 }
  0x8a   :  { %366 = vrot.lane.b32.xlu1 %v357_v34, %s4784_s14  ;;  %364 = vrot.lane.b32.xlu0 %v356_v35, %s4784_s14  ;;  %v632_v34 = vmul.f32 %v630_v31, %v4930_v38  ;;  %v631_v35 = vmul.f32 %v630_v31, %v4932_v40 }
  0x8e   :  { %370 = vrot.lane.b32.xlu1 %v359_v36, %s4784_s14  ;;  %368 = vrot.lane.b32.xlu0 %v358_v37, %s4784_s14 }
  0x92   :  { %397 = vrot.lane.b32.xlu1 %v388_v41, %s4784_s14  ;;  %395 = vrot.lane.b32.xlu0 %v387_v42, %s4784_s14  ;;  %v633_v41 = vmul.f32 %v630_v31, %v4940_v44  ;;  %v657_v42 = vstv %s4467_s28  ;;  %s4492_s28 = sld [smem:[#allocation9 + $0x32]] }
  0x93   :  { %v659_v47 = vmul.f32 %v657_v42, %v4930_v38  ;;  %v660_v52 = vmul.f32 %v657_v42, %v4940_v44 }
  0x96   :  { %401 = vrot.lane.b32.xlu1 %v390_v45, %s4784_s14  ;;  %399 = vrot.lane.b32.xlu0 %v389_v46, %s4784_s14 }
  0x9a   :  { %424 = vrot.lane.b32.xlu1 %v415_v48, %s4784_s14  ;;  %422 = vrot.lane.b32.xlu0 %v414_v49, %s4784_s14  ;;  %v658_v48 = vmul.f32 %v657_v42, %v4932_v40 }
  0x9e   :  { %428 = vrot.lane.b32.xlu1 %v417_v50, %s4784_s14  ;;  %426 = vrot.lane.b32.xlu0 %v416_v51, %s4784_s14  ;;  %v661_v51 = vmul.f32 %v657_v42, %v4938_v43 }
  0xa2   :  { %451 = vrot.lane.b32.xlu1 %v442_v53, %s4784_s14  ;;  %449 = vrot.lane.b32.xlu0 %v441_v54, %s4784_s14  ;;  %v684_v53 = vstv %s4468_s29  ;;  %s4493_s29 = sld [smem:[#allocation9 + $0x33]] }
  0xa3   :  { %v685_v57 = vmul.f32 %v684_v53, %v4932_v40 }
  0xa6   :  { %455 = vrot.lane.b32.xlu1 %v444_v55, %s4784_s14  ;;  %453 = vrot.lane.b32.xlu0 %v443_v56, %s4784_s14  ;;  %v686_v56 = vmul.f32 %v684_v53, %v4930_v38 }
  0xaa   :  { %478 = vrot.lane.b32.xlu1 %v469_v58, %s4785_s24  ;;  %476 = vrot.lane.b32.xlu0 %v468_v59, %s4785_s24 }
  0xae   :  { %482 = vrot.lane.b32.xlu1 %v471_v60, %s4785_s24  ;;  %480 = vrot.lane.b32.xlu0 %v470_v61, %s4785_s24  ;;  %v688_v60 = vmul.f32 %v684_v53, %v4938_v43  ;;  %v687_v61 = vmul.f32 %v684_v53, %v4940_v44 }
  0xb2   :  { %506 = vrot.lane.b32.xlu1 %v497_v63, %s4785_s24  ;;  %504 = vrot.lane.b32.xlu0 %v496_v2, %s4785_s24 }
  0xb6   :  { %510 = vrot.lane.b32.xlu1 %v499_v5, %s4785_s24  ;;  %508 = vrot.lane.b32.xlu0 %v498_v6, %s4785_s24  ;;  %v713_v5 = vmul.f32 %v711_v62, %v4874_v4  ;;  %v712_v6 = vmul.f32 %v711_v62, %v4870_v1 }
  0xba   :  { %533 = vrot.lane.b32.xlu1 %v524_v8, %s4785_s24  ;;  %531 = vrot.lane.b32.xlu0 %v523_v9, %s4785_s24  ;;  %v715_v9 = vmul.f32 %v711_v62, %v4872_v3 }
  0xbe   :  { %537 = vrot.lane.b32.xlu1 %v526_v10, %s4785_s24  ;;  %535 = vrot.lane.b32.xlu0 %v525_v11, %s4785_s24  ;;  %v714_v10 = vmul.f32 %v711_v62, %v4868_v0  ;;  %v739_v11 = vstv %s4470_s7  ;;  %s4495_s7 = sld [smem:[#allocation9 + $0x35]] }
  0xc2   :  { %560 = vrot.lane.b32.xlu1 %v551_v13, %s4785_s24  ;;  %558 = vrot.lane.b32.xlu0 %v550_v14, %s4785_s24  ;;  %v741_v14 = vmul.f32 %v739_v11, %v4874_v4 }
  0xc6   :  { %564 = vrot.lane.b32.xlu1 %v553_v15, %s4785_s24  ;;  %562 = vrot.lane.b32.xlu0 %v552_v16, %s4785_s24  ;;  %v740_v15 = vmul.f32 %v739_v11, %v4870_v1 }
  0xca   :  { %587 = vrot.lane.b32.xlu1 %v578_v18, %s4785_s24  ;;  %585 = vrot.lane.b32.xlu0 %v577_v20, %s4785_s24  ;;  %v743_v18 = vmul.f32 %v739_v11, %v4872_v3  ;;  %v742_v20 = vmul.f32 %v739_v11, %v4868_v0  ;;  %v847_v11 = vstv %s4474_s11  ;;  %s4498_s11 = sld [smem:[#allocation9 + $0x38]] }
  0xce   :  { %591 = vrot.lane.b32.xlu1 %v580_v22, %s4785_s24  ;;  %589 = vrot.lane.b32.xlu0 %v579_v23, %s4785_s24  ;;  %v766_v22 = vstv %s4471_s8  ;;  %s4496_s8 = sld [smem:[#allocation9 + $0x36]] }
  0xcf   :  { %v770_v31 = vmul.f32 %v766_v22, %v4872_v3 }
  0xd2   :  { %614 = vrot.lane.b32.xlu1 %v605_v27, %s4785_s24  ;;  %612 = vrot.lane.b32.xlu0 %v604_v28, %s4785_s24  ;;  %v768_v27 = vmul.f32 %v766_v22, %v4874_v4  ;;  %v767_v28 = vmul.f32 %v766_v22, %v4870_v1 }
  0xd4   :  { %v5010_v32 = vpop.permute.xlu1 %228  ;;  %v5012_v33 = vpop.permute.xlu0 %224 }
  0xd6   :  { %618 = vrot.lane.b32.xlu1 %v607_v29, %s4785_s24  ;;  %616 = vrot.lane.b32.xlu0 %v606_v30, %s4785_s24 }
  0xd8   :  { %v5018_v36 = vpop.permute.xlu1 %230  ;;  %v5020_v37 = vpop.permute.xlu0 %226 }
  0xda   :  { %641 = vrot.lane.b32.xlu1 %v632_v34, %s4785_s24  ;;  %639 = vrot.lane.b32.xlu0 %v631_v35, %s4785_s24  ;;  %v769_v34 = vmul.f32 %v766_v22, %v4868_v0  ;;  %v793_v35 = vstv %s4472_s9  ;;  %s4497_s9 = sld [smem:[#allocation9 + $0x37]] }
  0xdb   :  { %v795_v42 = vmul.f32 %v793_v35, %v4898_v19  ;;  %v796_v53 = vmul.f32 %v793_v35, %v4908_v25 }
  0xdc   :  { %v5026_v45 = vpop.permute.xlu1 %254  ;;  %v5028_v46 = vpop.permute.xlu0 %252 }
  0xde   :  { %645 = vrot.lane.b32.xlu1 %v634_v39, %s4785_s24  ;;  %643 = vrot.lane.b32.xlu0 %v633_v41, %s4785_s24 }
  0xe0   :  { %v5034_v49 = vpop.permute.xlu1 %258  ;;  %v5036_v50 = vpop.permute.xlu0 %256 }
  0xe2   :  { %668 = vrot.lane.b32.xlu1 %v659_v47, %s4785_s24  ;;  %666 = vrot.lane.b32.xlu0 %v658_v48, %s4785_s24  ;;  %v794_v47 = vmul.f32 %v793_v35, %v4900_v21 }
  0xe4   :  { %v5042_v54 = vpop.permute.xlu1 %281  ;;  %v5044_v55 = vpop.permute.xlu0 %279 }
  0xe6   :  { %672 = vrot.lane.b32.xlu1 %v661_v51, %s4785_s24  ;;  %670 = vrot.lane.b32.xlu0 %v660_v52, %s4785_s24  ;;  %v797_v52 = vmul.f32 %v793_v35, %v4906_v24 }
  0xe8   :  { %v5050_v58 = vpop.permute.xlu1 %285  ;;  %v5052_v59 = vpop.permute.xlu0 %283 }
  0xea   :  { %695 = vrot.lane.b32.xlu1 %v686_v56, %s4785_s24  ;;  %693 = vrot.lane.b32.xlu0 %v685_v57, %s4785_s24  ;;  %v820_v56 = vstv %s4473_s10  ;;  %s4789_s10 = smov 80  }
  0xeb   :  { %v821_v62 = vmul.f32 %v820_v56, %v4900_v21 }
  0xec   :  { %v5058_v63 = vpop.permute.xlu1 %312  ;;  %v5060_v2 = vpop.permute.xlu0 %310 }
  0xee   :  { %699 = vrot.lane.b32.xlu1 %v688_v60, %s4785_s24  ;;  %697 = vrot.lane.b32.xlu0 %v687_v61, %s4785_s24  ;;  %v822_v61 = vmul.f32 %v820_v56, %v4898_v19 }
  0xf0   :  { %v5066_v7 = vpop.permute.xlu1 %316  ;;  %v5068_v8 = vpop.permute.xlu0 %314 }
  0xf2   :  { %722 = vrot.lane.b32.xlu1 %v713_v5, %s4786_s3  ;;  %720 = vrot.lane.b32.xlu0 %v712_v6, %s4786_s3 }
  0xf4   :  { %v5074_v12 = vpop.permute.xlu1 %339  ;;  %v5076_v13 = vpop.permute.xlu0 %337 }
  0xf6   :  { %726 = vrot.lane.b32.xlu1 %v715_v9, %s4786_s3  ;;  %724 = vrot.lane.b32.xlu0 %v714_v10, %s4786_s3  ;;  %v824_v9 = vmul.f32 %v820_v56, %v4906_v24  ;;  %v823_v10 = vmul.f32 %v820_v56, %v4908_v25 }
  0xf8   :  { %v5082_v16 = vpop.permute.xlu1 %343  ;;  %v5084_v17 = vpop.permute.xlu0 %341 }
  0xf9   :  { %9078 = vst [vmem:[#allocation22_spill] sm:$0xff] %v5082_v16  ;;  %9079 = vst [vmem:[#allocation23_spill] sm:$0xff] %v5084_v17 }
  0xfa   :  { %750 = vrot.lane.b32.xlu1 %v741_v14, %s4786_s3  ;;  %748 = vrot.lane.b32.xlu0 %v740_v15, %s4786_s3 }
  0xfc   :  { %v5090_v23 = vpop.permute.xlu1 %366  ;;  %v5092_v26 = vpop.permute.xlu0 %364 }
  0xfd   :  { %9080 = vst [vmem:[#allocation24_spill] sm:$0xff] %v5090_v23  ;;  %9081 = vst [vmem:[#allocation25_spill] sm:$0xff] %v5092_v26 }
  0xfe   :  { %754 = vrot.lane.b32.xlu1 %v743_v18, %s4786_s3  ;;  %752 = vrot.lane.b32.xlu0 %v742_v20, %s4786_s3  ;;  %v849_v18 = vmul.f32 %v847_v11, %v4898_v19  ;;  %v848_v20 = vmul.f32 %v847_v11, %v4900_v21 }
 0x100   :  { %v5098_v29 = vpop.permute.xlu1 %370  ;;  %v5100_v30 = vpop.permute.xlu0 %368 }
 0x101   :  { %9082 = vst [vmem:[#allocation26_spill] sm:$0xff] %v5098_v29  ;;  %9083 = vst [vmem:[#allocation27_spill] sm:$0xff] %v5100_v30 }
 0x102   :  { %777 = vrot.lane.b32.xlu1 %v768_v27, %s4786_s3  ;;  %775 = vrot.lane.b32.xlu0 %v767_v28, %s4786_s3  ;;  %v851_v28 = vmul.f32 %v847_v11, %v4906_v24 }
 0x104   :  { %v5106_v39 = vpop.permute.xlu1 %397  ;;  %v5108_v41 = vpop.permute.xlu0 %395 }
 0x105   :  { %9084 = vst [vmem:[#allocation28_spill] sm:$0xff] %v5106_v39  ;;  %9085 = vst [vmem:[#allocation29_spill] sm:$0xff] %v5108_v41 }
 0x106   :  { %781 = vrot.lane.b32.xlu1 %v770_v31, %s4786_s3  ;;  %779 = vrot.lane.b32.xlu0 %v769_v34, %s4786_s3  ;;  %v850_v31 = vmul.f32 %v847_v11, %v4908_v25  ;;  %v874_v34 = vstv %s4475_s1  ;;  %s4499_s1 = sld [smem:[#allocation9 + $0x39]] }
 0x108   :  { %v5114_v48 = vpop.permute.xlu1 %401  ;;  %v5116_v51 = vpop.permute.xlu0 %399 }
 0x109   :  { %9086 = vst [vmem:[#allocation30_spill] sm:$0xff] %v5114_v48  ;;  %9087 = vst [vmem:[#allocation31_spill] sm:$0xff] %v5116_v51 }
 0x10a   :  { %804 = vrot.lane.b32.xlu1 %v795_v42, %s4786_s3  ;;  %802 = vrot.lane.b32.xlu0 %v794_v47, %s4786_s3  ;;  %v876_v47 = vmul.f32 %v874_v34, %v4930_v38 }
 0x10c   :  { %v5122_v57 = vpop.permute.xlu1 %424  ;;  %v5124_v60 = vpop.permute.xlu0 %422 }
 0x10d   :  { %9088 = vst [vmem:[#allocation32_spill] sm:$0xff] %v5122_v57  ;;  %9089 = vst [vmem:[#allocation33_spill] sm:$0xff] %v5124_v60 }
 0x10e   :  { %808 = vrot.lane.b32.xlu1 %v797_v52, %s4786_s3  ;;  %806 = vrot.lane.b32.xlu0 %v796_v53, %s4786_s3  ;;  %v875_v52 = vmul.f32 %v874_v34, %v4932_v40 }
 0x110   :  { %v5130_v5 = vpop.permute.xlu1 %428  ;;  %v5132_v6 = vpop.permute.xlu0 %426 }
 0x111   :  { %9090 = vst [vmem:[#allocation34_spill] sm:$0xff] %v5130_v5  ;;  %9091 = vst [vmem:[#allocation35_spill] sm:$0xff] %v5132_v6 }
 0x112   :  { %831 = vrot.lane.b32.xlu1 %v822_v61, %s4786_s3  ;;  %829 = vrot.lane.b32.xlu0 %v821_v62, %s4786_s3  ;;  %v878_v61 = vmul.f32 %v874_v34, %v4938_v43  ;;  %v877_v62 = vmul.f32 %v874_v34, %v4940_v44 }
 0x114   :  { %v5138_v14 = vpop.permute.xlu1 %451  ;;  %v5140_v15 = vpop.permute.xlu0 %449 }
 0x115   :  { %9092 = vst [vmem:[#allocation36_spill] sm:$0xff] %v5138_v14  ;;  %9093 = vst [vmem:[#allocation37_spill] sm:$0xff] %v5140_v15 }
 0x116   :  { %835 = vrot.lane.b32.xlu1 %v824_v9, %s4786_s3  ;;  %833 = vrot.lane.b32.xlu0 %v823_v10, %s4786_s3  ;;  %v901_v9 = vstv %s4476_s12  ;;  %s4500_s12 = sld [smem:[#allocation9 + $0x3a]] }
 0x117   :  { %v905_v34 = vmul.f32 %v901_v9, %v4938_v43 }
 0x118   :  { %v5146_v22 = vpop.permute.xlu1 %455  ;;  %v5148_v27 = vpop.permute.xlu0 %453 }
 0x119   :  { %9094 = vst [vmem:[#allocation38_spill] sm:$0xff] %v5146_v22  ;;  %9095 = vst [vmem:[#allocation39_spill] sm:$0xff] %v5148_v27 }
 0x11a   :  { %858 = vrot.lane.b32.xlu1 %v849_v18, %s4786_s3  ;;  %856 = vrot.lane.b32.xlu0 %v848_v20, %s4786_s3  ;;  %v903_v18 = vmul.f32 %v901_v9, %v4930_v38  ;;  %v902_v20 = vmul.f32 %v901_v9, %v4932_v40 }
 0x11c   :  { %v5154_v35 = vpop.permute.xlu1 %478  ;;  %v5156_v42 = vpop.permute.xlu0 %476 }
 0x11d   :  { %9096 = vst [vmem:[#allocation40_spill] sm:$0xff] %v5154_v35  ;;  %9097 = vst [vmem:[#allocation41_spill] sm:$0xff] %v5156_v42 }
 0x11e   :  { %862 = vrot.lane.b32.xlu1 %v851_v28, %s4786_s3  ;;  %860 = vrot.lane.b32.xlu0 %v850_v31, %s4786_s3 }
 0x120   :  { %v5162_v53 = vpop.permute.xlu1 %482  ;;  %v5164_v56 = vpop.permute.xlu0 %480 }
 0x121   :  { %9098 = vst [vmem:[#allocation42_spill] sm:$0xff] %v5162_v53  ;;  %9099 = vst [vmem:[#allocation43_spill] sm:$0xff] %v5164_v56 }
 0x122   :  { %885 = vrot.lane.b32.xlu1 %v876_v47, %s4786_s3  ;;  %883 = vrot.lane.b32.xlu0 %v875_v52, %s4786_s3  ;;  %v904_v47 = vmul.f32 %v901_v9, %v4940_v44  ;;  %v928_v52 = vstv %s4477_s4  ;;  %s4501_s4 = sld [smem:[#allocation9 + $0x3b]] }
 0x123   :  { %v932_v9 = vmul.f32 %v928_v52, %v4938_v43 }
 0x124   :  { %v5170_v10 = vpop.permute.xlu1 %506  ;;  %v5172_v11 = vpop.permute.xlu0 %504 }
 0x125   :  { %9100 = vst [vmem:[#allocation44_spill] sm:$0xff] %v5170_v10  ;;  %9101 = vst [vmem:[#allocation45_spill] sm:$0xff] %v5172_v11 }
 0x126   :  { %889 = vrot.lane.b32.xlu1 %v878_v61, %s4786_s3  ;;  %887 = vrot.lane.b32.xlu0 %v877_v62, %s4786_s3 }
 0x128   :  { %v5178_v28 = vpop.permute.xlu1 %510  ;;  %v5180_v31 = vpop.permute.xlu0 %508 }
 0x129   :  { %9102 = vst [vmem:[#allocation46_spill] sm:$0xff] %v5178_v28  ;;  %9103 = vst [vmem:[#allocation47_spill] sm:$0xff] %v5180_v31  ;;  %v930_v28 = vmul.f32 %v928_v52, %v4930_v38 }
 0x12a   :  { %912 = vrot.lane.b32.xlu1 %v903_v18, %s4786_s3  ;;  %910 = vrot.lane.b32.xlu0 %v902_v20, %s4786_s3  ;;  %v929_v18 = vmul.f32 %v928_v52, %v4932_v40 }
 0x12c   :  { %v5186_v61 = vpop.permute.xlu1 %533  ;;  %v5188_v62 = vpop.permute.xlu0 %531 }
 0x12d   :  { %9104 = vst [vmem:[#allocation48_spill] sm:$0xff] %v5186_v61  ;;  %9105 = vst [vmem:[#allocation49_spill] sm:$0xff] %v5188_v62  ;;  %v931_v62 = vmul.f32 %v928_v52, %v4940_v44  ;;  %v955_v61 = vstv %s4478_s5  ;;  %s4502_s5 = sld [smem:[#allocation9 + $0x3c]] }
 0x12e   :  { %916 = vrot.lane.b32.xlu1 %v905_v34, %s4786_s3  ;;  %914 = vrot.lane.b32.xlu0 %v904_v47, %s4786_s3  ;;  %v959_v52 = vmul.f32 %v955_v61, %v4872_v3 }
 0x130   :  { %v5194_v31 = vpop.permute.xlu1 %537  ;;  %v5196_v20 = vpop.permute.xlu0 %535 }
 0x131   :  { %9106 = vst [vmem:[#allocation50_spill] sm:$0xff] %v5194_v31  ;;  %9107 = vst [vmem:[#allocation51_spill] sm:$0xff] %v5196_v20  ;;  %v957_v31 = vmul.f32 %v955_v61, %v4874_v4 }
 0x132   :  { %939 = vrot.lane.b32.xlu1 %v930_v28, %s4786_s3  ;;  %937 = vrot.lane.b32.xlu0 %v929_v18, %s4786_s3  ;;  %v956_v28 = vmul.f32 %v955_v61, %v4870_v1 }
 0x134   :  { %v5202_v34 = vpop.permute.xlu1 %560  ;;  %v5204_v47 = vpop.permute.xlu0 %558 }
 0x135   :  { %9108 = vst [vmem:[#allocation52_spill] sm:$0xff] %v5202_v34  ;;  %9109 = vst [vmem:[#allocation53_spill] sm:$0xff] %v5204_v47  ;;  %v958_v47 = vmul.f32 %v955_v61, %v4868_v0 }
 0x136   :  { %943 = vrot.lane.b32.xlu1 %v932_v9, %s4786_s3  ;;  %941 = vrot.lane.b32.xlu0 %v931_v62, %s4786_s3  ;;  %v983_v9 = vstv %s4479_s13  ;;  %s4503_s13 = sld [smem:[#allocation9 + $0x3d]] }
 0x137   :  { %v987_v61 = vmul.f32 %v983_v9, %v4872_v3 }
 0x138   :  { %v5210_v20 = vpop.permute.xlu1 %564  ;;  %v5212_v18 = vpop.permute.xlu0 %562 }
 0x139   :  { %9110 = vst [vmem:[#allocation54_spill] sm:$0xff] %v5210_v20  ;;  %9111 = vst [vmem:[#allocation55_spill] sm:$0xff] %v5212_v18  ;;  %v985_v20 = vmul.f32 %v983_v9, %v4874_v4 }
 0x13a   :  { %966 = vrot.lane.b32.xlu1 %v957_v31, %s4787_s15  ;;  %964 = vrot.lane.b32.xlu0 %v956_v28, %s4787_s15  ;;  %v984_v31 = vmul.f32 %v983_v9, %v4870_v1 }
 0x13c   :  { %v5218_v62 = vpop.permute.xlu1 %587  ;;  %v5220_v34 = vpop.permute.xlu0 %585 }
 0x13d   :  { %9112 = vst [vmem:[#allocation56_spill] sm:$0xff] %v5218_v62  ;;  %9113 = vst [vmem:[#allocation57_spill] sm:$0xff] %v5220_v34  ;;  %v986_v34 = vmul.f32 %v983_v9, %v4868_v0  ;;  %v1010_v62 = vstv %s4480_s16  ;;  %s4504_s16 = sld [smem:[#allocation9 + $0x3e]] }
 0x13e   :  { %970 = vrot.lane.b32.xlu1 %v959_v52, %s4787_s15  ;;  %968 = vrot.lane.b32.xlu0 %v958_v47, %s4787_s15  ;;  %v1014_v9 = vmul.f32 %v1010_v62, %v4872_v3 }
 0x140   :  { %v5226_v18 = vpop.permute.xlu1 %591  ;;  %v5228_v28 = vpop.permute.xlu0 %589 }
 0x141   :  { %9114 = vst [vmem:[#allocation58_spill] sm:$0xff] %v5226_v18  ;;  %9115 = vst [vmem:[#allocation59_spill] sm:$0xff] %v5228_v28  ;;  %v1012_v18 = vmul.f32 %v1010_v62, %v4874_v4 }
 0x142   :  { %994 = vrot.lane.b32.xlu1 %v985_v20, %s4787_s15  ;;  %992 = vrot.lane.b32.xlu0 %v984_v31, %s4787_s15  ;;  %v1011_v20 = vmul.f32 %v1010_v62, %v4870_v1 }
 0x144   :  { %v5234_v52 = vpop.permute.xlu1 %614  ;;  %v5236_v47 = vpop.permute.xlu0 %612 }
 0x145   :  { %9116 = vst [vmem:[#allocation60_spill] sm:$0xff] %v5234_v52  ;;  %9117 = vst [vmem:[#allocation61_spill] sm:$0xff] %v5236_v47  ;;  %v1013_v47 = vmul.f32 %v1010_v62, %v4868_v0  ;;  %v1037_v52 = vstv %s4481_s17  ;;  %s4505_s17 = sld [smem:[#allocation9 + $0x3f]] }
 0x146   :  { %998 = vrot.lane.b32.xlu1 %v987_v61, %s4787_s15  ;;  %996 = vrot.lane.b32.xlu0 %v986_v34, %s4787_s15  ;;  %v1041_v62 = vmul.f32 %v1037_v52, %v4906_v24 }
 0x148   :  { %v5242_v28 = vpop.permute.xlu1 %618  ;;  %v5244_v31 = vpop.permute.xlu0 %616 }
 0x149   :  { %9118 = vst [vmem:[#allocation62_spill] sm:$0xff] %v5242_v28  ;;  %9119 = vst [vmem:[#allocation63_spill] sm:$0xff] %v5244_v31  ;;  %v1039_v28 = vmul.f32 %v1037_v52, %v4898_v19 }
 0x14a   :  { %1021 = vrot.lane.b32.xlu1 %v1012_v18, %s4787_s15  ;;  %1019 = vrot.lane.b32.xlu0 %v1011_v20, %s4787_s15  ;;  %v1038_v18 = vmul.f32 %v1037_v52, %v4900_v21 }
 0x14c   :  { %v5250_v61 = vpop.permute.xlu1 %641  ;;  %v5252_v34 = vpop.permute.xlu0 %639 }
 0x14d   :  { %9120 = vst [vmem:[#allocation64_spill] sm:$0xff] %v5250_v61  ;;  %9121 = vst [vmem:[#allocation65_spill] sm:$0xff] %v5252_v34  ;;  %v1040_v34 = vmul.f32 %v1037_v52, %v4908_v25  ;;  %v1064_v61 = vstv %s4482_s18  ;;  %s4506_s18 = sld [smem:[#allocation9 + $0x40]] }
 0x14e   :  { %1025 = vrot.lane.b32.xlu1 %v1014_v9, %s4787_s15  ;;  %1023 = vrot.lane.b32.xlu0 %v1013_v47, %s4787_s15  ;;  %v1068_v52 = vmul.f32 %v1064_v61, %v4906_v24 }
 0x150   :  { %v5258_v31 = vpop.permute.xlu1 %645  ;;  %v5260_v20 = vpop.permute.xlu0 %643 }
 0x151   :  { %9122 = vst [vmem:[#allocation66_spill] sm:$0xff] %v5258_v31  ;;  %9123 = vst [vmem:[#allocation67_spill] sm:$0xff] %v5260_v20  ;;  %v1066_v31 = vmul.f32 %v1064_v61, %v4898_v19 }
 0x152   :  { %1048 = vrot.lane.b32.xlu1 %v1039_v28, %s4787_s15  ;;  %1046 = vrot.lane.b32.xlu0 %v1038_v18, %s4787_s15  ;;  %v1065_v28 = vmul.f32 %v1064_v61, %v4900_v21 }
 0x154   :  { %v5266_v9 = vpop.permute.xlu1 %668  ;;  %v5268_v47 = vpop.permute.xlu0 %666 }
 0x155   :  { %9124 = vst [vmem:[#allocation68_spill] sm:$0xff] %v5266_v9  ;;  %9125 = vst [vmem:[#allocation69_spill] sm:$0xff] %v5268_v47  ;;  %v1067_v47 = vmul.f32 %v1064_v61, %v4908_v25  ;;  %v1091_v9 = vstv %s4483_s19  ;;  %s4790_s19 = smov 79  }
 0x156   :  { %1052 = vrot.lane.b32.xlu1 %v1041_v62, %s4787_s15  ;;  %1050 = vrot.lane.b32.xlu0 %v1040_v34, %s4787_s15  ;;  %v1095_v61 = vmul.f32 %v1091_v9, %v4906_v24 }
 0x158   :  { %v5274_v20 = vpop.permute.xlu1 %672  ;;  %v5276_v18 = vpop.permute.xlu0 %670 }
 0x159   :  { %9126 = vst [vmem:[#allocation70_spill] sm:$0xff] %v5274_v20  ;;  %9127 = vst [vmem:[#allocation71_spill] sm:$0xff] %v5276_v18  ;;  %v1093_v20 = vmul.f32 %v1091_v9, %v4898_v19 }
 0x15a   :  { %1075 = vrot.lane.b32.xlu1 %v1066_v31, %s4787_s15  ;;  %1073 = vrot.lane.b32.xlu0 %v1065_v28, %s4787_s15  ;;  %v1092_v31 = vmul.f32 %v1091_v9, %v4900_v21 }
 0x15c   :  { %v5282_v62 = vpop.permute.xlu1 %695  ;;  %v5284_v34 = vpop.permute.xlu0 %693 }
 0x15d   :  { %9128 = vst [vmem:[#allocation72_spill] sm:$0xff] %v5282_v62  ;;  %9129 = vst [vmem:[#allocation73_spill] sm:$0xff] %v5284_v34  ;;  %v1094_v34 = vmul.f32 %v1091_v9, %v4908_v25  ;;  %v1118_v62 = vstv %s4484_s20  ;;  %s4507_s20 = sld [smem:[#allocation9 + $0x41]] }
 0x15e   :  { %1079 = vrot.lane.b32.xlu1 %v1068_v52, %s4787_s15  ;;  %1077 = vrot.lane.b32.xlu0 %v1067_v47, %s4787_s15  ;;  %v1122_v9 = vmul.f32 %v1118_v62, %v4938_v43 }
 0x160   :  { %v5290_v18 = vpop.permute.xlu1 %699  ;;  %v5292_v28 = vpop.permute.xlu0 %697 }
 0x161   :  { %9130 = vst [vmem:[#allocation74_spill] sm:$0xff] %v5290_v18  ;;  %9131 = vst [vmem:[#allocation75_spill] sm:$0xff] %v5292_v28  ;;  %v1120_v18 = vmul.f32 %v1118_v62, %v4930_v38 }
 0x162   :  { %1102 = vrot.lane.b32.xlu1 %v1093_v20, %s4787_s15  ;;  %1100 = vrot.lane.b32.xlu0 %v1092_v31, %s4787_s15  ;;  %v1119_v20 = vmul.f32 %v1118_v62, %v4932_v40 }
 0x164   :  { %v5298_v52 = vpop.permute.xlu1 %722  ;;  %v5300_v47 = vpop.permute.xlu0 %720 }
 0x165   :  { %9132 = vst [vmem:[#allocation76_spill] sm:$0xff] %v5298_v52  ;;  %9133 = vst [vmem:[#allocation77_spill] sm:$0xff] %v5300_v47  ;;  %v1121_v47 = vmul.f32 %v1118_v62, %v4940_v44  ;;  %v1145_v52 = vstv %s4485_s21  ;;  %s4508_s21 = sld [smem:[#allocation9 + $0x42]] }
 0x166   :  { %1106 = vrot.lane.b32.xlu1 %v1095_v61, %s4787_s15  ;;  %1104 = vrot.lane.b32.xlu0 %v1094_v34, %s4787_s15  ;;  %v1149_v62 = vmul.f32 %v1145_v52, %v4938_v43 }
 0x168   :  { %v5306_v28 = vpop.permute.xlu1 %726  ;;  %v5308_v31 = vpop.permute.xlu0 %724 }
 0x169   :  { %9134 = vst [vmem:[#allocation78_spill] sm:$0xff] %v5306_v28  ;;  %9135 = vst [vmem:[#allocation79_spill] sm:$0xff] %v5308_v31  ;;  %v1147_v28 = vmul.f32 %v1145_v52, %v4930_v38 }
 0x16a   :  { %1129 = vrot.lane.b32.xlu1 %v1120_v18, %s4787_s15  ;;  %1127 = vrot.lane.b32.xlu0 %v1119_v20, %s4787_s15  ;;  %v1146_v18 = vmul.f32 %v1145_v52, %v4932_v40 }
 0x16c   :  { %v5314_v61 = vpop.permute.xlu1 %750  ;;  %v5316_v34 = vpop.permute.xlu0 %748 }
 0x16d   :  { %9136 = vst [vmem:[#allocation80_spill] sm:$0xff] %v5314_v61  ;;  %9137 = vst [vmem:[#allocation81_spill] sm:$0xff] %v5316_v34  ;;  %v1148_v34 = vmul.f32 %v1145_v52, %v4940_v44  ;;  %v1172_v61 = vstv %s4486_s22  ;;  %s4509_s22 = sld [smem:[#allocation9 + $0x43]] }
 0x16e   :  { %1133 = vrot.lane.b32.xlu1 %v1122_v9, %s4787_s15  ;;  %1131 = vrot.lane.b32.xlu0 %v1121_v47, %s4787_s15  ;;  %v1176_v52 = vmul.f32 %v1172_v61, %v4938_v43 }
 0x170   :  { %v5322_v31 = vpop.permute.xlu1 %754  ;;  %v5324_v20 = vpop.permute.xlu0 %752 }
 0x171   :  { %9138 = vst [vmem:[#allocation82_spill] sm:$0xff] %v5322_v31  ;;  %9139 = vst [vmem:[#allocation83_spill] sm:$0xff] %v5324_v20  ;;  %v1174_v31 = vmul.f32 %v1172_v61, %v4930_v38 }
 0x172   :  { %1156 = vrot.lane.b32.xlu1 %v1147_v28, %s4787_s15  ;;  %1154 = vrot.lane.b32.xlu0 %v1146_v18, %s4787_s15  ;;  %v1173_v28 = vmul.f32 %v1172_v61, %v4932_v40 }
 0x174   :  { %v5330_v9 = vpop.permute.xlu1 %777  ;;  %v5332_v47 = vpop.permute.xlu0 %775 }
 0x175   :  { %9140 = vst [vmem:[#allocation84_spill] sm:$0xff] %v5330_v9  ;;  %9141 = vst [vmem:[#allocation85_spill] sm:$0xff] %v5332_v47  ;;  %v1175_v47 = vmul.f32 %v1172_v61, %v4940_v44  ;;  %v1199_v9 = vstv %s4487_s23  ;;  %s4510_s23 = sld [smem:[#allocation9 + $0x44]] }
 0x176   :  { %1160 = vrot.lane.b32.xlu1 %v1149_v62, %s4787_s15  ;;  %1158 = vrot.lane.b32.xlu0 %v1148_v34, %s4787_s15  ;;  %v1203_v61 = vmul.f32 %v1199_v9, %v4872_v3 }
 0x178   :  { %v5338_v20 = vpop.permute.xlu1 %781  ;;  %v5340_v18 = vpop.permute.xlu0 %779 }
 0x179   :  { %9142 = vst [vmem:[#allocation86_spill] sm:$0xff] %v5338_v20  ;;  %9143 = vst [vmem:[#allocation87_spill] sm:$0xff] %v5340_v18  ;;  %v1201_v20 = vmul.f32 %v1199_v9, %v4874_v4 }
 0x17a   :  { %1183 = vrot.lane.b32.xlu1 %v1174_v31, %s4787_s15  ;;  %1181 = vrot.lane.b32.xlu0 %v1173_v28, %s4787_s15  ;;  %v1200_v31 = vmul.f32 %v1199_v9, %v4870_v1 }
 0x17c   :  { %v5346_v62 = vpop.permute.xlu1 %804  ;;  %v5348_v34 = vpop.permute.xlu0 %802 }
 0x17d   :  { %9144 = vst [vmem:[#allocation88_spill] sm:$0xff] %v5346_v62  ;;  %9145 = vst [vmem:[#allocation89_spill] sm:$0xff] %v5348_v34  ;;  %v1202_v34 = vmul.f32 %v1199_v9, %v4868_v0 }
 0x17e   :  { %1187 = vrot.lane.b32.xlu1 %v1176_v52, %s4787_s15  ;;  %1185 = vrot.lane.b32.xlu0 %v1175_v47, %s4787_s15  ;;  %v1227_v52 = vstv %s4488_s25  ;;  %s4511_s25 = sld [smem:[#allocation9 + $0x45]] }
 0x17f   :  { %v1231_v9 = vmul.f32 %v1227_v52, %v4872_v3 }
 0x180   :  { %v5354_v18 = vpop.permute.xlu1 %808  ;;  %v5356_v28 = vpop.permute.xlu0 %806 }
 0x181   :  { %9146 = vst [vmem:[#allocation90_spill] sm:$0xff] %v5354_v18  ;;  %9147 = vst [vmem:[#allocation91_spill] sm:$0xff] %v5356_v28  ;;  %v1229_v18 = vmul.f32 %v1227_v52, %v4874_v4 }
 0x182   :  { %1210 = vrot.lane.b32.xlu1 %v1201_v20, %s4788_s26  ;;  %1208 = vrot.lane.b32.xlu0 %v1200_v31, %s4788_s26  ;;  %v1228_v20 = vmul.f32 %v1227_v52, %v4870_v1 }
 0x184   :  { %v5362_v47 = vpop.permute.xlu1 %831  ;;  %v5364_v62 = vpop.permute.xlu0 %829 }
 0x185   :  { %9148 = vst [vmem:[#allocation92_spill] sm:$0xff] %v5362_v47  ;;  %9149 = vst [vmem:[#allocation93_spill] sm:$0xff] %v5364_v62  ;;  %v1230_v62 = vmul.f32 %v1227_v52, %v4868_v0  ;;  %v1254_v47 = vstv %s4489_s0  ;;  %s4512_s0 = sld [smem:[#allocation9 + $0x46]] }
 0x186   :  { %1214 = vrot.lane.b32.xlu1 %v1203_v61, %s4788_s26  ;;  %1212 = vrot.lane.b32.xlu0 %v1202_v34, %s4788_s26  ;;  %v1258_v52 = vmul.f32 %v1254_v47, %v4872_v3 }
 0x188   :  { %v5370_v28 = vpop.permute.xlu1 %835  ;;  %v5372_v31 = vpop.permute.xlu0 %833 }
 0x189   :  { %9150 = vst [vmem:[#allocation94_spill] sm:$0xff] %v5370_v28  ;;  %9151 = vst [vmem:[#allocation95_spill] sm:$0xff] %v5372_v31  ;;  %v1256_v28 = vmul.f32 %v1254_v47, %v4874_v4 }
 0x18a   :  { %1238 = vrot.lane.b32.xlu1 %v1229_v18, %s4788_s26  ;;  %1236 = vrot.lane.b32.xlu0 %v1228_v20, %s4788_s26  ;;  %v1255_v18 = vmul.f32 %v1254_v47, %v4870_v1 }
 0x18c   :  { %v5378_v61 = vpop.permute.xlu1 %858  ;;  %v5380_v34 = vpop.permute.xlu0 %856 }
 0x18d   :  { %9152 = vst [vmem:[#allocation96_spill] sm:$0xff] %v5378_v61  ;;  %9153 = vst [vmem:[#allocation97_spill] sm:$0xff] %v5380_v34  ;;  %v1257_v34 = vmul.f32 %v1254_v47, %v4868_v0  ;;  %v1281_v61 = vstv %s4490_s2  ;;  %v1308_v47 = vstv %s4491_s27  ;;  %s4513_s2 = sld [smem:[#allocation9 + $0x47]]  ;;  %s4514_s27 = sld [smem:[#allocation9 + $0x48]] }
 0x18e   :  { %1242 = vrot.lane.b32.xlu1 %v1231_v9, %s4788_s26  ;;  %1240 = vrot.lane.b32.xlu0 %v1230_v62, %s4788_s26  ;;  %v1283_v1 = vmul.f32 %v1281_v61, %v4898_v19  ;;  %v1282_v4 = vmul.f32 %v1281_v61, %v4900_v21  ;;  %v1285_v0 = vmul.f32 %v1281_v61, %v4906_v24 }
 0x18f   :  { %v1284_v3 = vmul.f32 %v1281_v61, %v4908_v25  ;;  %v1312_v61 = vmul.f32 %v1308_v47, %v4906_v24 }
 0x190   :  { %v5386_v31 = vpop.permute.xlu1 %862  ;;  %v5388_v20 = vpop.permute.xlu0 %860 }
 0x191   :  { %9154 = vst [vmem:[#allocation98_spill] sm:$0xff] %v5386_v31  ;;  %9155 = vst [vmem:[#allocation99_spill] sm:$0xff] %v5388_v20 }
 0x192   :  { %1265 = vrot.lane.b32.xlu1 %v1256_v28, %s4788_s26  ;;  %1263 = vrot.lane.b32.xlu0 %v1255_v18, %s4788_s26 }
 0x194   :  { %v5394_v9 = vpop.permute.xlu1 %885  ;;  %v5396_v62 = vpop.permute.xlu0 %883 }
 0x195   :  { %9156 = vst [vmem:[#allocation100_spill] sm:$0xff] %v5394_v9  ;;  %9157 = vst [vmem:[#allocation101_spill] sm:$0xff] %v5396_v62  ;;  %v1633_v9 = vstv %s4503_s13  ;;  %s4448_s13 = sld [smem:[#allocation9 + $0x6]] }
 0x196   :  { %1269 = vrot.lane.b32.xlu1 %v1258_v52, %s4788_s26  ;;  %1267 = vrot.lane.b32.xlu0 %v1257_v34, %s4788_s26 }
 0x198   :  { %v5402_v28 = vpop.permute.xlu1 %889  ;;  %v5404_v18 = vpop.permute.xlu0 %887 }
 0x199   :  { %9158 = vst [vmem:[#allocation102_spill] sm:$0xff] %v5402_v28  ;;  %9159 = vst [vmem:[#allocation103_spill] sm:$0xff] %v5404_v18  ;;  %v1310_v28 = vmul.f32 %v1308_v47, %v4898_v19 }
 0x19a   :  { %1292 = vrot.lane.b32.xlu1 %v1283_v1, %s4788_s26  ;;  %1290 = vrot.lane.b32.xlu0 %v1282_v4, %s4788_s26  ;;  %v1309_v1 = vmul.f32 %v1308_v47, %v4900_v21 }
 0x19c   :  { %v5410_v52 = vpop.permute.xlu1 %912  ;;  %v5412_v34 = vpop.permute.xlu0 %910 }
 0x19d   :  { %9160 = vst [vmem:[#allocation104_spill] sm:$0xff] %v5410_v52  ;;  %9161 = vst [vmem:[#allocation105_spill] sm:$0xff] %v5412_v34  ;;  %v1311_v34 = vmul.f32 %v1308_v47, %v4908_v25  ;;  %v1335_v52 = vstv %s4492_s28  ;;  %s4515_s28 = sld [smem:[#allocation9 + $0x49]] }
 0x19e   :  { %1296 = vrot.lane.b32.xlu1 %v1285_v0, %s4788_s26  ;;  %1294 = vrot.lane.b32.xlu0 %v1284_v3, %s4788_s26  ;;  %v1339_v47 = vmul.f32 %v1335_v52, %v4906_v24 }
 0x1a0   :  { %v5418_v18 = vpop.permute.xlu1 %916  ;;  %v5420_v4 = vpop.permute.xlu0 %914 }
 0x1a1   :  { %9162 = vst [vmem:[#allocation106_spill] sm:$0xff] %v5418_v18  ;;  %9163 = vst [vmem:[#allocation107_spill] sm:$0xff] %v5420_v4  ;;  %v1337_v18 = vmul.f32 %v1335_v52, %v4898_v19 }
 0x1a2   :  { %1319 = vrot.lane.b32.xlu1 %v1310_v28, %s4788_s26  ;;  %1317 = vrot.lane.b32.xlu0 %v1309_v1, %s4788_s26  ;;  %v1336_v28 = vmul.f32 %v1335_v52, %v4900_v21 }
 0x1a4   :  { %v5426_v0 = vpop.permute.xlu1 %939  ;;  %v5428_v3 = vpop.permute.xlu0 %937 }
 0x1a5   :  { %9164 = vst [vmem:[#allocation108_spill] sm:$0xff] %v5426_v0  ;;  %9165 = vst [vmem:[#allocation109_spill] sm:$0xff] %v5428_v3  ;;  %v1338_v3 = vmul.f32 %v1335_v52, %v4908_v25  ;;  %v1362_v0 = vstv %s4493_s29  ;;  %v1389_v52 = vstv %s4494_s30  ;;  %s4791_s29 = smov 78   ;;  %s4516_s30 = sld [smem:[#allocation9 + $0x4a]] }
 0x1a6   :  { %1323 = vrot.lane.b32.xlu1 %v1312_v61, %s4788_s26  ;;  %1321 = vrot.lane.b32.xlu0 %v1311_v34, %s4788_s26  ;;  %v1364_v19 = vmul.f32 %v1362_v0, %v4930_v38  ;;  %v1363_v21 = vmul.f32 %v1362_v0, %v4932_v40  ;;  %v1366_v24 = vmul.f32 %v1362_v0, %v4938_v43 }
 0x1a7   :  { %v1365_v25 = vmul.f32 %v1362_v0, %v4940_v44  ;;  %v1393_v0 = vmul.f32 %v1389_v52, %v4938_v43 }
 0x1a8   :  { %v5434_v4 = vpop.permute.xlu1 %943  ;;  %v5436_v1 = vpop.permute.xlu0 %941 }
 0x1a9   :  { %9166 = vst [vmem:[#allocation110_spill] sm:$0xff] %v5434_v4  ;;  %9167 = vst [vmem:[#allocation111_spill] sm:$0xff] %v5436_v1 }
 0x1aa   :  { %1346 = vrot.lane.b32.xlu1 %v1337_v18, %s4788_s26  ;;  %1344 = vrot.lane.b32.xlu0 %v1336_v28, %s4788_s26 }
 0x1ac   :  { %v5442_v61 = vpop.permute.xlu1 %966  ;;  %v5444_v34 = vpop.permute.xlu0 %964 }
 0x1ad   :  { %9168 = vst [vmem:[#allocation112_spill] sm:$0xff] %v5442_v61  ;;  %9169 = vst [vmem:[#allocation113_spill] sm:$0xff] %v5444_v34  ;;  %v1552_v61 = vstv %s4500_s12  ;;  %s4445_s12 = sld [smem:[#allocation9 + $0x3]] }
 0x1ae   :  { %1350 = vrot.lane.b32.xlu1 %v1339_v47, %s4788_s26  ;;  %1348 = vrot.lane.b32.xlu0 %v1338_v3, %s4788_s26 }
 0x1b0   :  { %v5450_v18 = vpop.permute.xlu1 %970  ;;  %v5452_v28 = vpop.permute.xlu0 %968 }
 0x1b1   :  { %9170 = vst [vmem:[#allocation114_spill] sm:$0xff] %v5450_v18  ;;  %9171 = vst [vmem:[#allocation115_spill] sm:$0xff] %v5452_v28  ;;  %v1391_v18 = vmul.f32 %v1389_v52, %v4930_v38 }
 0x1b2   :  { %1373 = vrot.lane.b32.xlu1 %v1364_v19, %s4788_s26  ;;  %1371 = vrot.lane.b32.xlu0 %v1363_v21, %s4788_s26  ;;  %v1390_v19 = vmul.f32 %v1389_v52, %v4932_v40 }
 0x1b4   :  { %v5458_v47 = vpop.permute.xlu1 %994  ;;  %v5460_v3 = vpop.permute.xlu0 %992 }
 0x1b5   :  { %9172 = vst [vmem:[#allocation116_spill] sm:$0xff] %v5458_v47  ;;  %9173 = vst [vmem:[#allocation117_spill] sm:$0xff] %v5460_v3  ;;  %v1392_v3 = vmul.f32 %v1389_v52, %v4940_v44  ;;  %v1416_v47 = vstv %s4495_s7  ;;  %s4517_s7 = sld [smem:[#allocation9 + $0x4b]] }
 0x1b6   :  { %1377 = vrot.lane.b32.xlu1 %v1366_v24, %s4788_s26  ;;  %1375 = vrot.lane.b32.xlu0 %v1365_v25, %s4788_s26  ;;  %v1420_v52 = vmul.f32 %v1416_v47, %v4938_v43 }
 0x1b8   :  { %v5466_v28 = vpop.permute.xlu1 %998  ;;  %v5468_v21 = vpop.permute.xlu0 %996 }
 0x1b9   :  { %9174 = vst [vmem:[#allocation118_spill] sm:$0xff] %v5466_v28  ;;  %9175 = vst [vmem:[#allocation119_spill] sm:$0xff] %v5468_v21  ;;  %v1418_v28 = vmul.f32 %v1416_v47, %v4930_v38  ;;  %v5496_v38 = vld [vmem:[#allocation3 + $0x8] sm:$0xff] }
 0x1ba   :  { %1400 = vrot.lane.b32.xlu1 %v1391_v18, %s4788_s26  ;;  %1398 = vrot.lane.b32.xlu0 %v1390_v19, %s4788_s26  ;;  %v1417_v18 = vmul.f32 %v1416_v47, %v4932_v40 }
 0x1bc   :  { %v5474_v24 = vpop.permute.xlu1 %1021  ;;  %v5476_v25 = vpop.permute.xlu0 %1019 }
 0x1bd   :  { %9176 = vst [vmem:[#allocation120_spill] sm:$0xff] %v5474_v24  ;;  %9177 = vst [vmem:[#allocation121_spill] sm:$0xff] %v5476_v25  ;;  %v1419_v25 = vmul.f32 %v1416_v47, %v4940_v44  ;;  %v1443_v24 = vstv %s4496_s8  ;;  %v5508_v47 = vld [vmem:[#allocation3 + $0x18] sm:$0xff]  ;;  %s4518_s8 = sld [smem:[#allocation9 + $0x4c]] }
 0x1be   :  { %1404 = vrot.lane.b32.xlu1 %v1393_v0, %s4788_s26  ;;  %1402 = vrot.lane.b32.xlu0 %v1392_v3, %s4788_s26  ;;  %v1445_v40 = vmul.f32 %v5496_v38, %v1443_v24 }
 0x1c0   :  { %v5482_v21 = vpop.permute.xlu1 %1025  ;;  %v5484_v19 = vpop.permute.xlu0 %1023 }
 0x1c1   :  { %9178 = vst [vmem:[#allocation122_spill] sm:$0xff] %v5482_v21  ;;  %9179 = vst [vmem:[#allocation123_spill] sm:$0xff] %v5484_v19 }
 0x1c2   :  { %1427 = vrot.lane.b32.xlu1 %v1418_v28, %s4788_s26  ;;  %1425 = vrot.lane.b32.xlu0 %v1417_v18, %s4788_s26  ;;  %v5499_v28 = vld [vmem:[#allocation3] sm:$0xff] }
 0x1c3   :  { %v1444_v43 = vmul.f32 %v5499_v28, %v1443_v24 }
 0x1c4   :  { %v5490_v0 = vpop.permute.xlu1 %1048  ;;  %v5492_v3 = vpop.permute.xlu0 %1046 }
 0x1c5   :  { %9180 = vst [vmem:[#allocation124_spill] sm:$0xff] %v5490_v0  ;;  %9181 = vst [vmem:[#allocation125_spill] sm:$0xff] %v5492_v3  ;;  %v1471_v0 = vstv %s4497_s9  ;;  %s4519_s9 = sld [smem:[#allocation9 + $0x4d]] }
 0x1c6   :  { %1431 = vrot.lane.b32.xlu1 %v1420_v52, %s4788_s26  ;;  %1429 = vrot.lane.b32.xlu0 %v1419_v25, %s4788_s26  ;;  %v1447_v25 = vmul.f32 %v5508_v47, %v1443_v24  ;;  %v5511_v52 = vld [vmem:[#allocation3 + $0x10] sm:$0xff] }
 0x1c7   :  { %v1446_v3 = vmul.f32 %v5511_v52, %v1443_v24  ;;  %v1475_v24 = vmul.f32 %v5508_v47, %v1471_v0 }
 0x1c8   :  { %v5502_v18 = vpop.permute.xlu1 %1052  ;;  %v5504_v44 = vpop.permute.xlu0 %1050 }
 0x1c9   :  { %9182 = vst [vmem:[#allocation126_spill] sm:$0xff] %v5502_v18  ;;  %9183 = vst [vmem:[#allocation127_spill] sm:$0xff] %v5504_v44 }
 0x1ca   :  { %1454 = vrot.lane.b32.xlu1 %v1445_v40, %s4789_s10  ;;  %1452 = vrot.lane.b32.xlu0 %v1444_v43, %s4789_s10  ;;  %v1473_v40 = vmul.f32 %v5496_v38, %v1471_v0  ;;  %v1472_v43 = vmul.f32 %v5499_v28, %v1471_v0 }
 0x1cc   :  { %v5514_v21 = vpop.permute.xlu1 %1075  ;;  %v5516_v18 = vpop.permute.xlu0 %1073 }
 0x1cd   :  { %9184 = vst [vmem:[#allocation128_spill] sm:$0xff] %v5514_v21  ;;  %9185 = vst [vmem:[#allocation129_spill] sm:$0xff] %v5516_v18  ;;  %v1474_v18 = vmul.f32 %v5511_v52, %v1471_v0  ;;  %v1498_v21 = vstv %s4498_s11  ;;  %s4520_s11 = sld [smem:[#allocation9 + $0x4e]] }
 0x1ce   :  { %1458 = vrot.lane.b32.xlu1 %v1447_v25, %s4789_s10  ;;  %1456 = vrot.lane.b32.xlu0 %v1446_v3, %s4789_s10  ;;  %v1502_v0 = vmul.f32 %v5508_v47, %v1498_v21 }
 0x1d0   :  { %v5522_v44 = vpop.permute.xlu1 %1079  ;;  %v5524_v19 = vpop.permute.xlu0 %1077 }
 0x1d1   :  { %9186 = vst [vmem:[#allocation130_spill] sm:$0xff] %v5522_v44  ;;  %9187 = vst [vmem:[#allocation131_spill] sm:$0xff] %v5524_v19  ;;  %v1500_v44 = vmul.f32 %v5496_v38, %v1498_v21 }
 0x1d2   :  { %1482 = vrot.lane.b32.xlu1 %v1473_v40, %s4789_s10  ;;  %1480 = vrot.lane.b32.xlu0 %v1472_v43, %s4789_s10  ;;  %v1499_v40 = vmul.f32 %v5499_v28, %v1498_v21 }
 0x1d4   :  { %v5530_v25 = vpop.permute.xlu1 %1102  ;;  %v5532_v3 = vpop.permute.xlu0 %1100 }
 0x1d5   :  { %9188 = vst [vmem:[#allocation132_spill] sm:$0xff] %v5530_v25  ;;  %9189 = vst [vmem:[#allocation133_spill] sm:$0xff] %v5532_v3  ;;  %v1501_v3 = vmul.f32 %v5511_v52, %v1498_v21  ;;  %v1525_v25 = vstv %s4499_s1  ;;  %s4521_s1 = sld [smem:[#allocation9 + $0x4f]] }
 0x1d6   :  { %1486 = vrot.lane.b32.xlu1 %v1475_v24, %s4789_s10  ;;  %1484 = vrot.lane.b32.xlu0 %v1474_v18, %s4789_s10 }
 0x1d8   :  { %v5538_v19 = vpop.permute.xlu1 %1106  ;;  %v5540_v43 = vpop.permute.xlu0 %1104 }
 0x1d9   :  { %9190 = vst [vmem:[#allocation134_spill] sm:$0xff] %v5538_v19  ;;  %9191 = vst [vmem:[#allocation135_spill] sm:$0xff] %v5540_v43  ;;  %v5552_v19 = vld [vmem:[#allocation3 + $0x28] sm:$0xff]  ;;  %v5555_v43 = vld [vmem:[#allocation3 + $0x20] sm:$0xff] }
 0x1da   :  { %1509 = vrot.lane.b32.xlu1 %v1500_v44, %s4789_s10  ;;  %1507 = vrot.lane.b32.xlu0 %v1499_v40, %s4789_s10  ;;  %v1527_v44 = vmul.f32 %v5552_v19, %v1525_v25  ;;  %v1526_v40 = vmul.f32 %v5555_v43, %v1525_v25 }
 0x1dc   :  { %v5546_v24 = vpop.permute.xlu1 %1129  ;;  %v5548_v18 = vpop.permute.xlu0 %1127 }
 0x1dd   :  { %9192 = vst [vmem:[#allocation136_spill] sm:$0xff] %v5546_v24  ;;  %9193 = vst [vmem:[#allocation137_spill] sm:$0xff] %v5548_v18  ;;  %v5564_v18 = vld [vmem:[#allocation3 + $0x38] sm:$0xff] }
 0x1de   :  { %1513 = vrot.lane.b32.xlu1 %v1502_v0, %s4789_s10  ;;  %1511 = vrot.lane.b32.xlu0 %v1501_v3, %s4789_s10  ;;  %v1529_v3 = vmul.f32 %v5564_v18, %v1525_v25  ;;  %v5567_v0 = vld [vmem:[#allocation3 + $0x30] sm:$0xff] }
 0x1df   :  { %v1528_v24 = vmul.f32 %v5567_v0, %v1525_v25  ;;  %v1556_v25 = vmul.f32 %v5564_v18, %v1552_v61 }
 0x1e0   :  { %v5558_v34 = vpop.permute.xlu1 %1133  ;;  %v5560_v21 = vpop.permute.xlu0 %1131 }
 0x1e1   :  { %9194 = vst [vmem:[#allocation138_spill] sm:$0xff] %v5558_v34  ;;  %9195 = vst [vmem:[#allocation139_spill] sm:$0xff] %v5560_v21 }
 0x1e2   :  { %1536 = vrot.lane.b32.xlu1 %v1527_v44, %s4789_s10  ;;  %1534 = vrot.lane.b32.xlu0 %v1526_v40, %s4789_s10  ;;  %v1554_v44 = vmul.f32 %v5552_v19, %v1552_v61  ;;  %v1553_v40 = vmul.f32 %v5555_v43, %v1552_v61 }
 0x1e4   :  { %v5570_v4 = vpop.permute.xlu1 %1156  ;;  %v5572_v1 = vpop.permute.xlu0 %1154 }
 0x1e5   :  { %9196 = vst [vmem:[#allocation140_spill] sm:$0xff] %v5570_v4  ;;  %9197 = vst [vmem:[#allocation141_spill] sm:$0xff] %v5572_v1  ;;  %v1555_v1 = vmul.f32 %v5567_v0, %v1552_v61  ;;  %v1579_v4 = vstv %s4501_s4  ;;  %s126_s4 = sld [smem:[#allocation9]] }
 0x1e6   :  { %1540 = vrot.lane.b32.xlu1 %v1529_v3, %s4789_s10  ;;  %1538 = vrot.lane.b32.xlu0 %v1528_v24, %s4789_s10  ;;  %v1583_v61 = vmul.f32 %v5564_v18, %v1579_v4 }
 0x1e8   :  { %v5578_v34 = vpop.permute.xlu1 %1160  ;;  %v5580_v21 = vpop.permute.xlu0 %1158 }
 0x1e9   :  { %9198 = vst [vmem:[#allocation142_spill] sm:$0xff] %v5578_v34  ;;  %9199 = vst [vmem:[#allocation143_spill] sm:$0xff] %v5580_v21  ;;  %v1581_v34 = vmul.f32 %v5552_v19, %v1579_v4 }
 0x1ea   :  { %1563 = vrot.lane.b32.xlu1 %v1554_v44, %s4789_s10  ;;  %1561 = vrot.lane.b32.xlu0 %v1553_v40, %s4789_s10  ;;  %v1580_v44 = vmul.f32 %v5555_v43, %v1579_v4 }
 0x1ec   :  { %v5586_v3 = vpop.permute.xlu1 %1183  ;;  %v5588_v24 = vpop.permute.xlu0 %1181 }
 0x1ed   :  { %9200 = vst [vmem:[#allocation144_spill] sm:$0xff] %v5586_v3  ;;  %9201 = vst [vmem:[#allocation145_spill] sm:$0xff] %v5588_v24  ;;  %v1582_v24 = vmul.f32 %v5567_v0, %v1579_v4  ;;  %v1606_v3 = vstv %s4502_s5  ;;  %s4446_s5 = sld [smem:[#allocation9 + $0x4]] }
 0x1ee   :  { %1567 = vrot.lane.b32.xlu1 %v1556_v25, %s4789_s10  ;;  %1565 = vrot.lane.b32.xlu0 %v1555_v1, %s4789_s10 }
 0x1f0   :  { %v5594_v21 = vpop.permute.xlu1 %1187  ;;  %v5596_v40 = vpop.permute.xlu0 %1185 }
 0x1f1   :  { %9202 = vst [vmem:[#allocation146_spill] sm:$0xff] %v5594_v21  ;;  %9203 = vst [vmem:[#allocation147_spill] sm:$0xff] %v5596_v40  ;;  %v5608_v21 = vld [vmem:[#allocation3 + $0x48] sm:$0xff]  ;;  %v5611_v40 = vld [vmem:[#allocation3 + $0x40] sm:$0xff] }
 0x1f2   :  { %1590 = vrot.lane.b32.xlu1 %v1581_v34, %s4789_s10  ;;  %1588 = vrot.lane.b32.xlu0 %v1580_v44, %s4789_s10  ;;  %v1608_v34 = vmul.f32 %v5608_v21, %v1606_v3  ;;  %v1607_v44 = vmul.f32 %v5611_v40, %v1606_v3 }
 0x1f4   :  { %v5602_v25 = vpop.permute.xlu1 %1210  ;;  %v5604_v1 = vpop.permute.xlu0 %1208 }
 0x1f5   :  { %9204 = vst [vmem:[#allocation148_spill] sm:$0xff] %v5602_v25  ;;  %9205 = vst [vmem:[#allocation149_spill] sm:$0xff] %v5604_v1  ;;  %v5620_v1 = vld [vmem:[#allocation3 + $0x58] sm:$0xff] }
 0x1f6   :  { %1594 = vrot.lane.b32.xlu1 %v1583_v61, %s4789_s10  ;;  %1592 = vrot.lane.b32.xlu0 %v1582_v24, %s4789_s10  ;;  %v1610_v24 = vmul.f32 %v5620_v1, %v1606_v3  ;;  %v5623_v61 = vld [vmem:[#allocation3 + $0x50] sm:$0xff] }
 0x1f7   :  { %v1609_v25 = vmul.f32 %v5623_v61, %v1606_v3  ;;  %v1637_v3 = vmul.f32 %v5620_v1, %v1633_v9 }
 0x1f8   :  { %v5614_v62 = vpop.permute.xlu1 %1214  ;;  %v5616_v4 = vpop.permute.xlu0 %1212 }
 0x1f9   :  { %9206 = vst [vmem:[#allocation150_spill] sm:$0xff] %v5614_v62  ;;  %9207 = vst [vmem:[#allocation151_spill] sm:$0xff] %v5616_v4 }
 0x1fa   :  { %1617 = vrot.lane.b32.xlu1 %v1608_v34, %s4789_s10  ;;  %1615 = vrot.lane.b32.xlu0 %v1607_v44, %s4789_s10  ;;  %v1635_v34 = vmul.f32 %v5608_v21, %v1633_v9  ;;  %v1634_v44 = vmul.f32 %v5611_v40, %v1633_v9 }
 0x1fc   :  { %v5626_v31 = vpop.permute.xlu1 %1238  ;;  %v5628_v20 = vpop.permute.xlu0 %1236 }
 0x1fd   :  { %9208 = vst [vmem:[#allocation152_spill] sm:$0xff] %v5626_v31  ;;  %9209 = vst [vmem:[#allocation153_spill] sm:$0xff] %v5628_v20  ;;  %v1636_v20 = vmul.f32 %v5623_v61, %v1633_v9  ;;  %v1660_v31 = vstv %s4504_s16  ;;  %s114_s16 = sld [smem:[#allocation10]] }
 0x1fe   :  { %1621 = vrot.lane.b32.xlu1 %v1610_v24, %s4789_s10  ;;  %1619 = vrot.lane.b32.xlu0 %v1609_v25, %s4789_s10  ;;  %v1664_v9 = vmul.f32 %v5620_v1, %v1660_v31 }
 0x200   :  { %v5634_v62 = vpop.permute.xlu1 %1242  ;;  %v5636_v4 = vpop.permute.xlu0 %1240 }
 0x201   :  { %9210 = vst [vmem:[#allocation154_spill] sm:$0xff] %v5634_v62  ;;  %9211 = vst [vmem:[#allocation155_spill] sm:$0xff] %v5636_v4  ;;  %v1662_v62 = vmul.f32 %v5608_v21, %v1660_v31 }
 0x202   :  { %1644 = vrot.lane.b32.xlu1 %v1635_v34, %s4789_s10  ;;  %1642 = vrot.lane.b32.xlu0 %v1634_v44, %s4789_s10  ;;  %v1661_v34 = vmul.f32 %v5611_v40, %v1660_v31 }
 0x203   :  { %v115_v10 = vstv %s114_s16  ;;  %s4546_s16 = sld [smem:[#allocation12 + $0x16]] }
 0x204   :  { %v5642_v24 = vpop.permute.xlu1 %1265  ;;  %v5644_v25 = vpop.permute.xlu0 %1263 }
 0x205   :  { %9212 = vst [vmem:[#allocation156_spill] sm:$0xff] %v5642_v24  ;;  %9213 = vst [vmem:[#allocation157_spill] sm:$0xff] %v5644_v25  ;;  %v1663_v25 = vmul.f32 %v5623_v61, %v1660_v31  ;;  %v1687_v24 = vstv %s4505_s17  ;;  %s4522_s17 = sld [smem:[#allocation9 + $0x50]] }
 0x206   :  { %1648 = vrot.lane.b32.xlu1 %v1637_v3, %s4789_s10  ;;  %1646 = vrot.lane.b32.xlu0 %v1636_v20, %s4789_s10  ;;  %v1691_v31 = vmul.f32 %v5508_v47, %v1687_v24 }
 0x208   :  { %v5650_v4 = vpop.permute.xlu1 %1269  ;;  %v5652_v44 = vpop.permute.xlu0 %1267 }
 0x209   :  { %9214 = vst [vmem:[#allocation158_spill] sm:$0xff] %v5650_v4  ;;  %9215 = vst [vmem:[#allocation159_spill] sm:$0xff] %v5652_v44  ;;  %v1689_v4 = vmul.f32 %v5496_v38, %v1687_v24 }
 0x20a   :  { %1671 = vrot.lane.b32.xlu1 %v1662_v62, %s4789_s10  ;;  %1669 = vrot.lane.b32.xlu0 %v1661_v34, %s4789_s10  ;;  %v1688_v62 = vmul.f32 %v5499_v28, %v1687_v24 }
 0x20b   :  { %v2148_v56 = vstv %s4522_s17  ;;  %s4547_s17 = sld [smem:[#allocation12 + $0x17]] }
 0x20c   :  { %v5658_v3 = vpop.permute.xlu1 %1292  ;;  %v5660_v20 = vpop.permute.xlu0 %1290  ;;  %v2152_v26 = vmul.f32 %v5620_v1, %v2148_v56 }
 0x20d   :  { %9216 = vst [vmem:[#allocation160_spill] sm:$0xff] %v5658_v3  ;;  %9217 = vst [vmem:[#allocation161_spill] sm:$0xff] %v5660_v20  ;;  %v1690_v20 = vmul.f32 %v5511_v52, %v1687_v24 }
 0x20e   :  { %1675 = vrot.lane.b32.xlu1 %v1664_v9, %s4789_s10  ;;  %1673 = vrot.lane.b32.xlu0 %v1663_v25, %s4789_s10  ;;  %v1715_v9 = vstv %s4506_s18  ;;  %s5914_s18 = sld [smem:[#allocation9 + $0x1]] }
 0x20f   :  { %v1719_v24 = vmul.f32 %v5508_v47, %v1715_v9 }
 0x210   :  { %v5666_v44 = vpop.permute.xlu1 %1296  ;;  %v5668_v34 = vpop.permute.xlu0 %1294 }
 0x211   :  { %9218 = vst [vmem:[#allocation162_spill] sm:$0xff] %v5666_v44  ;;  %9219 = vst [vmem:[#allocation163_spill] sm:$0xff] %v5668_v34  ;;  %v1717_v44 = vmul.f32 %v5496_v38, %v1715_v9 }
 0x212   :  { %1698 = vrot.lane.b32.xlu1 %v1689_v4, %s4790_s19  ;;  %1696 = vrot.lane.b32.xlu0 %v1688_v62, %s4790_s19  ;;  %v1716_v4 = vmul.f32 %v5499_v28, %v1715_v9 }
 0x214   :  { %v5674_v25 = vpop.permute.xlu1 %1319  ;;  %v5676_v3 = vpop.permute.xlu0 %1317  ;;  %v135_v35 = vstv %s5914_s18  ;;  %s4548_s18 = sld [smem:[#allocation12 + $0x18]] }
 0x215   :  { %9220 = vst [vmem:[#allocation164_spill] sm:$0xff] %v5674_v25  ;;  %9221 = vst [vmem:[#allocation165_spill] sm:$0xff] %v5676_v3  ;;  %v1718_v3 = vmul.f32 %v5511_v52, %v1715_v9  ;;  %v1742_v25 = vstv %s4507_s20  ;;  %s5920_s20 = sld [smem:[#allocation9 + $0x2]]  ;;  %v137_v51 = vmul.f32 %v5496_v38, %v135_v35 }
 0x216   :  { %1702 = vrot.lane.b32.xlu1 %v1691_v31, %s4790_s19  ;;  %1700 = vrot.lane.b32.xlu0 %v1690_v20, %s4790_s19  ;;  %v1746_v9 = vmul.f32 %v5508_v47, %v1742_v25 }
 0x218   :  { %v5682_v34 = vpop.permute.xlu1 %1323  ;;  %v5684_v62 = vpop.permute.xlu0 %1321 }
 0x219   :  { %9222 = vst [vmem:[#allocation166_spill] sm:$0xff] %v5682_v34  ;;  %9223 = vst [vmem:[#allocation167_spill] sm:$0xff] %v5684_v62  ;;  %v1744_v34 = vmul.f32 %v5496_v38, %v1742_v25 }
 0x21a   :  { %1726 = vrot.lane.b32.xlu1 %v1717_v44, %s4790_s19  ;;  %1724 = vrot.lane.b32.xlu0 %v1716_v4, %s4790_s19  ;;  %v1743_v44 = vmul.f32 %v5499_v28, %v1742_v25 }
 0x21b   :  { %v143_v14 = vstv %s5920_s20  ;;  %s4549_s20 = sld [smem:[#allocation12 + $0x19]] }
 0x21c   :  { %v5690_v31 = vpop.permute.xlu1 %1346  ;;  %v5692_v20 = vpop.permute.xlu0 %1344 }
 0x21d   :  { %9224 = vst [vmem:[#allocation168_spill] sm:$0xff] %v5690_v31  ;;  %9225 = vst [vmem:[#allocation169_spill] sm:$0xff] %v5692_v20  ;;  %v1745_v20 = vmul.f32 %v5511_v52, %v1742_v25  ;;  %v1769_v31 = vstv %s4508_s21  ;;  %s5922_s21 = sld [smem:[#allocation9 + $0x5]] }
 0x21e   :  { %1730 = vrot.lane.b32.xlu1 %v1719_v24, %s4790_s19  ;;  %1728 = vrot.lane.b32.xlu0 %v1718_v3, %s4790_s19  ;;  %v1773_v25 = vmul.f32 %v5564_v18, %v1769_v31 }
 0x220   :  { %v5698_v62 = vpop.permute.xlu1 %1350  ;;  %v5700_v4 = vpop.permute.xlu0 %1348 }
 0x221   :  { %9226 = vst [vmem:[#allocation170_spill] sm:$0xff] %v5698_v62  ;;  %9227 = vst [vmem:[#allocation171_spill] sm:$0xff] %v5700_v4  ;;  %v1771_v62 = vmul.f32 %v5552_v19, %v1769_v31 }
 0x222   :  { %1753 = vrot.lane.b32.xlu1 %v1744_v34, %s4790_s19  ;;  %1751 = vrot.lane.b32.xlu0 %v1743_v44, %s4790_s19  ;;  %v1770_v34 = vmul.f32 %v5555_v43, %v1769_v31 }
 0x223   :  { %v173_v5 = vstv %s5922_s21  ;;  %s4550_s21 = sld [smem:[#allocation12 + $0x1a]] }
 0x224   :  { %v5706_v24 = vpop.permute.xlu1 %1373  ;;  %v5708_v3 = vpop.permute.xlu0 %1371  ;;  %v176_v16 = vmul.f32 %v5567_v0, %v173_v5 }
 0x225   :  { %9228 = vst [vmem:[#allocation172_spill] sm:$0xff] %v5706_v24  ;;  %9229 = vst [vmem:[#allocation173_spill] sm:$0xff] %v5708_v3  ;;  %v1772_v3 = vmul.f32 %v5567_v0, %v1769_v31  ;;  %v1796_v24 = vstv %s4509_s22  ;;  %s5928_s22 = sld [smem:[#allocation10 + $0x1]] }
 0x226   :  { %1757 = vrot.lane.b32.xlu1 %v1746_v9, %s4790_s19  ;;  %1755 = vrot.lane.b32.xlu0 %v1745_v20, %s4790_s19  ;;  %v1800_v31 = vmul.f32 %v5564_v18, %v1796_v24 }
 0x228   :  { %v5714_v4 = vpop.permute.xlu1 %1377  ;;  %v5716_v44 = vpop.permute.xlu0 %1375 }
 0x229   :  { %9230 = vst [vmem:[#allocation174_spill] sm:$0xff] %v5714_v4  ;;  %9231 = vst [vmem:[#allocation175_spill] sm:$0xff] %v5716_v44  ;;  %v1798_v4 = vmul.f32 %v5552_v19, %v1796_v24 }
 0x22a   :  { %1780 = vrot.lane.b32.xlu1 %v1771_v62, %s4790_s19  ;;  %1778 = vrot.lane.b32.xlu0 %v1770_v34, %s4790_s19  ;;  %v1797_v62 = vmul.f32 %v5555_v43, %v1796_v24 }
 0x22b   :  { %v117_v57 = vstv %s5928_s22  ;;  %s4551_s22 = sld [smem:[#allocation12 + $0x1b]] }
 0x22c   :  { %v5722_v9 = vpop.permute.xlu1 %1400  ;;  %v5724_v20 = vpop.permute.xlu0 %1398 }
 0x22d   :  { %9232 = vst [vmem:[#allocation176_spill] sm:$0xff] %v5722_v9  ;;  %9233 = vst [vmem:[#allocation177_spill] sm:$0xff] %v5724_v20  ;;  %v1799_v20 = vmul.f32 %v5567_v0, %v1796_v24  ;;  %v1823_v9 = vstv %s4510_s23  ;;  %s5930_s23 = sld [smem:[#allocation9 + $0x7]] }
 0x22e   :  { %1784 = vrot.lane.b32.xlu1 %v1773_v25, %s4790_s19  ;;  %1782 = vrot.lane.b32.xlu0 %v1772_v3, %s4790_s19  ;;  %v1827_v24 = vmul.f32 %v5564_v18, %v1823_v9 }
 0x230   :  { %v5730_v44 = vpop.permute.xlu1 %1404  ;;  %v5732_v34 = vpop.permute.xlu0 %1402 }
 0x231   :  { %9234 = vst [vmem:[#allocation178_spill] sm:$0xff] %v5730_v44  ;;  %9235 = vst [vmem:[#allocation179_spill] sm:$0xff] %v5732_v34  ;;  %v1825_v44 = vmul.f32 %v5552_v19, %v1823_v9 }
 0x232   :  { %1807 = vrot.lane.b32.xlu1 %v1798_v4, %s4790_s19  ;;  %1805 = vrot.lane.b32.xlu0 %v1797_v62, %s4790_s19  ;;  %v1824_v4 = vmul.f32 %v5555_v43, %v1823_v9 }
 0x233   :  { %v195_v48 = vstv %s5930_s23  ;;  %s4552_s23 = sld [smem:[#allocation12 + $0x1c]] }
 0x234   :  { %v5738_v25 = vpop.permute.xlu1 %1427  ;;  %v5740_v3 = vpop.permute.xlu0 %1425 }
 0x235   :  { %9236 = vst [vmem:[#allocation180_spill] sm:$0xff] %v5738_v25  ;;  %9237 = vst [vmem:[#allocation181_spill] sm:$0xff] %v5740_v3  ;;  %v1826_v3 = vmul.f32 %v5567_v0, %v1823_v9  ;;  %v1850_v25 = vstv %s4511_s25  ;;  %s5942_s25 = sld [smem:[#allocation10 + $0x2]] }
 0x236   :  { %1811 = vrot.lane.b32.xlu1 %v1800_v31, %s4790_s19  ;;  %1809 = vrot.lane.b32.xlu0 %v1799_v20, %s4790_s19  ;;  %v1854_v9 = vmul.f32 %v5620_v1, %v1850_v25 }
 0x238   :  { %v5746_v34 = vpop.permute.xlu1 %1431  ;;  %v5748_v62 = vpop.permute.xlu0 %1429 }
 0x239   :  { %9238 = vst [vmem:[#allocation182_spill] sm:$0xff] %v5746_v34  ;;  %9239 = vst [vmem:[#allocation183_spill] sm:$0xff] %v5748_v62  ;;  %v1852_v34 = vmul.f32 %v5608_v21, %v1850_v25 }
 0x23a   :  { %1834 = vrot.lane.b32.xlu1 %v1825_v44, %s4790_s19  ;;  %1832 = vrot.lane.b32.xlu0 %v1824_v4, %s4790_s19  ;;  %v1851_v44 = vmul.f32 %v5611_v40, %v1850_v25 }
 0x23b   :  { %v119_v29 = vstv %s5942_s25  ;;  %s4554_s25 = sld [smem:[#allocation12 + $0x1e]] }
 0x23c   :  { %v5754_v31 = vpop.permute.xlu1 %1454  ;;  %v5756_v20 = vpop.permute.xlu0 %1452 }
 0x23d   :  { %9240 = vst [vmem:[#allocation184_spill] sm:$0xff] %v5754_v31  ;;  %9241 = vst [vmem:[#allocation185_spill] sm:$0xff] %v5756_v20  ;;  %v1853_v20 = vmul.f32 %v5623_v61, %v1850_v25  ;;  %v1877_v31 = vstv %s4512_s0  ;;  %s5944_s0 = sld [smem:[#allocation9 + $0x8]] }
 0x23e   :  { %1838 = vrot.lane.b32.xlu1 %v1827_v24, %s4790_s19  ;;  %1836 = vrot.lane.b32.xlu0 %v1826_v3, %s4790_s19  ;;  %v1881_v25 = vmul.f32 %v5620_v1, %v1877_v31 }
 0x240   :  { %v5762_v62 = vpop.permute.xlu1 %1458  ;;  %v5764_v4 = vpop.permute.xlu0 %1456 }
 0x241   :  { %9242 = vst [vmem:[#allocation186_spill] sm:$0xff] %v5762_v62  ;;  %9243 = vst [vmem:[#allocation187_spill] sm:$0xff] %v5764_v4  ;;  %v1879_v62 = vmul.f32 %v5608_v21, %v1877_v31 }
 0x242   :  { %1861 = vrot.lane.b32.xlu1 %v1852_v34, %s4790_s19  ;;  %1859 = vrot.lane.b32.xlu0 %v1851_v44, %s4790_s19  ;;  %v1878_v34 = vmul.f32 %v5611_v40, %v1877_v31 }
 0x243   :  { %v203_v30 = vstv %s5944_s0  ;;  %s4555_s0 = sld [smem:[#allocation12 + $0x1f]] }
 0x244   :  { %v5770_v24 = vpop.permute.xlu1 %1482  ;;  %v5772_v3 = vpop.permute.xlu0 %1480  ;;  %v205_v23 = vmul.f32 %v5608_v21, %v203_v30 }
 0x245   :  { %9244 = vst [vmem:[#allocation188_spill] sm:$0xff] %v5770_v24  ;;  %9245 = vst [vmem:[#allocation189_spill] sm:$0xff] %v5772_v3  ;;  %v1880_v3 = vmul.f32 %v5623_v61, %v1877_v31  ;;  %v1904_v24 = vstv %s4513_s2  ;;  %s4793_s2 = smov 25  }
 0x246   :  { %1865 = vrot.lane.b32.xlu1 %v1854_v9, %s4790_s19  ;;  %1863 = vrot.lane.b32.xlu0 %v1853_v20, %s4790_s19  ;;  %v1908_v31 = vmul.f32 %v5620_v1, %v1904_v24 }
 0x248   :  { %v5778_v4 = vpop.permute.xlu1 %1486  ;;  %v5780_v44 = vpop.permute.xlu0 %1484 }
 0x249   :  { %9246 = vst [vmem:[#allocation190_spill] sm:$0xff] %v5778_v4  ;;  %9247 = vst [vmem:[#allocation191_spill] sm:$0xff] %v5780_v44  ;;  %v1906_v4 = vmul.f32 %v5608_v21, %v1904_v24 }
 0x24a   :  { %1888 = vrot.lane.b32.xlu1 %v1879_v62, %s4790_s19  ;;  %1886 = vrot.lane.b32.xlu0 %v1878_v34, %s4790_s19  ;;  %v1905_v62 = vmul.f32 %v5611_v40, %v1904_v24 }
 0x24c   :  { %v5786_v9 = vpop.permute.xlu1 %1509  ;;  %v5788_v20 = vpop.permute.xlu0 %1507 }
 0x24d   :  { %9248 = vst [vmem:[#allocation192_spill] sm:$0xff] %v5786_v9  ;;  %9249 = vst [vmem:[#allocation193_spill] sm:$0xff] %v5788_v20  ;;  %v1907_v20 = vmul.f32 %v5623_v61, %v1904_v24  ;;  %v1931_v9 = vstv %s4514_s27  ;;  %s4533_s27 = sld [smem:[#allocation12 + $0x9]] }
 0x24e   :  { %1892 = vrot.lane.b32.xlu1 %v1881_v25, %s4790_s19  ;;  %1890 = vrot.lane.b32.xlu0 %v1880_v3, %s4790_s19  ;;  %v1935_v24 = vmul.f32 %v5508_v47, %v1931_v9 }
 0x250   :  { %v5794_v44 = vpop.permute.xlu1 %1513  ;;  %v5796_v34 = vpop.permute.xlu0 %1511 }
 0x251   :  { %9250 = vst [vmem:[#allocation194_spill] sm:$0xff] %v5794_v44  ;;  %9251 = vst [vmem:[#allocation195_spill] sm:$0xff] %v5796_v34  ;;  %v1933_v44 = vmul.f32 %v5496_v38, %v1931_v9 }
 0x252   :  { %1915 = vrot.lane.b32.xlu1 %v1906_v4, %s4790_s19  ;;  %1913 = vrot.lane.b32.xlu0 %v1905_v62, %s4790_s19  ;;  %v1932_v4 = vmul.f32 %v5499_v28, %v1931_v9 }
 0x254   :  { %v5802_v25 = vpop.permute.xlu1 %1536  ;;  %v5804_v3 = vpop.permute.xlu0 %1534 }
 0x255   :  { %9252 = vst [vmem:[#allocation196_spill] sm:$0xff] %v5802_v25  ;;  %9253 = vst [vmem:[#allocation197_spill] sm:$0xff] %v5804_v3  ;;  %v1934_v3 = vmul.f32 %v5511_v52, %v1931_v9 }
 0x256   :  { %1919 = vrot.lane.b32.xlu1 %v1908_v31, %s4790_s19  ;;  %1917 = vrot.lane.b32.xlu0 %v1907_v20, %s4790_s19  ;;  %v1959_v31 = vstv %s4515_s28  ;;  %s4534_s28 = sld [smem:[#allocation12 + $0xa]] }
 0x257   :  { %v1963_v9 = vmul.f32 %v5508_v47, %v1959_v31 }
 0x258   :  { %v5810_v34 = vpop.permute.xlu1 %1540  ;;  %v5812_v62 = vpop.permute.xlu0 %1538 }
 0x259   :  { %9254 = vst [vmem:[#allocation198_spill] sm:$0xff] %v5810_v34  ;;  %9255 = vst [vmem:[#allocation199_spill] sm:$0xff] %v5812_v62  ;;  %v1961_v34 = vmul.f32 %v5496_v38, %v1959_v31 }
 0x25a   :  { %1942 = vrot.lane.b32.xlu1 %v1933_v44, %s4791_s29  ;;  %1940 = vrot.lane.b32.xlu0 %v1932_v4, %s4791_s29  ;;  %v1960_v44 = vmul.f32 %v5499_v28, %v1959_v31 }
 0x25c   :  { %v5818_v20 = vpop.permute.xlu1 %1563  ;;  %v5820_v25 = vpop.permute.xlu0 %1561 }
 0x25d   :  { %9256 = vst [vmem:[#allocation200_spill] sm:$0xff] %v5818_v20  ;;  %9257 = vst [vmem:[#allocation201_spill] sm:$0xff] %v5820_v25  ;;  %v1962_v25 = vmul.f32 %v5511_v52, %v1959_v31  ;;  %v1986_v20 = vstv %s4516_s30  ;;  %s4535_s30 = sld [smem:[#allocation12 + $0xb]] }
 0x25e   :  { %1946 = vrot.lane.b32.xlu1 %v1935_v24, %s4791_s29  ;;  %1944 = vrot.lane.b32.xlu0 %v1934_v3, %s4791_s29  ;;  %v1990_v31 = vmul.f32 %v5508_v47, %v1986_v20 }
 0x260   :  { %v5826_v62 = vpop.permute.xlu1 %1567  ;;  %v5828_v4 = vpop.permute.xlu0 %1565 }
 0x261   :  { %9258 = vst [vmem:[#allocation202_spill] sm:$0xff] %v5826_v62  ;;  %9259 = vst [vmem:[#allocation203_spill] sm:$0xff] %v5828_v4  ;;  %v1988_v62 = vmul.f32 %v5496_v38, %v1986_v20 }
 0x262   :  { %1970 = vrot.lane.b32.xlu1 %v1961_v34, %s4791_s29  ;;  %1968 = vrot.lane.b32.xlu0 %v1960_v44, %s4791_s29  ;;  %v1987_v34 = vmul.f32 %v5499_v28, %v1986_v20 }
 0x264   :  { %v5834_v24 = vpop.permute.xlu1 %1590  ;;  %v5836_v3 = vpop.permute.xlu0 %1588 }
 0x265   :  { %9260 = vst [vmem:[#allocation204_spill] sm:$0xff] %v5834_v24  ;;  %9261 = vst [vmem:[#allocation205_spill] sm:$0xff] %v5836_v3  ;;  %v1989_v3 = vmul.f32 %v5511_v52, %v1986_v20  ;;  %v2013_v24 = vstv %s4517_s7  ;;  %s4536_s7 = sld [smem:[#allocation12 + $0xc]] }
 0x266   :  { %1974 = vrot.lane.b32.xlu1 %v1963_v9, %s4791_s29  ;;  %1972 = vrot.lane.b32.xlu0 %v1962_v25, %s4791_s29  ;;  %v2017_v47 = vmul.f32 %v5564_v18, %v2013_v24  ;;  %v2016_v20 = vmul.f32 %v5567_v0, %v2013_v24 }
 0x268   :  { %v5842_v4 = vpop.permute.xlu1 %1594  ;;  %v5844_v44 = vpop.permute.xlu0 %1592 }
 0x269   :  { %9262 = vst [vmem:[#allocation206_spill] sm:$0xff] %v5842_v4  ;;  %9263 = vst [vmem:[#allocation207_spill] sm:$0xff] %v5844_v44  ;;  %v2015_v4 = vmul.f32 %v5552_v19, %v2013_v24 }
 0x26a   :  { %1997 = vrot.lane.b32.xlu1 %v1988_v62, %s4791_s29  ;;  %1995 = vrot.lane.b32.xlu0 %v1987_v34, %s4791_s29  ;;  %v2014_v62 = vmul.f32 %v5555_v43, %v2013_v24 }
 0x26c   :  { %v5850_v9 = vpop.permute.xlu1 %1617  ;;  %v5852_v25 = vpop.permute.xlu0 %1615 }
 0x26d   :  { %9264 = vst [vmem:[#allocation208_spill] sm:$0xff] %v5850_v9  ;;  %9265 = vst [vmem:[#allocation209_spill] sm:$0xff] %v5852_v25  ;;  %v2040_v25 = vstv %s4518_s8  ;;  %v187_v9 = vstv %s4448_s13  ;;  %s4537_s8 = sld [smem:[#allocation12 + $0xd]]  ;;  %s4544_s13 = sld [smem:[#allocation12 + $0x14]] }
 0x26e   :  { %2001 = vrot.lane.b32.xlu1 %v1990_v31, %s4791_s29  ;;  %1999 = vrot.lane.b32.xlu0 %v1989_v3, %s4791_s29  ;;  %v2044_v24 = vmul.f32 %v5564_v18, %v2040_v25  ;;  %v189_v15 = vmul.f32 %v5608_v21, %v187_v9  ;;  %v190_v60 = vmul.f32 %v5623_v61, %v187_v9 }
 0x270   :  { %v5858_v44 = vpop.permute.xlu1 %1621  ;;  %v5860_v34 = vpop.permute.xlu0 %1619 }
 0x271   :  { %9266 = vst [vmem:[#allocation210_spill] sm:$0xff] %v5858_v44  ;;  %9267 = vst [vmem:[#allocation211_spill] sm:$0xff] %v5860_v34  ;;  %v2042_v44 = vmul.f32 %v5552_v19, %v2040_v25 }
 0x272   :  { %2024 = vrot.lane.b32.xlu1 %v2015_v4, %s4791_s29  ;;  %2022 = vrot.lane.b32.xlu0 %v2014_v62, %s4791_s29  ;;  %v2041_v4 = vmul.f32 %v5555_v43, %v2040_v25 }
 0x274   :  { %v5866_v31 = vpop.permute.xlu1 %1644  ;;  %v5868_v3 = vpop.permute.xlu0 %1642 }
 0x275   :  { %9268 = vst [vmem:[#allocation212_spill] sm:$0xff] %v5866_v31  ;;  %9269 = vst [vmem:[#allocation213_spill] sm:$0xff] %v5868_v3  ;;  %v2043_v3 = vmul.f32 %v5567_v0, %v2040_v25  ;;  %v2067_v31 = vstv %s4519_s9  ;;  %s4538_s9 = sld [smem:[#allocation12 + $0xe]] }
 0x276   :  { %2028 = vrot.lane.b32.xlu1 %v2017_v47, %s4791_s29  ;;  %2026 = vrot.lane.b32.xlu0 %v2016_v20, %s4791_s29  ;;  %v2071_v25 = vmul.f32 %v5564_v18, %v2067_v31 }
 0x278   :  { %v5874_v34 = vpop.permute.xlu1 %1648  ;;  %v5876_v62 = vpop.permute.xlu0 %1646 }
 0x279   :  { %9270 = vst [vmem:[#allocation214_spill] sm:$0xff] %v5874_v34  ;;  %9271 = vst [vmem:[#allocation215_spill] sm:$0xff] %v5876_v62  ;;  %v2069_v34 = vmul.f32 %v5552_v19, %v2067_v31 }
 0x27a   :  { %2051 = vrot.lane.b32.xlu1 %v2042_v44, %s4791_s29  ;;  %2049 = vrot.lane.b32.xlu0 %v2041_v4, %s4791_s29  ;;  %v2068_v44 = vmul.f32 %v5555_v43, %v2067_v31 }
 0x27c   :  { %v5882_v47 = vpop.permute.xlu1 %1671  ;;  %v5884_v20 = vpop.permute.xlu0 %1669 }
 0x27d   :  { %9272 = vst [vmem:[#allocation216_spill] sm:$0xff] %v5882_v47  ;;  %9273 = vst [vmem:[#allocation217_spill] sm:$0xff] %v5884_v20  ;;  %v2070_v20 = vmul.f32 %v5567_v0, %v2067_v31  ;;  %v2094_v47 = vstv %s4520_s11  ;;  %s4539_s11 = sld [smem:[#allocation12 + $0xf]] }
 0x27e   :  { %2055 = vrot.lane.b32.xlu1 %v2044_v24, %s4791_s29  ;;  %2053 = vrot.lane.b32.xlu0 %v2043_v3, %s4791_s29  ;;  %v2098_v31 = vmul.f32 %v5620_v1, %v2094_v47 }
 0x280   :  { %v5890_v62 = vpop.permute.xlu1 %1675  ;;  %v5892_v4 = vpop.permute.xlu0 %1673 }
 0x281   :  { %9274 = vst [vmem:[#allocation218_spill] sm:$0xff] %v5890_v62  ;;  %9275 = vst [vmem:[#allocation219_spill] sm:$0xff] %v5892_v4  ;;  %v2096_v62 = vmul.f32 %v5608_v21, %v2094_v47 }
 0x282   :  { %2078 = vrot.lane.b32.xlu1 %v2069_v34, %s4791_s29  ;;  %2076 = vrot.lane.b32.xlu0 %v2068_v44, %s4791_s29  ;;  %v2095_v34 = vmul.f32 %v5611_v40, %v2094_v47 }
 0x284   :  { %v5898_v24 = vpop.permute.xlu1 %1698  ;;  %v5900_v3 = vpop.permute.xlu0 %1696 }
 0x285   :  { %9276 = vst [vmem:[#allocation220_spill] sm:$0xff] %v5898_v24  ;;  %9277 = vst [vmem:[#allocation221_spill] sm:$0xff] %v5900_v3 }
 0x286   :  { %2082 = vrot.lane.b32.xlu1 %v2071_v25, %s4791_s29  ;;  %2080 = vrot.lane.b32.xlu0 %v2070_v20, %s4791_s29  ;;  %v2097_v25 = vmul.f32 %v5623_v61, %v2094_v47  ;;  %v2121_v20 = vstv %s4521_s1  ;;  %s4540_s1 = sld [smem:[#allocation12 + $0x10]] }
 0x287   :  { %v2122_v47 = vmul.f32 %v5611_v40, %v2121_v20 }
 0x288   :  { %v5906_v44 = vpop.permute.xlu1 %1702  ;;  %v5908_v18 = vpop.permute.xlu0 %1700 }
 0x289   :  { %9278 = vst [vmem:[#allocation222_spill] sm:$0xff] %v5906_v44  ;;  %9279 = vst [vmem:[#allocation223_spill] sm:$0xff] %v5908_v18  ;;  %v157_v18 = vstv %s4445_s12  ;;  %s4541_s12 = sld [smem:[#allocation12 + $0x11]] }
 0x28a   :  { %2105 = vrot.lane.b32.xlu1 %v2096_v62, %s4791_s29  ;;  %2103 = vrot.lane.b32.xlu0 %v2095_v34, %s4791_s29  ;;  %v2123_v62 = vmul.f32 %v5608_v21, %v2121_v20  ;;  %v127_v34 = vstv %s126_s4  ;;  %v5937_v24 = vmul.f32 %v5567_v0, %v157_v18  ;;  %v5952_v11 = vmul.f32 %v5552_v19, %v157_v18  ;;  %s4542_s4 = sld [smem:[#allocation12 + $0x12]] }
 0x28b   :  { %v128_v4 = vmul.f32 %v5499_v28, %v127_v34  ;;  %v129_v53 = vmul.f32 %v5496_v38, %v127_v34  ;;  %v130_v27 = vmul.f32 %v5511_v52, %v127_v34  ;;  %v136_v34 = vmul.f32 %v5499_v28, %v135_v35 }
 0x28c   :  { %v5916_v3 = vpop.permute.xlu1 %1726  ;;  %v5918_v44 = vpop.permute.xlu0 %1724 }
 0x28d   :  { %9280 = vst [vmem:[#allocation224_spill] sm:$0xff] %v5916_v3  ;;  %9281 = vst [vmem:[#allocation225_spill] sm:$0xff] %v5918_v44  ;;  %v131_v6 = vadd.f32 %v128_v4, %v115_v10  ;;  %v138_v4 = vmul.f32 %v5511_v52, %v135_v35  ;;  %v133_v39 = vadd.f32 %v130_v27, %v115_v10 }
 0x28e   :  { %2109 = vrot.lane.b32.xlu1 %v2098_v31, %s4791_s29  ;;  %2107 = vrot.lane.b32.xlu0 %v2097_v25, %s4791_s29  ;;  %v5940_v31 = vmul.f32 %v5555_v43, %v157_v18  ;;  %v165_v25 = vstv %s4446_s5  ;;  %v188_v18 = vmul.f32 %v5611_v40, %v187_v9  ;;  %v146_v9 = vmul.f32 %v5511_v52, %v143_v14  ;;  %s4543_s5 = sld [smem:[#allocation12 + $0x13]] }
 0x28f   :  { %v5956_v42 = vmul.f32 %v5555_v43, %v165_v25  ;;  %v2151_v35 = vmul.f32 %v5623_v61, %v2148_v56  ;;  %v198_v27 = vmul.f32 %v5623_v61, %v195_v48  ;;  %v204_v52 = vmul.f32 %v5611_v40, %v203_v30 }
 0x290   :  { %v5932_v3 = vpop.permute.xlu1 %1730  ;;  %v5934_v44 = vpop.permute.xlu0 %1728  ;;  %v149_v17 = vadd.f32 %v146_v9, %v119_v29 }
 0x291   :  { %9282 = vst [vmem:[#allocation226_spill] sm:$0xff] %v5932_v3  ;;  %9283 = vst [vmem:[#allocation227_spill] sm:$0xff] %v5934_v44  ;;  %v2125_v3 = vmul.f32 %v5620_v1, %v2121_v20  ;;  %v2124_v44 = vmul.f32 %v5623_v61, %v2121_v20 }
 0x292   :  { %2132 = vrot.lane.b32.xlu1 %v2123_v62, %s4791_s29  ;;  %2130 = vrot.lane.b32.xlu0 %v2122_v47, %s4791_s29  ;;  %v5959_v62 = vmul.f32 %v5552_v19, %v165_v25  ;;  %v5962_v47 = vmul.f32 %v5567_v0, %v165_v25  ;;  %v2150_v25 = vmul.f32 %v5608_v21, %v2148_v56 }
 0x294   :  { %v5965_v20 = vpop.permute.xlu1 %1753  ;;  %v5967_v22 = vpop.permute.xlu0 %1751 }
 0x295   :  { %9284 = vst [vmem:[#allocation228_spill] sm:$0xff] %v5965_v20  ;;  %9285 = vst [vmem:[#allocation229_spill] sm:$0xff] %v5967_v22  ;;  %v2149_v22 = vmul.f32 %v5611_v40, %v2148_v56  ;;  %v132_v20 = vadd.f32 %v129_v53, %v115_v10  ;;  %v145_v53 = vmul.f32 %v5496_v38, %v143_v14  ;;  %v8974_v10 = vmov 0.0  }
 0x296   :  { %2136 = vrot.lane.b32.xlu1 %v2125_v3, %s4791_s29  ;;  %2134 = vrot.lane.b32.xlu0 %v2124_v44, %s4791_s29  ;;  %v144_v3 = vmul.f32 %v5499_v28, %v143_v14  ;;  %v139_v28 = vadd.f32 %v136_v34, %v117_v57  ;;  %101 = vst [vmem:[#allocation2] sm:$0xff] %v8974_v10  ;;  %106 = vst [vmem:[#allocation2 + $0x20] sm:$0xff] %v8974_v10 }
 0x297   :  { %110 = vst [vmem:[#allocation2 + $0x40] sm:$0xff] %v8974_v10  ;;  %v140_v14 = vadd.f32 %v137_v51, %v117_v57  ;;  %v148_v34 = vadd.f32 %v145_v53, %v119_v29  ;;  %v206_v51 = vmul.f32 %v5623_v61, %v203_v30  ;;  %v234_v30 = vsel %vm232_vm0, %v5020_v37, %v5010_v32  ;;  %v9288_v61 = vld [vmem:[#allocation23_spill] sm:$0xff] }
 0x298   :  { %v5985_v41 = vpop.permute.xlu1 %1757  ;;  %v5987_v44 = vpop.permute.xlu0 %1755  ;;  %v147_v38 = vadd.f32 %v144_v3, %v119_v29 }
 0x299   :  { %9286 = vst [vmem:[#allocation230_spill] sm:$0xff] %v5985_v41  ;;  %9287 = vst [vmem:[#allocation231_spill] sm:$0xff] %v5987_v44  ;;  %v196_v41 = vmul.f32 %v5611_v40, %v195_v48  ;;  %v197_v44 = vmul.f32 %v5608_v21, %v195_v48  ;;  %v175_v48 = vmul.f32 %v5552_v19, %v173_v5 }
 0x29a   :  { %2159 = vrot.lane.b32.xlu1 %v2150_v25, %s4791_s29  ;;  %2157 = vrot.lane.b32.xlu0 %v2149_v22, %s4791_s29  ;;  %v141_v22 = vadd.f32 %v138_v4, %v117_v57  ;;  %v174_v25 = vmul.f32 %v5555_v43, %v173_v5  ;;  %v191_v57 = vadd.f32 %v188_v18, %v131_v6 }
 0x29b   :  { %v192_v40 = vadd.f32 %v189_v15, %v132_v20  ;;  %v193_v4 = vadd.f32 %v190_v60, %v133_v39  ;;  %v199_v3 = vadd.f32 %v196_v41, %v139_v28  ;;  %v235_v19 = vsel %vm232_vm0, %v5010_v32, %v5018_v36  ;;  %v9294_v28 = vld [vmem:[#allocation28_spill] sm:$0xff] }
 0x29c   :  { %v6004_v56 = vpop.permute.xlu1 %1780  ;;  %v6006_v1 = vpop.permute.xlu0 %1778  ;;  %v200_v43 = vadd.f32 %v197_v44, %v140_v14  ;;  %v201_v53 = vadd.f32 %v198_v27, %v141_v22  ;;  %v207_v21 = vadd.f32 %v204_v52, %v147_v38  ;;  %v260_v39 = vsel %vm232_vm0, %v5028_v46, %v5026_v45  ;;  %v9295_v27 = vld [vmem:[#allocation29_spill] sm:$0xff]  ;;  %v9296_v22 = vld [vmem:[#allocation31_spill] sm:$0xff]  ;;  %v9297_v52 = vld [vmem:[#allocation30_spill] sm:$0xff] }
 0x29d   :  { %v208_v36 = vadd.f32 %v205_v23, %v148_v34  ;;  %v261_v41 = vsel %vm232_vm0, %v5026_v45, %v5036_v50  ;;  %v262_v60 = vsel %vm232_vm0, %v5036_v50, %v5034_v49  ;;  %v209_v5 = vadd.f32 %v206_v51, %v149_v17 }
 0x29e   :  { %2163 = vrot.lane.b32.xlu1 %v2152_v26, %s4791_s29  ;;  %2161 = vrot.lane.b32.xlu0 %v2151_v35, %s4791_s29  ;;  %v233_v26 = vsel %vm232_vm0, %v5012_v33, %v5020_v37  ;;  %v241_v33 = vadd.f32 %v235_v19, %v5937_v24  ;;  %v287_v32 = vsel %vm232_vm0, %v5044_v55, %v5042_v54 }
 0x29f   :  { %v288_v37 = vsel %vm232_vm0, %v5042_v54, %v5052_v59  ;;  %v289_v45 = vsel %vm232_vm0, %v5052_v59, %v5050_v58  ;;  %v239_v46 = vadd.f32 %v233_v26, %v5940_v31  ;;  %v240_v49 = vadd.f32 %v234_v30, %v5952_v11  ;;  %v9289_v31 = vld [vmem:[#allocation22_spill] sm:$0xff]  ;;  %v9300_v26 = vld [vmem:[#allocation35_spill] sm:$0xff] }
 0x2a0   :  { %v6018_v10 = vpop.permute.xlu1 %1784  ;;  %v6020_v29 = vpop.permute.xlu0 %1782  ;;  %v266_v50 = vadd.f32 %v260_v39, %v5956_v42  ;;  %v318_v17 = vsel %vm232_vm0, %v5060_v2, %v5058_v63  ;;  %v267_v54 = vadd.f32 %v261_v41, %v5959_v62  ;;  %v268_v6 = vadd.f32 %v262_v60, %v5962_v47  ;;  %v9290_v62 = vld [vmem:[#allocation24_spill] sm:$0xff]  ;;  %v9291_v47 = vld [vmem:[#allocation25_spill] sm:$0xff]  ;;  %v9301_v39 = vld [vmem:[#allocation34_spill] sm:$0xff] }
 0x2a1   :  { %v319_v58 = vsel %vm232_vm0, %v5058_v63, %v5068_v8  ;;  %v320_v59 = vsel %vm232_vm0, %v5068_v8, %v5066_v7  ;;  %v293_v15 = vadd.f32 %v287_v32, %v174_v25  ;;  %v294_v42 = vadd.f32 %v288_v37, %v175_v48 }
 0x2a2   :  { %v295_v11 = vadd.f32 %v289_v45, %v176_v16  ;;  %v345_v2 = vsel %vm232_vm0, %v5076_v13, %v5074_v12  ;;  %v324_v0 = vadd.f32 %v318_v17, %v191_v57  ;;  %v346_v24 = vsel %vm232_vm0, %v5074_v12, %v9288_v61  ;;  %v9292_v16 = vld [vmem:[#allocation27_spill] sm:$0xff]  ;;  %v9293_v13 = vld [vmem:[#allocation26_spill] sm:$0xff]  ;;  %v9298_v57 = vld [vmem:[#allocation32_spill] sm:$0xff] }
 0x2a3   :  { %v347_v63 = vsel %vm232_vm0, %v9288_v61, %v9289_v31  ;;  %v372_v7 = vsel %vm232_vm0, %v9291_v47, %v9290_v62  ;;  %v325_v8 = vadd.f32 %v319_v58, %v192_v40  ;;  %v326_v20 = vadd.f32 %v320_v59, %v193_v4  ;;  %v9299_v40 = vld [vmem:[#allocation33_spill] sm:$0xff]  ;;  %v9305_v59 = vld [vmem:[#allocation38_spill] sm:$0xff]  ;;  %v9308_v31 = vld [vmem:[#allocation43_spill] sm:$0xff] }
 0x2a4   :  { %v6053_v23 = vpop.permute.xlu1 %1807  ;;  %v6055_v55 = vpop.permute.xlu0 %1805  ;;  %v373_v18 = vsel %vm232_vm0, %v9290_v62, %v9292_v16  ;;  %v374_v44 = vsel %vm232_vm0, %v9292_v16, %v9293_v13  ;;  %v351_v35 = vadd.f32 %v345_v2, %v199_v3  ;;  %v403_v14 = vsel %vm232_vm0, %v9295_v27, %v9294_v28  ;;  %v9309_v62 = vld [vmem:[#allocation42_spill] sm:$0xff]  ;;  %v9311_v16 = vld [vmem:[#allocation45_spill] sm:$0xff]  ;;  %v9312_v13 = vld [vmem:[#allocation47_spill] sm:$0xff] }
 0x2a5   :  { %v404_v38 = vsel %vm232_vm0, %v9294_v28, %v9296_v22  ;;  %v405_v25 = vsel %vm232_vm0, %v9296_v22, %v9297_v52  ;;  %v352_v48 = vadd.f32 %v346_v24, %v200_v43  ;;  %v353_v34 = vadd.f32 %v347_v63, %v201_v53  ;;  %v9302_v43 = vld [vmem:[#allocation36_spill] sm:$0xff]  ;;  %v9303_v53 = vld [vmem:[#allocation37_spill] sm:$0xff]  ;;  %v9313_v28 = vld [vmem:[#allocation46_spill] sm:$0xff] }
 0x2a6   :  { %v378_v51 = vadd.f32 %v372_v7, %v207_v21  ;;  %v430_v4 = vsel %vm232_vm0, %v9299_v40, %v9298_v57  ;;  %v379_v3 = vadd.f32 %v373_v18, %v208_v36  ;;  %v380_v19 = vadd.f32 %v374_v44, %v209_v5  ;;  %v9304_v5 = vld [vmem:[#allocation39_spill] sm:$0xff]  ;;  %v9310_v7 = vld [vmem:[#allocation44_spill] sm:$0xff] }
 0x2a7   :  { %v431_v30 = vsel %vm232_vm0, %v9298_v57, %v9300_v26  ;;  %v432_v41 = vsel %vm232_vm0, %v9300_v26, %v9301_v39  ;;  %v409_v60 = vadd.f32 %v403_v14, %v239_v46  ;;  %v410_v32 = vadd.f32 %v404_v38, %v240_v49  ;;  %v9306_v46 = vld [vmem:[#allocation40_spill] sm:$0xff]  ;;  %v9307_v49 = vld [vmem:[#allocation41_spill] sm:$0xff] }
 0x2a8   :  { %v6083_v9 = vpop.permute.xlu1 %1811  ;;  %v6085_v12 = vpop.permute.xlu0 %1809  ;;  %v411_v37 = vadd.f32 %v405_v25, %v241_v33  ;;  %v457_v21 = vsel %vm232_vm0, %v9303_v53, %v9302_v43  ;;  %v436_v36 = vadd.f32 %v430_v4, %v266_v50  ;;  %v458_v58 = vsel %vm232_vm0, %v9302_v43, %v9304_v5  ;;  %v9314_v22 = vld [vmem:[#allocation48_spill] sm:$0xff]  ;;  %v9315_v38 = vld [vmem:[#allocation49_spill] sm:$0xff]  ;;  %v9316_v4 = vld [vmem:[#allocation51_spill] sm:$0xff] }
 0x2a9   :  { %v459_v2 = vsel %vm232_vm0, %v9304_v5, %v9305_v59  ;;  %v485_v33 = vsel %vm484_vm1, %v9307_v49, %v9306_v46  ;;  %v437_v61 = vadd.f32 %v431_v30, %v267_v54  ;;  %v438_v24 = vadd.f32 %v432_v41, %v268_v6  ;;  %v9317_v30 = vld [vmem:[#allocation50_spill] sm:$0xff]  ;;  %v9318_v41 = vld [vmem:[#allocation52_spill] sm:$0xff]  ;;  %v9319_v43 = vld [vmem:[#allocation53_spill] sm:$0xff] }
 0x2aa   :  { %v486_v63 = vsel %vm484_vm1, %v9306_v46, %v9308_v31  ;;  %v487_v50 = vsel %vm484_vm1, %v9308_v31, %v9309_v62  ;;  %v463_v47 = vadd.f32 %v457_v21, %v293_v15  ;;  %v512_v18 = vsel %vm484_vm1, %v9311_v16, %v9310_v7  ;;  %v9320_v5 = vld [vmem:[#allocation55_spill] sm:$0xff]  ;;  %v9322_v59 = vld [vmem:[#allocation56_spill] sm:$0xff] }
 0x2ab   :  { %v513_v44 = vsel %vm484_vm1, %v9310_v7, %v9312_v13  ;;  %v514_v54 = vsel %vm484_vm1, %v9312_v13, %v9313_v28  ;;  %v464_v6 = vadd.f32 %v458_v58, %v294_v42  ;;  %v465_v27 = vadd.f32 %v459_v2, %v295_v11  ;;  %v9323_v2 = vld [vmem:[#allocation57_spill] sm:$0xff] }
 0x2ac   :  { %v6108_v45 = vpop.permute.xlu1 %1834  ;;  %v6110_v17 = vpop.permute.xlu0 %1832  ;;  %v491_v14 = vadd.f32 %v485_v33, %v324_v0  ;;  %v539_v52 = vsel %vm484_vm1, %v9315_v38, %v9314_v22  ;;  %v492_v57 = vadd.f32 %v486_v63, %v325_v8  ;;  %v493_v40 = vadd.f32 %v487_v50, %v326_v20  ;;  %v9321_v20 = vld [vmem:[#allocation54_spill] sm:$0xff]  ;;  %v9326_v50 = vld [vmem:[#allocation60_spill] sm:$0xff]  ;;  %v9327_v7 = vld [vmem:[#allocation61_spill] sm:$0xff] }
 0x2ad   :  { %v540_v26 = vsel %vm484_vm1, %v9314_v22, %v9316_v4  ;;  %v541_v42 = vsel %vm484_vm1, %v9316_v4, %v9317_v30  ;;  %v518_v11 = vadd.f32 %v512_v18, %v351_v35  ;;  %v519_v0 = vadd.f32 %v513_v44, %v352_v48  ;;  %v9325_v33 = vld [vmem:[#allocation58_spill] sm:$0xff]  ;;  %v9328_v18 = vld [vmem:[#allocation63_spill] sm:$0xff]  ;;  %v9330_v22 = vld [vmem:[#allocation64_spill] sm:$0xff] }
 0x2ae   :  { %v520_v39 = vadd.f32 %v514_v54, %v353_v34  ;;  %v566_v53 = vsel %vm484_vm1, %v9319_v43, %v9318_v41  ;;  %v545_v21 = vadd.f32 %v539_v52, %v378_v51  ;;  %v567_v8 = vsel %vm484_vm1, %v9318_v41, %v9320_v5  ;;  %v9324_v34 = vld [vmem:[#allocation59_spill] sm:$0xff]  ;;  %v9331_v38 = vld [vmem:[#allocation65_spill] sm:$0xff] }
 0x2af   :  { %v568_v58 = vsel %vm484_vm1, %v9320_v5, %v9321_v20  ;;  %v593_v46 = vsel %vm484_vm1, %v9323_v2, %v9322_v59  ;;  %v546_v35 = vadd.f32 %v540_v26, %v379_v3  ;;  %v547_v48 = vadd.f32 %v541_v42, %v380_v19  ;;  %v9329_v19 = vld [vmem:[#allocation62_spill] sm:$0xff]  ;;  %v9332_v26 = vld [vmem:[#allocation67_spill] sm:$0xff] }
 0x2b0   :  { %v6139_v15 = vpop.permute.xlu1 %1838  ;;  %v6141_v25 = vpop.permute.xlu0 %1836  ;;  %v594_v49 = vsel %vm484_vm1, %v9322_v59, %v9324_v34  ;;  %v595_v51 = vsel %vm484_vm1, %v9324_v34, %v9325_v33  ;;  %v572_v62 = vadd.f32 %v566_v53, %v409_v60  ;;  %v620_v16 = vsel %vm484_vm1, %v9327_v7, %v9326_v50  ;;  %v9333_v42 = vld [vmem:[#allocation66_spill] sm:$0xff]  ;;  %v9342_v7 = vld [vmem:[#allocation76_spill] sm:$0xff] }
 0x2b1   :  { %v621_v3 = vsel %vm484_vm1, %v9326_v50, %v9328_v18  ;;  %v622_v13 = vsel %vm484_vm1, %v9328_v18, %v9329_v19  ;;  %v573_v44 = vadd.f32 %v567_v8, %v410_v32  ;;  %v574_v28 = vadd.f32 %v568_v58, %v411_v37  ;;  %v9334_v32 = vld [vmem:[#allocation68_spill] sm:$0xff]  ;;  %v9335_v37 = vld [vmem:[#allocation69_spill] sm:$0xff]  ;;  %v9337_v59 = vld [vmem:[#allocation70_spill] sm:$0xff] }
 0x2b2   :  { %v599_v54 = vadd.f32 %v593_v46, %v436_v36  ;;  %v647_v52 = vsel %vm484_vm1, %v9331_v38, %v9330_v22  ;;  %v600_v60 = vadd.f32 %v594_v49, %v437_v61  ;;  %v601_v4 = vadd.f32 %v595_v51, %v438_v24  ;;  %v9336_v24 = vld [vmem:[#allocation71_spill] sm:$0xff]  ;;  %v9341_v51 = vld [vmem:[#allocation74_spill] sm:$0xff] }
 0x2b3   :  { %v648_v30 = vsel %vm484_vm1, %v9330_v22, %v9332_v26  ;;  %v649_v41 = vsel %vm484_vm1, %v9332_v26, %v9333_v42  ;;  %v626_v43 = vadd.f32 %v620_v16, %v463_v47  ;;  %v627_v53 = vadd.f32 %v621_v3, %v464_v6  ;;  %v9338_v47 = vld [vmem:[#allocation72_spill] sm:$0xff]  ;;  %v9339_v6 = vld [vmem:[#allocation73_spill] sm:$0xff]  ;;  %v9340_v49 = vld [vmem:[#allocation75_spill] sm:$0xff] }
 0x2b4   :  { %v6167_v31 = vpop.permute.xlu1 %1861  ;;  %v6169_v63 = vpop.permute.xlu0 %1859  ;;  %v628_v5 = vadd.f32 %v622_v13, %v465_v27  ;;  %v674_v36 = vsel %vm484_vm1, %v9335_v37, %v9334_v32  ;;  %v653_v61 = vadd.f32 %v647_v52, %v491_v14  ;;  %v675_v58 = vsel %vm484_vm1, %v9334_v32, %v9336_v24  ;;  %v9343_v16 = vld [vmem:[#allocation77_spill] sm:$0xff]  ;;  %v9344_v3 = vld [vmem:[#allocation79_spill] sm:$0xff]  ;;  %v9345_v13 = vld [vmem:[#allocation78_spill] sm:$0xff] }
 0x2b5   :  { %v676_v2 = vsel %vm484_vm1, %v9336_v24, %v9337_v59  ;;  %v701_v27 = vsel %vm484_vm1, %v9339_v6, %v9338_v47  ;;  %v654_v46 = vadd.f32 %v648_v30, %v492_v57  ;;  %v655_v34 = vadd.f32 %v649_v41, %v493_v40  ;;  %v9346_v52 = vld [vmem:[#allocation80_spill] sm:$0xff]  ;;  %v9347_v26 = vld [vmem:[#allocation81_spill] sm:$0xff]  ;;  %v9350_v37 = vld [vmem:[#allocation83_spill] sm:$0xff] }
 0x2b6   :  { %v702_v33 = vsel %vm484_vm1, %v9338_v47, %v9340_v49  ;;  %v703_v14 = vsel %vm484_vm1, %v9340_v49, %v9341_v51  ;;  %v680_v50 = vadd.f32 %v674_v36, %v518_v11  ;;  %v729_v18 = vsel %vm728_vm2, %v9343_v16, %v9342_v7  ;;  %v9351_v24 = vld [vmem:[#allocation82_spill] sm:$0xff]  ;;  %v9352_v59 = vld [vmem:[#allocation84_spill] sm:$0xff]  ;;  %v9357_v51 = vld [vmem:[#allocation89_spill] sm:$0xff] }
 0x2b7   :  { %v730_v19 = vsel %vm728_vm2, %v9342_v7, %v9344_v3  ;;  %v731_v57 = vsel %vm728_vm2, %v9344_v3, %v9345_v13  ;;  %v681_v40 = vadd.f32 %v675_v58, %v519_v0  ;;  %v682_v22 = vadd.f32 %v676_v2, %v520_v39  ;;  %v9353_v2 = vld [vmem:[#allocation85_spill] sm:$0xff]  ;;  %v9359_v16 = vld [vmem:[#allocation90_spill] sm:$0xff]  ;;  %v9362_v13 = vld [vmem:[#allocation92_spill] sm:$0xff] }
 0x2b8   :  { %v6192_v8 = vpop.permute.xlu1 %1865  ;;  %v6194_v20 = vpop.permute.xlu0 %1863  ;;  %v707_v38 = vadd.f32 %v701_v27, %v545_v21  ;;  %v756_v30 = vsel %vm728_vm2, %v9347_v26, %v9346_v52  ;;  %v708_v41 = vadd.f32 %v702_v33, %v546_v35  ;;  %v709_v32 = vadd.f32 %v703_v14, %v547_v48  ;;  %v9354_v27 = vld [vmem:[#allocation87_spill] sm:$0xff]  ;;  %v9355_v48 = vld [vmem:[#allocation86_spill] sm:$0xff]  ;;  %v9356_v33 = vld [vmem:[#allocation88_spill] sm:$0xff] }
 0x2b9   :  { %v757_v36 = vsel %vm728_vm2, %v9346_v52, %v9350_v37  ;;  %v758_v0 = vsel %vm728_vm2, %v9350_v37, %v9351_v24  ;;  %v735_v39 = vadd.f32 %v729_v18, %v572_v62  ;;  %v736_v21 = vadd.f32 %v730_v19, %v573_v44  ;;  %v9364_v26 = vld [vmem:[#allocation95_spill] sm:$0xff] }
 0x2ba   :  { %v737_v58 = vadd.f32 %v731_v57, %v574_v28  ;;  %v783_v47 = vsel %vm728_vm2, %v9353_v2, %v9352_v59  ;;  %v762_v6 = vadd.f32 %v756_v30, %v599_v54  ;;  %v784_v35 = vsel %vm728_vm2, %v9352_v59, %v9354_v27  ;;  %v9358_v28 = vld [vmem:[#allocation91_spill] sm:$0xff]  ;;  %v9363_v57 = vld [vmem:[#allocation93_spill] sm:$0xff] }
 0x2bb   :  { %v785_v49 = vsel %vm728_vm2, %v9354_v27, %v9355_v48  ;;  %v810_v14 = vsel %vm728_vm2, %v9357_v51, %v9356_v33  ;;  %v763_v62 = vadd.f32 %v757_v36, %v600_v60  ;;  %v764_v44 = vadd.f32 %v758_v0, %v601_v4  ;;  %v9365_v4 = vld [vmem:[#allocation94_spill] sm:$0xff]  ;;  %v9366_v0 = vld [vmem:[#allocation96_spill] sm:$0xff]  ;;  %v9367_v59 = vld [vmem:[#allocation97_spill] sm:$0xff] }
 0x2bc   :  { %v6223_v11 = vpop.permute.xlu1 %1888  ;;  %v6225_v42 = vpop.permute.xlu0 %1886  ;;  %v811_v7 = vsel %vm728_vm2, %v9356_v33, %v9358_v28  ;;  %v812_v54 = vsel %vm728_vm2, %v9358_v28, %v9359_v16  ;;  %v789_v19 = vadd.f32 %v783_v47, %v626_v43  ;;  %v837_v52 = vsel %vm728_vm2, %v9363_v57, %v9362_v13  ;;  %v9368_v27 = vld [vmem:[#allocation99_spill] sm:$0xff]  ;;  %v9369_v33 = vld [vmem:[#allocation98_spill] sm:$0xff] }
 0x2bd   :  { %9348 = vst [vmem:[#allocation23_spill] sm:$0xff] %v6223_v11  ;;  %9349 = vst [vmem:[#allocation22_spill] sm:$0xff] %v6225_v42  ;;  %v838_v60 = vsel %vm728_vm2, %v9362_v13, %v9364_v26  ;;  %v839_v30 = vsel %vm728_vm2, %v9364_v26, %v9365_v4  ;;  %v790_v37 = vadd.f32 %v784_v35, %v627_v53  ;;  %v9370_v53 = vld [vmem:[#allocation100_spill] sm:$0xff]  ;;  %v9378_v26 = vld [vmem:[#allocation107_spill] sm:$0xff] }
 0x2be   :  { %v791_v36 = vadd.f32 %v785_v49, %v628_v5  ;;  %v816_v24 = vadd.f32 %v810_v14, %v653_v61  ;;  %v864_v2 = vsel %vm728_vm2, %v9367_v59, %v9366_v0  ;;  %v817_v43 = vadd.f32 %v811_v7, %v654_v46  ;;  %v9371_v5 = vld [vmem:[#allocation101_spill] sm:$0xff]  ;;  %v9375_v7 = vld [vmem:[#allocation102_spill] sm:$0xff]  ;;  %v9495_v11 = vld [vmem:[#allocation211_spill] sm:$0xff] }
 0x2bf   :  { %v818_v47 = vadd.f32 %v812_v54, %v655_v34  ;;  %v865_v48 = vsel %vm728_vm2, %v9366_v0, %v9368_v27  ;;  %v866_v51 = vsel %vm728_vm2, %v9368_v27, %v9369_v33  ;;  %v843_v28 = vadd.f32 %v837_v52, %v680_v50  ;;  %v9374_v34 = vld [vmem:[#allocation103_spill] sm:$0xff]  ;;  %v9376_v50 = vld [vmem:[#allocation104_spill] sm:$0xff]  ;;  %v9379_v4 = vld [vmem:[#allocation106_spill] sm:$0xff] }
 0x2c0   :  { %v6251_v18 = vpop.permute.xlu1 %1892  ;;  %v6253_v3 = vpop.permute.xlu0 %1890  ;;  %v844_v16 = vadd.f32 %v838_v60, %v681_v40  ;;  %v845_v13 = vadd.f32 %v839_v30, %v682_v22  ;;  %v891_v61 = vsel %vm728_vm2, %v9371_v5, %v9370_v53  ;;  %v870_v46 = vadd.f32 %v864_v2, %v707_v38  ;;  %v9377_v40 = vld [vmem:[#allocation105_spill] sm:$0xff]  ;;  %v9380_v0 = vld [vmem:[#allocation108_spill] sm:$0xff]  ;;  %v9382_v27 = vld [vmem:[#allocation111_spill] sm:$0xff] }
 0x2c1   :  { %9360 = vst [vmem:[#allocation24_spill] sm:$0xff] %v6251_v18  ;;  %9361 = vst [vmem:[#allocation25_spill] sm:$0xff] %v6253_v3  ;;  %v892_v14 = vsel %vm728_vm2, %v9370_v53, %v9374_v34  ;;  %v893_v54 = vsel %vm728_vm2, %v9374_v34, %v9375_v7  ;;  %v918_v22 = vsel %vm728_vm2, %v9377_v40, %v9376_v50  ;;  %v9381_v59 = vld [vmem:[#allocation109_spill] sm:$0xff]  ;;  %v9383_v53 = vld [vmem:[#allocation110_spill] sm:$0xff] }
 0x2c2   :  { %v871_v57 = vadd.f32 %v865_v48, %v708_v41  ;;  %v872_v52 = vadd.f32 %v866_v51, %v709_v32  ;;  %v919_v60 = vsel %vm728_vm2, %v9376_v50, %v9378_v26  ;;  %v920_v38 = vsel %vm728_vm2, %v9378_v26, %v9379_v4  ;;  %v9384_v5 = vld [vmem:[#allocation112_spill] sm:$0xff]  ;;  %v9385_v34 = vld [vmem:[#allocation113_spill] sm:$0xff]  ;;  %v9388_v26 = vld [vmem:[#allocation115_spill] sm:$0xff] }
 0x2c3   :  { %v897_v30 = vadd.f32 %v891_v61, %v735_v39  ;;  %v945_v2 = vsel %vm728_vm2, %v9381_v59, %v9380_v0  ;;  %v946_v33 = vsel %vm728_vm2, %v9380_v0, %v9382_v27  ;;  %v947_v41 = vsel %vm728_vm2, %v9382_v27, %v9383_v53  ;;  %v9389_v0 = vld [vmem:[#allocation114_spill] sm:$0xff]  ;;  %v9392_v53 = vld [vmem:[#allocation119_spill] sm:$0xff] }
 0x2c4   :  { %v6276_v35 = vpop.permute.xlu1 %1915  ;;  %v6278_v49 = vpop.permute.xlu0 %1913  ;;  %v898_v32 = vadd.f32 %v892_v14, %v736_v21  ;;  %v899_v48 = vadd.f32 %v893_v54, %v737_v58  ;;  %v924_v51 = vadd.f32 %v918_v22, %v762_v6  ;;  %v973_v7 = vsel %vm972_vm3, %v9385_v34, %v9384_v5  ;;  %v9390_v54 = vld [vmem:[#allocation116_spill] sm:$0xff]  ;;  %v9391_v22 = vld [vmem:[#allocation117_spill] sm:$0xff]  ;;  %v9423_v18 = vld [vmem:[#allocation146_spill] sm:$0xff] }
 0x2c5   :  { %9372 = vst [vmem:[#allocation27_spill] sm:$0xff] %v6276_v35  ;;  %9373 = vst [vmem:[#allocation26_spill] sm:$0xff] %v6278_v49  ;;  %v925_v50 = vadd.f32 %v919_v60, %v763_v62  ;;  %v926_v40 = vadd.f32 %v920_v38, %v764_v44  ;;  %v974_v4 = vsel %vm972_vm3, %v9384_v5, %v9388_v26  ;;  %v9393_v44 = vld [vmem:[#allocation118_spill] sm:$0xff]  ;;  %v9394_v38 = vld [vmem:[#allocation120_spill] sm:$0xff] }
 0x2c6   :  { %v975_v21 = vsel %vm972_vm3, %v9388_v26, %v9389_v0  ;;  %v951_v58 = vadd.f32 %v945_v2, %v789_v19  ;;  %v952_v6 = vadd.f32 %v946_v33, %v790_v37  ;;  %v953_v14 = vadd.f32 %v947_v41, %v791_v36  ;;  %v9395_v5 = vld [vmem:[#allocation121_spill] sm:$0xff]  ;;  %v9396_v36 = vld [vmem:[#allocation123_spill] sm:$0xff]  ;;  %v9398_v0 = vld [vmem:[#allocation124_spill] sm:$0xff] }
 0x2c7   :  { %v1000_v59 = vsel %vm972_vm3, %v9391_v22, %v9390_v54  ;;  %v979_v27 = vadd.f32 %v973_v7, %v816_v24  ;;  %v1001_v62 = vsel %vm972_vm3, %v9390_v54, %v9392_v53  ;;  %v1002_v60 = vsel %vm972_vm3, %v9392_v53, %v9393_v44  ;;  %v9397_v24 = vld [vmem:[#allocation122_spill] sm:$0xff]  ;;  %v9399_v54 = vld [vmem:[#allocation125_spill] sm:$0xff]  ;;  %v9400_v53 = vld [vmem:[#allocation127_spill] sm:$0xff] }
 0x2c8   :  { %v6307_v39 = vpop.permute.xlu1 %1919  ;;  %v6309_v61 = vpop.permute.xlu0 %1917  ;;  %v1027_v34 = vsel %vm972_vm3, %v9395_v5, %v9394_v38  ;;  %v980_v19 = vadd.f32 %v974_v4, %v817_v43  ;;  %v981_v37 = vadd.f32 %v975_v21, %v818_v47  ;;  %v1028_v2 = vsel %vm972_vm3, %v9394_v38, %v9396_v36  ;;  %v9401_v47 = vld [vmem:[#allocation126_spill] sm:$0xff]  ;;  %v9402_v5 = vld [vmem:[#allocation128_spill] sm:$0xff] }
 0x2c9   :  { %9386 = vst [vmem:[#allocation28_spill] sm:$0xff] %v6307_v39  ;;  %9387 = vst [vmem:[#allocation29_spill] sm:$0xff] %v6309_v61  ;;  %v1029_v33 = vsel %vm972_vm3, %v9396_v36, %v9397_v24  ;;  %v1006_v26 = vadd.f32 %v1000_v59, %v843_v28  ;;  %v1054_v22 = vsel %vm972_vm3, %v9399_v54, %v9398_v0  ;;  %v9403_v36 = vld [vmem:[#allocation129_spill] sm:$0xff]  ;;  %v9404_v39 = vld [vmem:[#allocation131_spill] sm:$0xff] }
 0x2ca   :  { %v1055_v43 = vsel %vm972_vm3, %v9398_v0, %v9400_v53  ;;  %v1056_v4 = vsel %vm972_vm3, %v9400_v53, %v9401_v47  ;;  %v1007_v21 = vadd.f32 %v1001_v62, %v844_v16  ;;  %v1008_v44 = vadd.f32 %v1002_v60, %v845_v13  ;;  %v9405_v61 = vld [vmem:[#allocation130_spill] sm:$0xff]  ;;  %v9406_v16 = vld [vmem:[#allocation132_spill] sm:$0xff]  ;;  %v9407_v13 = vld [vmem:[#allocation133_spill] sm:$0xff] }
 0x2cb   :  { %v1033_v38 = vadd.f32 %v1027_v34, %v870_v46  ;;  %v1081_v24 = vsel %vm972_vm3, %v9403_v36, %v9402_v5  ;;  %v1034_v28 = vadd.f32 %v1028_v2, %v871_v57  ;;  %v1035_v59 = vadd.f32 %v1029_v33, %v872_v52  ;;  %v9408_v52 = vld [vmem:[#allocation135_spill] sm:$0xff]  ;;  %v9409_v2 = vld [vmem:[#allocation134_spill] sm:$0xff]  ;;  %v9415_v36 = vld [vmem:[#allocation141_spill] sm:$0xff] }
 0x2cc   :  { %v6335_v41 = vpop.permute.xlu1 %1942  ;;  %v6337_v7 = vpop.permute.xlu0 %1940  ;;  %v1082_v54 = vsel %vm972_vm3, %v9402_v5, %v9404_v39  ;;  %v1083_v0 = vsel %vm972_vm3, %v9404_v39, %v9405_v61  ;;  %v1060_v49 = vadd.f32 %v1054_v22, %v897_v30  ;;  %v1061_v35 = vadd.f32 %v1055_v43, %v898_v32  ;;  %v9410_v30 = vld [vmem:[#allocation136_spill] sm:$0xff]  ;;  %v9411_v32 = vld [vmem:[#allocation137_spill] sm:$0xff]  ;;  %v9412_v22 = vld [vmem:[#allocation139_spill] sm:$0xff] }
 0x2cd   :  { %v1062_v53 = vadd.f32 %v1056_v4, %v899_v48  ;;  %v1108_v46 = vsel %vm972_vm3, %v9407_v13, %v9406_v16  ;;  %v1087_v57 = vadd.f32 %v1081_v24, %v924_v51  ;;  %v1109_v34 = vsel %vm972_vm3, %v9406_v16, %v9408_v52  ;;  %v9413_v47 = vld [vmem:[#allocation138_spill] sm:$0xff]  ;;  %v9414_v5 = vld [vmem:[#allocation140_spill] sm:$0xff]  ;;  %v9416_v16 = vld [vmem:[#allocation143_spill] sm:$0xff] }
 0x2ce   :  { %v1110_v39 = vsel %vm972_vm3, %v9408_v52, %v9409_v2  ;;  %v1135_v48 = vsel %vm972_vm3, %v9411_v32, %v9410_v30  ;;  %v1088_v61 = vadd.f32 %v1082_v54, %v925_v50  ;;  %v1089_v33 = vadd.f32 %v1083_v0, %v926_v40  ;;  %v9417_v52 = vld [vmem:[#allocation142_spill] sm:$0xff]  ;;  %v9418_v2 = vld [vmem:[#allocation144_spill] sm:$0xff] }
 0x2cf   :  { %v1136_v43 = vsel %vm972_vm3, %v9410_v30, %v9412_v22  ;;  %v1137_v51 = vsel %vm972_vm3, %v9412_v22, %v9413_v47  ;;  %v1114_v4 = vadd.f32 %v1108_v46, %v951_v58  ;;  %v1162_v24 = vsel %vm972_vm3, %v9415_v36, %v9414_v5  ;;  %v9419_v30 = vld [vmem:[#allocation145_spill] sm:$0xff]  ;;  %v9422_v36 = vld [vmem:[#allocation147_spill] sm:$0xff] }
 0x2d0   :  { %v6360_v62 = vpop.permute.xlu1 %1946  ;;  %v6362_v60 = vpop.permute.xlu0 %1944  ;;  %v1163_v13 = vsel %vm972_vm3, %v9414_v5, %v9416_v16  ;;  %v1164_v50 = vsel %vm972_vm3, %v9416_v16, %v9417_v52  ;;  %v1115_v40 = vadd.f32 %v1109_v34, %v952_v6  ;;  %v1116_v54 = vadd.f32 %v1110_v39, %v953_v14  ;;  %v9424_v39 = vld [vmem:[#allocation148_spill] sm:$0xff] }
 0x2d1   :  { %v1141_v0 = vadd.f32 %v1135_v48, %v979_v27  ;;  %v1189_v32 = vsel %vm972_vm3, %v9419_v30, %v9418_v2  ;;  %v1142_v22 = vadd.f32 %v1136_v43, %v980_v19  ;;  %v1143_v47 = vadd.f32 %v1137_v51, %v981_v37  ;;  %v9425_v48 = vld [vmem:[#allocation149_spill] sm:$0xff]  ;;  %v9426_v30 = vld [vmem:[#allocation151_spill] sm:$0xff]  ;;  %v9427_v37 = vld [vmem:[#allocation150_spill] sm:$0xff] }
 0x2d2   :  { %v1190_v5 = vsel %vm972_vm3, %v9418_v2, %v9422_v36  ;;  %v1191_v6 = vsel %vm972_vm3, %v9422_v36, %v9423_v18  ;;  %v1168_v14 = vadd.f32 %v1162_v24, %v1006_v26  ;;  %v1169_v27 = vadd.f32 %v1163_v13, %v1007_v21  ;;  %v9428_v51 = vld [vmem:[#allocation152_spill] sm:$0xff]  ;;  %v9429_v2 = vld [vmem:[#allocation153_spill] sm:$0xff]  ;;  %v9431_v13 = vld [vmem:[#allocation154_spill] sm:$0xff] }
 0x2d3   :  { %v1170_v34 = vadd.f32 %v1164_v50, %v1008_v44  ;;  %v1217_v16 = vsel %vm1216_vm4, %v9425_v48, %v9424_v39  ;;  %v1195_v52 = vadd.f32 %v1189_v32, %v1033_v38  ;;  %v1218_v19 = vsel %vm1216_vm4, %v9424_v39, %v9426_v30  ;;  %v9430_v44 = vld [vmem:[#allocation155_spill] sm:$0xff]  ;;  %v9434_v39 = vld [vmem:[#allocation156_spill] sm:$0xff]  ;;  %v9435_v48 = vld [vmem:[#allocation157_spill] sm:$0xff] }
 0x2d4   :  { %v6391_v58 = vpop.permute.xlu1 %1970  ;;  %v6393_v46 = vpop.permute.xlu0 %1968  ;;  %v1219_v43 = vsel %vm1216_vm4, %v9426_v30, %v9427_v37  ;;  %v1244_v18 = vsel %vm1216_vm4, %v9429_v2, %v9428_v51  ;;  %v1196_v26 = vadd.f32 %v1190_v5, %v1034_v28  ;;  %v1197_v21 = vadd.f32 %v1191_v6, %v1035_v59  ;;  %v9436_v28 = vld [vmem:[#allocation159_spill] sm:$0xff]  ;;  %v9437_v5 = vld [vmem:[#allocation158_spill] sm:$0xff] }
 0x2d5   :  { %9420 = vst [vmem:[#allocation31_spill] sm:$0xff] %v6391_v58  ;;  %9421 = vst [vmem:[#allocation30_spill] sm:$0xff] %v6393_v46  ;;  %v1245_v24 = vsel %vm1216_vm4, %v9428_v51, %v9430_v44  ;;  %v1246_v38 = vsel %vm1216_vm4, %v9430_v44, %v9431_v13  ;;  %v1223_v36 = vadd.f32 %v1217_v16, %v1060_v49  ;;  %v9438_v44 = vld [vmem:[#allocation160_spill] sm:$0xff]  ;;  %v9439_v13 = vld [vmem:[#allocation161_spill] sm:$0xff] }
 0x2d6   :  { %v1271_v30 = vsel %vm1216_vm4, %v9435_v48, %v9434_v39  ;;  %v1272_v59 = vsel %vm1216_vm4, %v9434_v39, %v9436_v28  ;;  %v1273_v6 = vsel %vm1216_vm4, %v9436_v28, %v9437_v5  ;;  %v1224_v37 = vadd.f32 %v1218_v19, %v1061_v35  ;;  %v9441_v46 = vld [vmem:[#allocation162_spill] sm:$0xff]  ;;  %v9442_v35 = vld [vmem:[#allocation164_spill] sm:$0xff] }
 0x2d7   :  { %v1225_v51 = vadd.f32 %v1219_v43, %v1062_v53  ;;  %v1250_v2 = vadd.f32 %v1244_v18, %v1087_v57  ;;  %v1251_v49 = vadd.f32 %v1245_v24, %v1088_v61  ;;  %v1252_v16 = vadd.f32 %v1246_v38, %v1089_v33  ;;  %v9443_v53 = vld [vmem:[#allocation165_spill] sm:$0xff]  ;;  %v9446_v33 = vld [vmem:[#allocation167_spill] sm:$0xff]  ;;  %v9447_v24 = vld [vmem:[#allocation166_spill] sm:$0xff] }
 0x2d8   :  { %v6419_v50 = vpop.permute.xlu1 %1974  ;;  %v6421_v32 = vpop.permute.xlu0 %1972  ;;  %v1277_v58 = vadd.f32 %v1271_v30, %v1114_v4  ;;  %v1278_v3 = vadd.f32 %v1272_v59, %v1115_v40  ;;  %v1279_v28 = vadd.f32 %v1273_v6, %v1116_v54  ;;  %v1325_v57 = vsel %vm1216_vm4, %v9443_v53, %v9442_v35  ;;  %v9448_v4 = vld [vmem:[#allocation168_spill] sm:$0xff]  ;;  %v9449_v40 = vld [vmem:[#allocation169_spill] sm:$0xff]  ;;  %v9450_v30 = vld [vmem:[#allocation171_spill] sm:$0xff] }
 0x2d9   :  { %9432 = vst [vmem:[#allocation32_spill] sm:$0xff] %v6419_v50  ;;  %9433 = vst [vmem:[#allocation33_spill] sm:$0xff] %v6421_v32  ;;  %v1298_v50 = vsel %vm1216_vm4, %v9439_v13, %v9438_v44  ;;  %v9440_v32 = vld [vmem:[#allocation163_spill] sm:$0xff]  ;;  %v1326_v18 = vsel %vm1216_vm4, %v9442_v35, %v9446_v33  ;;  %v1352_v54 = vsel %vm1216_vm4, %v9449_v40, %v9448_v4  ;;  %v9451_v5 = vld [vmem:[#allocation170_spill] sm:$0xff] }
 0x2da   :  { %v1299_v48 = vsel %vm1216_vm4, %v9438_v44, %v9440_v32  ;;  %v1300_v39 = vsel %vm1216_vm4, %v9440_v32, %v9441_v46  ;;  %v1304_v61 = vadd.f32 %v1298_v50, %v1141_v0  ;;  %v1327_v46 = vsel %vm1216_vm4, %v9446_v33, %v9447_v24  ;;  %v9452_v6 = vld [vmem:[#allocation172_spill] sm:$0xff]  ;;  %v9453_v44 = vld [vmem:[#allocation173_spill] sm:$0xff]  ;;  %v9454_v35 = vld [vmem:[#allocation175_spill] sm:$0xff] }
 0x2db   :  { %v1305_v38 = vadd.f32 %v1299_v48, %v1142_v22  ;;  %v1306_v32 = vadd.f32 %v1300_v39, %v1143_v47  ;;  %v1353_v59 = vsel %vm1216_vm4, %v9448_v4, %v9450_v30  ;;  %v1354_v0 = vsel %vm1216_vm4, %v9450_v30, %v9451_v5  ;;  %v9455_v33 = vld [vmem:[#allocation174_spill] sm:$0xff]  ;;  %v9456_v24 = vld [vmem:[#allocation176_spill] sm:$0xff]  ;;  %v9457_v4 = vld [vmem:[#allocation177_spill] sm:$0xff] }
 0x2dc   :  { %v6444_v19 = vpop.permute.xlu1 %1997  ;;  %v6446_v43 = vpop.permute.xlu0 %1995  ;;  %v1331_v50 = vadd.f32 %v1325_v57, %v1168_v14  ;;  %v1379_v13 = vsel %vm1216_vm4, %v9453_v44, %v9452_v6  ;;  %v1380_v53 = vsel %vm1216_vm4, %v9452_v6, %v9454_v35  ;;  %v1381_v22 = vsel %vm1216_vm4, %v9454_v35, %v9455_v33  ;;  %v9460_v44 = vld [vmem:[#allocation179_spill] sm:$0xff] }
 0x2dd   :  { %9444 = vst [vmem:[#allocation35_spill] sm:$0xff] %v6444_v19  ;;  %9445 = vst [vmem:[#allocation34_spill] sm:$0xff] %v6446_v43  ;;  %v1332_v47 = vadd.f32 %v1326_v18, %v1169_v27  ;;  %v1333_v48 = vadd.f32 %v1327_v46, %v1170_v34  ;;  %v1358_v39 = vadd.f32 %v1352_v54, %v1195_v52  ;;  %v9461_v43 = vld [vmem:[#allocation178_spill] sm:$0xff]  ;;  %v9462_v46 = vld [vmem:[#allocation180_spill] sm:$0xff] }
 0x2de   :  { %v1406_v40 = vsel %vm1216_vm4, %v9457_v4, %v9456_v24  ;;  %v1359_v30 = vadd.f32 %v1353_v59, %v1196_v26  ;;  %v1360_v5 = vadd.f32 %v1354_v0, %v1197_v21  ;;  %v1407_v6 = vsel %vm1216_vm4, %v9456_v24, %v9460_v44  ;;  %v9463_v54 = vld [vmem:[#allocation181_spill] sm:$0xff]  ;;  %v9464_v4 = vld [vmem:[#allocation183_spill] sm:$0xff]  ;;  %v9465_v21 = vld [vmem:[#allocation182_spill] sm:$0xff] }
 0x2df   :  { %v1408_v27 = vsel %vm1216_vm4, %v9460_v44, %v9461_v43  ;;  %v1385_v34 = vadd.f32 %v1379_v13, %v1223_v36  ;;  %v1386_v52 = vadd.f32 %v1380_v53, %v1224_v37  ;;  %v1387_v18 = vadd.f32 %v1381_v22, %v1225_v51  ;;  %v9466_v0 = vld [vmem:[#allocation184_spill] sm:$0xff]  ;;  %v9467_v24 = vld [vmem:[#allocation185_spill] sm:$0xff]  ;;  %v9468_v51 = vld [vmem:[#allocation187_spill] sm:$0xff] }
 0x2e0   :  { %v6475_v14 = vpop.permute.xlu1 %2001  ;;  %v6477_v57 = vpop.permute.xlu0 %1999  ;;  %v1433_v35 = vsel %vm1216_vm4, %v9463_v54, %v9462_v46  ;;  %v1412_v33 = vadd.f32 %v1406_v40, %v1250_v2  ;;  %v1434_v26 = vsel %vm1216_vm4, %v9462_v46, %v9464_v4  ;;  %v1435_v59 = vsel %vm1216_vm4, %v9464_v4, %v9465_v21  ;;  %v9469_v53 = vld [vmem:[#allocation186_spill] sm:$0xff]  ;;  %v9470_v46 = vld [vmem:[#allocation188_spill] sm:$0xff]  ;;  %v9471_v54 = vld [vmem:[#allocation189_spill] sm:$0xff] }
 0x2e1   :  { %9458 = vst [vmem:[#allocation36_spill] sm:$0xff] %v6475_v14  ;;  %9459 = vst [vmem:[#allocation37_spill] sm:$0xff] %v6477_v57  ;;  %v1461_v43 = vsel %vm1460_vm5, %v9467_v24, %v9466_v0  ;;  %v1413_v36 = vadd.f32 %v1407_v6, %v1251_v49  ;;  %v1414_v37 = vadd.f32 %v1408_v27, %v1252_v16  ;;  %v9472_v21 = vld [vmem:[#allocation191_spill] sm:$0xff]  ;;  %v9473_v16 = vld [vmem:[#allocation190_spill] sm:$0xff] }
 0x2e2   :  { %v1462_v13 = vsel %vm1460_vm5, %v9466_v0, %v9468_v51  ;;  %v1463_v2 = vsel %vm1460_vm5, %v9468_v51, %v9469_v53  ;;  %v1439_v44 = vadd.f32 %v1433_v35, %v1277_v58  ;;  %v1488_v4 = vsel %vm1460_vm5, %v9471_v54, %v9470_v46  ;;  %v9474_v51 = vld [vmem:[#allocation192_spill] sm:$0xff]  ;;  %v9475_v53 = vld [vmem:[#allocation193_spill] sm:$0xff]  ;;  %v9476_v57 = vld [vmem:[#allocation195_spill] sm:$0xff] }
 0x2e3   :  { %v1489_v49 = vsel %vm1460_vm5, %v9470_v46, %v9472_v21  ;;  %v1490_v6 = vsel %vm1460_vm5, %v9472_v21, %v9473_v16  ;;  %v1440_v27 = vadd.f32 %v1434_v26, %v1278_v3  ;;  %v1441_v0 = vadd.f32 %v1435_v59, %v1279_v28  ;;  %v9477_v19 = vld [vmem:[#allocation194_spill] sm:$0xff]  ;;  %v9478_v28 = vld [vmem:[#allocation196_spill] sm:$0xff] }
 0x2e4   :  { %v6503_v22 = vpop.permute.xlu1 %2024  ;;  %v6505_v40 = vpop.permute.xlu0 %2022  ;;  %v1467_v24 = vadd.f32 %v1461_v43, %v1304_v61  ;;  %v1515_v14 = vsel %vm1460_vm5, %v9475_v53, %v9474_v51  ;;  %v1468_v58 = vadd.f32 %v1462_v13, %v1305_v38  ;;  %v1469_v35 = vadd.f32 %v1463_v2, %v1306_v32  ;;  %v9479_v61 = vld [vmem:[#allocation197_spill] sm:$0xff]  ;;  %v9481_v32 = vld [vmem:[#allocation199_spill] sm:$0xff]  ;;  %v9482_v2 = vld [vmem:[#allocation198_spill] sm:$0xff] }
 0x2e5   :  { %v1516_v54 = vsel %vm1460_vm5, %v9474_v51, %v9476_v57  ;;  %v1517_v46 = vsel %vm1460_vm5, %v9476_v57, %v9477_v19  ;;  %v1494_v42 = vadd.f32 %v1488_v4, %v1331_v50  ;;  %v1495_v21 = vadd.f32 %v1489_v49, %v1332_v47  ;;  %v9483_v50 = vld [vmem:[#allocation200_spill] sm:$0xff]  ;;  %v9484_v47 = vld [vmem:[#allocation201_spill] sm:$0xff]  ;;  %v9485_v49 = vld [vmem:[#allocation203_spill] sm:$0xff] }
 0x2e6   :  { %v1496_v3 = vadd.f32 %v1490_v6, %v1333_v48  ;;  %v1542_v26 = vsel %vm1460_vm5, %v9479_v61, %v9478_v28  ;;  %v1521_v38 = vadd.f32 %v1515_v14, %v1358_v39  ;;  %v1543_v13 = vsel %vm1460_vm5, %v9478_v28, %v9481_v32  ;;  %v9486_v6 = vld [vmem:[#allocation202_spill] sm:$0xff]  ;;  %v9487_v51 = vld [vmem:[#allocation204_spill] sm:$0xff]  ;;  %v9488_v53 = vld [vmem:[#allocation205_spill] sm:$0xff] }
 0x2e7   :  { %v1544_v19 = vsel %vm1460_vm5, %v9481_v32, %v9482_v2  ;;  %v1569_v48 = vsel %vm1460_vm5, %v9484_v47, %v9483_v50  ;;  %v1522_v57 = vadd.f32 %v1516_v54, %v1359_v30  ;;  %v1523_v4 = vadd.f32 %v1517_v46, %v1360_v5  ;;  %v9489_v61 = vld [vmem:[#allocation207_spill] sm:$0xff]  ;;  %v9490_v2 = vld [vmem:[#allocation206_spill] sm:$0xff]  ;;  %v9492_v47 = vld [vmem:[#allocation209_spill] sm:$0xff] }
 0x2e8   :  { %v6528_v59 = vpop.permute.xlu1 %2028  ;;  %v6530_v43 = vpop.permute.xlu0 %2026  ;;  %v1570_v16 = vsel %vm1460_vm5, %v9483_v50, %v9485_v49  ;;  %v1571_v39 = vsel %vm1460_vm5, %v9485_v49, %v9486_v6  ;;  %v1548_v14 = vadd.f32 %v1542_v26, %v1385_v34  ;;  %v1596_v28 = vsel %vm1460_vm5, %v9488_v53, %v9487_v51  ;;  %v9491_v50 = vld [vmem:[#allocation208_spill] sm:$0xff] }
 0x2e9   :  { %9480 = vst [vmem:[#allocation39_spill] sm:$0xff] %v6528_v59  ;;  %v1597_v32 = vsel %vm1460_vm5, %v9487_v51, %v9489_v61  ;;  %v1598_v30 = vsel %vm1460_vm5, %v9489_v61, %v9490_v2  ;;  %v1549_v5 = vadd.f32 %v1543_v13, %v1386_v52  ;;  %v1550_v54 = vadd.f32 %v1544_v19, %v1387_v18  ;;  %v9496_v59 = vld [vmem:[#allocation210_spill] sm:$0xff]  ;;  %v9497_v19 = vld [vmem:[#allocation212_spill] sm:$0xff] }
 0x2ea   :  { %v1575_v46 = vadd.f32 %v1569_v48, %v1412_v33  ;;  %v1623_v49 = vsel %vm1460_vm5, %v9492_v47, %v9491_v50  ;;  %v1576_v6 = vadd.f32 %v1570_v16, %v1413_v36  ;;  %v1577_v53 = vadd.f32 %v1571_v39, %v1414_v37  ;;  %v9498_v48 = vld [vmem:[#allocation213_spill] sm:$0xff]  ;;  %v9499_v47 = vld [vmem:[#allocation215_spill] sm:$0xff]  ;;  %v9500_v37 = vld [vmem:[#allocation214_spill] sm:$0xff] }
 0x2eb   :  { %v1624_v51 = vsel %vm1460_vm5, %v9491_v50, %v9495_v11  ;;  %v1625_v52 = vsel %vm1460_vm5, %v9495_v11, %v9496_v59  ;;  %v1602_v18 = vadd.f32 %v1596_v28, %v1439_v44  ;;  %v1603_v33 = vadd.f32 %v1597_v32, %v1440_v27  ;;  %v9501_v39 = vld [vmem:[#allocation216_spill] sm:$0xff]  ;;  %v9502_v50 = vld [vmem:[#allocation217_spill] sm:$0xff]  ;;  %v9504_v28 = vld [vmem:[#allocation218_spill] sm:$0xff] }
 0x2ec   :  { %v6559_v34 = vpop.permute.xlu1 %2051  ;;  %v6561_v26 = vpop.permute.xlu0 %2049  ;;  %v1604_v13 = vadd.f32 %v1598_v30, %v1441_v0  ;;  %v1650_v61 = vsel %vm1460_vm5, %v9498_v48, %v9497_v19  ;;  %v1629_v2 = vadd.f32 %v1623_v49, %v1467_v24  ;;  %v1651_v36 = vsel %vm1460_vm5, %v9497_v19, %v9499_v47  ;;  %v9503_v0 = vld [vmem:[#allocation219_spill] sm:$0xff]  ;;  %v9507_v19 = vld [vmem:[#allocation220_spill] sm:$0xff]  ;;  %v9508_v48 = vld [vmem:[#allocation221_spill] sm:$0xff] }
 0x2ed   :  { %9493 = vst [vmem:[#allocation38_spill] sm:$0xff] %v6559_v34  ;;  %9494 = vst [vmem:[#allocation40_spill] sm:$0xff] %v6561_v26  ;;  %v1652_v16 = vsel %vm1460_vm5, %v9499_v47, %v9500_v37  ;;  %v1677_v11 = vsel %vm1460_vm5, %v9502_v50, %v9501_v39  ;;  %v1630_v44 = vadd.f32 %v1624_v51, %v1468_v58  ;;  %v9509_v37 = vld [vmem:[#allocation223_spill] sm:$0xff]  ;;  %v9514_v26 = vld [vmem:[#allocation226_spill] sm:$0xff] }
 0x2ee   :  { %v1631_v27 = vadd.f32 %v1625_v52, %v1469_v35  ;;  %v1678_v59 = vsel %vm1460_vm5, %v9501_v39, %v9503_v0  ;;  %v1679_v24 = vsel %vm1460_vm5, %v9503_v0, %v9504_v28  ;;  %v1656_v49 = vadd.f32 %v1650_v61, %v1494_v42  ;;  %v9510_v35 = vld [vmem:[#allocation222_spill] sm:$0xff]  ;;  %v9511_v0 = vld [vmem:[#allocation224_spill] sm:$0xff]  ;;  %v9512_v28 = vld [vmem:[#allocation225_spill] sm:$0xff] }
 0x2ef   :  { %v1705_v47 = vsel %vm1704_vm6, %v9508_v48, %v9507_v19  ;;  %v1706_v58 = vsel %vm1704_vm6, %v9507_v19, %v9509_v37  ;;  %v1707_v51 = vsel %vm1704_vm6, %v9509_v37, %v9510_v35  ;;  %v1657_v52 = vadd.f32 %v1651_v36, %v1495_v21 }
 0x2f0   :  { %v6587_v32 = vpop.permute.xlu1 %2055  ;;  %v6589_v30 = vpop.permute.xlu0 %2053  ;;  %v1658_v39 = vadd.f32 %v1652_v16, %v1496_v3  ;;  %v1683_v50 = vadd.f32 %v1677_v11, %v1521_v38  ;;  %v1684_v42 = vadd.f32 %v1678_v59, %v1522_v57  ;;  %v6603_v61 = vadd.f32 %v1679_v24, %v1523_v4  ;;  %v9515_v3 = vld [vmem:[#allocation228_spill] sm:$0xff]  ;;  %v9516_v38 = vld [vmem:[#allocation229_spill] sm:$0xff]  ;;  %v9517_v11 = vld [vmem:[#allocation231_spill] sm:$0xff] }
 0x2f1   :  { %9505 = vst [vmem:[#allocation41_spill] sm:$0xff] %v6587_v32  ;;  %9506 = vst [vmem:[#allocation43_spill] sm:$0xff] %v6589_v30  ;;  %v1732_v32 = vsel %vm1704_vm6, %v9512_v28, %v9511_v0  ;;  %v9513_v30 = vld [vmem:[#allocation227_spill] sm:$0xff]  ;;  %v1711_v34 = vadd.f32 %v1705_v47, %v1548_v14  ;;  %v1712_v37 = vadd.f32 %v1706_v58, %v1549_v5  ;;  %v9518_v24 = vld [vmem:[#allocation230_spill] sm:$0xff] }
 0x2f2   :  { %v1733_v48 = vsel %vm1704_vm6, %v9511_v0, %v9513_v30  ;;  %v1734_v19 = vsel %vm1704_vm6, %v9513_v30, %v9514_v26  ;;  %v1713_v21 = vadd.f32 %v1707_v51, %v1550_v54  ;;  %v1759_v36 = vsel %vm1704_vm6, %v9516_v38, %v9515_v3 }
 0x2f3   :  { %v6618_v4 = vadd.f32 %v1732_v32, %v1575_v46  ;;  %v1760_v59 = vsel %vm1704_vm6, %v9515_v3, %v9517_v11  ;;  %v1761_v14 = vsel %vm1704_vm6, %v9517_v11, %v9518_v24  ;;  %v1786_v5 = vsel %vm1704_vm6, %v6006_v1, %v6004_v56  ;;  %v9523_v3 = vld [vmem:[#allocation25_spill] sm:$0xff]  ;;  %v9525_v11 = vld [vmem:[#allocation30_spill] sm:$0xff] }
 0x2f4   :  { %v6614_v16 = vpop.permute.xlu1 %2078  ;;  %v6616_v57 = vpop.permute.xlu0 %2076  ;;  %v6629_v54 = vadd.f32 %v1733_v48, %v1576_v6  ;;  %v6631_v26 = vadd.f32 %v1734_v19, %v1577_v53  ;;  %v1787_v46 = vsel %vm1704_vm6, %v6004_v56, %v6020_v29  ;;  %v1788_v32 = vsel %vm1704_vm6, %v6020_v29, %v6018_v10  ;;  %v9521_v48 = vld [vmem:[#allocation23_spill] sm:$0xff] }
 0x2f5   :  { %v6639_v30 = vadd.f32 %v1759_v36, %v1602_v18  ;;  %v1813_v47 = vsel %vm1704_vm6, %v6055_v55, %v6053_v23  ;;  %v1814_v1 = vsel %vm1704_vm6, %v6053_v23, %v6085_v12  ;;  %v1815_v6 = vsel %vm1704_vm6, %v6085_v12, %v6083_v9  ;;  %v9524_v36 = vld [vmem:[#allocation31_spill] sm:$0xff] }
 0x2f6   :  { %v6650_v53 = vadd.f32 %v1760_v59, %v1603_v33  ;;  %v6652_v56 = vadd.f32 %v1761_v14, %v1604_v13  ;;  %v1792_v58 = vadd.f32 %v1786_v5, %v1629_v2  ;;  %v1840_v10 = vsel %vm1704_vm6, %v6110_v17, %v6108_v45 }
 0x2f7   :  { %v1793_v18 = vadd.f32 %v1787_v46, %v1630_v44  ;;  %v1794_v35 = vadd.f32 %v1788_v32, %v1631_v27  ;;  %v1867_v23 = vsel %vm1704_vm6, %v6169_v63, %v6167_v31  ;;  %v1949_v9 = vsel %vm1948_vm7, %v6337_v7, %v6335_v41  ;;  %v9526_v32 = vld [vmem:[#allocation38_spill] sm:$0xff] }
 0x2f8   :  { %v6657_v29 = vpop.permute.xlu1 %2082  ;;  %v6659_v55 = vpop.permute.xlu0 %2080  ;;  %v1819_v12 = vadd.f32 %v1813_v47, %v1656_v49  ;;  %v6667_v33 = vadd.f32 %v1814_v1, %v1657_v52  ;;  %v6669_v13 = vadd.f32 %v1815_v6, %v1658_v39  ;;  %v1841_v17 = vsel %vm1704_vm6, %v6108_v45, %v6141_v25  ;;  %v9527_v47 = vld [vmem:[#allocation40_spill] sm:$0xff] }
 0x2f9   :  { %v6674_v2 = vadd.f32 %v1840_v10, %v1683_v50  ;;  %v6679_v44 = vsel %vm1704_vm6, %v6141_v25, %v6139_v15  ;;  %v2030_v63 = vsel %vm1948_vm7, %v6505_v40, %v6503_v22  ;;  %v1873_v7 = vadd.f32 %v1867_v23, %v1711_v34  ;;  %v9520_v34 = vld [vmem:[#allocation39_spill] sm:$0xff] }
 0x2fa   :  { %v1868_v27 = vsel %vm1704_vm6, %v6167_v31, %v6194_v20  ;;  %v1869_v45 = vsel %vm1704_vm6, %v6194_v20, %v6192_v8  ;;  %v1955_v49 = vadd.f32 %v1949_v9, %v1792_v58  ;;  %v9519_v39 = vmov 0.0  }
 0x2fb   :  { %105 = vst.msk [vmem:[#allocation2 + $0x18] sm:$0xff] %vm104_vm8, %v9519_v39  ;;  %109 = vst.msk [vmem:[#allocation2 + $0x38] sm:$0xff] %vm104_vm8, %v9519_v39  ;;  %v6693_v15 = vadd.f32 %v1841_v17, %v1684_v42  ;;  %v1950_v25 = vsel %vm1948_vm7, %v6335_v41, %v6362_v60  ;;  %v1951_v31 = vsel %vm1948_vm7, %v6362_v60, %v6360_v62  ;;  %v9522_v41 = vld [vmem:[#allocation22_spill] sm:$0xff]  ;;  %v9529_v17 = vld [vmem:[#allocation33_spill] sm:$0xff] }
 0x2fc   :  { %v2106_v51 = vpop.permute.xlu1 %2105  ;;  %v2104_v52 = vpop.permute.xlu0 %2103  ;;  %113 = vst.msk [vmem:[#allocation2 + $0x58] sm:$0xff] %vm104_vm8, %v9519_v39  ;;  %v2036_v20 = vadd.f32 %v2030_v63, %v1873_v7  ;;  %v2031_v40 = vsel %vm1948_vm7, %v6503_v22, %v6530_v43  ;;  %v2032_v50 = vsel %vm1948_vm7, %v6530_v43, %v9520_v34  ;;  %v1874_v28 = vadd.f32 %v1868_v27, %v1712_v37  ;;  %v9530_v7 = vld [vmem:[#allocation32_spill] sm:$0xff]  ;;  %v9532_v34 = vld [vmem:[#allocation41_spill] sm:$0xff] }
 0x2fd   :  { %v2111_v8 = vsel %vm1948_vm7, %v2104_v52, %v2106_v51  ;;  %v1875_v42 = vadd.f32 %v1869_v45, %v1713_v21  ;;  %v1894_v19 = vsel %vm1704_vm6, %v9522_v41, %v9521_v48  ;;  %v1895_v62 = vsel %vm1704_vm6, %v9521_v48, %v9523_v3  ;;  %v6717_v21 = vld [vmem:[#allocation7] sm:$0xff]  ;;  %v9533_v48 = vld [vmem:[#allocation27_spill] sm:$0xff] }
 0x2fe   :  { %v2117_v0 = vadd.f32 %v2111_v8, %v1955_v49  ;;  %v1956_v60 = vadd.f32 %v1950_v25, %v1793_v18  ;;  %v1957_v38 = vadd.f32 %v1951_v31, %v1794_v35  ;;  %v1976_v22 = vsel %vm1948_vm7, %v9525_v11, %v9524_v36  ;;  %v9528_v35 = vld [vmem:[#allocation24_spill] sm:$0xff]  ;;  %v9531_v31 = vld [vmem:[#allocation43_spill] sm:$0xff]  ;;  %v9534_v41 = vld [vmem:[#allocation26_spill] sm:$0xff] }
 0x2ff   :  { %v2037_v14 = vadd.f32 %v2031_v40, %v1874_v28  ;;  %v2038_v37 = vadd.f32 %v2032_v50, %v1875_v42  ;;  %v2057_v1 = vsel %vm1948_vm7, %v9527_v47, %v9526_v32  ;;  %v1900_v18 = vadd.f32 %v1894_v19, %v6618_v4  ;;  %v6742_v40 = vld [vmem:[#allocation7 + $0x10] sm:$0xff] }
 0x300   :  { %v2174_v59 = vadd.f32 %v2117_v0, %v2036_v20  ;;  %v2110_v24 = vpop.permute.xlu1 %2109  ;;  %v2108_v43 = vpop.permute.xlu0 %2107  ;;  %v1896_v23 = vsel %vm1704_vm6, %v9523_v3, %v9528_v35  ;;  %v1982_v9 = vadd.f32 %v1976_v22, %v1819_v12  ;;  %v1977_v63 = vsel %vm1948_vm7, %v9524_v36, %v9529_v17  ;;  %v6740_v20 = vld [vmem:[#allocation7 + $0x8] sm:$0xff] }
 0x301   :  { %v2112_v5 = vsel %vm1948_vm7, %v2106_v51, %v2108_v43  ;;  %v2113_v46 = vsel %vm1948_vm7, %v2108_v43, %v2110_v24  ;;  %v1978_v27 = vsel %vm1948_vm7, %v9529_v17, %v9530_v7  ;;  %v1901_v4 = vadd.f32 %v1895_v62, %v6629_v54 }
 0x302   :  { %v2183_v6 = vmax.f32 %v2174_v59, 0.0  ;;  %v2118_v58 = vadd.f32 %v2112_v5, %v1956_v60  ;;  %v2119_v10 = vadd.f32 %v2113_v46, %v1957_v38  ;;  %v2063_v25 = vadd.f32 %v2057_v1, %v1900_v18  ;;  %v9535_v60 = vld [vmem:[#allocation35_spill] sm:$0xff]  ;;  %v9536_v38 = vld [vmem:[#allocation34_spill] sm:$0xff]  ;;  %v9537_v1 = vld [vmem:[#allocation29_spill] sm:$0xff] }
 0x303   :  { %v2058_v12 = vsel %vm1948_vm7, %v9526_v32, %v9531_v31  ;;  %v2059_v50 = vsel %vm1948_vm7, %v9531_v31, %v9532_v34  ;;  %v1902_v54 = vadd.f32 %v1896_v23, %v6631_v26  ;;  %v1921_v19 = vsel %vm1704_vm6, %v9534_v41, %v9533_v48 }
 0x304   :  { %v2186_v45 = vmul.f32 %v2183_v6, %v6717_v21  ;;  %v2175_v49 = vadd.f32 %v2118_v58, %v2037_v14  ;;  %v2176_v51 = vadd.f32 %v2119_v10, %v2038_v37  ;;  %v2133_v52 = vpop.permute.xlu1 %2132  ;;  %v2131_v39 = vpop.permute.xlu0 %2130  ;;  %v1983_v3 = vadd.f32 %v1977_v63, %v6667_v33  ;;  %v9538_v58 = vld [vmem:[#allocation28_spill] sm:$0xff] }
 0x305   :  { %v2138_v8 = vsel %vm1948_vm7, %v2131_v39, %v2133_v52  ;;  %v1984_v62 = vadd.f32 %v1978_v27, %v6669_v13  ;;  %v2003_v36 = vsel %vm1948_vm7, %v9536_v38, %v9535_v60  ;;  %v2064_v26 = vadd.f32 %v2058_v12, %v1901_v4  ;;  %v9540_v27 = vld [vmem:[#allocation36_spill] sm:$0xff] }
 0x306   :  { %v2184_v0 = vmax.f32 %v2175_v49, 0.0  ;;  %v2185_v28 = vmax.f32 %v2176_v51, 0.0  ;;  %v2144_v42 = vadd.f32 %v2138_v8, %v1982_v9  ;;  %2192 = vrot.lane.b32.xlu0 %v2186_v45, %s4793_s2  ;;  %v2065_v14 = vadd.f32 %v2059_v50, %v1902_v54 }
 0x307   :  { %v2084_v33 = vsel %vm1948_vm7, %v6616_v57, %v6614_v16  ;;  %v1927_v47 = vadd.f32 %v1921_v19, %v6639_v30  ;;  %v1922_v6 = vsel %vm1704_vm6, %v9533_v48, %v9537_v1  ;;  %v1923_v10 = vsel %vm1704_vm6, %v9537_v1, %v9538_v58  ;;  %v9539_v57 = vld [vmem:[#allocation37_spill] sm:$0xff] }
 0x308   :  { %v2177_v11 = vadd.f32 %v2144_v42, %v2063_v25  ;;  %v2137_v22 = vpop.permute.xlu1 %2136  ;;  %v2135_v59 = vpop.permute.xlu0 %2134  ;;  %v2187_v24 = vmul.f32 %v2184_v0, %v6740_v20  ;;  %v2188_v43 = vmul.f32 %v2185_v28, %v6742_v40  ;;  %v2009_v18 = vadd.f32 %v2003_v36, %v6674_v2 }
 0x309   :  { %v2139_v37 = vsel %vm1948_vm7, %v2133_v52, %v2135_v59  ;;  %v2140_v5 = vsel %vm1948_vm7, %v2135_v59, %v2137_v22  ;;  %v2004_v35 = vsel %vm1948_vm7, %v9535_v60, %v9539_v57  ;;  %v1848_v7 = vadd.f32 %v6679_v44, %v6603_v61 }
 0x30a   :  { %v2210_v13 = vmax.f32 %v2177_v11, 0.0  ;;  %v2145_v46 = vadd.f32 %v2139_v37, %v1983_v3  ;;  %v2146_v32 = vadd.f32 %v2140_v5, %v1984_v62  ;;  %2194 = vrot.lane.b32.xlu1 %v2187_v24, %s4793_s2  ;;  %2196 = vrot.lane.b32.xlu0 %v2188_v43, %s4793_s2  ;;  %v2005_v45 = vsel %vm1948_vm7, %v9539_v57, %v9540_v27 }
 0x30b   :  { %v2090_v49 = vadd.f32 %v2084_v33, %v1927_v47  ;;  %v2085_v51 = vsel %vm1948_vm7, %v6614_v16, %v6659_v55  ;;  %v1928_v25 = vadd.f32 %v1922_v6, %v6650_v53  ;;  %v1929_v61 = vadd.f32 %v1923_v10, %v6652_v56 }
 0x30c   :  { %v2213_v23 = vmul.f32 %v2210_v13, %v6717_v21  ;;  %v2178_v9 = vadd.f32 %v2145_v46, %v2064_v26  ;;  %v2179_v17 = vadd.f32 %v2146_v32, %v2065_v14  ;;  %v2160_v63 = vpop.permute.xlu1 %2159  ;;  %v2158_v30 = vpop.permute.xlu0 %2157  ;;  %v2010_v44 = vadd.f32 %v2004_v35, %v6693_v15 }
 0x30d   :  { %v2165_v2 = vsel %vm1948_vm7, %v2158_v30, %v2160_v63  ;;  %v2086_v31 = vsel %vm1948_vm7, %v6659_v55, %v6657_v29  ;;  %v2011_v12 = vadd.f32 %v2005_v45, %v1848_v7  ;;  %v2091_v28 = vadd.f32 %v2085_v51, %v1928_v25 }
 0x30e   :  { %v2211_v52 = vmax.f32 %v2178_v9, 0.0  ;;  %v2212_v39 = vmax.f32 %v2179_v17, 0.0  ;;  %v2171_v4 = vadd.f32 %v2165_v2, %v2009_v18  ;;  %2219 = vrot.lane.b32.xlu1 %v2213_v23, %s4793_s2  ;;  %v2092_v56 = vadd.f32 %v2086_v31, %v1929_v61 }
 0x30f   :  { %v2381_v32 = vstv %s4534_s28  ;;  %v2408_v9 = vstv %s4535_s30  ;;  %v2439_v45 = vstv %s4536_s7  ;;  %s4558_s28 = sld [smem:[#allocation12 + $0x22]]  ;;  %s4559_s30 = sld [smem:[#allocation12 + $0x23]] }
 0x310   :  { %v2180_v8 = vadd.f32 %v2171_v4, %v2090_v49  ;;  %v2164_v34 = vpop.permute.xlu1 %2163  ;;  %v2162_v50 = vpop.permute.xlu0 %2161  ;;  %v2215_v16 = vmul.f32 %v2212_v39, %v6742_v40  ;;  %v2214_v0 = vmul.f32 %v2211_v52, %v6740_v20  ;;  %v2466_v4 = vstv %s4537_s8  ;;  %s4560_s7 = sld [smem:[#allocation12 + $0x24]]  ;;  %s4561_s8 = sld [smem:[#allocation12 + $0x25]] }
 0x311   :  { %v2166_v42 = vsel %vm1948_vm7, %v2160_v63, %v2162_v50  ;;  %v2167_v53 = vsel %vm1948_vm7, %v2162_v50, %v2164_v34 }
 0x312   :  { %v2236_v54 = vmax.f32 %v2180_v8, 0.0  ;;  %v2172_v15 = vadd.f32 %v2166_v42, %v2010_v44  ;;  %v2173_v48 = vadd.f32 %v2167_v53, %v2011_v12  ;;  %2223 = vrot.lane.b32.xlu1 %v2215_v16, %s4793_s2  ;;  %2221 = vrot.lane.b32.xlu0 %v2214_v0, %s4793_s2  ;;  %v2493_v12 = vstv %s4538_s9  ;;  %s4563_s9 = sld [smem:[#allocation12 + $0x27]] }
 0x314   :  { %v2239_v29 = vmul.f32 %v2236_v54, %v6717_v21  ;;  %v2181_v55 = vadd.f32 %v2172_v15, %v2091_v28  ;;  %v2182_v41 = vadd.f32 %v2173_v48, %v2092_v56  ;;  %v2354_v21 = vstv %s4533_s27  ;;  %s4557_s27 = sld [smem:[#allocation12 + $0x21]] }
 0x315   :  { %v2524_v28 = vstv %s4539_s11  ;;  %v2551_v48 = vstv %s4540_s1  ;;  %s4564_s11 = sld [smem:[#allocation12 + $0x28]]  ;;  %s4565_s1 = sld [smem:[#allocation12 + $0x29]] }
 0x316   :  { %v2237_v19 = vmax.f32 %v2181_v55, 0.0  ;;  %v2238_v3 = vmax.f32 %v2182_v41, 0.0  ;;  %2245 = vrot.lane.b32.xlu0 %v2239_v29, %s4793_s2 }
 0x318   :  { %v2240_v62 = vmul.f32 %v2237_v19, %v6740_v20  ;;  %v2241_v60 = vmul.f32 %v2238_v3, %v6742_v40  ;;  %v2578_v3 = vstv %s4541_s12  ;;  %s4566_s12 = sld [smem:[#allocation12 + $0x2a]] }
 0x31a   :  { %2247 = vrot.lane.b32.xlu1 %v2240_v62, %s4793_s2  ;;  %2249 = vrot.lane.b32.xlu0 %v2241_v60, %s4793_s2  ;;  %s4556_s2 = sld [smem:[#allocation12 + $0x20]] }
 0x378   :  { %v2193_v38 = vpop.permute.xlu0 %2192 }
 0x379   :  { %2206 = vst.msk [vmem:[#allocation2] sm:$0xff] %vm2205_vm9, %v2193_v38 }
 0x37c   :  { %v2195_v36 = vpop.permute.xlu1 %2194  ;;  %v2197_v11 = vpop.permute.xlu0 %2196 }
 0x37d   :  { %v6808_v22 = vsel %vm2198_vm10, %v2193_v38, %v2195_v36  ;;  %v6811_v20 = vsel %vm2198_vm10, %v2195_v36, %v2197_v11  ;;  %2209 = vst.msk [vmem:[#allocation2 + $0x18] sm:$0xff] %vm2198_vm10, %v2197_v11  ;;  %v2605_v36 = vstv %s4542_s4  ;;  %s4567_s4 = sld [smem:[#allocation12 + $0x2b]] }
 0x37e   :  { %2207 = vst [vmem:[#allocation2 + $0x8] sm:$0xff] %v6808_v22  ;;  %2208 = vst [vmem:[#allocation2 + $0x10] sm:$0xff] %v6811_v20  ;;  %v2356_v40 = vmul.f32 %v2354_v21, %v6808_v22  ;;  %v2357_v13 = vmul.f32 %v2354_v21, %v6811_v20  ;;  %v2383_v6 = vmul.f32 %v2381_v32, %v6808_v22 }
 0x37f   :  { %v2384_v35 = vmul.f32 %v2381_v32, %v6811_v20  ;;  %v2410_v63 = vmul.f32 %v2408_v9, %v6808_v22  ;;  %v2411_v30 = vmul.f32 %v2408_v9, %v6811_v20 }
 0x380   :  { %v6817_v59 = vld [vmem:[#allocation2] sm:$0xff]  ;;  %v2220_v24 = vpop.permute.xlu1 %2219  ;;  %2365 = vrot.lane.b32.xlu0 %v2356_v40, %s4784_s14  ;;  %v2607_v40 = vmul.f32 %v2605_v36, %v6808_v22 }
 0x381   :  { %2232 = vst.msk [vmem:[#allocation2 + $0x20] sm:$0xff] %vm2205_vm9, %v2220_v24  ;;  %v2355_v43 = vmul.f32 %v2354_v21, %v6817_v59  ;;  %v2382_v1 = vmul.f32 %v2381_v32, %v6817_v59  ;;  %v2409_v17 = vmul.f32 %v2408_v9, %v6817_v59  ;;  %v2606_v11 = vmul.f32 %v2605_v36, %v6817_v59 }
 0x383   :  { %2363 = vrot.lane.b32.xlu1 %v2355_v43, %s4784_s14 }
 0x384   :  { %v6823_v26 = vld [vmem:[#allocation2 + $0x18] sm:$0xff]  ;;  %v2224_v14 = vpop.permute.xlu1 %2223  ;;  %v2222_v37 = vpop.permute.xlu0 %2221 }
 0x385   :  { %2235 = vst.msk [vmem:[#allocation2 + $0x38] sm:$0xff] %vm2198_vm10, %v2224_v14  ;;  %v6827_v5 = vsel %vm2198_vm10, %v2220_v24, %v2222_v37  ;;  %v6830_v33 = vsel %vm2198_vm10, %v2222_v37, %v2224_v14  ;;  %v2358_v46 = vmul.f32 %v2354_v21, %v6823_v26  ;;  %v2385_v23 = vmul.f32 %v2381_v32, %v6823_v26 }
 0x386   :  { %2233 = vst [vmem:[#allocation2 + $0x28] sm:$0xff] %v6827_v5  ;;  %2234 = vst [vmem:[#allocation2 + $0x30] sm:$0xff] %v6830_v33  ;;  %v2412_v7 = vmul.f32 %v2408_v9, %v6823_v26  ;;  %v2441_v2 = vmul.f32 %v2439_v45, %v6827_v5  ;;  %v2442_v52 = vmul.f32 %v2439_v45, %v6830_v33  ;;  %v2632_v14 = vstv %s4543_s5  ;;  %s4568_s5 = sld [smem:[#allocation12 + $0x2c]] }
 0x387   :  { %2367 = vrot.lane.b32.xlu1 %v2357_v13, %s4784_s14  ;;  %2369 = vrot.lane.b32.xlu0 %v2358_v46, %s4784_s14  ;;  %v2468_v61 = vmul.f32 %v2466_v4, %v6827_v5  ;;  %v2469_v44 = vmul.f32 %v2466_v4, %v6830_v33  ;;  %v2495_v34 = vmul.f32 %v2493_v12, %v6827_v5 }
 0x388   :  { %v2246_v47 = vpop.permute.xlu0 %2245  ;;  %v6862_v27 = vld [vmem:[#allocation2 + $0x20] sm:$0xff]  ;;  %v2496_v50 = vmul.f32 %v2493_v12, %v6830_v33  ;;  %v2608_v24 = vmul.f32 %v2605_v36, %v6811_v20  ;;  %v2609_v43 = vmul.f32 %v2605_v36, %v6823_v26  ;;  %v2633_v37 = vmul.f32 %v2632_v14, %v6817_v59 }
 0x389   :  { %2258 = vst.msk [vmem:[#allocation2 + $0x40] sm:$0xff] %vm2205_vm9, %v2246_v47  ;;  %v2440_v49 = vmul.f32 %v2439_v45, %v6862_v27  ;;  %v2467_v25 = vmul.f32 %v2466_v4, %v6862_v27  ;;  %v2494_v8 = vmul.f32 %v2493_v12, %v6862_v27  ;;  %v2634_v13 = vmul.f32 %v2632_v14, %v6808_v22 }
 0x38a   :  { %v2635_v46 = vmul.f32 %v2632_v14, %v6811_v20  ;;  %v2636_v32 = vmul.f32 %v2632_v14, %v6823_v26 }
 0x38b   :  { %2390 = vrot.lane.b32.xlu1 %v2382_v1, %s4784_s14  ;;  %2392 = vrot.lane.b32.xlu0 %v2383_v6, %s4784_s14 }
 0x38c   :  { %v2248_v58 = vpop.permute.xlu1 %2247  ;;  %v2250_v10 = vpop.permute.xlu0 %2249  ;;  %v6868_v51 = vld [vmem:[#allocation2 + $0x38] sm:$0xff] }
 0x38d   :  { %v6844_v18 = vsel %vm2198_vm10, %v2246_v47, %v2248_v58  ;;  %v6847_v57 = vsel %vm2198_vm10, %v2248_v58, %v2250_v10  ;;  %2261 = vst.msk [vmem:[#allocation2 + $0x58] sm:$0xff] %vm2198_vm10, %v2250_v10  ;;  %v2443_v39 = vmul.f32 %v2439_v45, %v6868_v51  ;;  %v2470_v31 = vmul.f32 %v2466_v4, %v6868_v51 }
 0x38e   :  { %2259 = vst [vmem:[#allocation2 + $0x48] sm:$0xff] %v6844_v18  ;;  %2260 = vst [vmem:[#allocation2 + $0x50] sm:$0xff] %v6847_v57  ;;  %v2497_v16 = vmul.f32 %v2493_v12, %v6868_v51  ;;  %v2526_v53 = vmul.f32 %v2524_v28, %v6844_v18  ;;  %v2527_v54 = vmul.f32 %v2524_v28, %v6847_v57  ;;  %v2659_v47 = vstv %s4544_s13  ;;  %s4569_s13 = sld [smem:[#allocation12 + $0x2d]] }
 0x38f   :  { %2394 = vrot.lane.b32.xlu1 %v2384_v35, %s4784_s14  ;;  %2396 = vrot.lane.b32.xlu0 %v2385_v23, %s4784_s14  ;;  %v2553_v55 = vmul.f32 %v2551_v48, %v6844_v18  ;;  %v2554_v41 = vmul.f32 %v2551_v48, %v6847_v57  ;;  %v2580_v60 = vmul.f32 %v2578_v3, %v6844_v18  ;;  %v2767_v12 = vstv %s4548_s18  ;;  %s4573_s18 = sld [smem:[#allocation12 + $0x31]] }
 0x390   :  { %v6890_v0 = vld [vmem:[#allocation2 + $0x40] sm:$0xff]  ;;  %v2581_v38 = vmul.f32 %v2578_v3, %v6847_v57  ;;  %v2660_v1 = vmul.f32 %v2659_v47, %v6817_v59  ;;  %v2661_v6 = vmul.f32 %v2659_v47, %v6808_v22  ;;  %v2662_v58 = vmul.f32 %v2659_v47, %v6811_v20 }
 0x391   :  { %v2525_v42 = vmul.f32 %v2524_v28, %v6890_v0  ;;  %v2552_v29 = vmul.f32 %v2551_v48, %v6890_v0  ;;  %v2579_v62 = vmul.f32 %v2578_v3, %v6890_v0  ;;  %v2663_v10 = vmul.f32 %v2659_v47, %v6823_v26 }
 0x393   :  { %2417 = vrot.lane.b32.xlu1 %v2409_v17, %s4784_s14  ;;  %2419 = vrot.lane.b32.xlu0 %v2410_v63, %s4784_s14 }
 0x394   :  { %v6896_v56 = vld [vmem:[#allocation2 + $0x58] sm:$0xff] }
 0x395   :  { %v2528_v15 = vmul.f32 %v2524_v28, %v6896_v56  ;;  %v2555_v19 = vmul.f32 %v2551_v48, %v6896_v56  ;;  %v2582_v21 = vmul.f32 %v2578_v3, %v6896_v56 }
 0x397   :  { %2421 = vrot.lane.b32.xlu1 %v2411_v30, %s4784_s14  ;;  %2423 = vrot.lane.b32.xlu0 %v2412_v7, %s4784_s14  ;;  %v2713_v30 = vstv %s4546_s16  ;;  %s4571_s16 = sld [smem:[#allocation12 + $0x2f]] }
 0x398   :  { %v2714_v7 = vmul.f32 %v2713_v30, %v6862_v27  ;;  %v2715_v45 = vmul.f32 %v2713_v30, %v6827_v5 }
 0x39b   :  { %2448 = vrot.lane.b32.xlu1 %v2440_v49, %s4784_s14  ;;  %2450 = vrot.lane.b32.xlu0 %v2441_v2, %s4784_s14  ;;  %v2716_v49 = vmul.f32 %v2713_v30, %v6830_v33  ;;  %v2717_v2 = vmul.f32 %v2713_v30, %v6868_v51 }
 0x39f   :  { %2452 = vrot.lane.b32.xlu1 %v2442_v52, %s4784_s14  ;;  %2454 = vrot.lane.b32.xlu0 %v2443_v39, %s4784_s14  ;;  %v2740_v52 = vstv %s4547_s17  ;;  %s4572_s17 = sld [smem:[#allocation12 + $0x30]] }
 0x3a0   :  { %v2741_v39 = vmul.f32 %v2740_v52, %v6862_v27  ;;  %v2742_v4 = vmul.f32 %v2740_v52, %v6827_v5 }
 0x3a3   :  { %2475 = vrot.lane.b32.xlu1 %v2467_v25, %s4784_s14  ;;  %2477 = vrot.lane.b32.xlu0 %v2468_v61, %s4784_s14  ;;  %v2743_v61 = vmul.f32 %v2740_v52, %v6830_v33 }
 0x3a7   :  { %2479 = vrot.lane.b32.xlu1 %v2469_v44, %s4784_s14  ;;  %2481 = vrot.lane.b32.xlu0 %v2470_v31, %s4784_s14  ;;  %v2744_v31 = vmul.f32 %v2740_v52, %v6868_v51 }
 0x3ab   :  { %2502 = vrot.lane.b32.xlu1 %v2494_v8, %s4784_s14  ;;  %2504 = vrot.lane.b32.xlu0 %v2495_v34, %s4784_s14  ;;  %v2768_v34 = vmul.f32 %v2767_v12, %v6890_v0 }
 0x3af   :  { %2506 = vrot.lane.b32.xlu1 %v2496_v50, %s4784_s14  ;;  %2508 = vrot.lane.b32.xlu0 %v2497_v16, %s4784_s14  ;;  %v2769_v16 = vmul.f32 %v2767_v12, %v6844_v18 }
 0x3b3   :  { %2533 = vrot.lane.b32.xlu1 %v2525_v42, %s4784_s14  ;;  %2535 = vrot.lane.b32.xlu0 %v2526_v53, %s4784_s14  ;;  %v2770_v42 = vmul.f32 %v2767_v12, %v6847_v57 }
 0x3b7   :  { %2537 = vrot.lane.b32.xlu1 %v2527_v54, %s4784_s14  ;;  %2539 = vrot.lane.b32.xlu0 %v2528_v15, %s4784_s14  ;;  %v2771_v54 = vmul.f32 %v2767_v12, %v6896_v56  ;;  %v2794_v15 = vstv %s4549_s20  ;;  %s4574_s20 = sld [smem:[#allocation12 + $0x32]] }
 0x3b8   :  { %v2797_v3 = vmul.f32 %v2794_v15, %v6847_v57 }
 0x3bb   :  { %2560 = vrot.lane.b32.xlu1 %v2552_v29, %s4784_s14  ;;  %2562 = vrot.lane.b32.xlu0 %v2553_v55, %s4784_s14  ;;  %v2795_v29 = vmul.f32 %v2794_v15, %v6890_v0 }
 0x3bf   :  { %2564 = vrot.lane.b32.xlu1 %v2554_v41, %s4784_s14  ;;  %2566 = vrot.lane.b32.xlu0 %v2555_v19, %s4784_s14  ;;  %v2796_v41 = vmul.f32 %v2794_v15, %v6844_v18 }
 0x3c3   :  { %2587 = vrot.lane.b32.xlu1 %v2579_v62, %s4784_s14  ;;  %2589 = vrot.lane.b32.xlu0 %v2580_v60, %s4784_s14  ;;  %v2798_v60 = vmul.f32 %v2794_v15, %v6896_v56 }
 0x3c7   :  { %2591 = vrot.lane.b32.xlu1 %v2581_v38, %s4784_s14  ;;  %2593 = vrot.lane.b32.xlu0 %v2582_v21, %s4784_s14  ;;  %s4545_s14 = sld [smem:[#allocation12 + $0x15]]  ;;  %v2821_v38 = vstv %s4550_s21  ;;  %s4575_s21 = sld [smem:[#allocation12 + $0x33]] }
 0x3c8   :  { %v2822_v36 = vmul.f32 %v2821_v38, %v6890_v0 }
 0x3cb   :  { %2614 = vrot.lane.b32.xlu1 %v2606_v11, %s4785_s24  ;;  %2616 = vrot.lane.b32.xlu0 %v2607_v40, %s4785_s24  ;;  %v2823_v40 = vmul.f32 %v2821_v38, %v6844_v18 }
 0x3cd   :  { %v2686_v35 = vstv %s4545_s14  ;;  %s4570_s14 = sld [smem:[#allocation12 + $0x2e]] }
 0x3ce   :  { %v2687_v23 = vmul.f32 %v2686_v35, %v6862_v27  ;;  %v2688_v9 = vmul.f32 %v2686_v35, %v6827_v5  ;;  %v2689_v17 = vmul.f32 %v2686_v35, %v6830_v33  ;;  %v2690_v63 = vmul.f32 %v2686_v35, %v6868_v51 }
 0x3cf   :  { %2618 = vrot.lane.b32.xlu1 %v2608_v24, %s4785_s24  ;;  %2620 = vrot.lane.b32.xlu0 %v2609_v43, %s4785_s24  ;;  %v2824_v43 = vmul.f32 %v2821_v38, %v6847_v57 }
 0x3d3   :  { %2641 = vrot.lane.b32.xlu1 %v2633_v37, %s4785_s24  ;;  %2643 = vrot.lane.b32.xlu0 %v2634_v13, %s4785_s24  ;;  %v2825_v37 = vmul.f32 %v2821_v38, %v6896_v56  ;;  %v2848_v13 = vstv %s4551_s22  ;;  %s4576_s22 = sld [smem:[#allocation12 + $0x34]] }
 0x3d4   :  { %v2852_v35 = vmul.f32 %v2848_v13, %v6823_v26 }
 0x3d7   :  { %2645 = vrot.lane.b32.xlu1 %v2635_v46, %s4785_s24  ;;  %2647 = vrot.lane.b32.xlu0 %v2636_v32, %s4785_s24  ;;  %v2849_v32 = vmul.f32 %v2848_v13, %v6817_v59 }
 0x3db   :  { %2668 = vrot.lane.b32.xlu1 %v2660_v1, %s4785_s24  ;;  %2670 = vrot.lane.b32.xlu0 %v2661_v6, %s4785_s24  ;;  %v2850_v1 = vmul.f32 %v2848_v13, %v6808_v22 }
 0x3df   :  { %2672 = vrot.lane.b32.xlu1 %v2662_v58, %s4785_s24  ;;  %2674 = vrot.lane.b32.xlu0 %v2663_v10, %s4785_s24  ;;  %v2851_v58 = vmul.f32 %v2848_v13, %v6811_v20 }
 0x3e3   :  { %2695 = vrot.lane.b32.xlu1 %v2687_v23, %s4785_s24  ;;  %2697 = vrot.lane.b32.xlu0 %v2688_v9, %s4785_s24  ;;  %v2875_v23 = vstv %s4552_s23  ;;  %s4577_s23 = sld [smem:[#allocation12 + $0x35]] }
 0x3e4   :  { %v2877_v30 = vmul.f32 %v2875_v23, %v6808_v22 }
 0x3e7   :  { %2699 = vrot.lane.b32.xlu1 %v2689_v17, %s4785_s24  ;;  %2701 = vrot.lane.b32.xlu0 %v2690_v63, %s4785_s24  ;;  %v2876_v17 = vmul.f32 %v2875_v23, %v6817_v59 }
 0x3eb   :  { %2722 = vrot.lane.b32.xlu1 %v2714_v7, %s4785_s24  ;;  %2724 = vrot.lane.b32.xlu0 %v2715_v45, %s4785_s24  ;;  %v2878_v45 = vmul.f32 %v2875_v23, %v6811_v20 }
 0x3ef   :  { %2726 = vrot.lane.b32.xlu1 %v2716_v49, %s4785_s24  ;;  %2728 = vrot.lane.b32.xlu0 %v2717_v2, %s4785_s24  ;;  %v2879_v2 = vmul.f32 %v2875_v23, %v6823_v26 }
 0x3f2   :  { %v6967_v44 = vpop.permute.xlu0 %2365 }
 0x3f3   :  { %2749 = vrot.lane.b32.xlu1 %v2741_v39, %s4785_s24  ;;  %2751 = vrot.lane.b32.xlu0 %v2742_v4, %s4785_s24 }
 0x3f5   :  { %v6964_v25 = vpop.permute.xlu1 %2363 }
 0x3f7   :  { %2753 = vrot.lane.b32.xlu1 %v2743_v61, %s4785_s24  ;;  %2755 = vrot.lane.b32.xlu0 %v2744_v31, %s4785_s24 }
 0x3f9   :  { %v6972_v8 = vpop.permute.xlu1 %2367  ;;  %v6975_v50 = vpop.permute.xlu0 %2369 }
 0x3fb   :  { %2776 = vrot.lane.b32.xlu1 %v2768_v34, %s4785_s24  ;;  %2778 = vrot.lane.b32.xlu0 %v2769_v16, %s4785_s24 }
 0x3fd   :  { %v6980_v28 = vpop.permute.xlu1 %2390  ;;  %v6983_v53 = vpop.permute.xlu0 %2392 }
 0x3ff   :  { %2780 = vrot.lane.b32.xlu1 %v2770_v42, %s4785_s24  ;;  %2782 = vrot.lane.b32.xlu0 %v2771_v54, %s4785_s24  ;;  %v2929_v54 = vstv %s4554_s25  ;;  %s4579_s25 = sld [smem:[#allocation12 + $0x37]] }
 0x400   :  { %v2932_v38 = vmul.f32 %v2929_v54, %v6830_v33 }
 0x401   :  { %v6988_v48 = vpop.permute.xlu1 %2394  ;;  %v6991_v55 = vpop.permute.xlu0 %2396 }
 0x403   :  { %2803 = vrot.lane.b32.xlu1 %v2795_v29, %s4785_s24  ;;  %2805 = vrot.lane.b32.xlu0 %v2796_v41, %s4785_s24  ;;  %v2930_v29 = vmul.f32 %v2929_v54, %v6862_v27 }
 0x405   :  { %v6996_v19 = vpop.permute.xlu1 %2417  ;;  %v6999_v62 = vpop.permute.xlu0 %2419 }
 0x407   :  { %2807 = vrot.lane.b32.xlu1 %v2797_v3, %s4785_s24  ;;  %2809 = vrot.lane.b32.xlu0 %v2798_v60, %s4785_s24  ;;  %v2931_v3 = vmul.f32 %v2929_v54, %v6827_v5 }
 0x409   :  { %v7004_v21 = vpop.permute.xlu1 %2421  ;;  %v7007_v11 = vpop.permute.xlu0 %2423 }
 0x40b   :  { %2830 = vrot.lane.b32.xlu1 %v2822_v36, %s4785_s24  ;;  %2832 = vrot.lane.b32.xlu0 %v2823_v40, %s4785_s24  ;;  %v2933_v40 = vmul.f32 %v2929_v54, %v6868_v51 }
 0x40d   :  { %v7012_v24 = vpop.permute.xlu1 %2448  ;;  %v7015_v14 = vpop.permute.xlu0 %2450 }
 0x40f   :  { %2834 = vrot.lane.b32.xlu1 %v2824_v43, %s4785_s24  ;;  %2836 = vrot.lane.b32.xlu0 %v2825_v37, %s4785_s24  ;;  %s4553_s24 = sld [smem:[#allocation12 + $0x1d]]  ;;  %v2956_v43 = vstv %s4555_s0  ;;  %s4581_s0 = sld [smem:[#allocation12 + $0x39]] }
 0x410   :  { %v2957_v13 = vmul.f32 %v2956_v43, %v6862_v27 }
 0x411   :  { %v7020_v46 = vpop.permute.xlu1 %2452  ;;  %v7023_v47 = vpop.permute.xlu0 %2454 }
 0x412   :  { %9541 = vst [vmem:[#allocation42_spill] sm:$0xff] %v7023_v47 }
 0x413   :  { %2857 = vrot.lane.b32.xlu1 %v2849_v32, %s4786_s3  ;;  %2859 = vrot.lane.b32.xlu0 %v2850_v1, %s4786_s3  ;;  %v2958_v1 = vmul.f32 %v2956_v43, %v6827_v5 }
 0x415   :  { %v7028_v6 = vpop.permute.xlu1 %2475  ;;  %v7031_v10 = vpop.permute.xlu0 %2477  ;;  %v2902_v52 = vstv %s4553_s24  ;;  %s4578_s24 = sld [smem:[#allocation12 + $0x36]] }
 0x416   :  { %9542 = vst [vmem:[#allocation44_spill] sm:$0xff] %v7028_v6  ;;  %9543 = vst [vmem:[#allocation45_spill] sm:$0xff] %v7031_v10  ;;  %v2903_v4 = vmul.f32 %v2902_v52, %v6817_v59  ;;  %v2904_v31 = vmul.f32 %v2902_v52, %v6808_v22  ;;  %v2905_v34 = vmul.f32 %v2902_v52, %v6811_v20 }
 0x417   :  { %2861 = vrot.lane.b32.xlu1 %v2851_v58, %s4786_s3  ;;  %2863 = vrot.lane.b32.xlu0 %v2852_v35, %s4786_s3  ;;  %v2906_v42 = vmul.f32 %v2902_v52, %v6823_v26  ;;  %v2959_v35 = vmul.f32 %v2956_v43, %v6830_v33 }
 0x419   :  { %v7036_v9 = vpop.permute.xlu1 %2479  ;;  %v7039_v63 = vpop.permute.xlu0 %2481 }
 0x41a   :  { %9544 = vst [vmem:[#allocation47_spill] sm:$0xff] %v7036_v9  ;;  %9545 = vst [vmem:[#allocation46_spill] sm:$0xff] %v7039_v63 }
 0x41b   :  { %2884 = vrot.lane.b32.xlu1 %v2876_v17, %s4786_s3  ;;  %2886 = vrot.lane.b32.xlu0 %v2877_v30, %s4786_s3  ;;  %v2960_v17 = vmul.f32 %v2956_v43, %v6868_v51  ;;  %v2983_v30 = vstv %s4556_s2  ;;  %s4582_s2 = sld [smem:[#allocation12 + $0x3a]] }
 0x41c   :  { %v2987_v54 = vmul.f32 %v2983_v30, %v6868_v51 }
 0x41d   :  { %v7044_v7 = vpop.permute.xlu1 %2502  ;;  %v7047_v49 = vpop.permute.xlu0 %2504 }
 0x41e   :  { %9546 = vst [vmem:[#allocation48_spill] sm:$0xff] %v7044_v7  ;;  %9547 = vst [vmem:[#allocation49_spill] sm:$0xff] %v7047_v49 }
 0x41f   :  { %2888 = vrot.lane.b32.xlu1 %v2878_v45, %s4786_s3  ;;  %2890 = vrot.lane.b32.xlu0 %v2879_v2, %s4786_s3  ;;  %v2984_v2 = vmul.f32 %v2983_v30, %v6862_v27 }
 0x421   :  { %v7052_v39 = vpop.permute.xlu1 %2506  ;;  %v7055_v61 = vpop.permute.xlu0 %2508 }
 0x422   :  { %9548 = vst [vmem:[#allocation51_spill] sm:$0xff] %v7052_v39  ;;  %9549 = vst [vmem:[#allocation50_spill] sm:$0xff] %v7055_v61 }
 0x423   :  { %2911 = vrot.lane.b32.xlu1 %v2903_v4, %s4786_s3  ;;  %2913 = vrot.lane.b32.xlu0 %v2904_v31, %s4786_s3  ;;  %v2985_v4 = vmul.f32 %v2983_v30, %v6827_v5 }
 0x425   :  { %v7060_v12 = vpop.permute.xlu1 %2533  ;;  %v7063_v16 = vpop.permute.xlu0 %2535 }
 0x426   :  { %9550 = vst [vmem:[#allocation52_spill] sm:$0xff] %v7060_v12  ;;  %9551 = vst [vmem:[#allocation53_spill] sm:$0xff] %v7063_v16 }
 0x427   :  { %2915 = vrot.lane.b32.xlu1 %v2905_v34, %s4786_s3  ;;  %2917 = vrot.lane.b32.xlu0 %v2906_v42, %s4786_s3  ;;  %v2986_v34 = vmul.f32 %v2983_v30, %v6830_v33  ;;  %v3037_v30 = vstv %s4558_s28  ;;  %s4584_s28 = sld [smem:[#allocation12 + $0x3c]] }
 0x429   :  { %v7068_v15 = vpop.permute.xlu1 %2537  ;;  %v7071_v41 = vpop.permute.xlu0 %2539 }
 0x42a   :  { %9552 = vst [vmem:[#allocation55_spill] sm:$0xff] %v7068_v15  ;;  %9553 = vst [vmem:[#allocation54_spill] sm:$0xff] %v7071_v41 }
 0x42b   :  { %2938 = vrot.lane.b32.xlu1 %v2930_v29, %s4786_s3  ;;  %2940 = vrot.lane.b32.xlu0 %v2931_v3, %s4786_s3  ;;  %v3010_v29 = vstv %s4557_s27  ;;  %s4583_s27 = sld [smem:[#allocation12 + $0x3b]] }
 0x42c   :  { %v3012_v43 = vmul.f32 %v3010_v29, %v6844_v18 }
 0x42d   :  { %v7076_v60 = vpop.permute.xlu1 %2560  ;;  %v7079_v36 = vpop.permute.xlu0 %2562 }
 0x42e   :  { %9554 = vst [vmem:[#allocation56_spill] sm:$0xff] %v7076_v60  ;;  %9555 = vst [vmem:[#allocation57_spill] sm:$0xff] %v7079_v36 }
 0x42f   :  { %2942 = vrot.lane.b32.xlu1 %v2932_v38, %s4786_s3  ;;  %2944 = vrot.lane.b32.xlu0 %v2933_v40, %s4786_s3  ;;  %v3011_v38 = vmul.f32 %v3010_v29, %v6890_v0 }
 0x431   :  { %v7084_v37 = vpop.permute.xlu1 %2564  ;;  %v7087_v32 = vpop.permute.xlu0 %2566 }
 0x432   :  { %9556 = vst [vmem:[#allocation59_spill] sm:$0xff] %v7084_v37  ;;  %9557 = vst [vmem:[#allocation58_spill] sm:$0xff] %v7087_v32 }
 0x433   :  { %2965 = vrot.lane.b32.xlu1 %v2957_v13, %s4786_s3  ;;  %2967 = vrot.lane.b32.xlu0 %v2958_v1, %s4786_s3  ;;  %v3013_v1 = vmul.f32 %v3010_v29, %v6847_v57 }
 0x435   :  { %v7092_v58 = vpop.permute.xlu1 %2587  ;;  %v7095_v23 = vpop.permute.xlu0 %2589 }
 0x436   :  { %9558 = vst [vmem:[#allocation60_spill] sm:$0xff] %v7092_v58  ;;  %9559 = vst [vmem:[#allocation61_spill] sm:$0xff] %v7095_v23 }
 0x437   :  { %2969 = vrot.lane.b32.xlu1 %v2959_v35, %s4786_s3  ;;  %2971 = vrot.lane.b32.xlu0 %v2960_v17, %s4786_s3  ;;  %v3014_v17 = vmul.f32 %v3010_v29, %v6896_v56  ;;  %v3040_v29 = vmul.f32 %v3037_v30, %v6847_v57 }
 0x439   :  { %v7100_v45 = vpop.permute.xlu1 %2591  ;;  %v7103_v52 = vpop.permute.xlu0 %2593 }
 0x43a   :  { %9560 = vst [vmem:[#allocation63_spill] sm:$0xff] %v7100_v45  ;;  %9561 = vst [vmem:[#allocation62_spill] sm:$0xff] %v7103_v52 }
 0x43b   :  { %2992 = vrot.lane.b32.xlu1 %v2984_v2, %s4786_s3  ;;  %2994 = vrot.lane.b32.xlu0 %v2985_v4, %s4786_s3  ;;  %v3038_v4 = vmul.f32 %v3037_v30, %v6890_v0 }
 0x43d   :  { %v7108_v31 = vpop.permute.xlu1 %2614  ;;  %v7111_v42 = vpop.permute.xlu0 %2616 }
 0x43e   :  { %9562 = vst [vmem:[#allocation64_spill] sm:$0xff] %v7108_v31  ;;  %9563 = vst [vmem:[#allocation65_spill] sm:$0xff] %v7111_v42 }
 0x43f   :  { %2996 = vrot.lane.b32.xlu1 %v2986_v34, %s4786_s3  ;;  %2998 = vrot.lane.b32.xlu0 %v2987_v54, %s4786_s3  ;;  %v3039_v54 = vmul.f32 %v3037_v30, %v6844_v18 }
 0x441   :  { %v7116_v3 = vpop.permute.xlu1 %2618  ;;  %v7119_v40 = vpop.permute.xlu0 %2620 }
 0x442   :  { %9564 = vst [vmem:[#allocation67_spill] sm:$0xff] %v7116_v3  ;;  %9565 = vst [vmem:[#allocation66_spill] sm:$0xff] %v7119_v40 }
 0x443   :  { %3019 = vrot.lane.b32.xlu1 %v3011_v38, %s4786_s3  ;;  %3021 = vrot.lane.b32.xlu0 %v3012_v43, %s4786_s3 }
 0x445   :  { %v7124_v13 = vpop.permute.xlu1 %2641  ;;  %v7127_v35 = vpop.permute.xlu0 %2643 }
 0x446   :  { %9566 = vst [vmem:[#allocation68_spill] sm:$0xff] %v7124_v13  ;;  %9567 = vst [vmem:[#allocation69_spill] sm:$0xff] %v7127_v35 }
 0x447   :  { %3023 = vrot.lane.b32.xlu1 %v3013_v1, %s4786_s3  ;;  %3025 = vrot.lane.b32.xlu0 %v3014_v17, %s4786_s3  ;;  %v3041_v1 = vmul.f32 %v3037_v30, %v6896_v56  ;;  %v3064_v17 = vstv %s4559_s30  ;;  %s4585_s30 = sld [smem:[#allocation12 + $0x3d]] }
 0x448   :  { %v3067_v30 = vmul.f32 %v3064_v17, %v6847_v57 }
 0x449   :  { %v7132_v2 = vpop.permute.xlu1 %2645  ;;  %v7135_v34 = vpop.permute.xlu0 %2647 }
 0x44a   :  { %9568 = vst [vmem:[#allocation71_spill] sm:$0xff] %v7132_v2  ;;  %9569 = vst [vmem:[#allocation70_spill] sm:$0xff] %v7135_v34 }
 0x44b   :  { %3046 = vrot.lane.b32.xlu1 %v3038_v4, %s4786_s3  ;;  %3048 = vrot.lane.b32.xlu0 %v3039_v54, %s4786_s3  ;;  %v3065_v4 = vmul.f32 %v3064_v17, %v6890_v0  ;;  %v3066_v54 = vmul.f32 %v3064_v17, %v6844_v18 }
 0x44d   :  { %v7140_v38 = vpop.permute.xlu1 %2668  ;;  %v7143_v43 = vpop.permute.xlu0 %2670 }
 0x44e   :  { %9570 = vst [vmem:[#allocation72_spill] sm:$0xff] %v7140_v38  ;;  %9571 = vst [vmem:[#allocation73_spill] sm:$0xff] %v7143_v43 }
 0x44f   :  { %3050 = vrot.lane.b32.xlu1 %v3040_v29, %s4786_s3  ;;  %3052 = vrot.lane.b32.xlu0 %v3041_v1, %s4786_s3  ;;  %v3068_v29 = vmul.f32 %v3064_v17, %v6896_v56  ;;  %v3091_v1 = vstv %s4560_s7  ;;  %s4586_s7 = sld [smem:[#allocation12 + $0x3e]] }
 0x450   :  { %v3094_v17 = vmul.f32 %v3091_v1, %v6811_v20 }
 0x451   :  { %v7148_v34 = vpop.permute.xlu1 %2672  ;;  %v7151_v2 = vpop.permute.xlu0 %2674 }
 0x452   :  { %9572 = vst [vmem:[#allocation75_spill] sm:$0xff] %v7148_v34  ;;  %9573 = vst [vmem:[#allocation74_spill] sm:$0xff] %v7151_v2 }
 0x453   :  { %3073 = vrot.lane.b32.xlu1 %v3065_v4, %s4786_s3  ;;  %3075 = vrot.lane.b32.xlu0 %v3066_v54, %s4786_s3  ;;  %v3092_v4 = vmul.f32 %v3091_v1, %v6817_v59  ;;  %v3093_v54 = vmul.f32 %v3091_v1, %v6808_v22 }
 0x455   :  { %v7156_v38 = vpop.permute.xlu1 %2695  ;;  %v7159_v43 = vpop.permute.xlu0 %2697 }
 0x456   :  { %9574 = vst [vmem:[#allocation76_spill] sm:$0xff] %v7156_v38  ;;  %9575 = vst [vmem:[#allocation77_spill] sm:$0xff] %v7159_v43 }
 0x457   :  { %3077 = vrot.lane.b32.xlu1 %v3067_v30, %s4786_s3  ;;  %3079 = vrot.lane.b32.xlu0 %v3068_v29, %s4786_s3  ;;  %v3095_v30 = vmul.f32 %v3091_v1, %v6823_v26  ;;  %v3118_v29 = vstv %s4561_s8  ;;  %s4562_s3 = sld [smem:[#allocation12 + $0x26]]  ;;  %s4587_s8 = sld [smem:[#allocation12 + $0x3f]] }
 0x458   :  { %v3121_v1 = vmul.f32 %v3118_v29, %v6811_v20 }
 0x459   :  { %v7164_v2 = vpop.permute.xlu1 %2699  ;;  %v7167_v34 = vpop.permute.xlu0 %2701 }
 0x45a   :  { %9576 = vst [vmem:[#allocation79_spill] sm:$0xff] %v7164_v2  ;;  %9577 = vst [vmem:[#allocation78_spill] sm:$0xff] %v7167_v34 }
 0x45b   :  { %3100 = vrot.lane.b32.xlu1 %v3092_v4, %s4787_s15  ;;  %3102 = vrot.lane.b32.xlu0 %v3093_v54, %s4787_s15  ;;  %v3119_v4 = vmul.f32 %v3118_v29, %v6817_v59  ;;  %v3120_v54 = vmul.f32 %v3118_v29, %v6808_v22 }
 0x45d   :  { %v7172_v38 = vpop.permute.xlu1 %2722  ;;  %v7175_v43 = vpop.permute.xlu0 %2724 }
 0x45e   :  { %9578 = vst [vmem:[#allocation80_spill] sm:$0xff] %v7172_v38  ;;  %9579 = vst [vmem:[#allocation81_spill] sm:$0xff] %v7175_v43 }
 0x45f   :  { %3104 = vrot.lane.b32.xlu1 %v3094_v17, %s4787_s15  ;;  %3106 = vrot.lane.b32.xlu0 %v3095_v30, %s4787_s15  ;;  %v3122_v17 = vmul.f32 %v3118_v29, %v6823_v26  ;;  %v3145_v30 = vstv %s4562_s3  ;;  %s4588_s3 = sld [smem:[#allocation12 + $0x40]] }
 0x460   :  { %v3148_v29 = vmul.f32 %v3145_v30, %v6811_v20 }
 0x461   :  { %v7180_v34 = vpop.permute.xlu1 %2726  ;;  %v7183_v2 = vpop.permute.xlu0 %2728 }
 0x462   :  { %9580 = vst [vmem:[#allocation83_spill] sm:$0xff] %v7180_v34  ;;  %9581 = vst [vmem:[#allocation82_spill] sm:$0xff] %v7183_v2 }
 0x463   :  { %3127 = vrot.lane.b32.xlu1 %v3119_v4, %s4787_s15  ;;  %3129 = vrot.lane.b32.xlu0 %v3120_v54, %s4787_s15  ;;  %v3146_v4 = vmul.f32 %v3145_v30, %v6817_v59  ;;  %v3147_v54 = vmul.f32 %v3145_v30, %v6808_v22 }
 0x465   :  { %v7188_v38 = vpop.permute.xlu1 %2749  ;;  %v7191_v43 = vpop.permute.xlu0 %2751 }
 0x466   :  { %9582 = vst [vmem:[#allocation84_spill] sm:$0xff] %v7188_v38  ;;  %9583 = vst [vmem:[#allocation85_spill] sm:$0xff] %v7191_v43 }
 0x467   :  { %3131 = vrot.lane.b32.xlu1 %v3121_v1, %s4787_s15  ;;  %3133 = vrot.lane.b32.xlu0 %v3122_v17, %s4787_s15  ;;  %v3149_v1 = vmul.f32 %v3145_v30, %v6823_v26  ;;  %v3172_v17 = vstv %s4563_s9  ;;  %s4590_s9 = sld [smem:[#allocation12 + $0x42]] }
 0x468   :  { %v3175_v30 = vmul.f32 %v3172_v17, %v6830_v33 }
 0x469   :  { %v7196_v2 = vpop.permute.xlu1 %2753  ;;  %v7199_v34 = vpop.permute.xlu0 %2755 }
 0x46a   :  { %9584 = vst [vmem:[#allocation87_spill] sm:$0xff] %v7196_v2  ;;  %9585 = vst [vmem:[#allocation86_spill] sm:$0xff] %v7199_v34 }
 0x46b   :  { %3154 = vrot.lane.b32.xlu1 %v3146_v4, %s4787_s15  ;;  %3156 = vrot.lane.b32.xlu0 %v3147_v54, %s4787_s15  ;;  %v3173_v4 = vmul.f32 %v3172_v17, %v6862_v27  ;;  %v3174_v54 = vmul.f32 %v3172_v17, %v6827_v5 }
 0x46d   :  { %v7204_v38 = vpop.permute.xlu1 %2776  ;;  %v7207_v43 = vpop.permute.xlu0 %2778 }
 0x46e   :  { %9586 = vst [vmem:[#allocation88_spill] sm:$0xff] %v7204_v38  ;;  %9587 = vst [vmem:[#allocation89_spill] sm:$0xff] %v7207_v43 }
 0x46f   :  { %3158 = vrot.lane.b32.xlu1 %v3148_v29, %s4787_s15  ;;  %3160 = vrot.lane.b32.xlu0 %v3149_v1, %s4787_s15  ;;  %v3176_v29 = vmul.f32 %v3172_v17, %v6868_v51  ;;  %v3199_v1 = vstv %s4564_s11  ;;  %s4591_s11 = sld [smem:[#allocation12 + $0x43]] }
 0x470   :  { %v3202_v17 = vmul.f32 %v3199_v1, %v6830_v33 }
 0x471   :  { %v7212_v34 = vpop.permute.xlu1 %2780  ;;  %v7215_v2 = vpop.permute.xlu0 %2782 }
 0x472   :  { %9588 = vst [vmem:[#allocation91_spill] sm:$0xff] %v7212_v34  ;;  %9589 = vst [vmem:[#allocation90_spill] sm:$0xff] %v7215_v2 }
 0x473   :  { %3181 = vrot.lane.b32.xlu1 %v3173_v4, %s4787_s15  ;;  %3183 = vrot.lane.b32.xlu0 %v3174_v54, %s4787_s15  ;;  %v3200_v4 = vmul.f32 %v3199_v1, %v6862_v27  ;;  %v3201_v54 = vmul.f32 %v3199_v1, %v6827_v5 }
 0x475   :  { %v7220_v38 = vpop.permute.xlu1 %2803  ;;  %v7223_v43 = vpop.permute.xlu0 %2805 }
 0x476   :  { %9590 = vst [vmem:[#allocation92_spill] sm:$0xff] %v7220_v38  ;;  %9591 = vst [vmem:[#allocation93_spill] sm:$0xff] %v7223_v43 }
 0x477   :  { %3185 = vrot.lane.b32.xlu1 %v3175_v30, %s4787_s15  ;;  %3187 = vrot.lane.b32.xlu0 %v3176_v29, %s4787_s15  ;;  %v3203_v30 = vmul.f32 %v3199_v1, %v6868_v51  ;;  %v3226_v29 = vstv %s4565_s1  ;;  %s4592_s1 = sld [smem:[#allocation12 + $0x44]] }
 0x478   :  { %v3229_v1 = vmul.f32 %v3226_v29, %v6830_v33 }
 0x479   :  { %v7228_v2 = vpop.permute.xlu1 %2807  ;;  %v7231_v34 = vpop.permute.xlu0 %2809 }
 0x47a   :  { %9592 = vst [vmem:[#allocation95_spill] sm:$0xff] %v7228_v2  ;;  %9593 = vst [vmem:[#allocation94_spill] sm:$0xff] %v7231_v34 }
 0x47b   :  { %3208 = vrot.lane.b32.xlu1 %v3200_v4, %s4787_s15  ;;  %3210 = vrot.lane.b32.xlu0 %v3201_v54, %s4787_s15  ;;  %v3227_v4 = vmul.f32 %v3226_v29, %v6862_v27  ;;  %v3228_v54 = vmul.f32 %v3226_v29, %v6827_v5 }
 0x47d   :  { %v7236_v38 = vpop.permute.xlu1 %2830  ;;  %v7239_v43 = vpop.permute.xlu0 %2832 }
 0x47e   :  { %9594 = vst [vmem:[#allocation96_spill] sm:$0xff] %v7236_v38  ;;  %9595 = vst [vmem:[#allocation97_spill] sm:$0xff] %v7239_v43 }
 0x47f   :  { %3212 = vrot.lane.b32.xlu1 %v3202_v17, %s4787_s15  ;;  %3214 = vrot.lane.b32.xlu0 %v3203_v30, %s4787_s15  ;;  %v3230_v17 = vmul.f32 %v3226_v29, %v6868_v51  ;;  %v3253_v30 = vstv %s4566_s12  ;;  %s4593_s12 = sld [smem:[#allocation12 + $0x45]] }
 0x480   :  { %v3256_v29 = vmul.f32 %v3253_v30, %v6847_v57 }
 0x481   :  { %v7244_v34 = vpop.permute.xlu1 %2834  ;;  %v7247_v2 = vpop.permute.xlu0 %2836 }
 0x482   :  { %9596 = vst [vmem:[#allocation99_spill] sm:$0xff] %v7244_v34  ;;  %9597 = vst [vmem:[#allocation98_spill] sm:$0xff] %v7247_v2 }
 0x483   :  { %3235 = vrot.lane.b32.xlu1 %v3227_v4, %s4787_s15  ;;  %3237 = vrot.lane.b32.xlu0 %v3228_v54, %s4787_s15  ;;  %v3254_v4 = vmul.f32 %v3253_v30, %v6890_v0  ;;  %v3255_v54 = vmul.f32 %v3253_v30, %v6844_v18 }
 0x485   :  { %v7252_v38 = vpop.permute.xlu1 %2857  ;;  %v7255_v43 = vpop.permute.xlu0 %2859 }
 0x486   :  { %9598 = vst [vmem:[#allocation100_spill] sm:$0xff] %v7252_v38  ;;  %9599 = vst [vmem:[#allocation101_spill] sm:$0xff] %v7255_v43 }
 0x487   :  { %3239 = vrot.lane.b32.xlu1 %v3229_v1, %s4787_s15  ;;  %3241 = vrot.lane.b32.xlu0 %v3230_v17, %s4787_s15  ;;  %v3257_v1 = vmul.f32 %v3253_v30, %v6896_v56  ;;  %v3280_v17 = vstv %s4567_s4  ;;  %s7698_s4 = sld [smem:[#allocation12 + $0x3]] }
 0x488   :  { %v3283_v30 = vmul.f32 %v3280_v17, %v6847_v57 }
 0x489   :  { %v7260_v2 = vpop.permute.xlu1 %2861  ;;  %v7263_v34 = vpop.permute.xlu0 %2863 }
 0x48a   :  { %9600 = vst [vmem:[#allocation103_spill] sm:$0xff] %v7260_v2  ;;  %9601 = vst [vmem:[#allocation102_spill] sm:$0xff] %v7263_v34 }
 0x48b   :  { %3262 = vrot.lane.b32.xlu1 %v3254_v4, %s4787_s15  ;;  %3264 = vrot.lane.b32.xlu0 %v3255_v54, %s4787_s15  ;;  %v3281_v4 = vmul.f32 %v3280_v17, %v6890_v0  ;;  %v3282_v54 = vmul.f32 %v3280_v17, %v6844_v18 }
 0x48d   :  { %v7268_v38 = vpop.permute.xlu1 %2884  ;;  %v7271_v43 = vpop.permute.xlu0 %2886 }
 0x48e   :  { %9602 = vst [vmem:[#allocation104_spill] sm:$0xff] %v7268_v38  ;;  %9603 = vst [vmem:[#allocation105_spill] sm:$0xff] %v7271_v43 }
 0x48f   :  { %3266 = vrot.lane.b32.xlu1 %v3256_v29, %s4787_s15  ;;  %3268 = vrot.lane.b32.xlu0 %v3257_v1, %s4787_s15  ;;  %v3284_v29 = vmul.f32 %v3280_v17, %v6896_v56  ;;  %v3307_v1 = vstv %s4568_s5  ;;  %s7700_s5 = sld [smem:[#allocation12 + $0x4]] }
 0x490   :  { %v3310_v17 = vmul.f32 %v3307_v1, %v6847_v57 }
 0x491   :  { %v7276_v34 = vpop.permute.xlu1 %2888  ;;  %v7279_v2 = vpop.permute.xlu0 %2890 }
 0x492   :  { %9604 = vst [vmem:[#allocation107_spill] sm:$0xff] %v7276_v34  ;;  %9605 = vst [vmem:[#allocation106_spill] sm:$0xff] %v7279_v2 }
 0x493   :  { %3289 = vrot.lane.b32.xlu1 %v3281_v4, %s4787_s15  ;;  %3291 = vrot.lane.b32.xlu0 %v3282_v54, %s4787_s15  ;;  %v3308_v4 = vmul.f32 %v3307_v1, %v6890_v0  ;;  %v3309_v54 = vmul.f32 %v3307_v1, %v6844_v18 }
 0x495   :  { %v7284_v38 = vpop.permute.xlu1 %2911  ;;  %v7287_v43 = vpop.permute.xlu0 %2913 }
 0x496   :  { %9606 = vst [vmem:[#allocation108_spill] sm:$0xff] %v7284_v38  ;;  %9607 = vst [vmem:[#allocation109_spill] sm:$0xff] %v7287_v43 }
 0x497   :  { %3293 = vrot.lane.b32.xlu1 %v3283_v30, %s4787_s15  ;;  %3295 = vrot.lane.b32.xlu0 %v3284_v29, %s4787_s15  ;;  %v3311_v30 = vmul.f32 %v3307_v1, %v6896_v56  ;;  %v3334_v29 = vstv %s4569_s13  ;;  %s7704_s13 = sld [smem:[#allocation13]] }
 0x498   :  { %v3335_v18 = vmul.f32 %v3334_v29, %v6817_v59  ;;  %v3337_v1 = vmul.f32 %v3334_v29, %v6811_v20 }
 0x499   :  { %v7292_v2 = vpop.permute.xlu1 %2915  ;;  %v7295_v34 = vpop.permute.xlu0 %2917 }
 0x49a   :  { %9608 = vst [vmem:[#allocation111_spill] sm:$0xff] %v7292_v2  ;;  %9609 = vst [vmem:[#allocation110_spill] sm:$0xff] %v7295_v34 }
 0x49b   :  { %3316 = vrot.lane.b32.xlu1 %v3308_v4, %s4787_s15  ;;  %3318 = vrot.lane.b32.xlu0 %v3309_v54, %s4787_s15  ;;  %v3336_v54 = vmul.f32 %v3334_v29, %v6808_v22 }
 0x49d   :  { %v7300_v38 = vpop.permute.xlu1 %2938  ;;  %v7303_v43 = vpop.permute.xlu0 %2940 }
 0x49e   :  { %9610 = vst [vmem:[#allocation112_spill] sm:$0xff] %v7300_v38  ;;  %9611 = vst [vmem:[#allocation113_spill] sm:$0xff] %v7303_v43  ;;  %v3766_v43 = vstv %s4585_s30  ;;  %s7767_s30 = sld [smem:[#allocation12 + $0x4c]] }
 0x49f   :  { %3320 = vrot.lane.b32.xlu1 %v3310_v17, %s4787_s15  ;;  %3322 = vrot.lane.b32.xlu0 %v3311_v30, %s4787_s15  ;;  %v3338_v17 = vmul.f32 %v3334_v29, %v6823_v26  ;;  %v3361_v30 = vstv %s4570_s14  ;;  %s2271_s14 = sld [smem:[#allocation12]] }
 0x4a0   :  { %v3364_v29 = vmul.f32 %v3361_v30, %v6811_v20 }
 0x4a1   :  { %v7308_v34 = vpop.permute.xlu1 %2942  ;;  %v7311_v4 = vpop.permute.xlu0 %2944 }
 0x4a2   :  { %9612 = vst [vmem:[#allocation115_spill] sm:$0xff] %v7308_v34  ;;  %9613 = vst [vmem:[#allocation114_spill] sm:$0xff] %v7311_v4 }
 0x4a3   :  { %3343 = vrot.lane.b32.xlu1 %v3335_v18, %s4788_s26  ;;  %3345 = vrot.lane.b32.xlu0 %v3336_v54, %s4788_s26  ;;  %v3362_v18 = vmul.f32 %v3361_v30, %v6817_v59  ;;  %v3363_v54 = vmul.f32 %v3361_v30, %v6808_v22 }
 0x4a4   :  { %v7835_v63 = vstv %s7767_s30 }
 0x4a5   :  { %v7316_v57 = vpop.permute.xlu1 %2965  ;;  %v7319_v38 = vpop.permute.xlu0 %2967 }
 0x4a6   :  { %9614 = vst [vmem:[#allocation116_spill] sm:$0xff] %v7316_v57  ;;  %9615 = vst [vmem:[#allocation117_spill] sm:$0xff] %v7319_v38 }
 0x4a7   :  { %3347 = vrot.lane.b32.xlu1 %v3337_v1, %s4788_s26  ;;  %3349 = vrot.lane.b32.xlu0 %v3338_v17, %s4788_s26  ;;  %v3365_v1 = vmul.f32 %v3361_v30, %v6823_v26  ;;  %v3388_v17 = vstv %s4571_s16  ;;  %s7706_s16 = sld [smem:[#allocation12 + $0x5]] }
 0x4a8   :  { %v3391_v30 = vmul.f32 %v3388_v17, %v6811_v20 }
 0x4a9   :  { %v7324_v4 = vpop.permute.xlu1 %2969  ;;  %v7327_v34 = vpop.permute.xlu0 %2971 }
 0x4aa   :  { %9616 = vst [vmem:[#allocation119_spill] sm:$0xff] %v7324_v4  ;;  %9617 = vst [vmem:[#allocation118_spill] sm:$0xff] %v7327_v34 }
 0x4ab   :  { %3370 = vrot.lane.b32.xlu1 %v3362_v18, %s4788_s26  ;;  %3372 = vrot.lane.b32.xlu0 %v3363_v54, %s4788_s26  ;;  %v3389_v18 = vmul.f32 %v3388_v17, %v6817_v59  ;;  %v3390_v54 = vmul.f32 %v3388_v17, %v6808_v22 }
 0x4ad   :  { %v7332_v57 = vpop.permute.xlu1 %2992  ;;  %v7335_v38 = vpop.permute.xlu0 %2994 }
 0x4ae   :  { %9618 = vst [vmem:[#allocation120_spill] sm:$0xff] %v7332_v57  ;;  %9619 = vst [vmem:[#allocation121_spill] sm:$0xff] %v7335_v38 }
 0x4af   :  { %3374 = vrot.lane.b32.xlu1 %v3364_v29, %s4788_s26  ;;  %3376 = vrot.lane.b32.xlu0 %v3365_v1, %s4788_s26  ;;  %v3392_v29 = vmul.f32 %v3388_v17, %v6823_v26  ;;  %v3415_v1 = vstv %s4572_s17  ;;  %s7708_s17 = sld [smem:[#allocation12 + $0x1]] }
 0x4b0   :  { %v3416_v22 = vmul.f32 %v3415_v1, %v6862_v27  ;;  %v3418_v26 = vmul.f32 %v3415_v1, %v6830_v33 }
 0x4b1   :  { %v7340_v34 = vpop.permute.xlu1 %2996  ;;  %v7343_v4 = vpop.permute.xlu0 %2998 }
 0x4b2   :  { %9620 = vst [vmem:[#allocation123_spill] sm:$0xff] %v7340_v34  ;;  %9621 = vst [vmem:[#allocation122_spill] sm:$0xff] %v7343_v4  ;;  %v3685_v4 = vstv %s4582_s2  ;;  %s7742_s2 = sld [smem:[#allocation12 + $0x4a]] }
 0x4b3   :  { %3397 = vrot.lane.b32.xlu1 %v3389_v18, %s4788_s26  ;;  %3399 = vrot.lane.b32.xlu0 %v3390_v54, %s4788_s26  ;;  %v3417_v54 = vmul.f32 %v3415_v1, %v6827_v5 }
 0x4b5   :  { %v7348_v57 = vpop.permute.xlu1 %3019  ;;  %v7351_v38 = vpop.permute.xlu0 %3021  ;;  %v2280_v13 = vstv %s7708_s17 }
 0x4b6   :  { %9622 = vst [vmem:[#allocation124_spill] sm:$0xff] %v7348_v57  ;;  %9623 = vst [vmem:[#allocation125_spill] sm:$0xff] %v7351_v38 }
 0x4b7   :  { %3401 = vrot.lane.b32.xlu1 %v3391_v30, %s4788_s26  ;;  %3403 = vrot.lane.b32.xlu0 %v3392_v29, %s4788_s26  ;;  %v3419_v30 = vmul.f32 %v3415_v1, %v6868_v51  ;;  %v3442_v29 = vstv %s4573_s18  ;;  %s7716_s18 = sld [smem:[#allocation13 + $0x1]] }
 0x4b8   :  { %v3443_v5 = vmul.f32 %v3442_v29, %v6862_v27  ;;  %v7791_v60 = vstv %s7742_s2 }
 0x4b9   :  { %v7356_v59 = vpop.permute.xlu1 %3023  ;;  %v7359_v18 = vpop.permute.xlu0 %3025 }
 0x4ba   :  { %9624 = vst [vmem:[#allocation127_spill] sm:$0xff] %v7356_v59  ;;  %9625 = vst [vmem:[#allocation126_spill] sm:$0xff] %v7359_v18 }
 0x4bb   :  { %3424 = vrot.lane.b32.xlu1 %v3416_v22, %s4788_s26  ;;  %3426 = vrot.lane.b32.xlu0 %v3417_v54, %s4788_s26  ;;  %v7377_v54 = vld [vmem:[#allocation2 + $0x28] sm:$0xff] }
 0x4bc   :  { %v3444_v33 = vmul.f32 %v7377_v54, %v3442_v29 }
 0x4bd   :  { %v7364_v20 = vpop.permute.xlu1 %3046  ;;  %v7367_v17 = vpop.permute.xlu0 %3048  ;;  %v7762_v35 = vstv %s7716_s18 }
 0x4be   :  { %9626 = vst [vmem:[#allocation128_spill] sm:$0xff] %v7364_v20  ;;  %9627 = vst [vmem:[#allocation129_spill] sm:$0xff] %v7367_v17  ;;  %v7384_v20 = vld [vmem:[#allocation2 + $0x30] sm:$0xff]  ;;  %v3469_v17 = vstv %s4574_s20  ;;  %s7718_s20 = sld [smem:[#allocation12 + $0x2]] }
 0x4bf   :  { %3428 = vrot.lane.b32.xlu1 %v3418_v26, %s4788_s26  ;;  %3430 = vrot.lane.b32.xlu0 %v3419_v30, %s4788_s26  ;;  %v3445_v26 = vmul.f32 %v7384_v20, %v3442_v29 }
 0x4c1   :  { %v7372_v18 = vpop.permute.xlu1 %3050  ;;  %v7375_v22 = vpop.permute.xlu0 %3052 }
 0x4c2   :  { %9628 = vst [vmem:[#allocation131_spill] sm:$0xff] %v7372_v18  ;;  %9629 = vst [vmem:[#allocation130_spill] sm:$0xff] %v7375_v22  ;;  %v3446_v18 = vmul.f32 %v3442_v29, %v6868_v51  ;;  %v3472_v29 = vmul.f32 %v7384_v20, %v3469_v17 }
 0x4c3   :  { %3451 = vrot.lane.b32.xlu1 %v3443_v5, %s4788_s26  ;;  %3453 = vrot.lane.b32.xlu0 %v3444_v33, %s4788_s26  ;;  %v3470_v5 = vmul.f32 %v3469_v17, %v6862_v27 }
 0x4c4   :  { %v2288_v40 = vstv %s7718_s20 }
 0x4c5   :  { %v7382_v1 = vpop.permute.xlu1 %3073  ;;  %v7387_v30 = vpop.permute.xlu0 %3075 }
 0x4c6   :  { %9630 = vst [vmem:[#allocation132_spill] sm:$0xff] %v7382_v1  ;;  %9631 = vst [vmem:[#allocation133_spill] sm:$0xff] %v7387_v30  ;;  %v3471_v1 = vmul.f32 %v7377_v54, %v3469_v17 }
 0x4c7   :  { %3455 = vrot.lane.b32.xlu1 %v3445_v26, %s4788_s26  ;;  %3457 = vrot.lane.b32.xlu0 %v3446_v18, %s4788_s26  ;;  %v3473_v18 = vmul.f32 %v3469_v17, %v6868_v51  ;;  %v3496_v26 = vstv %s4575_s21  ;;  %v7420_v17 = vld [vmem:[#allocation2 + $0x50] sm:$0xff]  ;;  %s7720_s21 = sld [smem:[#allocation12 + $0x6]] }
 0x4c9   :  { %v7392_v22 = vpop.permute.xlu1 %3077  ;;  %v7395_v33 = vpop.permute.xlu0 %3079 }
 0x4ca   :  { %9632 = vst [vmem:[#allocation135_spill] sm:$0xff] %v7392_v22  ;;  %9633 = vst [vmem:[#allocation134_spill] sm:$0xff] %v7395_v33 }
 0x4cb   :  { %3478 = vrot.lane.b32.xlu1 %v3470_v5, %s4788_s26  ;;  %3480 = vrot.lane.b32.xlu0 %v3471_v1, %s4788_s26  ;;  %v3497_v5 = vmul.f32 %v3496_v26, %v6890_v0  ;;  %v7413_v1 = vld [vmem:[#allocation2 + $0x48] sm:$0xff] }
 0x4cd   :  { %v7400_v30 = vpop.permute.xlu1 %3100  ;;  %v7403_v59 = vpop.permute.xlu0 %3102  ;;  %v2326_v3 = vstv %s7720_s21 }
 0x4ce   :  { %9634 = vst [vmem:[#allocation136_spill] sm:$0xff] %v7400_v30  ;;  %9635 = vst [vmem:[#allocation137_spill] sm:$0xff] %v7403_v59  ;;  %v3498_v30 = vmul.f32 %v7413_v1, %v3496_v26  ;;  %v3523_v59 = vstv %s4576_s22  ;;  %s7722_s22 = sld [smem:[#allocation13 + $0x2]] }
 0x4cf   :  { %3482 = vrot.lane.b32.xlu1 %v3472_v29, %s4788_s26  ;;  %3484 = vrot.lane.b32.xlu0 %v3473_v18, %s4788_s26  ;;  %v3499_v29 = vmul.f32 %v7420_v17, %v3496_v26 }
 0x4d1   :  { %v7408_v27 = vpop.permute.xlu1 %3104  ;;  %v7411_v33 = vpop.permute.xlu0 %3106 }
 0x4d2   :  { %9636 = vst [vmem:[#allocation139_spill] sm:$0xff] %v7408_v27  ;;  %9637 = vst [vmem:[#allocation138_spill] sm:$0xff] %v7411_v33  ;;  %v3500_v27 = vmul.f32 %v3496_v26, %v6896_v56  ;;  %v3526_v26 = vmul.f32 %v7420_v17, %v3523_v59 }
 0x4d3   :  { %3505 = vrot.lane.b32.xlu1 %v3497_v5, %s4788_s26  ;;  %3507 = vrot.lane.b32.xlu0 %v3498_v30, %s4788_s26  ;;  %v3524_v30 = vmul.f32 %v3523_v59, %v6890_v0 }
 0x4d4   :  { %v7773_v31 = vstv %s7722_s22 }
 0x4d5   :  { %v7418_v51 = vpop.permute.xlu1 %3127  ;;  %v7423_v18 = vpop.permute.xlu0 %3129 }
 0x4d6   :  { %9638 = vst [vmem:[#allocation140_spill] sm:$0xff] %v7418_v51  ;;  %9639 = vst [vmem:[#allocation141_spill] sm:$0xff] %v7423_v18  ;;  %v3525_v51 = vmul.f32 %v7413_v1, %v3523_v59 }
 0x4d7   :  { %3509 = vrot.lane.b32.xlu1 %v3499_v29, %s4788_s26  ;;  %3511 = vrot.lane.b32.xlu0 %v3500_v27, %s4788_s26  ;;  %v3527_v27 = vmul.f32 %v3523_v59, %v6896_v56  ;;  %v3550_v29 = vstv %s4577_s23  ;;  %s7726_s23 = sld [smem:[#allocation12 + $0x7]] }
 0x4d8   :  { %v3553_v59 = vmul.f32 %v7420_v17, %v3550_v29 }
 0x4d9   :  { %v7428_v33 = vpop.permute.xlu1 %3131  ;;  %v7431_v5 = vpop.permute.xlu0 %3133 }
 0x4da   :  { %9640 = vst [vmem:[#allocation143_spill] sm:$0xff] %v7428_v33  ;;  %9641 = vst [vmem:[#allocation142_spill] sm:$0xff] %v7431_v5 }
 0x4db   :  { %3532 = vrot.lane.b32.xlu1 %v3524_v30, %s4788_s26  ;;  %3534 = vrot.lane.b32.xlu0 %v3525_v51, %s4788_s26  ;;  %v3551_v30 = vmul.f32 %v3550_v29, %v6890_v0  ;;  %v3552_v51 = vmul.f32 %v7413_v1, %v3550_v29 }
 0x4dd   :  { %v7436_v18 = vpop.permute.xlu1 %3154  ;;  %v7439_v22 = vpop.permute.xlu0 %3156  ;;  %v2334_v42 = vstv %s7726_s23 }
 0x4de   :  { %9642 = vst [vmem:[#allocation144_spill] sm:$0xff] %v7436_v18  ;;  %9643 = vst [vmem:[#allocation145_spill] sm:$0xff] %v7439_v22 }
 0x4df   :  { %3536 = vrot.lane.b32.xlu1 %v3526_v26, %s4788_s26  ;;  %3538 = vrot.lane.b32.xlu0 %v3527_v27, %s4788_s26  ;;  %v3554_v26 = vmul.f32 %v3550_v29, %v6896_v56  ;;  %v3577_v27 = vstv %s4578_s24  ;;  %v7474_v29 = vld [vmem:[#allocation2 + $0x10] sm:$0xff]  ;;  %s7728_s24 = sld [smem:[#allocation12 + $0x8]] }
 0x4e1   :  { %v7444_v5 = vpop.permute.xlu1 %3158  ;;  %v7447_v33 = vpop.permute.xlu0 %3160 }
 0x4e2   :  { %9644 = vst [vmem:[#allocation147_spill] sm:$0xff] %v7444_v5  ;;  %9645 = vst [vmem:[#allocation146_spill] sm:$0xff] %v7447_v33  ;;  %v7462_v33 = vld [vmem:[#allocation2] sm:$0xff]  ;;  %v3604_v5 = vstv %s4579_s25  ;;  %s7736_s25 = sld [smem:[#allocation12 + $0x48]] }
 0x4e3   :  { %3559 = vrot.lane.b32.xlu1 %v3551_v30, %s4788_s26  ;;  %3561 = vrot.lane.b32.xlu0 %v3552_v51, %s4788_s26  ;;  %v3578_v30 = vmul.f32 %v7462_v33, %v3577_v27  ;;  %v2281_v15 = vmul.f32 %v7462_v33, %v2280_v13 }
 0x4e5   :  { %v7452_v18 = vpop.permute.xlu1 %3181  ;;  %v7455_v22 = vpop.permute.xlu0 %3183  ;;  %v2342_v52 = vstv %s7728_s24 }
 0x4e6   :  { %9646 = vst [vmem:[#allocation148_spill] sm:$0xff] %v7452_v18  ;;  %9647 = vst [vmem:[#allocation149_spill] sm:$0xff] %v7455_v22  ;;  %v7467_v18 = vld [vmem:[#allocation2 + $0x8] sm:$0xff] }
 0x4e7   :  { %3563 = vrot.lane.b32.xlu1 %v3553_v59, %s4788_s26  ;;  %3565 = vrot.lane.b32.xlu0 %v3554_v26, %s4788_s26  ;;  %v3579_v22 = vmul.f32 %v7467_v18, %v3577_v27  ;;  %v3580_v59 = vmul.f32 %v7474_v29, %v3577_v27  ;;  %s4580_s26 = sld [smem:[#allocation12 + $0x38]]  ;;  %v3606_v57 = vmul.f32 %v7467_v18, %v3604_v5 }
 0x4e8   :  { %v7785_v32 = vstv %s7736_s25  ;;  %v2282_v16 = vmul.f32 %v7467_v18, %v2280_v13 }
 0x4e9   :  { %v7460_v0 = vpop.permute.xlu1 %3185  ;;  %v7465_v51 = vpop.permute.xlu0 %3187 }
 0x4ea   :  { %9648 = vst [vmem:[#allocation151_spill] sm:$0xff] %v7460_v0  ;;  %9649 = vst [vmem:[#allocation150_spill] sm:$0xff] %v7465_v51  ;;  %v7479_v0 = vld [vmem:[#allocation2 + $0x18] sm:$0xff] }
 0x4eb   :  { %3586 = vrot.lane.b32.xlu1 %v3578_v30, %s4789_s10  ;;  %3588 = vrot.lane.b32.xlu0 %v3579_v22, %s4789_s10  ;;  %v3581_v51 = vmul.f32 %v7479_v0, %v3577_v27  ;;  %v3605_v22 = vmul.f32 %v7462_v33, %v3604_v5  ;;  %v3607_v27 = vmul.f32 %v7474_v29, %v3604_v5 }
 0x4ed   :  { %v7472_v56 = vpop.permute.xlu1 %3208  ;;  %v7477_v26 = vpop.permute.xlu0 %3210 }
 0x4ee   :  { %9650 = vst [vmem:[#allocation152_spill] sm:$0xff] %v7472_v56  ;;  %9651 = vst [vmem:[#allocation153_spill] sm:$0xff] %v7477_v26 }
 0x4ef   :  { %3590 = vrot.lane.b32.xlu1 %v3580_v59, %s4789_s10  ;;  %3592 = vrot.lane.b32.xlu0 %v3581_v51, %s4789_s10  ;;  %v3608_v51 = vmul.f32 %v7479_v0, %v3604_v5  ;;  %v3631_v59 = vstv %s4580_s26  ;;  %s7738_s26 = sld [smem:[#allocation12 + $0x49]] }
 0x4f0   :  { %v3634_v5 = vmul.f32 %v7474_v29, %v3631_v59 }
 0x4f1   :  { %v7484_v30 = vpop.permute.xlu1 %3212  ;;  %v7487_v56 = vpop.permute.xlu0 %3214 }
 0x4f2   :  { %9652 = vst [vmem:[#allocation155_spill] sm:$0xff] %v7484_v30  ;;  %9653 = vst [vmem:[#allocation154_spill] sm:$0xff] %v7487_v56 }
 0x4f3   :  { %3613 = vrot.lane.b32.xlu1 %v3605_v22, %s4789_s10  ;;  %3615 = vrot.lane.b32.xlu0 %v3606_v57, %s4789_s10  ;;  %v3632_v22 = vmul.f32 %v7462_v33, %v3631_v59  ;;  %v3633_v57 = vmul.f32 %v7467_v18, %v3631_v59 }
 0x4f5   :  { %v7492_v26 = vpop.permute.xlu1 %3235  ;;  %v7495_v38 = vpop.permute.xlu0 %3237  ;;  %v7788_v37 = vstv %s7738_s26 }
 0x4f6   :  { %9654 = vst [vmem:[#allocation156_spill] sm:$0xff] %v7492_v26  ;;  %9655 = vst [vmem:[#allocation157_spill] sm:$0xff] %v7495_v38 }
 0x4f7   :  { %3617 = vrot.lane.b32.xlu1 %v3607_v27, %s4789_s10  ;;  %3619 = vrot.lane.b32.xlu0 %v3608_v51, %s4789_s10  ;;  %v3635_v27 = vmul.f32 %v7479_v0, %v3631_v59  ;;  %v3658_v51 = vstv %s4581_s0  ;;  %s7740_s0 = sld [smem:[#allocation12 + $0x46]] }
 0x4f9   :  { %v7500_v56 = vpop.permute.xlu1 %3239  ;;  %v7503_v30 = vpop.permute.xlu0 %3241 }
 0x4fa   :  { %9656 = vst [vmem:[#allocation159_spill] sm:$0xff] %v7500_v56  ;;  %9657 = vst [vmem:[#allocation158_spill] sm:$0xff] %v7503_v30  ;;  %v7518_v56 = vld [vmem:[#allocation2 + $0x20] sm:$0xff] }
 0x4fb   :  { %3640 = vrot.lane.b32.xlu1 %v3632_v22, %s4789_s10  ;;  %3642 = vrot.lane.b32.xlu0 %v3633_v57, %s4789_s10  ;;  %v3659_v22 = vmul.f32 %v7518_v56, %v3658_v51 }
 0x4fd   :  { %v7508_v26 = vpop.permute.xlu1 %3262  ;;  %v7511_v38 = vpop.permute.xlu0 %3264  ;;  %v4009_v23 = vstv %s7740_s0 }
 0x4fe   :  { %9658 = vst [vmem:[#allocation160_spill] sm:$0xff] %v7508_v26  ;;  %9659 = vst [vmem:[#allocation161_spill] sm:$0xff] %v7511_v38  ;;  %v3660_v26 = vmul.f32 %v7377_v54, %v3658_v51  ;;  %v4011_v39 = vmul.f32 %v7413_v1, %v4009_v23  ;;  %v4012_v47 = vmul.f32 %v7420_v17, %v4009_v23 }
 0x4ff   :  { %3644 = vrot.lane.b32.xlu1 %v3634_v5, %s4789_s10  ;;  %3646 = vrot.lane.b32.xlu0 %v3635_v27, %s4789_s10  ;;  %v3661_v5 = vmul.f32 %v7384_v20, %v3658_v51  ;;  %v7531_v27 = vld [vmem:[#allocation2 + $0x38] sm:$0xff] }
 0x501   :  { %v7516_v30 = vpop.permute.xlu1 %3266  ;;  %v7521_v57 = vpop.permute.xlu0 %3268 }
 0x502   :  { %9660 = vst [vmem:[#allocation163_spill] sm:$0xff] %v7516_v30  ;;  %9661 = vst [vmem:[#allocation162_spill] sm:$0xff] %v7521_v57  ;;  %v3662_v30 = vmul.f32 %v7531_v27, %v3658_v51  ;;  %v3688_v51 = vmul.f32 %v7384_v20, %v3685_v4 }
 0x503   :  { %3667 = vrot.lane.b32.xlu1 %v3659_v22, %s4789_s10  ;;  %3669 = vrot.lane.b32.xlu0 %v3660_v26, %s4789_s10  ;;  %v3686_v26 = vmul.f32 %v7518_v56, %v3685_v4 }
 0x505   :  { %v7526_v59 = vpop.permute.xlu1 %3289  ;;  %v7529_v38 = vpop.permute.xlu0 %3291 }
 0x506   :  { %9662 = vst [vmem:[#allocation164_spill] sm:$0xff] %v7526_v59  ;;  %9663 = vst [vmem:[#allocation165_spill] sm:$0xff] %v7529_v38  ;;  %v3687_v59 = vmul.f32 %v7377_v54, %v3685_v4 }
 0x507   :  { %3671 = vrot.lane.b32.xlu1 %v3661_v5, %s4789_s10  ;;  %3673 = vrot.lane.b32.xlu0 %v3662_v30, %s4789_s10  ;;  %v3689_v30 = vmul.f32 %v7531_v27, %v3685_v4  ;;  %v3712_v5 = vstv %s4583_s27  ;;  %s7746_s27 = sld [smem:[#allocation12 + $0x47]] }
 0x508   :  { %v3715_v4 = vmul.f32 %v7384_v20, %v3712_v5 }
 0x509   :  { %v7536_v57 = vpop.permute.xlu1 %3293  ;;  %v7539_v22 = vpop.permute.xlu0 %3295 }
 0x50a   :  { %9664 = vst [vmem:[#allocation167_spill] sm:$0xff] %v7536_v57  ;;  %9665 = vst [vmem:[#allocation166_spill] sm:$0xff] %v7539_v22 }
 0x50b   :  { %3694 = vrot.lane.b32.xlu1 %v3686_v26, %s4789_s10  ;;  %3696 = vrot.lane.b32.xlu0 %v3687_v59, %s4789_s10  ;;  %v3713_v26 = vmul.f32 %v7518_v56, %v3712_v5  ;;  %v3714_v59 = vmul.f32 %v7377_v54, %v3712_v5 }
 0x50d   :  { %v7544_v38 = vpop.permute.xlu1 %3316  ;;  %v7547_v34 = vpop.permute.xlu0 %3318  ;;  %v7796_v36 = vstv %s7746_s27 }
 0x50e   :  { %9666 = vst [vmem:[#allocation168_spill] sm:$0xff] %v7544_v38  ;;  %9667 = vst [vmem:[#allocation169_spill] sm:$0xff] %v7547_v34 }
 0x50f   :  { %3698 = vrot.lane.b32.xlu1 %v3688_v51, %s4789_s10  ;;  %3700 = vrot.lane.b32.xlu0 %v3689_v30, %s4789_s10  ;;  %v3716_v51 = vmul.f32 %v7531_v27, %v3712_v5  ;;  %v3739_v30 = vstv %s4584_s28  ;;  %s7748_s28 = sld [smem:[#allocation12 + $0x4b]] }
 0x511   :  { %v7552_v22 = vpop.permute.xlu1 %3320  ;;  %v7555_v57 = vpop.permute.xlu0 %3322 }
 0x512   :  { %9668 = vst [vmem:[#allocation171_spill] sm:$0xff] %v7552_v22  ;;  %9669 = vst [vmem:[#allocation170_spill] sm:$0xff] %v7555_v57  ;;  %v7570_v22 = vld [vmem:[#allocation2 + $0x40] sm:$0xff] }
 0x513   :  { %3721 = vrot.lane.b32.xlu1 %v3713_v26, %s4789_s10  ;;  %3723 = vrot.lane.b32.xlu0 %v3714_v59, %s4789_s10  ;;  %v3740_v26 = vmul.f32 %v7570_v22, %v3739_v30  ;;  %v2327_v12 = vmul.f32 %v7570_v22, %v2326_v3 }
 0x515   :  { %v7560_v38 = vpop.permute.xlu1 %3343  ;;  %v7563_v34 = vpop.permute.xlu0 %3345 }
 0x516   :  { %9670 = vst [vmem:[#allocation172_spill] sm:$0xff] %v7560_v38  ;;  %9671 = vst [vmem:[#allocation173_spill] sm:$0xff] %v7563_v34  ;;  %v3741_v38 = vmul.f32 %v7413_v1, %v3739_v30 }
 0x517   :  { %3725 = vrot.lane.b32.xlu1 %v3715_v4, %s4789_s10  ;;  %3727 = vrot.lane.b32.xlu0 %v3716_v51, %s4789_s10  ;;  %v3742_v4 = vmul.f32 %v7420_v17, %v3739_v30  ;;  %v7583_v51 = vld [vmem:[#allocation2 + $0x58] sm:$0xff] }
 0x519   :  { %v7568_v57 = vpop.permute.xlu1 %3347  ;;  %v7573_v59 = vpop.permute.xlu0 %3349 }
 0x51a   :  { %9672 = vst [vmem:[#allocation175_spill] sm:$0xff] %v7568_v57  ;;  %9673 = vst [vmem:[#allocation174_spill] sm:$0xff] %v7573_v59  ;;  %v3743_v57 = vmul.f32 %v7583_v51, %v3739_v30  ;;  %v3769_v30 = vmul.f32 %v7420_v17, %v3766_v43 }
 0x51b   :  { %3748 = vrot.lane.b32.xlu1 %v3740_v26, %s4789_s10  ;;  %3750 = vrot.lane.b32.xlu0 %v3741_v38, %s4789_s10  ;;  %v3767_v38 = vmul.f32 %v7570_v22, %v3766_v43 }
 0x51d   :  { %v7578_v5 = vpop.permute.xlu1 %3370  ;;  %v7581_v34 = vpop.permute.xlu0 %3372 }
 0x51e   :  { %9674 = vst [vmem:[#allocation176_spill] sm:$0xff] %v7578_v5  ;;  %9675 = vst [vmem:[#allocation177_spill] sm:$0xff] %v7581_v34  ;;  %v3768_v5 = vmul.f32 %v7413_v1, %v3766_v43 }
 0x51f   :  { %3752 = vrot.lane.b32.xlu1 %v3742_v4, %s4789_s10  ;;  %3754 = vrot.lane.b32.xlu0 %v3743_v57, %s4789_s10  ;;  %v3770_v57 = vmul.f32 %v7583_v51, %v3766_v43  ;;  %v3793_v4 = vstv %s4586_s7  ;;  %s7801_s7 = sld [smem:[#allocation12 + $0x4d]] }
 0x520   :  { %v3796_v43 = vmul.f32 %v7420_v17, %v3793_v4 }
 0x521   :  { %v7588_v59 = vpop.permute.xlu1 %3374  ;;  %v7591_v26 = vpop.permute.xlu0 %3376 }
 0x522   :  { %9676 = vst [vmem:[#allocation179_spill] sm:$0xff] %v7588_v59  ;;  %9677 = vst [vmem:[#allocation178_spill] sm:$0xff] %v7591_v26 }
 0x523   :  { %3775 = vrot.lane.b32.xlu1 %v3767_v38, %s4789_s10  ;;  %3777 = vrot.lane.b32.xlu0 %v3768_v5, %s4789_s10  ;;  %v3794_v38 = vmul.f32 %v7570_v22, %v3793_v4  ;;  %v3795_v5 = vmul.f32 %v7413_v1, %v3793_v4 }
 0x525   :  { %v7596_v34 = vpop.permute.xlu1 %3397  ;;  %v7599_v2 = vpop.permute.xlu0 %3399 }
 0x526   :  { %9678 = vst [vmem:[#allocation180_spill] sm:$0xff] %v7596_v34  ;;  %9679 = vst [vmem:[#allocation181_spill] sm:$0xff] %v7599_v2 }
 0x527   :  { %3779 = vrot.lane.b32.xlu1 %v3769_v30, %s4789_s10  ;;  %3781 = vrot.lane.b32.xlu0 %v3770_v57, %s4789_s10  ;;  %v3797_v30 = vmul.f32 %v7583_v51, %v3793_v4  ;;  %v3820_v57 = vstv %s4587_s8  ;;  %s7837_s8 = sld [smem:[#allocation12 + $0x4e]] }
 0x528   :  { %v3823_v4 = vmul.f32 %v7474_v29, %v3820_v57 }
 0x529   :  { %v7604_v26 = vpop.permute.xlu1 %3401  ;;  %v7607_v59 = vpop.permute.xlu0 %3403 }
 0x52a   :  { %9680 = vst [vmem:[#allocation183_spill] sm:$0xff] %v7604_v26  ;;  %9681 = vst [vmem:[#allocation182_spill] sm:$0xff] %v7607_v59 }
 0x52b   :  { %3802 = vrot.lane.b32.xlu1 %v3794_v38, %s4789_s10  ;;  %3804 = vrot.lane.b32.xlu0 %v3795_v5, %s4789_s10  ;;  %v3821_v38 = vmul.f32 %v7462_v33, %v3820_v57  ;;  %v3822_v5 = vmul.f32 %v7467_v18, %v3820_v57 }
 0x52d   :  { %v7612_v34 = vpop.permute.xlu1 %3424  ;;  %v7615_v2 = vpop.permute.xlu0 %3426 }
 0x52e   :  { %9682 = vst [vmem:[#allocation184_spill] sm:$0xff] %v7612_v34  ;;  %9683 = vst [vmem:[#allocation185_spill] sm:$0xff] %v7615_v2 }
 0x52f   :  { %3806 = vrot.lane.b32.xlu1 %v3796_v43, %s4789_s10  ;;  %3808 = vrot.lane.b32.xlu0 %v3797_v30, %s4789_s10  ;;  %v3824_v43 = vmul.f32 %v7479_v0, %v3820_v57  ;;  %v3847_v30 = vstv %s4588_s3  ;;  %s4589_s10 = sld [smem:[#allocation12 + $0x41]]  ;;  %s7870_s3 = sld [smem:[#allocation12 + $0x4f]] }
 0x530   :  { %v3850_v57 = vmul.f32 %v7474_v29, %v3847_v30 }
 0x531   :  { %v7620_v59 = vpop.permute.xlu1 %3428  ;;  %v7623_v26 = vpop.permute.xlu0 %3430 }
 0x532   :  { %9684 = vst [vmem:[#allocation187_spill] sm:$0xff] %v7620_v59  ;;  %9685 = vst [vmem:[#allocation186_spill] sm:$0xff] %v7623_v26 }
 0x533   :  { %3829 = vrot.lane.b32.xlu1 %v3821_v38, %s4790_s19  ;;  %3831 = vrot.lane.b32.xlu0 %v3822_v5, %s4790_s19  ;;  %v3848_v38 = vmul.f32 %v7462_v33, %v3847_v30  ;;  %v3849_v5 = vmul.f32 %v7467_v18, %v3847_v30 }
 0x535   :  { %v7628_v34 = vpop.permute.xlu1 %3451  ;;  %v7631_v2 = vpop.permute.xlu0 %3453 }
 0x536   :  { %9686 = vst [vmem:[#allocation188_spill] sm:$0xff] %v7628_v34  ;;  %9687 = vst [vmem:[#allocation189_spill] sm:$0xff] %v7631_v2 }
 0x537   :  { %3833 = vrot.lane.b32.xlu1 %v3823_v4, %s4790_s19  ;;  %3835 = vrot.lane.b32.xlu0 %v3824_v43, %s4790_s19  ;;  %v3851_v4 = vmul.f32 %v7479_v0, %v3847_v30  ;;  %v3874_v43 = vstv %s4589_s10  ;;  %s7899_s10 = sld [smem:[#allocation12 + $0x50]] }
 0x538   :  { %v3877_v30 = vmul.f32 %v7474_v29, %v3874_v43 }
 0x539   :  { %v7636_v26 = vpop.permute.xlu1 %3455  ;;  %v7639_v59 = vpop.permute.xlu0 %3457 }
 0x53a   :  { %9688 = vst [vmem:[#allocation191_spill] sm:$0xff] %v7636_v26  ;;  %9689 = vst [vmem:[#allocation190_spill] sm:$0xff] %v7639_v59 }
 0x53b   :  { %3856 = vrot.lane.b32.xlu1 %v3848_v38, %s4790_s19  ;;  %3858 = vrot.lane.b32.xlu0 %v3849_v5, %s4790_s19  ;;  %v3875_v38 = vmul.f32 %v7462_v33, %v3874_v43  ;;  %v3876_v5 = vmul.f32 %v7467_v18, %v3874_v43 }
 0x53d   :  { %v7644_v34 = vpop.permute.xlu1 %3478  ;;  %v7647_v2 = vpop.permute.xlu0 %3480 }
 0x53e   :  { %9690 = vst [vmem:[#allocation192_spill] sm:$0xff] %v7644_v34  ;;  %9691 = vst [vmem:[#allocation193_spill] sm:$0xff] %v7647_v2 }
 0x53f   :  { %3860 = vrot.lane.b32.xlu1 %v3850_v57, %s4790_s19  ;;  %3862 = vrot.lane.b32.xlu0 %v3851_v4, %s4790_s19  ;;  %v3878_v57 = vmul.f32 %v7479_v0, %v3874_v43  ;;  %v3901_v4 = vstv %s4590_s9 }
 0x540   :  { %v3904_v43 = vmul.f32 %v7384_v20, %v3901_v4 }
 0x541   :  { %v7652_v59 = vpop.permute.xlu1 %3482  ;;  %v7655_v26 = vpop.permute.xlu0 %3484 }
 0x542   :  { %9692 = vst [vmem:[#allocation195_spill] sm:$0xff] %v7652_v59  ;;  %9693 = vst [vmem:[#allocation194_spill] sm:$0xff] %v7655_v26 }
 0x543   :  { %3883 = vrot.lane.b32.xlu1 %v3875_v38, %s4790_s19  ;;  %3885 = vrot.lane.b32.xlu0 %v3876_v5, %s4790_s19  ;;  %v3902_v38 = vmul.f32 %v7518_v56, %v3901_v4  ;;  %v3903_v5 = vmul.f32 %v7377_v54, %v3901_v4 }
 0x545   :  { %v7660_v34 = vpop.permute.xlu1 %3505  ;;  %v7663_v2 = vpop.permute.xlu0 %3507 }
 0x546   :  { %9694 = vst [vmem:[#allocation196_spill] sm:$0xff] %v7660_v34  ;;  %9695 = vst [vmem:[#allocation197_spill] sm:$0xff] %v7663_v2 }
 0x547   :  { %3887 = vrot.lane.b32.xlu1 %v3877_v30, %s4790_s19  ;;  %3889 = vrot.lane.b32.xlu0 %v3878_v57, %s4790_s19  ;;  %v3905_v30 = vmul.f32 %v7531_v27, %v3901_v4  ;;  %v3928_v57 = vstv %s4591_s11 }
 0x548   :  { %v3931_v4 = vmul.f32 %v7384_v20, %v3928_v57 }
 0x549   :  { %v7668_v26 = vpop.permute.xlu1 %3509  ;;  %v7671_v59 = vpop.permute.xlu0 %3511 }
 0x54a   :  { %9696 = vst [vmem:[#allocation199_spill] sm:$0xff] %v7668_v26  ;;  %9697 = vst [vmem:[#allocation198_spill] sm:$0xff] %v7671_v59 }
 0x54b   :  { %3910 = vrot.lane.b32.xlu1 %v3902_v38, %s4790_s19  ;;  %3912 = vrot.lane.b32.xlu0 %v3903_v5, %s4790_s19  ;;  %v3929_v38 = vmul.f32 %v7518_v56, %v3928_v57  ;;  %v3930_v5 = vmul.f32 %v7377_v54, %v3928_v57 }
 0x54d   :  { %v7676_v34 = vpop.permute.xlu1 %3532  ;;  %v7679_v2 = vpop.permute.xlu0 %3534 }
 0x54e   :  { %9698 = vst [vmem:[#allocation200_spill] sm:$0xff] %v7676_v34  ;;  %9699 = vst [vmem:[#allocation201_spill] sm:$0xff] %v7679_v2 }
 0x54f   :  { %3914 = vrot.lane.b32.xlu1 %v3904_v43, %s4790_s19  ;;  %3916 = vrot.lane.b32.xlu0 %v3905_v30, %s4790_s19  ;;  %v3932_v43 = vmul.f32 %v7531_v27, %v3928_v57  ;;  %v3955_v30 = vstv %s4592_s1 }
 0x550   :  { %v3956_v57 = vmul.f32 %v7518_v56, %v3955_v30 }
 0x551   :  { %v7684_v59 = vpop.permute.xlu1 %3536  ;;  %v7687_v26 = vpop.permute.xlu0 %3538 }
 0x552   :  { %9700 = vst [vmem:[#allocation203_spill] sm:$0xff] %v7684_v59  ;;  %9701 = vst [vmem:[#allocation202_spill] sm:$0xff] %v7687_v26  ;;  %v3959_v59 = vmul.f32 %v7531_v27, %v3955_v30 }
 0x553   :  { %3937 = vrot.lane.b32.xlu1 %v3929_v38, %s4790_s19  ;;  %3939 = vrot.lane.b32.xlu0 %v3930_v5, %s4790_s19 }
 0x555   :  { %v7692_v34 = vpop.permute.xlu1 %3559  ;;  %v7695_v2 = vpop.permute.xlu0 %3561 }
 0x556   :  { %9702 = vst [vmem:[#allocation204_spill] sm:$0xff] %v7692_v34  ;;  %9703 = vst [vmem:[#allocation205_spill] sm:$0xff] %v7695_v2  ;;  %v3957_v34 = vmul.f32 %v7377_v54, %v3955_v30  ;;  %v2307_v2 = vstv %s7700_s5 }
 0x557   :  { %3941 = vrot.lane.b32.xlu1 %v3931_v4, %s4790_s19  ;;  %3943 = vrot.lane.b32.xlu0 %v3932_v43, %s4790_s19  ;;  %v3958_v43 = vmul.f32 %v7384_v20, %v3955_v30  ;;  %v2299_v30 = vstv %s7698_s4  ;;  %v7823_v7 = vmul.f32 %v7518_v56, %v2307_v2  ;;  %v7829_v49 = vmul.f32 %v7384_v20, %v2307_v2 }
 0x559   :  { %v7710_v38 = vpop.permute.xlu1 %3563  ;;  %v7713_v5 = vpop.permute.xlu0 %3565  ;;  %9715 = vst [vmem:[#allocation217_spill] sm:$0xff] %v7829_v49 }
 0x55a   :  { %9704 = vst [vmem:[#allocation207_spill] sm:$0xff] %v7710_v38  ;;  %9705 = vst [vmem:[#allocation206_spill] sm:$0xff] %v7713_v5  ;;  %v2263_v38 = vstv %s7704_s13 }
 0x55b   :  { %3964 = vrot.lane.b32.xlu1 %v3956_v57, %s4790_s19  ;;  %3966 = vrot.lane.b32.xlu0 %v3957_v34, %s4790_s19  ;;  %v3982_v34 = vstv %s4593_s12  ;;  %v2272_v57 = vstv %s2271_s14 }
 0x55d   :  { %v7730_v4 = vpop.permute.xlu1 %3586  ;;  %v7733_v26 = vpop.permute.xlu0 %3588 }
 0x55e   :  { %9706 = vst [vmem:[#allocation208_spill] sm:$0xff] %v7730_v4  ;;  %9707 = vst [vmem:[#allocation209_spill] sm:$0xff] %v7733_v26  ;;  %v3983_v26 = vmul.f32 %v7570_v22, %v3982_v34 }
 0x55f   :  { %3968 = vrot.lane.b32.xlu1 %v3958_v43, %s4790_s19  ;;  %3970 = vrot.lane.b32.xlu0 %v3959_v59, %s4790_s19  ;;  %v3984_v43 = vmul.f32 %v7413_v1, %v3982_v34  ;;  %v2315_v59 = vstv %s7706_s16 }
 0x560   :  { %v7843_v9 = vmul.f32 %v7377_v54, %v2315_v59  ;;  %v7846_v6 = vmul.f32 %v7384_v20, %v2315_v59 }
 0x561   :  { %v7751_v4 = vpop.permute.xlu1 %3590  ;;  %v7754_v5 = vpop.permute.xlu0 %3592 }
 0x562   :  { %9708 = vst [vmem:[#allocation211_spill] sm:$0xff] %v7751_v4  ;;  %9709 = vst [vmem:[#allocation210_spill] sm:$0xff] %v7754_v5  ;;  %v2273_v5 = vmul.f32 %v7462_v33, %v2272_v57  ;;  %v2274_v4 = vmul.f32 %v7467_v18, %v2272_v57 }
 0x563   :  { %3991 = vrot.lane.b32.xlu1 %v3983_v26, %s4790_s19  ;;  %3993 = vrot.lane.b32.xlu0 %v3984_v43, %s4790_s19  ;;  %v3985_v26 = vmul.f32 %v7420_v17, %v3982_v34  ;;  %v3986_v43 = vmul.f32 %v7583_v51, %v3982_v34  ;;  %v2275_v34 = vmul.f32 %v7474_v29, %v2272_v57 }
 0x564   :  { %v2277_v41 = vadd.f32 %v2274_v4, %v2263_v38  ;;  %v7817_v4 = vmul.f32 %v7377_v54, %v2299_v30  ;;  %v7820_v57 = vmul.f32 %v7384_v20, %v2299_v30  ;;  %9717 = vst [vmem:[#allocation218_spill] sm:$0xff] %v7843_v9  ;;  %9718 = vst [vmem:[#allocation220_spill] sm:$0xff] %v7846_v6 }
 0x565   :  { %v7777_v45 = vpop.permute.xlu1 %3613  ;;  %v7780_v58 = vpop.permute.xlu0 %3615  ;;  %v2289_v9 = vmul.f32 %v7462_v33, %v2288_v40 }
 0x566   :  { %9710 = vst [vmem:[#allocation212_spill] sm:$0xff] %v7777_v45  ;;  %9711 = vst [vmem:[#allocation213_spill] sm:$0xff] %v7780_v58  ;;  %v7799_v45 = vstv %s7748_s28  ;;  %v2276_v58 = vadd.f32 %v2273_v5, %v2263_v38  ;;  %v7814_v5 = vmul.f32 %v7518_v56, %v2299_v30  ;;  %v7840_v30 = vmul.f32 %v7518_v56, %v2315_v59 }
 0x567   :  { %3995 = vrot.lane.b32.xlu1 %v3985_v26, %s4790_s19  ;;  %3997 = vrot.lane.b32.xlu0 %v3986_v43, %s4790_s19  ;;  %v4010_v43 = vmul.f32 %v7570_v22, %v4009_v23  ;;  %v2290_v59 = vmul.f32 %v7467_v18, %v2288_v40 }
 0x568   :  { %9716 = vst [vmem:[#allocation219_spill] sm:$0xff] %v7840_v30  ;;  %v7848_v10 = vadd.f32 %v2327_v12, %v2276_v58  ;;  %v4013_v30 = vmul.f32 %v7583_v51, %v4009_v23  ;;  %v2335_v58 = vmul.f32 %v7570_v22, %v2334_v42  ;;  %v2337_v23 = vmul.f32 %v7420_v17, %v2334_v42 }
 0x569   :  { %v7807_v26 = vpop.permute.xlu1 %3617  ;;  %v7810_v61 = vpop.permute.xlu0 %3619 }
 0x56a   :  { %9712 = vst [vmem:[#allocation215_spill] sm:$0xff] %v7807_v26  ;;  %9713 = vst [vmem:[#allocation214_spill] sm:$0xff] %v7810_v61  ;;  %v7826_v26 = vmul.f32 %v7377_v54, %v2307_v2  ;;  %v2328_v61 = vmul.f32 %v7413_v1, %v2326_v3  ;;  %v2278_v2 = vadd.f32 %v2275_v34, %v2263_v38  ;;  %v7868_v34 = vstv %s7801_s7 }
 0x56b   :  { %4018 = vrot.lane.b32.xlu1 %v4010_v43, %s4790_s19  ;;  %4020 = vrot.lane.b32.xlu0 %v4011_v39, %s4790_s19  ;;  %9719 = vst [vmem:[#allocation221_spill] sm:$0xff] %v7848_v10  ;;  %v2329_v43 = vmul.f32 %v7420_v17, %v2326_v3  ;;  %v2291_v38 = vmul.f32 %v7474_v29, %v2288_v40 }
 0x56c   :  { %9714 = vst [vmem:[#allocation216_spill] sm:$0xff] %v7826_v26  ;;  %v2283_v26 = vmul.f32 %v7474_v29, %v2280_v13  ;;  %v7861_v12 = vadd.f32 %v2328_v61, %v2277_v41  ;;  %v2336_v3 = vmul.f32 %v7413_v1, %v2334_v42  ;;  %v2343_v13 = vmul.f32 %v7570_v22, %v2342_v52 }
 0x56d   :  { %v7851_v39 = vpop.permute.xlu1 %3640  ;;  %v7854_v49 = vpop.permute.xlu0 %3642  ;;  %v2344_v40 = vmul.f32 %v7413_v1, %v2342_v52  ;;  %v2345_v61 = vmul.f32 %v7420_v17, %v2342_v52  ;;  %v2284_v41 = vadd.f32 %v2281_v15, %v7762_v35  ;;  %v4038_v42 = vmul.f32 %v7413_v1, %v7796_v36 }
 0x56e   :  { %9720 = vst [vmem:[#allocation223_spill] sm:$0xff] %v7851_v39  ;;  %9721 = vst [vmem:[#allocation222_spill] sm:$0xff] %v7854_v49  ;;  %v2285_v39 = vadd.f32 %v2282_v16, %v7762_v35  ;;  %v2292_v10 = vadd.f32 %v2289_v9, %v7773_v31  ;;  %v2293_v52 = vadd.f32 %v2290_v59, %v7773_v31 }
 0x56f   :  { %9722 = vst [vmem:[#allocation224_spill] sm:$0xff] %v7861_v12  ;;  %4022 = vrot.lane.b32.xlu1 %v4012_v47, %s4790_s19  ;;  %4024 = vrot.lane.b32.xlu0 %v4013_v30, %s4790_s19  ;;  %v4037_v30 = vmul.f32 %v7570_v22, %v7796_v36  ;;  %v2286_v12 = vadd.f32 %v2283_v26, %v7762_v35 }
 0x570   :  { %v2294_v15 = vadd.f32 %v2291_v38, %v7773_v31  ;;  %v7890_v6 = vadd.f32 %v2329_v43, %v2278_v2  ;;  %v7892_v16 = vadd.f32 %v2335_v58, %v2284_v41  ;;  %v7903_v9 = vadd.f32 %v2343_v13, %v2292_v10 }
 0x571   :  { %v7878_v47 = vpop.permute.xlu1 %3644  ;;  %v7882_v49 = vpop.permute.xlu0 %3646  ;;  %v7901_v35 = vadd.f32 %v2337_v23, %v2286_v12  ;;  %v7905_v26 = vadd.f32 %v2344_v40, %v2293_v52  ;;  %v4039_v43 = vmul.f32 %v7420_v17, %v7796_v36  ;;  %v4064_v59 = vmul.f32 %v7462_v33, %v7785_v32 }
 0x572   :  { %9723 = vst [vmem:[#allocation225_spill] sm:$0xff] %v7878_v47  ;;  %9724 = vst [vmem:[#allocation227_spill] sm:$0xff] %v7882_v49  ;;  %v7894_v47 = vadd.f32 %v2336_v3, %v2285_v39  ;;  %v4225_v49 = vstv %s7837_s8  ;;  %v7907_v31 = vadd.f32 %v2345_v61, %v2294_v15  ;;  %v4040_v38 = vmul.f32 %v7583_v51, %v7796_v36 }
 0x573   :  { %4045 = vrot.lane.b32.xlu1 %v4037_v30, %s4790_s19  ;;  %4047 = vrot.lane.b32.xlu0 %v4038_v42, %s4790_s19  ;;  %v4066_v10 = vmul.f32 %v7474_v29, %v7785_v32  ;;  %v4065_v12 = vmul.f32 %v7467_v18, %v7785_v32  ;;  %v7925_v58 = vmul.f32 %v7462_v33, %v7788_v37 }
 0x574   :  { %v4067_v3 = vmul.f32 %v7479_v0, %v7785_v32  ;;  %v7931_v23 = vmul.f32 %v7474_v29, %v7788_v37  ;;  %v4092_v36 = vmul.f32 %v7467_v18, %v7788_v37  ;;  %v7939_v13 = vmul.f32 %v7462_v33, %v7791_v60 }
 0x575   :  { %v7909_v2 = vpop.permute.xlu1 %3667  ;;  %v7913_v39 = vpop.permute.xlu0 %3669  ;;  %v7943_v40 = vmul.f32 %v7479_v0, %v7788_v37  ;;  %v4252_v32 = vstv %s7870_s3  ;;  %v7948_v61 = vmul.f32 %v7474_v29, %v7791_v60  ;;  %v7952_v41 = vmul.f32 %v7467_v18, %v7791_v60 }
 0x576   :  { %9725 = vst [vmem:[#allocation226_spill] sm:$0xff] %v7909_v2  ;;  %9726 = vst [vmem:[#allocation228_spill] sm:$0xff] %v7913_v39  ;;  %v7956_v30 = vmul.f32 %v7518_v56, %v7799_v45  ;;  %v7960_v33 = vmul.f32 %v7479_v0, %v7791_v60  ;;  %v7968_v29 = vmul.f32 %v7384_v20, %v7799_v45 }
 0x577   :  { %4049 = vrot.lane.b32.xlu1 %v4039_v43, %s4790_s19  ;;  %4051 = vrot.lane.b32.xlu0 %v4040_v38, %s4790_s19  ;;  %v7972_v18 = vmul.f32 %v7377_v54, %v7799_v45  ;;  %v7976_v52 = vmul.f32 %v7518_v56, %v7835_v63  ;;  %v7980_v60 = vmul.f32 %v7531_v27, %v7799_v45 }
 0x578   :  { %v7984_v0 = vmul.f32 %v7384_v20, %v7835_v63  ;;  %v7988_v15 = vmul.f32 %v7377_v54, %v7835_v63  ;;  %v7992_v43 = vmul.f32 %v7518_v56, %v7868_v34  ;;  %v7996_v38 = vmul.f32 %v7531_v27, %v7835_v63 }
 0x579   :  { %v7962_v37 = vpop.permute.xlu1 %3671  ;;  %v7964_v42 = vpop.permute.xlu0 %3673  ;;  %v8002_v45 = vmul.f32 %v7384_v20, %v7868_v34  ;;  %v4279_v56 = vstv %s7899_s10  ;;  %v8014_v63 = vmul.f32 %v7531_v27, %v7868_v34  ;;  %v8023_v20 = vmul.f32 %v7570_v22, %v4252_v32 }
 0x57a   :  { %9727 = vst [vmem:[#allocation229_spill] sm:$0xff] %v7962_v37  ;;  %9728 = vst [vmem:[#allocation231_spill] sm:$0xff] %v7964_v42  ;;  %v8006_v42 = vmul.f32 %v7377_v54, %v7868_v34  ;;  %v8009_v37 = vmul.f32 %v7570_v22, %v4225_v49  ;;  %v2371_v54 = vsel %vm232_vm0, %v6964_v25, %v6967_v44 }
 0x57b   :  { %4072 = vrot.lane.b32.xlu1 %v4064_v59, %s4791_s29  ;;  %4074 = vrot.lane.b32.xlu0 %v4065_v12, %s4791_s29  ;;  %v8017_v59 = vmul.f32 %v7420_v17, %v4225_v49  ;;  %v8020_v12 = vmul.f32 %v7413_v1, %v4225_v49  ;;  %9730 = vst [vmem:[#allocation39_spill] sm:$0xff] %v8023_v20 }
 0x57c   :  { %v8033_v27 = vmul.f32 %v7583_v51, %v4225_v49  ;;  %v8036_v34 = vmul.f32 %v7420_v17, %v4252_v32  ;;  %v2372_v20 = vsel %vm232_vm0, %v6967_v44, %v6972_v8  ;;  %v2373_v25 = vsel %vm232_vm0, %v6972_v8, %v6975_v50 }
 0x57d   :  { %9729 = vst [vmem:[#allocation230_spill] sm:$0xff] %v8017_v59  ;;  %v8028_v2 = vpop.permute.xlu1 %3694  ;;  %v8030_v39 = vpop.permute.xlu0 %3696  ;;  %v8039_v59 = vmul.f32 %v7413_v1, %v4252_v32  ;;  %v8051_v49 = vmul.f32 %v7583_v51, %v4252_v32  ;;  %v8059_v44 = vmul.f32 %v7420_v17, %v4279_v56  ;;  %v2377_v8 = vadd.f32 %v2371_v54, %v7814_v5  ;;  %v9744_v54 = vld [vmem:[#allocation44_spill] sm:$0xff] }
 0x57e   :  { %9731 = vst [vmem:[#allocation23_spill] sm:$0xff] %v8028_v2  ;;  %9732 = vst [vmem:[#allocation22_spill] sm:$0xff] %v8030_v39  ;;  %v8048_v2 = vmul.f32 %v7570_v22, %v4279_v56  ;;  %v2398_v39 = vsel %vm232_vm0, %v6980_v28, %v6983_v53  ;;  %v2399_v50 = vsel %vm232_vm0, %v6983_v53, %v6988_v48 }
 0x57f   :  { %9733 = vst [vmem:[#allocation25_spill] sm:$0xff] %v8036_v34  ;;  %4076 = vrot.lane.b32.xlu1 %v4066_v10, %s4791_s29  ;;  %4078 = vrot.lane.b32.xlu0 %v4067_v3, %s4791_s29  ;;  %9734 = vst [vmem:[#allocation31_spill] sm:$0xff] %v8059_v44  ;;  %v8062_v34 = vmul.f32 %v7413_v1, %v4279_v56  ;;  %v2400_v28 = vsel %vm232_vm0, %v6988_v48, %v6991_v55  ;;  %v9777_v44 = vld [vmem:[#allocation75_spill] sm:$0xff] }
 0x580   :  { %v8072_v22 = vmul.f32 %v7583_v51, %v4279_v56  ;;  %v2378_v10 = vadd.f32 %v2372_v20, %v7817_v4  ;;  %v2379_v17 = vadd.f32 %v2373_v25, %v7820_v57  ;;  %v2425_v1 = vsel %vm232_vm0, %v6996_v19, %v6999_v62  ;;  %v9738_v4 = vld [vmem:[#allocation216_spill] sm:$0xff]  ;;  %v9739_v57 = vld [vmem:[#allocation217_spill] sm:$0xff]  ;;  %v9740_v56 = vld [vmem:[#allocation42_spill] sm:$0xff] }
 0x581   :  { %v2426_v5 = vsel %vm232_vm0, %v6999_v62, %v7004_v21  ;;  %v8082_v53 = vpop.permute.xlu1 %3698  ;;  %v8084_v3 = vpop.permute.xlu0 %3700  ;;  %v2404_v48 = vadd.f32 %v2398_v39, %v7823_v7  ;;  %v2427_v55 = vsel %vm232_vm0, %v7004_v21, %v7007_v11  ;;  %v2456_v51 = vsel %vm232_vm0, %v7012_v24, %v7015_v14  ;;  %v9741_v21 = vld [vmem:[#allocation219_spill] sm:$0xff]  ;;  %v9742_v24 = vld [vmem:[#allocation218_spill] sm:$0xff]  ;;  %v9743_v20 = vld [vmem:[#allocation45_spill] sm:$0xff] }
 0x582   :  { %9735 = vst [vmem:[#allocation30_spill] sm:$0xff] %v8072_v22  ;;  %9736 = vst [vmem:[#allocation38_spill] sm:$0xff] %v8082_v53  ;;  %v2457_v19 = vsel %vm232_vm0, %v7015_v14, %v7020_v46  ;;  %v2405_v62 = vadd.f32 %v2399_v50, %v9738_v4  ;;  %v2406_v32 = vadd.f32 %v2400_v28, %v9739_v57  ;;  %v9745_v25 = vld [vmem:[#allocation47_spill] sm:$0xff]  ;;  %v9746_v28 = vld [vmem:[#allocation220_spill] sm:$0xff] }
 0x583   :  { %9737 = vst [vmem:[#allocation40_spill] sm:$0xff] %v8084_v3  ;;  %v2458_v7 = vsel %vm232_vm0, %v7020_v46, %v9740_v56  ;;  %4099 = vrot.lane.b32.xlu1 %v7925_v58, %s4791_s29  ;;  %4101 = vrot.lane.b32.xlu0 %v4092_v36, %s4791_s29  ;;  %v2431_v11 = vadd.f32 %v2425_v1, %v9741_v21  ;;  %v9747_v46 = vld [vmem:[#allocation221_spill] sm:$0xff]  ;;  %v9748_v56 = vld [vmem:[#allocation224_spill] sm:$0xff]  ;;  %v9749_v3 = vld [vmem:[#allocation46_spill] sm:$0xff] }
 0x584   :  { %v2432_v39 = vadd.f32 %v2426_v5, %v9742_v24  ;;  %v2483_v14 = vsel %vm232_vm0, %v9744_v54, %v9743_v20  ;;  %v2484_v50 = vsel %vm232_vm0, %v9743_v20, %v9745_v25  ;;  %v2433_v4 = vadd.f32 %v2427_v55, %v9746_v28  ;;  %v9751_v24 = vld [vmem:[#allocation49_spill] sm:$0xff]  ;;  %v9752_v54 = vld [vmem:[#allocation48_spill] sm:$0xff]  ;;  %v9753_v53 = vld [vmem:[#allocation51_spill] sm:$0xff] }
 0x585   :  { %v2462_v57 = vadd.f32 %v2456_v51, %v9747_v46  ;;  %v2463_v58 = vadd.f32 %v2457_v19, %v9748_v56  ;;  %v2485_v36 = vsel %vm232_vm0, %v9745_v25, %v9749_v3  ;;  %v8118_v1 = vpop.permute.xlu1 %3721  ;;  %v8120_v5 = vpop.permute.xlu0 %3723  ;;  %v2464_v21 = vadd.f32 %v2458_v7, %v7890_v6  ;;  %v9754_v51 = vld [vmem:[#allocation50_spill] sm:$0xff]  ;;  %v9755_v28 = vld [vmem:[#allocation53_spill] sm:$0xff]  ;;  %v9756_v46 = vld [vmem:[#allocation52_spill] sm:$0xff] }
 0x586   :  { %9750 = vst [vmem:[#allocation24_spill] sm:$0xff] %v8118_v1  ;;  %v2510_v20 = vsel %vm232_vm0, %v9752_v54, %v9751_v24  ;;  %v2511_v55 = vsel %vm232_vm0, %v9751_v24, %v9753_v53  ;;  %v2512_v19 = vsel %vm232_vm0, %v9753_v53, %v9754_v51  ;;  %v2489_v3 = vadd.f32 %v2483_v14, %v7892_v16  ;;  %v9757_v56 = vld [vmem:[#allocation55_spill] sm:$0xff]  ;;  %v9758_v24 = vld [vmem:[#allocation54_spill] sm:$0xff]  ;;  %v9759_v16 = vld [vmem:[#allocation57_spill] sm:$0xff] }
 0x587   :  { %v2490_v25 = vadd.f32 %v2484_v50, %v7894_v47  ;;  %v2541_v6 = vsel %vm232_vm0, %v9756_v46, %v9755_v28  ;;  %4103 = vrot.lane.b32.xlu1 %v7931_v23, %s4791_s29  ;;  %4105 = vrot.lane.b32.xlu0 %v7943_v40, %s4791_s29  ;;  %v2491_v7 = vadd.f32 %v2485_v36, %v7901_v35  ;;  %v9760_v14 = vld [vmem:[#allocation56_spill] sm:$0xff]  ;;  %v9761_v51 = vld [vmem:[#allocation59_spill] sm:$0xff]  ;;  %v9762_v1 = vld [vmem:[#allocation58_spill] sm:$0xff] }
 0x588   :  { %v2542_v53 = vsel %vm232_vm0, %v9755_v28, %v9757_v56  ;;  %v2543_v47 = vsel %vm232_vm0, %v9757_v56, %v9758_v24  ;;  %v2568_v50 = vsel %vm232_vm0, %v9760_v14, %v9759_v16  ;;  %v2516_v54 = vadd.f32 %v2510_v20, %v7903_v9  ;;  %v9763_v24 = vld [vmem:[#allocation61_spill] sm:$0xff]  ;;  %v9764_v14 = vld [vmem:[#allocation60_spill] sm:$0xff] }
 0x589   :  { %v2517_v23 = vadd.f32 %v2511_v55, %v7905_v26  ;;  %v2518_v40 = vadd.f32 %v2512_v19, %v7907_v31  ;;  %v2569_v35 = vsel %vm232_vm0, %v9759_v16, %v9761_v51  ;;  %v8157_v36 = vpop.permute.xlu1 %3725  ;;  %v3728_v28 = vpop.permute.xlu0 %3727  ;;  %v2547_v46 = vadd.f32 %v2541_v6, %v2377_v8  ;;  %v9765_v19 = vld [vmem:[#allocation63_spill] sm:$0xff]  ;;  %v9766_v6 = vld [vmem:[#allocation62_spill] sm:$0xff] }
 0x58a   :  { %v2570_v56 = vsel %vm232_vm0, %v9761_v51, %v9762_v1  ;;  %v2595_v9 = vsel %vm232_vm0, %v9764_v14, %v9763_v24  ;;  %v8167_v26 = vsel %vm1460_vm5, %v8157_v36, %v3728_v28  ;;  %v2548_v31 = vadd.f32 %v2542_v53, %v2378_v10  ;;  %v9767_v51 = vld [vmem:[#allocation65_spill] sm:$0xff]  ;;  %v9768_v28 = vld [vmem:[#allocation64_spill] sm:$0xff]  ;;  %v9769_v53 = vld [vmem:[#allocation67_spill] sm:$0xff] }
 0x58b   :  { %v2549_v20 = vadd.f32 %v2543_v47, %v2379_v17  ;;  %v2574_v55 = vadd.f32 %v2568_v50, %v2404_v48  ;;  %4126 = vrot.lane.b32.xlu1 %v7939_v13, %s4791_s29  ;;  %4128 = vrot.lane.b32.xlu0 %v7952_v41, %s4791_s29  ;;  %v2575_v8 = vadd.f32 %v2569_v35, %v2405_v62  ;;  %v9770_v41 = vld [vmem:[#allocation66_spill] sm:$0xff]  ;;  %v9771_v35 = vld [vmem:[#allocation69_spill] sm:$0xff] }
 0x58c   :  { %v2596_v1 = vsel %vm232_vm0, %v9763_v24, %v9765_v19  ;;  %v2597_v16 = vsel %vm232_vm0, %v9765_v19, %v9766_v6  ;;  %v2622_v10 = vsel %vm484_vm1, %v9768_v28, %v9767_v51  ;;  %v2576_v17 = vadd.f32 %v2570_v56, %v2406_v32  ;;  %v9772_v24 = vld [vmem:[#allocation68_spill] sm:$0xff]  ;;  %v9773_v19 = vld [vmem:[#allocation71_spill] sm:$0xff]  ;;  %v9774_v32 = vld [vmem:[#allocation70_spill] sm:$0xff] }
 0x58d   :  { %v2601_v48 = vadd.f32 %v2595_v9, %v2431_v11  ;;  %v2623_v13 = vsel %vm484_vm1, %v9767_v51, %v9769_v53  ;;  %v2624_v62 = vsel %vm484_vm1, %v9769_v53, %v9770_v41  ;;  %v3749_v47 = vpop.permute.xlu1 %3748  ;;  %v3751_v50 = vpop.permute.xlu0 %3750  ;;  %v2649_v14 = vsel %vm484_vm1, %v9772_v24, %v9771_v35  ;;  %v9775_v24 = vld [vmem:[#allocation73_spill] sm:$0xff] }
 0x58e   :  { %v2650_v6 = vsel %vm484_vm1, %v9771_v35, %v9773_v19  ;;  %v2651_v11 = vsel %vm484_vm1, %v9773_v19, %v9774_v32  ;;  %v8198_v56 = vsel %vm1460_vm5, %v3749_v47, %v3751_v50  ;;  %v2602_v9 = vadd.f32 %v2596_v1, %v2432_v39  ;;  %v9776_v35 = vld [vmem:[#allocation72_spill] sm:$0xff]  ;;  %v9783_v32 = vld [vmem:[#allocation81_spill] sm:$0xff] }
 0x58f   :  { %v2603_v51 = vadd.f32 %v2597_v16, %v2433_v4  ;;  %v2628_v28 = vadd.f32 %v2622_v10, %v2462_v57  ;;  %4130 = vrot.lane.b32.xlu1 %v7948_v61, %s4791_s29  ;;  %4132 = vrot.lane.b32.xlu0 %v7960_v33, %s4791_s29  ;;  %v2629_v53 = vadd.f32 %v2623_v13, %v2463_v58  ;;  %v9778_v57 = vld [vmem:[#allocation74_spill] sm:$0xff]  ;;  %v9779_v33 = vld [vmem:[#allocation77_spill] sm:$0xff]  ;;  %v9780_v58 = vld [vmem:[#allocation76_spill] sm:$0xff] }
 0x590   :  { %v2630_v41 = vadd.f32 %v2624_v62, %v2464_v21  ;;  %v2676_v22 = vsel %vm484_vm1, %v9776_v35, %v9775_v24  ;;  %v2677_v47 = vsel %vm484_vm1, %v9775_v24, %v9777_v44  ;;  %v2655_v19 = vadd.f32 %v2649_v14, %v2489_v3  ;;  %v9781_v10 = vld [vmem:[#allocation79_spill] sm:$0xff]  ;;  %v9782_v14 = vld [vmem:[#allocation78_spill] sm:$0xff] }
 0x591   :  { %v2656_v39 = vadd.f32 %v2650_v6, %v2490_v25  ;;  %v2657_v4 = vadd.f32 %v2651_v11, %v2491_v7  ;;  %v2678_v61 = vsel %vm484_vm1, %v9777_v44, %v9778_v57  ;;  %v3753_v1 = vpop.permute.xlu1 %3752  ;;  %v3755_v16 = vpop.permute.xlu0 %3754  ;;  %v2703_v21 = vsel %vm484_vm1, %v9780_v58, %v9779_v33  ;;  %v9784_v11 = vld [vmem:[#allocation80_spill] sm:$0xff]  ;;  %v9785_v24 = vld [vmem:[#allocation83_spill] sm:$0xff]  ;;  %v9787_v57 = vld [vmem:[#allocation85_spill] sm:$0xff] }
 0x592   :  { %v2704_v13 = vsel %vm484_vm1, %v9779_v33, %v9781_v10  ;;  %v8220_v62 = vsel %vm1460_vm5, %v3751_v50, %v3753_v1  ;;  %v8223_v3 = vsel %vm1460_vm5, %v3753_v1, %v3755_v16  ;;  %v2682_v25 = vadd.f32 %v2676_v22, %v2516_v54  ;;  %v9786_v54 = vld [vmem:[#allocation82_spill] sm:$0xff] }
 0x593   :  { %v2683_v7 = vadd.f32 %v2677_v47, %v2517_v23  ;;  %v2705_v44 = vsel %vm484_vm1, %v9781_v10, %v9782_v14  ;;  %4153 = vrot.lane.b32.xlu1 %v7956_v30, %s4791_s29  ;;  %4155 = vrot.lane.b32.xlu0 %v7972_v18, %s4791_s29  ;;  %v2684_v6 = vadd.f32 %v2678_v61, %v2518_v40  ;;  %v9788_v30 = vld [vmem:[#allocation84_spill] sm:$0xff]  ;;  %v9789_v18 = vld [vmem:[#allocation87_spill] sm:$0xff]  ;;  %v9790_v58 = vld [vmem:[#allocation86_spill] sm:$0xff] }
 0x594   :  { %v2730_v50 = vsel %vm484_vm1, %v9784_v11, %v9783_v32  ;;  %v2731_v22 = vsel %vm484_vm1, %v9783_v32, %v9785_v24  ;;  %v2732_v23 = vsel %vm484_vm1, %v9785_v24, %v9786_v54  ;;  %v2709_v35 = vadd.f32 %v2703_v21, %v2547_v46  ;;  %v9791_v14 = vld [vmem:[#allocation89_spill] sm:$0xff]  ;;  %v9792_v32 = vld [vmem:[#allocation88_spill] sm:$0xff]  ;;  %v9793_v24 = vld [vmem:[#allocation91_spill] sm:$0xff] }
 0x595   :  { %v2710_v47 = vadd.f32 %v2704_v13, %v2548_v31  ;;  %v2757_v1 = vsel %vm484_vm1, %v9788_v30, %v9787_v57  ;;  %v2758_v40 = vsel %vm484_vm1, %v9787_v57, %v9789_v18  ;;  %v3776_v61 = vpop.permute.xlu1 %3775  ;;  %v3778_v16 = vpop.permute.xlu0 %3777  ;;  %v2711_v33 = vadd.f32 %v2705_v44, %v2549_v20  ;;  %v9794_v57 = vld [vmem:[#allocation90_spill] sm:$0xff] }
 0x596   :  { %v2759_v10 = vsel %vm484_vm1, %v9789_v18, %v9790_v58  ;;  %v2784_v46 = vsel %vm484_vm1, %v9792_v32, %v9791_v14  ;;  %v8254_v31 = vsel %vm1460_vm5, %v3776_v61, %v3778_v16  ;;  %v2736_v21 = vadd.f32 %v2730_v50, %v2574_v55 }
 0x597   :  { %v2737_v13 = vadd.f32 %v2731_v22, %v2575_v8  ;;  %v2738_v11 = vadd.f32 %v2732_v23, %v2576_v17  ;;  %4157 = vrot.lane.b32.xlu1 %v7968_v29, %s4791_s29  ;;  %4159 = vrot.lane.b32.xlu0 %v7980_v60, %s4791_s29  ;;  %v2763_v20 = vadd.f32 %v2757_v1, %v2601_v48  ;;  %v9795_v8 = vld [vmem:[#allocation93_spill] sm:$0xff]  ;;  %v9796_v17 = vld [vmem:[#allocation92_spill] sm:$0xff]  ;;  %v9797_v29 = vld [vmem:[#allocation95_spill] sm:$0xff] }
 0x598   :  { %v2764_v44 = vadd.f32 %v2758_v40, %v2602_v9  ;;  %v2785_v54 = vsel %vm484_vm1, %v9791_v14, %v9793_v24  ;;  %v2786_v30 = vsel %vm484_vm1, %v9793_v24, %v9794_v57  ;;  %v2765_v18 = vadd.f32 %v2759_v10, %v2603_v51  ;;  %v9798_v22 = vld [vmem:[#allocation94_spill] sm:$0xff]  ;;  %v9799_v1 = vld [vmem:[#allocation97_spill] sm:$0xff]  ;;  %v9800_v40 = vld [vmem:[#allocation96_spill] sm:$0xff] }
 0x599   :  { %v2790_v55 = vadd.f32 %v2784_v46, %v2628_v28  ;;  %v2811_v50 = vsel %vm484_vm1, %v9796_v17, %v9795_v8  ;;  %v2812_v60 = vsel %vm484_vm1, %v9795_v8, %v9797_v29  ;;  %v3780_v48 = vpop.permute.xlu1 %3779  ;;  %v3782_v9 = vpop.permute.xlu0 %3781  ;;  %v2813_v23 = vsel %vm484_vm1, %v9797_v29, %v9798_v22  ;;  %v9801_v14 = vld [vmem:[#allocation99_spill] sm:$0xff]  ;;  %v9802_v24 = vld [vmem:[#allocation98_spill] sm:$0xff]  ;;  %v9803_v57 = vld [vmem:[#allocation101_spill] sm:$0xff] }
 0x59a   :  { %v2838_v61 = vsel %vm484_vm1, %v9800_v40, %v9799_v1  ;;  %v8279_v51 = vsel %vm1460_vm5, %v3778_v16, %v3780_v48  ;;  %v8282_v28 = vsel %vm1460_vm5, %v3780_v48, %v3782_v9  ;;  %v2791_v58 = vadd.f32 %v2785_v54, %v2629_v53  ;;  %v9804_v8 = vld [vmem:[#allocation100_spill] sm:$0xff]  ;;  %v9807_v9 = vld [vmem:[#allocation105_spill] sm:$0xff]  ;;  %v9809_v40 = vld [vmem:[#allocation107_spill] sm:$0xff] }
 0x59b   :  { %v2792_v10 = vadd.f32 %v2786_v30, %v2630_v41  ;;  %v2839_v32 = vsel %vm484_vm1, %v9799_v1, %v9801_v14  ;;  %4180 = vrot.lane.b32.xlu1 %v7976_v52, %s4791_s29  ;;  %4182 = vrot.lane.b32.xlu0 %v7988_v15, %s4791_s29  ;;  %v2817_v46 = vadd.f32 %v2811_v50, %v2655_v19  ;;  %v9805_v41 = vld [vmem:[#allocation103_spill] sm:$0xff]  ;;  %v9806_v52 = vld [vmem:[#allocation102_spill] sm:$0xff]  ;;  %v9808_v22 = vld [vmem:[#allocation104_spill] sm:$0xff] }
 0x59c   :  { %v2840_v16 = vsel %vm484_vm1, %v9801_v14, %v9802_v24  ;;  %v2865_v53 = vsel %vm728_vm2, %v9804_v8, %v9803_v57  ;;  %v2866_v54 = vsel %vm728_vm2, %v9803_v57, %v9805_v41  ;;  %v2818_v30 = vadd.f32 %v2812_v60, %v2656_v39  ;;  %v9810_v60 = vld [vmem:[#allocation106_spill] sm:$0xff]  ;;  %v9813_v8 = vld [vmem:[#allocation111_spill] sm:$0xff] }
 0x59d   :  { %v2819_v17 = vadd.f32 %v2813_v23, %v2657_v4  ;;  %v2844_v29 = vadd.f32 %v2838_v61, %v2682_v25  ;;  %v2867_v15 = vsel %vm728_vm2, %v9805_v41, %v9806_v52  ;;  %v3803_v19 = vpop.permute.xlu1 %3802  ;;  %v3805_v50 = vpop.permute.xlu0 %3804  ;;  %v2845_v48 = vadd.f32 %v2839_v32, %v2683_v7  ;;  %v9811_v61 = vld [vmem:[#allocation109_spill] sm:$0xff]  ;;  %v9812_v32 = vld [vmem:[#allocation108_spill] sm:$0xff]  ;;  %v9817_v52 = vld [vmem:[#allocation115_spill] sm:$0xff] }
 0x59e   :  { %v2892_v1 = vsel %vm728_vm2, %v9808_v22, %v9807_v9  ;;  %v2893_v14 = vsel %vm728_vm2, %v9807_v9, %v9809_v40  ;;  %v8310_v24 = vsel %vm1460_vm5, %v3803_v19, %v3805_v50  ;;  %v2846_v39 = vadd.f32 %v2840_v16, %v2684_v6  ;;  %v9814_v16 = vld [vmem:[#allocation110_spill] sm:$0xff] }
 0x59f   :  { %v2871_v4 = vadd.f32 %v2865_v53, %v2709_v35  ;;  %v2872_v25 = vadd.f32 %v2866_v54, %v2710_v47  ;;  %4184 = vrot.lane.b32.xlu1 %v7984_v0, %s4791_s29  ;;  %4186 = vrot.lane.b32.xlu0 %v7996_v38, %s4791_s29  ;;  %v2873_v7 = vadd.f32 %v2867_v15, %v2711_v33  ;;  %v9815_v38 = vld [vmem:[#allocation113_spill] sm:$0xff]  ;;  %v9816_v33 = vld [vmem:[#allocation112_spill] sm:$0xff]  ;;  %v9818_v19 = vld [vmem:[#allocation114_spill] sm:$0xff] }
 0x5a0   :  { %v2894_v23 = vsel %vm728_vm2, %v9809_v40, %v9810_v60  ;;  %v2919_v57 = vsel %vm728_vm2, %v9812_v32, %v9811_v61  ;;  %v2920_v6 = vsel %vm728_vm2, %v9811_v61, %v9813_v8  ;;  %v2898_v35 = vadd.f32 %v2892_v1, %v2736_v21  ;;  %v9819_v60 = vld [vmem:[#allocation117_spill] sm:$0xff]  ;;  %v9820_v61 = vld [vmem:[#allocation116_spill] sm:$0xff] }
 0x5a1   :  { %v2899_v47 = vadd.f32 %v2893_v14, %v2737_v13  ;;  %v2921_v0 = vsel %vm728_vm2, %v9813_v8, %v9814_v16  ;;  %v2946_v53 = vsel %vm728_vm2, %v9816_v33, %v9815_v38  ;;  %v3807_v41 = vpop.permute.xlu1 %3806  ;;  %v3809_v54 = vpop.permute.xlu0 %3808  ;;  %v2947_v15 = vsel %vm728_vm2, %v9815_v38, %v9817_v52  ;;  %v9821_v8 = vld [vmem:[#allocation119_spill] sm:$0xff]  ;;  %v9822_v16 = vld [vmem:[#allocation118_spill] sm:$0xff] }
 0x5a2   :  { %v2948_v9 = vsel %vm728_vm2, %v9817_v52, %v9818_v19  ;;  %v8338_v21 = vsel %vm1460_vm5, %v3805_v50, %v3807_v41  ;;  %v8341_v13 = vsel %vm1460_vm5, %v3807_v41, %v3809_v54  ;;  %v2900_v22 = vadd.f32 %v2894_v23, %v2738_v11  ;;  %v9826_v33 = vld [vmem:[#allocation122_spill] sm:$0xff]  ;;  %v9827_v54 = vld [vmem:[#allocation125_spill] sm:$0xff]  ;;  %v9828_v52 = vld [vmem:[#allocation124_spill] sm:$0xff] }
 0x5a3   :  { %v2925_v1 = vadd.f32 %v2919_v57, %v2763_v20  ;;  %v2926_v40 = vadd.f32 %v2920_v6, %v2764_v44  ;;  %4207 = vrot.lane.b32.xlu1 %v7992_v43, %s4791_s29  ;;  %4209 = vrot.lane.b32.xlu0 %v8006_v42, %s4791_s29  ;;  %v2927_v14 = vadd.f32 %v2921_v0, %v2765_v18  ;;  %v9823_v43 = vld [vmem:[#allocation121_spill] sm:$0xff]  ;;  %v9824_v57 = vld [vmem:[#allocation120_spill] sm:$0xff]  ;;  %v9825_v0 = vld [vmem:[#allocation123_spill] sm:$0xff] }
 0x5a4   :  { %v2973_v32 = vsel %vm728_vm2, %v9820_v61, %v9819_v60  ;;  %v2974_v50 = vsel %vm728_vm2, %v9819_v60, %v9821_v8  ;;  %v2975_v11 = vsel %vm728_vm2, %v9821_v8, %v9822_v16  ;;  %v2952_v20 = vadd.f32 %v2946_v53, %v2790_v55  ;;  %v9830_v61 = vld [vmem:[#allocation126_spill] sm:$0xff]  ;;  %v9831_v16 = vld [vmem:[#allocation129_spill] sm:$0xff] }
 0x5a5   :  { %v2953_v44 = vadd.f32 %v2947_v15, %v2791_v58  ;;  %v2954_v23 = vadd.f32 %v2948_v9, %v2792_v10  ;;  %v3000_v42 = vsel %vm728_vm2, %v9824_v57, %v9823_v43  ;;  %v3830_v18 = vpop.permute.xlu1 %3829  ;;  %v3832_v6 = vpop.permute.xlu0 %3831  ;;  %v3001_v38 = vsel %vm728_vm2, %v9823_v43, %v9825_v0  ;;  %v9829_v9 = vld [vmem:[#allocation127_spill] sm:$0xff]  ;;  %v9832_v43 = vld [vmem:[#allocation128_spill] sm:$0xff] }
 0x5a6   :  { %v3002_v41 = vsel %vm728_vm2, %v9825_v0, %v9826_v33  ;;  %v3027_v55 = vsel %vm728_vm2, %v9828_v52, %v9827_v54  ;;  %v8369_v58 = vsel %vm1704_vm6, %v3830_v18, %v3832_v6  ;;  %v2979_v10 = vadd.f32 %v2973_v32, %v2817_v46  ;;  %v9836_v18 = vld [vmem:[#allocation132_spill] sm:$0xff]  ;;  %v9838_v52 = vld [vmem:[#allocation134_spill] sm:$0xff] }
 0x5a7   :  { %v2980_v53 = vadd.f32 %v2974_v50, %v2818_v30  ;;  %v2981_v15 = vadd.f32 %v2975_v11, %v2819_v17  ;;  %4211 = vrot.lane.b32.xlu1 %v8002_v45, %s4791_s29  ;;  %4213 = vrot.lane.b32.xlu0 %v8014_v63, %s4791_s29  ;;  %v3006_v19 = vadd.f32 %v3000_v42, %v2844_v29  ;;  %v9833_v63 = vld [vmem:[#allocation131_spill] sm:$0xff]  ;;  %v9834_v11 = vld [vmem:[#allocation130_spill] sm:$0xff]  ;;  %v9835_v42 = vld [vmem:[#allocation133_spill] sm:$0xff] }
 0x5a8   :  { %v3028_v60 = vsel %vm728_vm2, %v9827_v54, %v9829_v9  ;;  %v3029_v8 = vsel %vm728_vm2, %v9829_v9, %v9830_v61  ;;  %v3054_v46 = vsel %vm728_vm2, %v9832_v43, %v9831_v16  ;;  %v8384_v30 = vadd.f32 %v3001_v38, %v2845_v48  ;;  %v9837_v54 = vld [vmem:[#allocation135_spill] sm:$0xff]  ;;  %v9843_v43 = vld [vmem:[#allocation141_spill] sm:$0xff] }
 0x5a9   :  { %v8386_v17 = vadd.f32 %v3002_v41, %v2846_v39  ;;  %v8388_v45 = vadd.f32 %v3027_v55, %v2871_v4  ;;  %v3055_v29 = vsel %vm728_vm2, %v9831_v16, %v9833_v63  ;;  %v3834_v32 = vpop.permute.xlu1 %3833  ;;  %v3836_v50 = vpop.permute.xlu0 %3835  ;;  %v3056_v57 = vsel %vm728_vm2, %v9833_v63, %v9834_v11  ;;  %v9840_v55 = vld [vmem:[#allocation136_spill] sm:$0xff] }
 0x5aa   :  { %v3081_v0 = vsel %vm728_vm2, %v9836_v18, %v9835_v42  ;;  %v8400_v48 = vsel %vm1704_vm6, %v3832_v6, %v3834_v32  ;;  %v8403_v39 = vsel %vm1704_vm6, %v3834_v32, %v3836_v50  ;;  %v8405_v4 = vadd.f32 %v3028_v60, %v2872_v25  ;;  %v9841_v60 = vld [vmem:[#allocation139_spill] sm:$0xff]  ;;  %v9847_v18 = vld [vmem:[#allocation230_spill] sm:$0xff] }
 0x5ab   :  { %v8407_v38 = vadd.f32 %v3029_v8, %v2873_v7  ;;  %v8409_v33 = vadd.f32 %v3054_v46, %v2898_v35  ;;  %4234 = vrot.lane.b32.xlu1 %v8009_v37, %s4791_s29  ;;  %4236 = vrot.lane.b32.xlu0 %v8020_v12, %s4791_s29  ;;  %v8415_v41 = vadd.f32 %v3055_v29, %v2899_v47  ;;  %v9839_v7 = vld [vmem:[#allocation137_spill] sm:$0xff]  ;;  %v9842_v47 = vld [vmem:[#allocation138_spill] sm:$0xff]  ;;  %v9844_v46 = vld [vmem:[#allocation140_spill] sm:$0xff] }
 0x5ac   :  { %v3082_v6 = vsel %vm728_vm2, %v9835_v42, %v9837_v54  ;;  %v3083_v25 = vsel %vm728_vm2, %v9837_v54, %v9838_v52  ;;  %v3108_v35 = vsel %vm972_vm3, %v9840_v55, %v9839_v7  ;;  %v8426_v9 = vadd.f32 %v3056_v57, %v2900_v22  ;;  %v9845_v29 = vld [vmem:[#allocation143_spill] sm:$0xff]  ;;  %v9848_v54 = vld [vmem:[#allocation145_spill] sm:$0xff]  ;;  %v9849_v52 = vld [vmem:[#allocation144_spill] sm:$0xff] }
 0x5ad   :  { %v8428_v37 = vadd.f32 %v3081_v0, %v2925_v1  ;;  %v3109_v12 = vsel %vm972_vm3, %v9839_v7, %v9841_v60  ;;  %v3110_v61 = vsel %vm972_vm3, %v9841_v60, %v9842_v47  ;;  %v3857_v8 = vpop.permute.xlu1 %3856  ;;  %v3859_v16 = vpop.permute.xlu0 %3858  ;;  %v3135_v63 = vsel %vm972_vm3, %v9844_v46, %v9843_v43  ;;  %v9846_v1 = vld [vmem:[#allocation142_spill] sm:$0xff]  ;;  %v9850_v55 = vld [vmem:[#allocation159_spill] sm:$0xff]  ;;  %v9851_v60 = vld [vmem:[#allocation157_spill] sm:$0xff] }
 0x5ae   :  { %v3136_v22 = vsel %vm972_vm3, %v9843_v43, %v9845_v29  ;;  %v3137_v32 = vsel %vm972_vm3, %v9845_v29, %v9846_v1  ;;  %v8446_v50 = vsel %vm1704_vm6, %v3857_v8, %v3859_v16  ;;  %v3088_v11 = vadd.f32 %v3082_v6, %v2926_v40  ;;  %v9852_v8 = vld [vmem:[#allocation158_spill] sm:$0xff] }
 0x5af   :  { %v3089_v57 = vadd.f32 %v3083_v25, %v2927_v14  ;;  %v3114_v42 = vadd.f32 %v3108_v35, %v2952_v20  ;;  %4238 = vrot.lane.b32.xlu1 %v9847_v18, %s4791_s29  ;;  %4240 = vrot.lane.b32.xlu0 %v8033_v27, %s4791_s29  ;;  %v3115_v0 = vadd.f32 %v3109_v12, %v2953_v44  ;;  %v9853_v35 = vld [vmem:[#allocation183_spill] sm:$0xff]  ;;  %v9854_v12 = vld [vmem:[#allocation181_spill] sm:$0xff]  ;;  %v9855_v46 = vld [vmem:[#allocation182_spill] sm:$0xff] }
 0x5b0   :  { %v3162_v7 = vsel %vm972_vm3, %v9849_v52, %v9848_v54  ;;  %v3244_v47 = vsel %vm972_vm3, %v9851_v60, %v9850_v55  ;;  %v3245_v40 = vsel %vm972_vm3, %v9850_v55, %v9852_v8  ;;  %v3116_v14 = vadd.f32 %v3110_v61, %v2954_v23  ;;  %v9856_v61 = vld [vmem:[#allocation39_spill] sm:$0xff]  ;;  %v9861_v55 = vld [vmem:[#allocation205_spill] sm:$0xff] }
 0x5b1   :  { %v8461_v20 = vadd.f32 %v3135_v63, %v2979_v10  ;;  %v8463_v6 = vadd.f32 %v3136_v22, %v2980_v53  ;;  %v8465_v25 = vadd.f32 %v3137_v32, %v2981_v15  ;;  %v3861_v27 = vpop.permute.xlu1 %3860  ;;  %v3863_v44 = vpop.permute.xlu0 %3862  ;;  %v3406_v43 = vsel %vm1216_vm4, %v9854_v12, %v9853_v35  ;;  %v9857_v63 = vld [vmem:[#allocation147_spill] sm:$0xff]  ;;  %v9858_v32 = vld [vmem:[#allocation161_spill] sm:$0xff] }
 0x5b2   :  { %v3407_v29 = vsel %vm1216_vm4, %v9853_v35, %v9855_v46  ;;  %v8474_v1 = vsel %vm1704_vm6, %v3859_v16, %v3861_v27  ;;  %v8477_v23 = vsel %vm1704_vm6, %v3861_v27, %v3863_v44  ;;  %v8479_v10 = vadd.f32 %v3162_v7, %v3006_v19  ;;  %v9859_v16 = vld [vmem:[#allocation160_spill] sm:$0xff]  ;;  %v9860_v52 = vld [vmem:[#allocation207_spill] sm:$0xff]  ;;  %v9865_v35 = vld [vmem:[#allocation146_spill] sm:$0xff] }
 0x5b3   :  { %v3250_v53 = vadd.f32 %v3244_v47, %v3088_v11  ;;  %v3251_v15 = vadd.f32 %v3245_v40, %v3089_v57  ;;  %4261 = vrot.lane.b32.xlu1 %v9856_v61, %s4791_s29  ;;  %4263 = vrot.lane.b32.xlu0 %v8039_v59, %s4791_s29  ;;  %v3163_v22 = vsel %vm972_vm3, %v9848_v54, %v9857_v63  ;;  %v9862_v11 = vld [vmem:[#allocation206_spill] sm:$0xff]  ;;  %v9863_v7 = vld [vmem:[#allocation163_spill] sm:$0xff]  ;;  %v9866_v61 = vld [vmem:[#allocation185_spill] sm:$0xff] }
 0x5b4   :  { %v3270_v18 = vsel %vm972_vm3, %v9859_v16, %v9858_v32  ;;  %v3568_v19 = vsel %vm1216_vm4, %v9861_v55, %v9860_v52  ;;  %v3569_v57 = vsel %vm1216_vm4, %v9860_v52, %v9862_v11  ;;  %v3271_v59 = vsel %vm972_vm3, %v9858_v32, %v9863_v7  ;;  %v9864_v47 = vld [vmem:[#allocation162_spill] sm:$0xff]  ;;  %v9867_v16 = vld [vmem:[#allocation184_spill] sm:$0xff] }
 0x5b5   :  { %v3272_v54 = vsel %vm972_vm3, %v9863_v7, %v9864_v47  ;;  %v3412_v8 = vadd.f32 %v3406_v43, %v3250_v53  ;;  %v3413_v40 = vadd.f32 %v3407_v29, %v3251_v15  ;;  %v3884_v27 = vpop.permute.xlu1 %3883  ;;  %v3886_v44 = vpop.permute.xlu0 %3885  ;;  %v3164_v46 = vsel %vm972_vm3, %v9857_v63, %v9865_v35  ;;  %v9869_v53 = vld [vmem:[#allocation25_spill] sm:$0xff] }
 0x5b6   :  { %v3432_v52 = vsel %vm1216_vm4, %v9867_v16, %v9866_v61  ;;  %v3730_v32 = vsel %vm1460_vm5, %v8120_v5, %v8157_v36  ;;  %v8513_v11 = vsel %vm1704_vm6, %v3884_v27, %v3886_v44  ;;  %v3276_v7 = vadd.f32 %v3270_v18, %v3114_v42  ;;  %v9870_v35 = vld [vmem:[#allocation209_spill] sm:$0xff]  ;;  %v9871_v16 = vld [vmem:[#allocation208_spill] sm:$0xff] }
 0x5b7   :  { %9868 = vst [vmem:[#allocation33_spill] sm:$0xff] %v8513_v11  ;;  %v3574_v43 = vadd.f32 %v3568_v19, %v3412_v8  ;;  %v3575_v29 = vadd.f32 %v3569_v57, %v3413_v40  ;;  %4265 = vrot.lane.b32.xlu1 %v9869_v53, %s4791_s29  ;;  %4267 = vrot.lane.b32.xlu0 %v8051_v49, %s4791_s29  ;;  %v9872_v27 = vld [vmem:[#allocation165_spill] sm:$0xff]  ;;  %v9873_v11 = vld [vmem:[#allocation164_spill] sm:$0xff]  ;;  %v9874_v49 = vld [vmem:[#allocation187_spill] sm:$0xff] }
 0x5b8   :  { %v8520_v15 = vadd.f32 %v3163_v22, %v8384_v30  ;;  %v3277_v63 = vadd.f32 %v3271_v59, %v3115_v0  ;;  %v3278_v47 = vadd.f32 %v3272_v54, %v3116_v14  ;;  %v3594_v36 = vsel %vm1460_vm5, %v9871_v16, %v9870_v35  ;;  %v9875_v0 = vld [vmem:[#allocation186_spill] sm:$0xff] }
 0x5b9   :  { %v3297_v42 = vsel %vm972_vm3, %v9873_v11, %v9872_v27  ;;  %v3438_v18 = vadd.f32 %v3432_v52, %v3276_v7  ;;  %v3736_v19 = vadd.f32 %v3730_v32, %v3574_v43  ;;  %v3737_v57 = vadd.f32 %v8167_v26, %v3575_v29  ;;  %v3888_v8 = vpop.permute.xlu1 %3887  ;;  %v3890_v40 = vpop.permute.xlu0 %3889  ;;  %v9877_v52 = vld [vmem:[#allocation148_spill] sm:$0xff]  ;;  %v9878_v7 = vld [vmem:[#allocation167_spill] sm:$0xff]  ;;  %v9880_v53 = vld [vmem:[#allocation210_spill] sm:$0xff] }
 0x5ba   :  { %v3433_v30 = vsel %vm1216_vm4, %v9866_v61, %v9874_v49  ;;  %v3434_v14 = vsel %vm1216_vm4, %v9874_v49, %v9875_v0  ;;  %v3892_v22 = vsel %vm1704_vm6, %v3886_v44, %v3888_v8  ;;  %v3893_v59 = vsel %vm1704_vm6, %v3888_v8, %v3890_v40  ;;  %v9876_v61 = vld [vmem:[#allocation149_spill] sm:$0xff]  ;;  %v9879_v43 = vld [vmem:[#allocation211_spill] sm:$0xff]  ;;  %v9881_v16 = vld [vmem:[#allocation166_spill] sm:$0xff] }
 0x5bb   :  { %v3600_v54 = vadd.f32 %v3594_v36, %v3438_v18  ;;  %v8537_v11 = vadd.f32 %v3892_v22, %v3736_v19  ;;  %4288 = vrot.lane.b32.xlu1 %v8048_v2, %s4791_s29  ;;  %v8541_v26 = vadd.f32 %v3893_v59, %v3737_v57  ;;  %4290 = vrot.lane.b32.xlu0 %v8062_v34, %s4791_s29  ;;  %v9882_v49 = vld [vmem:[#allocation189_spill] sm:$0xff] }
 0x5bc   :  { %v3189_v32 = vsel %vm972_vm3, %v9877_v52, %v9876_v61  ;;  %v3298_v44 = vsel %vm972_vm3, %v9872_v27, %v9878_v7  ;;  %v3595_v29 = vsel %vm1460_vm5, %v9870_v35, %v9879_v43  ;;  %v3596_v2 = vsel %vm1460_vm5, %v9879_v43, %v9880_v53  ;;  %v9883_v35 = vld [vmem:[#allocation188_spill] sm:$0xff]  ;;  %v9888_v43 = vld [vmem:[#allocation169_spill] sm:$0xff] }
 0x5bd   :  { %v3299_v34 = vsel %vm972_vm3, %v9878_v7, %v9881_v16  ;;  %v3439_v36 = vadd.f32 %v3433_v30, %v3277_v63  ;;  %v3440_v18 = vadd.f32 %v3434_v14, %v3278_v47  ;;  %v3762_v19 = vadd.f32 %v8198_v56, %v3600_v54  ;;  %v3911_v57 = vpop.permute.xlu1 %3910  ;;  %v3913_v8 = vpop.permute.xlu0 %3912  ;;  %v9884_v7 = vld [vmem:[#allocation31_spill] sm:$0xff]  ;;  %v9885_v56 = vld [vmem:[#allocation30_spill] sm:$0xff]  ;;  %v9886_v47 = vld [vmem:[#allocation213_spill] sm:$0xff] }
 0x5be   :  { %v3170_v27 = vadd.f32 %v3164_v46, %v8386_v17  ;;  %v3303_v40 = vadd.f32 %v3297_v42, %v8461_v20  ;;  %v3459_v0 = vsel %vm1216_vm4, %v9883_v35, %v9882_v49  ;;  %v3918_v22 = vsel %vm1704_vm6, %v3911_v57, %v3913_v8  ;;  %v9887_v42 = vld [vmem:[#allocation212_spill] sm:$0xff]  ;;  %v4314_v14 = vld [vmem:[#allocation3] sm:$0xff]  ;;  %v4315_v54 = vld [vmem:[#allocation3 + $0x8] sm:$0xff] }
 0x5bf   :  { %v3601_v59 = vadd.f32 %v3595_v29, %v3439_v36  ;;  %v3602_v52 = vadd.f32 %v3596_v2, %v3440_v18  ;;  %4292 = vrot.lane.b32.xlu1 %v9884_v7, %s4791_s29  ;;  %v8569_v63 = vadd.f32 %v3918_v22, %v3762_v19  ;;  %4294 = vrot.lane.b32.xlu0 %v9885_v56, %s4791_s29  ;;  %v9889_v29 = vld [vmem:[#allocation168_spill] sm:$0xff]  ;;  %v9893_v35 = vld [vmem:[#allocation171_spill] sm:$0xff]  ;;  %v4317_v56 = vld [vmem:[#allocation3 + $0x18] sm:$0xff] }
 0x5c0   :  { %v8574_v17 = vadd.f32 %v3189_v32, %v8388_v45  ;;  %v3304_v20 = vadd.f32 %v3298_v44, %v8463_v6  ;;  %v3305_v46 = vadd.f32 %v3299_v34, %v8465_v25  ;;  %v3621_v30 = vsel %vm1460_vm5, %v9887_v42, %v9886_v47  ;;  %v9890_v6 = vld [vmem:[#allocation191_spill] sm:$0xff]  ;;  %v9891_v44 = vld [vmem:[#allocation190_spill] sm:$0xff]  ;;  %v4316_v7 = vld [vmem:[#allocation3 + $0x10] sm:$0xff] }
 0x5c1   :  { %v3324_v53 = vsel %vm972_vm3, %v9889_v29, %v9888_v43  ;;  %v3465_v2 = vadd.f32 %v3459_v0, %v3303_v40  ;;  %v3763_v16 = vadd.f32 %v8220_v62, %v3601_v59  ;;  %v3764_v45 = vadd.f32 %v8223_v3, %v3602_v52  ;;  %v3915_v32 = vpop.permute.xlu1 %3914  ;;  %v3917_v36 = vpop.permute.xlu0 %3916  ;;  %v9892_v3 = vld [vmem:[#allocation151_spill] sm:$0xff]  ;;  %v9895_v59 = vld [vmem:[#allocation214_spill] sm:$0xff] }
 0x5c2   :  { %v3460_v25 = vsel %vm1216_vm4, %v9882_v49, %v9890_v6  ;;  %v3461_v34 = vsel %vm1216_vm4, %v9890_v6, %v9891_v44  ;;  %v3919_v18 = vsel %vm1704_vm6, %v3913_v8, %v3915_v32  ;;  %v3920_v19 = vsel %vm1704_vm6, %v3915_v32, %v3917_v36  ;;  %v9894_v8 = vld [vmem:[#allocation215_spill] sm:$0xff]  ;;  %v9896_v42 = vld [vmem:[#allocation170_spill] sm:$0xff]  ;;  %v9899_v32 = vld [vmem:[#allocation192_spill] sm:$0xff] }
 0x5c3   :  { %v3627_v57 = vadd.f32 %v3621_v30, %v3465_v2  ;;  %v8594_v40 = vadd.f32 %v3919_v18, %v3763_v16  ;;  %4325 = vrot.lane.b32.xlu1 %v4314_v14, %s4787_s15  ;;  %v8597_v62 = vadd.f32 %v3920_v19, %v3764_v45  ;;  %4327 = vrot.lane.b32.xlu0 %v4315_v54, %s4787_s15  ;;  %v9897_v2 = vld [vmem:[#allocation150_spill] sm:$0xff]  ;;  %v9898_v45 = vld [vmem:[#allocation193_spill] sm:$0xff] }
 0x5c4   :  { %v3190_v49 = vsel %vm972_vm3, %v9876_v61, %v9892_v3  ;;  %v3325_v0 = vsel %vm972_vm3, %v9888_v43, %v9893_v35  ;;  %v3622_v22 = vsel %vm1460_vm5, %v9886_v47, %v9894_v8  ;;  %v3623_v52 = vsel %vm1460_vm5, %v9894_v8, %v9895_v59  ;;  %v4348_v19 = vld [vmem:[#allocation3 + $0x20] sm:$0xff] }
 0x5c5   :  { %v3326_v30 = vsel %vm972_vm3, %v9893_v35, %v9896_v42  ;;  %v3466_v14 = vadd.f32 %v3460_v25, %v3304_v20  ;;  %v3467_v61 = vadd.f32 %v3461_v34, %v3305_v46  ;;  %v3789_v54 = vadd.f32 %v8254_v31, %v3627_v57  ;;  %v3938_v29 = vpop.permute.xlu1 %3937  ;;  %v3940_v43 = vpop.permute.xlu0 %3939  ;;  %v4349_v57 = vld [vmem:[#allocation3 + $0x28] sm:$0xff]  ;;  %v9903_v35 = vld [vmem:[#allocation172_spill] sm:$0xff] }
 0x5c6   :  { %v3191_v47 = vsel %vm972_vm3, %v9892_v3, %v9897_v2  ;;  %v3330_v16 = vadd.f32 %v3324_v53, %v8479_v10  ;;  %v3486_v36 = vsel %vm1216_vm4, %v9899_v32, %v9898_v45  ;;  %v3945_v6 = vsel %vm1704_vm6, %v3938_v29, %v3940_v43  ;;  %v9900_v10 = vld [vmem:[#allocation222_spill] sm:$0xff]  ;;  %v9901_v53 = vld [vmem:[#allocation223_spill] sm:$0xff]  ;;  %v9902_v3 = vld [vmem:[#allocation173_spill] sm:$0xff] }
 0x5c7   :  { %v3628_v44 = vadd.f32 %v3622_v22, %v3466_v14  ;;  %v3629_v18 = vadd.f32 %v3623_v52, %v3467_v61  ;;  %4329 = vrot.lane.b32.xlu1 %v4316_v7, %s4787_s15  ;;  %v8625_v20 = vadd.f32 %v3945_v6, %v3789_v54  ;;  %4331 = vrot.lane.b32.xlu0 %v4317_v56, %s4787_s15  ;;  %v9906_v61 = vld [vmem:[#allocation175_spill] sm:$0xff]  ;;  %v9907_v29 = vld [vmem:[#allocation225_spill] sm:$0xff] }
 0x5c8   :  { %v3196_v31 = vadd.f32 %v3190_v49, %v8405_v4  ;;  %v3331_v46 = vadd.f32 %v3325_v0, %v8520_v15  ;;  %v3332_v25 = vadd.f32 %v3326_v30, %v3170_v27  ;;  %v3648_v34 = vsel %vm1460_vm5, %v9901_v53, %v9900_v10  ;;  %v9904_v49 = vld [vmem:[#allocation195_spill] sm:$0xff]  ;;  %v9905_v27 = vld [vmem:[#allocation194_spill] sm:$0xff]  ;;  %v4351_v32 = vld [vmem:[#allocation3 + $0x38] sm:$0xff] }
 0x5c9   :  { %v3351_v8 = vsel %vm1216_vm4, %v9903_v35, %v9902_v3  ;;  %v3492_v22 = vadd.f32 %v3486_v36, %v3330_v16  ;;  %v3790_v59 = vadd.f32 %v8279_v51, %v3628_v44  ;;  %v3791_v52 = vadd.f32 %v8282_v28, %v3629_v18  ;;  %v3942_v7 = vpop.permute.xlu1 %3941  ;;  %v3944_v4 = vpop.permute.xlu0 %3943  ;;  %v9908_v2 = vld [vmem:[#allocation227_spill] sm:$0xff]  ;;  %v9909_v36 = vld [vmem:[#allocation174_spill] sm:$0xff]  ;;  %v9913_v35 = vld [vmem:[#allocation196_spill] sm:$0xff] }
 0x5ca   :  { %v3487_v15 = vsel %vm1216_vm4, %v9898_v45, %v9904_v49  ;;  %v3488_v0 = vsel %vm1216_vm4, %v9904_v49, %v9905_v27  ;;  %v3946_v56 = vsel %vm1704_vm6, %v3940_v43, %v3942_v7  ;;  %v3947_v42 = vsel %vm1704_vm6, %v3942_v7, %v3944_v4  ;;  %v4350_v45 = vld [vmem:[#allocation3 + $0x30] sm:$0xff]  ;;  %v9916_v49 = vld [vmem:[#allocation226_spill] sm:$0xff] }
 0x5cb   :  { %v3654_v30 = vadd.f32 %v3648_v34, %v3492_v22  ;;  %v8646_v14 = vadd.f32 %v3946_v56, %v3790_v59  ;;  %4359 = vrot.lane.b32.xlu1 %v4348_v19, %s4787_s15  ;;  %v8649_v51 = vadd.f32 %v3947_v42, %v3791_v52  ;;  %4361 = vrot.lane.b32.xlu0 %v4349_v57, %s4787_s15  ;;  %v9910_v34 = vld [vmem:[#allocation153_spill] sm:$0xff]  ;;  %v9911_v19 = vld [vmem:[#allocation152_spill] sm:$0xff]  ;;  %v4382_v27 = vld [vmem:[#allocation3 + $0x40] sm:$0xff] }
 0x5cc   :  { %v3197_v28 = vadd.f32 %v3191_v47, %v8407_v38  ;;  %v3352_v54 = vsel %vm1216_vm4, %v9902_v3, %v9906_v61  ;;  %v3649_v43 = vsel %vm1460_vm5, %v9900_v10, %v9907_v29  ;;  %v3650_v16 = vsel %vm1460_vm5, %v9907_v29, %v9908_v2  ;;  %v9912_v3 = vld [vmem:[#allocation197_spill] sm:$0xff]  ;;  %v9918_v42 = vld [vmem:[#allocation176_spill] sm:$0xff] }
 0x5cd   :  { %v3353_v6 = vsel %vm1216_vm4, %v9906_v61, %v9909_v36  ;;  %v3493_v44 = vadd.f32 %v3487_v15, %v3331_v46  ;;  %v3494_v38 = vadd.f32 %v3488_v0, %v3332_v25  ;;  %v3816_v47 = vadd.f32 %v8310_v24, %v3654_v30  ;;  %v3965_v18 = vpop.permute.xlu1 %3964  ;;  %v3967_v53 = vpop.permute.xlu0 %3966  ;;  %v9914_v24 = vld [vmem:[#allocation155_spill] sm:$0xff]  ;;  %v9917_v56 = vld [vmem:[#allocation177_spill] sm:$0xff] }
 0x5ce   :  { %v3216_v10 = vsel %vm972_vm3, %v9911_v19, %v9910_v34  ;;  %v3357_v57 = vadd.f32 %v3351_v8, %v8574_v17  ;;  %v3513_v22 = vsel %vm1216_vm4, %v9913_v35, %v9912_v3  ;;  %v3972_v59 = vsel %vm1704_vm6, %v3965_v18, %v3967_v53  ;;  %v9915_v8 = vld [vmem:[#allocation228_spill] sm:$0xff]  ;;  %v4383_v0 = vld [vmem:[#allocation3 + $0x48] sm:$0xff]  ;;  %v9922_v18 = vld [vmem:[#allocation229_spill] sm:$0xff] }
 0x5cf   :  { %v3655_v52 = vadd.f32 %v3649_v43, %v3493_v44  ;;  %v3656_v7 = vadd.f32 %v3650_v16, %v3494_v38  ;;  %4363 = vrot.lane.b32.xlu1 %v4350_v45, %s4787_s15  ;;  %v8675_v46 = vadd.f32 %v3972_v59, %v3816_v47  ;;  %4365 = vrot.lane.b32.xlu0 %v4351_v32, %s4787_s15  ;;  %v9919_v45 = vld [vmem:[#allocation199_spill] sm:$0xff]  ;;  %v9921_v38 = vld [vmem:[#allocation154_spill] sm:$0xff] }
 0x5d0   :  { %v3217_v25 = vsel %vm972_vm3, %v9910_v34, %v9914_v24  ;;  %v3358_v4 = vadd.f32 %v3352_v54, %v3196_v31  ;;  %v3359_v17 = vadd.f32 %v3353_v6, %v3197_v28  ;;  %v3675_v15 = vsel %vm1460_vm5, %v9916_v49, %v9915_v8  ;;  %v9920_v28 = vld [vmem:[#allocation198_spill] sm:$0xff]  ;;  %v9923_v34 = vld [vmem:[#allocation231_spill] sm:$0xff] }
 0x5d1   :  { %v3378_v30 = vsel %vm1216_vm4, %v9918_v42, %v9917_v56  ;;  %v3519_v61 = vadd.f32 %v3513_v22, %v3357_v57  ;;  %v3817_v29 = vadd.f32 %v8338_v21, %v3655_v52  ;;  %v3818_v43 = vadd.f32 %v8341_v13, %v3656_v7  ;;  %v3969_v2 = vpop.permute.xlu1 %3968  ;;  %v3971_v16 = vpop.permute.xlu0 %3970  ;;  %v4384_v57 = vld [vmem:[#allocation3 + $0x50] sm:$0xff]  ;;  %v9924_v7 = vld [vmem:[#allocation179_spill] sm:$0xff] }
 0x5d2   :  { %v3514_v31 = vsel %vm1216_vm4, %v9912_v3, %v9919_v45  ;;  %v3515_v54 = vsel %vm1216_vm4, %v9919_v45, %v9920_v28  ;;  %v3973_v32 = vsel %vm1704_vm6, %v3967_v53, %v3969_v2  ;;  %v3974_v36 = vsel %vm1704_vm6, %v3969_v2, %v3971_v16  ;;  %v4385_v3 = vld [vmem:[#allocation3 + $0x58] sm:$0xff] }
 0x5d3   :  { %v3681_v6 = vadd.f32 %v3675_v15, %v3519_v61  ;;  %v8697_v44 = vadd.f32 %v3973_v32, %v3817_v29  ;;  %4393 = vrot.lane.b32.xlu1 %v4382_v27, %s4787_s15  ;;  %v8700_v21 = vadd.f32 %v3974_v36, %v3818_v43  ;;  %4395 = vrot.lane.b32.xlu0 %v4383_v0, %s4787_s15  ;;  %v9926_v15 = vld [vmem:[#allocation200_spill] sm:$0xff]  ;;  %v9930_v29 = vld [vmem:[#allocation23_spill] sm:$0xff]  ;;  %v9932_v32 = vld [vmem:[#allocation202_spill] sm:$0xff] }
 0x5d4   :  { %v3222_v13 = vadd.f32 %v3216_v10, %v8409_v33  ;;  %v3218_v47 = vsel %vm972_vm3, %v9914_v24, %v9921_v38  ;;  %v3676_v53 = vsel %vm1460_vm5, %v9915_v8, %v9922_v18  ;;  %v3677_v19 = vsel %vm1460_vm5, %v9922_v18, %v9923_v34  ;;  %v9925_v8 = vld [vmem:[#allocation201_spill] sm:$0xff]  ;;  %v9934_v34 = vld [vmem:[#allocation38_spill] sm:$0xff] }
 0x5d5   :  { %v3223_v35 = vadd.f32 %v3217_v25, %v8415_v41  ;;  %v3520_v22 = vadd.f32 %v3514_v31, %v3358_v4  ;;  %v3521_v59 = vadd.f32 %v3515_v54, %v3359_v17  ;;  %v3843_v33 = vadd.f32 %v8369_v58, %v3681_v6  ;;  %v3992_v10 = vpop.permute.xlu1 %3991  ;;  %v3994_v52 = vpop.permute.xlu0 %3993  ;;  %v9927_v25 = vld [vmem:[#allocation156_spill] sm:$0xff]  ;;  %v9928_v17 = vld [vmem:[#allocation178_spill] sm:$0xff]  ;;  %v9931_v54 = vld [vmem:[#allocation203_spill] sm:$0xff] }
 0x5d6   :  { %v3379_v24 = vsel %vm1216_vm4, %v9917_v56, %v9924_v7  ;;  %v3384_v49 = vadd.f32 %v3378_v30, %v3222_v13  ;;  %v3540_v27 = vsel %vm1216_vm4, %v9926_v15, %v9925_v8  ;;  %v3999_v0 = vsel %vm1704_vm6, %v3992_v10, %v3994_v52  ;;  %v9929_v30 = vld [vmem:[#allocation22_spill] sm:$0xff] }
 0x5d7   :  { %v3682_v42 = vadd.f32 %v3676_v53, %v3520_v22  ;;  %v3683_v61 = vadd.f32 %v3677_v19, %v3521_v59  ;;  %4397 = vrot.lane.b32.xlu1 %v4384_v57, %s4787_s15  ;;  %v8723_v41 = vadd.f32 %v3999_v0, %v3843_v33  ;;  %4399 = vrot.lane.b32.xlu0 %v4385_v3, %s4787_s15  ;;  %v9935_v57 = vld [vmem:[#allocation40_spill] sm:$0xff]  ;;  %s4794_s15 = smov [#allocation15]  }
 0x5d8   :  { %v3224_v58 = vadd.f32 %v3218_v47, %v8426_v9  ;;  %v3243_v4 = vsel %vm972_vm3, %v9927_v25, %v9851_v60  ;;  %v3380_v56 = vsel %vm1216_vm4, %v9924_v7, %v9928_v17  ;;  %v3702_v43 = vsel %vm1460_vm5, %v9930_v29, %v9929_v30  ;;  %v9936_v7 = vld [vmem:[#allocation204_spill] sm:$0xff]  ;;  %v9938_v29 = vld [vmem:[#allocation33_spill] sm:$0xff]  ;;  %s4421_s19 = sshll.u32 %s4794_s15, 4  ;;  %s4422_s19 = int_to_ptr.vmem [resolvable:$true] %s4421_s19 }
 0x5d9   :  { %v3385_v2 = vadd.f32 %v3379_v24, %v3223_v35  ;;  %v3546_v16 = vadd.f32 %v3540_v27, %v3384_v49  ;;  %v3844_v45 = vadd.f32 %v8400_v48, %v3682_v42  ;;  %v3845_v31 = vadd.f32 %v8403_v39, %v3683_v61  ;;  %v3996_v28 = vpop.permute.xlu1 %3995  ;;  %v3998_v9 = vpop.permute.xlu0 %3997  ;;  %v9933_v39 = vld [vmem:[#allocation180_spill] sm:$0xff]  ;;  %s4742_s29 = scalar_lea.vmem %s4422_s19, 1152  ;;  %p4747_p9 = scmp.lt.s32.totalorder %s4422_s19, %s4422_s19 }
 0x5da   :  { %v3541_v60 = vsel %vm1216_vm4, %v9925_v8, %v9931_v54  ;;  %v3542_v36 = vsel %vm1216_vm4, %v9931_v54, %v9932_v32  ;;  %v4000_v6 = vsel %vm1704_vm6, %v3994_v52, %v3996_v28  ;;  %v4001_v13 = vsel %vm1704_vm6, %v3996_v28, %v3998_v9  ;;  %v9937_v0 = vld [vmem:[#allocation24_spill] sm:$0xff]  ;;  %p4743_p8 = scmp.ne.s32.totalorder %s4422_s19, %s4742_s29  ;;  %p4748_p10 = scmp.lt.s32.totalorder %s4742_s29, %s4742_s29 }
 0x5db   :  { %v3386_v38 = vadd.f32 %v3380_v56, %v3224_v58  ;;  %v3708_v47 = vadd.f32 %v3702_v43, %v3546_v16  ;;  %v8746_v18 = vadd.f32 %v4000_v6, %v3844_v45  ;;  %v8748_v48 = vadd.f32 %v4001_v13, %v3845_v31 }
 0x5dc   :  { %v3405_v53 = vsel %vm1216_vm4, %v9933_v39, %v9854_v12  ;;  %v3703_v19 = vsel %vm1460_vm5, %v9929_v30, %v9934_v34  ;;  %v3704_v3 = vsel %vm1460_vm5, %v9934_v34, %v9935_v57  ;;  %v3249_v35 = vadd.f32 %v3243_v4, %v8428_v37  ;;  %p4749_p11 = por %p4748_p10, %p4747_p9 }
 0x5dd   :  { %v3547_v22 = vadd.f32 %v3541_v60, %v3385_v2  ;;  %v3548_v59 = vadd.f32 %v3542_v36, %v3386_v38  ;;  %v3870_v33 = vadd.f32 %v8446_v50, %v3708_v47  ;;  %v4019_v10 = vpop.permute.xlu1 %4018  ;;  %v4021_v52 = vpop.permute.xlu0 %4020  ;;  %v3567_v12 = vsel %vm1216_vm4, %v9936_v7, %v9861_v55 }
 0x5de   :  { %v4026_v24 = vsel %vm1704_vm6, %v4019_v10, %v4021_v52  ;;  %v3411_v49 = vadd.f32 %v3405_v53, %v3249_v35  ;;  %v3729_v37 = vsel %vm1460_vm5, %v9937_v0, %v8120_v5  ;;  %p4750_p12 = pnand %p4749_p11, %p4743_p8 }
 0x5df   :  { %v3709_v8 = vadd.f32 %v3703_v19, %v3547_v22  ;;  %v3710_v15 = vadd.f32 %v3704_v3, %v3548_v59  ;;  %v8765_v27 = vadd.f32 %v4026_v24, %v3870_v33 }
 0x5e0   :  { %v3573_v42 = vadd.f32 %v3567_v12, %v3411_v49 }
 0x5e1   :  { %v3871_v50 = vadd.f32 %v8474_v1, %v3709_v8  ;;  %v3872_v61 = vadd.f32 %v8477_v23, %v3710_v15  ;;  %v4023_v58 = vpop.permute.xlu1 %4022  ;;  %v4025_v25 = vpop.permute.xlu0 %4024 }
 0x5e2   :  { %v4027_v55 = vsel %vm1704_vm6, %v4021_v52, %v4023_v58  ;;  %v4028_v4 = vsel %vm1704_vm6, %v4023_v58, %v4025_v25  ;;  %v3735_v17 = vadd.f32 %v3729_v37, %v3573_v42 }
 0x5e3   :  { %v8774_v56 = vadd.f32 %v4027_v55, %v3871_v50  ;;  %v8776_v30 = vadd.f32 %v4028_v4, %v3872_v61 }
 0x5e4   :  { %v3897_v43 = vadd.f32 %v9938_v29, %v3735_v17 }
 0x5e5   :  { %v4046_v2 = vpop.permute.xlu1 %4045  ;;  %v4048_v5 = vpop.permute.xlu0 %4047 }
 0x5e6   :  { %v4053_v16 = vsel %vm1704_vm6, %v4046_v2, %v4048_v5 }
 0x5e7   :  { %v8780_v1 = vadd.f32 %v4053_v16, %v3897_v43 }
 0x5e9   :  { %v4050_v23 = vpop.permute.xlu1 %4049  ;;  %v4052_v45 = vpop.permute.xlu0 %4051 }
 0x5ea   :  { %v4054_v31 = vsel %vm1704_vm6, %v4048_v5, %v4050_v23  ;;  %v4055_v28 = vsel %vm1704_vm6, %v4050_v23, %v4052_v45 }
 0x5eb   :  { %v8785_v9 = vadd.f32 %v4054_v31, %v8537_v11  ;;  %v8788_v54 = vadd.f32 %v4055_v28, %v8541_v26 }
 0x5ed   :  { %v4073_v60 = vpop.permute.xlu1 %4072  ;;  %v4075_v32 = vpop.permute.xlu0 %4074 }
 0x5ee   :  { %v4080_v36 = vsel %vm1948_vm7, %v4073_v60, %v4075_v32 }
 0x5ef   :  { %v4086_v6 = vadd.f32 %v4080_v36, %v8569_v63 }
 0x5f1   :  { %v4077_v13 = vpop.permute.xlu1 %4076  ;;  %v4079_v38 = vpop.permute.xlu0 %4078 }
 0x5f2   :  { %v4081_v47 = vsel %vm1948_vm7, %v4075_v32, %v4077_v13  ;;  %v4082_v39 = vsel %vm1948_vm7, %v4077_v13, %v4079_v38 }
 0x5f3   :  { %v4087_v53 = vadd.f32 %v4081_v47, %v8594_v40  ;;  %v4088_v11 = vadd.f32 %v4082_v39, %v8597_v62 }
 0x5f5   :  { %v4100_v34 = vpop.permute.xlu1 %4099  ;;  %v4102_v19 = vpop.permute.xlu0 %4101 }
 0x5f6   :  { %v4107_v26 = vsel %vm1948_vm7, %v4100_v34, %v4102_v19 }
 0x5f7   :  { %v4113_v57 = vadd.f32 %v4107_v26, %v8625_v20 }
 0x5f9   :  { %v4104_v3 = vpop.permute.xlu1 %4103  ;;  %v4106_v35 = vpop.permute.xlu0 %4105 }
 0x5fa   :  { %v4108_v63 = vsel %vm1948_vm7, %v4102_v19, %v4104_v3  ;;  %v4109_v22 = vsel %vm1948_vm7, %v4104_v3, %v4106_v35 }
 0x5fb   :  { %v4114_v59 = vadd.f32 %v4108_v63, %v8646_v14  ;;  %v4115_v33 = vadd.f32 %v4109_v22, %v8649_v51 }
 0x5fd   :  { %v4127_v10 = vpop.permute.xlu1 %4126  ;;  %v4129_v40 = vpop.permute.xlu0 %4128 }
 0x5fe   :  { %v4134_v62 = vsel %vm1948_vm7, %v4127_v10, %v4129_v40 }
 0x5ff   :  { %v4140_v52 = vadd.f32 %v4134_v62, %v8675_v46 }
 0x601   :  { %v4131_v7 = vpop.permute.xlu1 %4130  ;;  %v4133_v12 = vpop.permute.xlu0 %4132 }
 0x602   :  { %v4135_v20 = vsel %vm1948_vm7, %v4129_v40, %v4131_v7  ;;  %v4136_v24 = vsel %vm1948_vm7, %v4131_v7, %v4133_v12 }
 0x603   :  { %v8807_v49 = vadd.f32 %v4135_v20, %v8697_v44  ;;  %v8810_v8 = vadd.f32 %v4136_v24, %v8700_v21 }
 0x605   :  { %v4154_v14 = vpop.permute.xlu1 %4153  ;;  %v4156_v51 = vpop.permute.xlu0 %4155 }
 0x606   :  { %v4161_v4 = vsel %vm1948_vm7, %v4154_v14, %v4156_v51 }
 0x607   :  { %v4167_v21 = vadd.f32 %v4161_v4, %v8723_v41 }
 0x609   :  { %v4158_v15 = vpop.permute.xlu1 %4157  ;;  %v4160_v0 = vpop.permute.xlu0 %4159 }
 0x60a   :  { %v4162_v2 = vsel %vm1948_vm7, %v4156_v51, %v4158_v15  ;;  %v4163_v5 = vsel %vm1948_vm7, %v4158_v15, %v4160_v0 }
 0x60b   :  { %v4168_v60 = vadd.f32 %v4162_v2, %v8746_v18  ;;  %v4169_v32 = vadd.f32 %v4163_v5, %v8748_v48 }
 0x60d   :  { %v4181_v37 = vpop.permute.xlu1 %4180  ;;  %v4183_v42 = vpop.permute.xlu0 %4182 }
 0x60e   :  { %v4188_v41 = vsel %vm1948_vm7, %v4181_v37, %v4183_v42 }
 0x60f   :  { %v4194_v19 = vadd.f32 %v4188_v41, %v8765_v27 }
 0x611   :  { %v4185_v50 = vpop.permute.xlu1 %4184  ;;  %v4187_v46 = vpop.permute.xlu0 %4186 }
 0x612   :  { %v4189_v3 = vsel %vm1948_vm7, %v4183_v42, %v4185_v50  ;;  %v4190_v35 = vsel %vm1948_vm7, %v4185_v50, %v4187_v46 }
 0x613   :  { %v4195_v22 = vadd.f32 %v4189_v3, %v8774_v56  ;;  %v4196_v10 = vadd.f32 %v4190_v35, %v8776_v30 }
 0x615   :  { %v4208_v61 = vpop.permute.xlu1 %4207  ;;  %v4210_v58 = vpop.permute.xlu0 %4209 }
 0x616   :  { %v4215_v27 = vsel %vm1948_vm7, %v4208_v61, %v4210_v58 }
 0x617   :  { %v4221_v14 = vadd.f32 %v4215_v27, %v8780_v1 }
 0x619   :  { %v4212_v25 = vpop.permute.xlu1 %4211  ;;  %v4214_v55 = vpop.permute.xlu0 %4213 }
 0x61a   :  { %v4216_v15 = vsel %vm1948_vm7, %v4210_v58, %v4212_v25  ;;  %v4217_v0 = vsel %vm1948_vm7, %v4212_v25, %v4214_v55 }
 0x61b   :  { %v4222_v42 = vadd.f32 %v4216_v15, %v8785_v9  ;;  %v4223_v50 = vadd.f32 %v4217_v0, %v8788_v54 }
 0x61d   :  { %v4235_v17 = vpop.permute.xlu1 %4234  ;;  %v4237_v44 = vpop.permute.xlu0 %4236 }
 0x61e   :  { %v4242_v29 = vsel %vm1948_vm7, %v4235_v17, %v4237_v44 }
 0x61f   :  { %v4248_v43 = vadd.f32 %v4242_v29, %v4086_v6 }
 0x621   :  { %v4239_v16 = vpop.permute.xlu1 %4238  ;;  %v4305_v23 = vadd.f32 %v4248_v43, %v4167_v21  ;;  %v4241_v45 = vpop.permute.xlu0 %4240 }
 0x622   :  { %v4243_v31 = vsel %vm1948_vm7, %v4237_v44, %v4239_v16  ;;  %v4244_v28 = vsel %vm1948_vm7, %v4239_v16, %v4241_v45 }
 0x623   :  { %v4249_v36 = vadd.f32 %v4243_v31, %v4087_v53  ;;  %v4250_v13 = vadd.f32 %v4244_v28, %v4088_v11  ;;  %v4318_v4 = vmax.f32 %v4305_v23, 0.0 }
 0x625   :  { %v4306_v6 = vadd.f32 %v4249_v36, %v4168_v60  ;;  %v4262_v38 = vpop.permute.xlu1 %4261  ;;  %v4307_v47 = vadd.f32 %v4250_v13, %v4169_v32  ;;  %v4264_v39 = vpop.permute.xlu0 %4263 }
 0x626   :  { %v4269_v34 = vsel %vm1948_vm7, %v4262_v38, %v4264_v39 }
 0x627   :  { %v4275_v26 = vadd.f32 %v4269_v34, %v4113_v57  ;;  %v4319_v29 = vmax.f32 %v4306_v6, 0.0  ;;  %v4320_v21 = vmax.f32 %v4307_v47, 0.0 }
 0x629   :  { %v4266_v18 = vpop.permute.xlu1 %4265  ;;  %v4308_v63 = vadd.f32 %v4275_v26, %v4194_v19  ;;  %v4268_v48 = vpop.permute.xlu0 %4267 }
 0x62a   :  { %v4270_v53 = vsel %vm1948_vm7, %v4264_v39, %v4266_v18  ;;  %v4271_v11 = vsel %vm1948_vm7, %v4266_v18, %v4268_v48 }
 0x62b   :  { %v4276_v40 = vadd.f32 %v4270_v53, %v4114_v59  ;;  %v4277_v62 = vadd.f32 %v4271_v11, %v4115_v33  ;;  %v4352_v5 = vmax.f32 %v4308_v63, 0.0 }
 0x62d   :  { %v4309_v57 = vadd.f32 %v4276_v40, %v4195_v22  ;;  %v4289_v7 = vpop.permute.xlu1 %4288  ;;  %v4310_v12 = vadd.f32 %v4277_v62, %v4196_v10  ;;  %v4291_v20 = vpop.permute.xlu0 %4290 }
 0x62e   :  { %v4296_v24 = vsel %vm1948_vm7, %v4289_v7, %v4291_v20 }
 0x62f   :  { %v4302_v51 = vadd.f32 %v4296_v24, %v4140_v52  ;;  %v4353_v28 = vmax.f32 %v4309_v57, 0.0  ;;  %v4354_v60 = vmax.f32 %v4310_v12, 0.0 }
 0x631   :  { %v4293_v56 = vpop.permute.xlu1 %4292  ;;  %v4311_v37 = vadd.f32 %v4302_v51, %v4221_v14  ;;  %v4295_v30 = vpop.permute.xlu0 %4294 }
 0x632   :  { %v4297_v59 = vsel %vm1948_vm7, %v4291_v20, %v4293_v56  ;;  %v4298_v33 = vsel %vm1948_vm7, %v4293_v56, %v4295_v30 }
 0x633   :  { %v4303_v46 = vadd.f32 %v4297_v59, %v8807_v49  ;;  %v4304_v1 = vadd.f32 %v4298_v33, %v8810_v8  ;;  %v4386_v47 = vmax.f32 %v4311_v37, 0.0 }
 0x635   :  { %v4312_v52 = vadd.f32 %v4303_v46, %v4222_v42  ;;  %v4326_v61 = vpop.permute.xlu1 %4325  ;;  %v4313_v58 = vadd.f32 %v4304_v1, %v4223_v50  ;;  %v4328_v25 = vpop.permute.xlu0 %4327 }
 0x636   :  { %v4333_v55 = vsel %vm972_vm3, %v4326_v61, %v4328_v25 }
 0x637   :  { %v4339_v17 = vadd.f32 %v4333_v55, %v4318_v4  ;;  %v4387_v3 = vmax.f32 %v4312_v52, 0.0  ;;  %v4388_v35 = vmax.f32 %v4313_v58, 0.0 }
 0x639   :  { %v4330_v44 = vpop.permute.xlu1 %4329  ;;  %4345 = vst [vmem:[#allocation15] sm:$0xff] %v4339_v17  ;;  %v4332_v43 = vpop.permute.xlu0 %4331 }
 0x63a   :  { %v4334_v9 = vsel %vm972_vm3, %v4328_v25, %v4330_v44  ;;  %v4335_v54 = vsel %vm972_vm3, %v4330_v44, %v4332_v43 }
 0x63b   :  { %v4340_v49 = vadd.f32 %v4334_v9, %v4319_v29  ;;  %v4341_v2 = vadd.f32 %v4335_v54, %v4320_v21 }
 0x63d   :  { %4346 = vst [vmem:[#allocation15 + $0x8] sm:$0xff] %v4340_v49  ;;  %v4360_v8 = vpop.permute.xlu1 %4359  ;;  %4347 = vst [vmem:[#allocation15 + $0x10] sm:$0xff] %v4341_v2  ;;  %v4362_v16 = vpop.permute.xlu0 %4361 }
 0x63e   :  { %v4367_v23 = vsel %vm972_vm3, %v4360_v8, %v4362_v16 }
 0x63f   :  { %v4373_v45 = vadd.f32 %v4367_v23, %v4352_v5 }
 0x641   :  { %v4364_v31 = vpop.permute.xlu1 %4363  ;;  %4379 = vst [vmem:[#allocation15 + $0x18] sm:$0xff] %v4373_v45  ;;  %v4366_v32 = vpop.permute.xlu0 %4365 }
 0x642   :  { %v4368_v36 = vsel %vm972_vm3, %v4362_v16, %v4364_v31  ;;  %v4369_v13 = vsel %vm972_vm3, %v4364_v31, %v4366_v32 }
 0x643   :  { %v4374_v41 = vadd.f32 %v4368_v36, %v4353_v28  ;;  %v4375_v6 = vadd.f32 %v4369_v13, %v4354_v60 }
 0x645   :  { %4380 = vst [vmem:[#allocation15 + $0x20] sm:$0xff] %v4374_v41  ;;  %v4394_v38 = vpop.permute.xlu1 %4393  ;;  %4381 = vst [vmem:[#allocation15 + $0x28] sm:$0xff] %v4375_v6  ;;  %v4396_v39 = vpop.permute.xlu0 %4395 }
 0x646   :  { %v4401_v34 = vsel %vm972_vm3, %v4394_v38, %v4396_v39 }
 0x647   :  { %v4407_v19 = vadd.f32 %v4401_v34, %v4386_v47 }
 0x649   :  { %v4398_v26 = vpop.permute.xlu1 %4397  ;;  %4413 = vst [vmem:[#allocation15 + $0x30] sm:$0xff] %v4407_v19  ;;  %v4400_v18 = vpop.permute.xlu0 %4399 }
 0x64a   :  { %v4402_v63 = vsel %vm972_vm3, %v4396_v39, %v4398_v26  ;;  %v4403_v48 = vsel %vm972_vm3, %v4398_v26, %v4400_v18 }
 0x64b   :  { %v4408_v53 = vadd.f32 %v4402_v63, %v4387_v3  ;;  %v4409_v11 = vadd.f32 %v4403_v48, %v4388_v35 }
 0x64d   :  { %4414 = vst [vmem:[#allocation15 + $0x38] sm:$0xff] %v4408_v53  ;;  %4415 = vst [vmem:[#allocation15 + $0x40] sm:$0xff] %v4409_v11 }
 0x64e   :  { %4753 = shalt.err (!%p4750_p12)
}
 0x64f   :  { %s4754_s1 = scalar_lea.hbm %s8868_s6, 1152 }
 0x650   :  { %p4755_p13 = scmp.ne.s32.totalorder %s8868_s6, %s4754_s1  ;;  %p4758_p0 = scmp.lt.u32.totalorder %s4754_s1, %s8868_s6 }
 0x652   :  { %p4760_p1 = pnand %p4758_p0, %p4755_p13 }
 0x654   :  { %4763 = shalt.err (!%p4760_p1)
}
 0x655   :  { %s4795_s14 = smov 384   ;;  %s4796_s16 = smov 24  }
 0x656   :  { %4427 = dma.vmem_to_hbm [thread:$0]  %s4422_s19, 1152, %s8868_s6, [#allocation5], %s4795_s14, %s4795_s14, %s4796_s16  }
 0x657   :  { %4774 = dma.done.wait [#allocation5], 1152  }
 0x658   :  { %4775 = vsyncadd [#allocation5], 4294966144 }
 0x659   :  { %4431 = vsyncpa [#allocation4], 1 }
 0x65a   :  { %4432 = vsyncpa [#allocation8], 1 }
 0x65b   :  { %4433 = vsyncpa [#allocation5], 1 }
 0x65c   :  { %4434 = vsyncpa [#allocation6], 1 }
 0x65d   :  { %4435 = vsyncpa [#allocation11], 1 }
 0x65e   :  { %4436 = vsyncpa [#allocation14], 1 }

</bundles_post_ra>
